<compile_context>
chip_gen: v7x
topology: tpu7x:2x2x1
jax: 0.10.0
libtpu: 0.0.40
codegen_flags: <defaults>
</compile_context>

<pallas_src>
import math
import functools

import jax
import jax.numpy as jnp
from jax import lax
from jax.experimental import pallas as pl
from jax.experimental.pallas import tpu as pltpu


# (patch_len, stride, right replication-pad) — matches the torch module
# (x_i_p1 is NOT padded in the reference forward, so pad=0 for the first branch).
PATCH_CFGS = ((8, 8, 0), (16, 8, 8), (24, 7, 7), (32, 6, 6))


# ------------------------- in-kernel math helpers -------------------------

def _layernorm(x, g, b):
    mean = jnp.mean(x, axis=-1, keepdims=True)
    xc = x - mean
    var = jnp.mean(xc * xc, axis=-1, keepdims=True)        # biased, as torch.nn.LayerNorm
    return xc * lax.rsqrt(var + 1e-5) * g + b


def _erf(x):
    # Abramowitz & Stegun 7.1.26, |abs err| <= 1.5e-7.  Keeps torch.nn.GELU's exact-erf
    # semantics while relying only on exp/mul/add, which are guaranteed Mosaic lowerings.
    a1, a2, a3, a4, a5 = 0.254829592, -0.284496736, 1.421413741, -1.453152027, 1.061405429
    pc = 0.3275911
    ax = jnp.abs(x)
    t = 1.0 / (1.0 + pc * ax)
    poly = ((((a5 * t + a4) * t + a3) * t + a2) * t + a1) * t
    y = 1.0 - poly * jnp.exp(-ax * ax)
    return jnp.where(x < 0.0, -y, y)


def _gelu(x):
    return 0.5 * x * (1.0 + _erf(x * 0.7071067811865475))


def _attention(q, k, v, wo, bo, *, seq_len, n_seq, n_heads):
    """Causal MHA over `n_seq` independent sequences stacked along the sublane dim.

    q, k, v: (n_seq*seq_len, D), scale already folded into q.  Each head's output is placed
    in its contiguous lane block (free 'concat'); the output projection is ONE dense matmul.
    """
    D = q.shape[-1]
    E = D // n_heads
    row = lax.broadcasted_iota(jnp.int32, (seq_len, seq_len), 0)
    col = lax.broadcasted_iota(jnp.int32, (seq_len, seq_len), 1)
    causal = col > row                                     # TriangularCausalMask
    seq_outs = []
    for s in range(n_seq):                                 # short static loop over sequences
        lo = s * seq_len
        qn = q[lo:lo + seq_len, :]
        kn = k[lo:lo + seq_len, :]
        vn = v[lo:lo + seq_len, :]
        head_outs = []
        for h in range(n_heads):                           # static unroll over heads
            qh = qn[:, h * E:(h + 1) * E]
            kh = kn[:, h * E:(h + 1) * E]
            vh = vn[:, h * E:(h + 1) * E]
            sc = lax.dot_general(qh, kh, (((1,), (1,)), ((), ())),
                                 preferred_element_type=jnp.float32)      # (S, S)
            sc = jnp.where(causal, -1e30, sc)
            m = jnp.max(sc, axis=-1, keepdims=True)
            p = jnp.exp(sc - m)
            p = p * pl.reciprocal(jnp.sum(p, axis=-1, keepdims=True), approx=True)
            head_outs.append(jnp.dot(p, vh, preferred_element_type=jnp.float32))
        seq_outs.append(jnp.concatenate(head_outs, axis=-1))              # (S, D)
    attn = seq_outs[0] if n_seq == 1 else jnp.concatenate(seq_outs, axis=0)
    return jnp.dot(attn, wo, preferred_element_type=jnp.float32) + bo


def _ffn_ln(attn, res, g1, b1, w1, bf1, w2, bf2, g2, b2):
    """add & LayerNorm -> FeedForward(GELU) -> add & LayerNorm."""
    x1 = _layernorm(attn + res, g1, b1)
    h1 = _gelu(jnp.dot(x1, w1, preferred_element_type=jnp.float32) + bf1)
    h2 = jnp.dot(h1, w2, preferred_element_type=jnp.float32) + bf2
    return _layernorm(h2 + x1, g2, b2)


# ------------------------- the single fused Pallas kernel -------------------------

def _mpf_kernel(*refs, e_layers, n_heads, patch_num, d_model, patch_cfgs):
    out_ref = refs[-1]
    it = iter(refs[:-1])
    x_ref = next(it)                                       # (1, C, L) block of this batch
    perm_np = next(it)[...]                                # p-major rows -> n-major rows
    perm_pn = next(it)[...]                                # n-major rows -> p-major rows
    pe_bias = next(it)[...]                                # (P, D): positional enc + patch bias
    w_cat = next(it)[...]                                  # (sum(patch_len), D) block-diagonal
    temporal = [tuple(next(it) for _ in range(12)) for _ in range(e_layers)]
    emb_w = next(it)[...]                                  # (P*D, D) channel embedding
    emb_b = next(it)[...]
    wc = next(it)[...]                                     # channel-wise Conv1d(D, D, 1)
    bc = next(it)[...]
    chan = tuple(next(it) for _ in range(14))
    w_eff = next(it)[...]                                  # composed cascaded heads
    b_eff = next(it)[...]

    P, D = patch_num, d_model
    scale = 1.0 / math.sqrt(D // n_heads)

    x = x_ref[0].astype(jnp.float32)                       # (C, L): this batch's channels
    C, L = x.shape

    # --- non-stationary normalisation (time on the lane axis) ---
    mean = jnp.mean(x, axis=-1, keepdims=True)
    xc = x - mean
    var = jnp.mean(xc * xc, axis=-1, keepdims=True)        # unbiased=False
    std = jnp.sqrt(var + 1e-5)
    x_n = xc / std

    # --- multi-scale patching + Conv1d patch embedding + PE, built in p-major row order ---
    x_pads = []
    for (plen, stride, pad) in patch_cfgs:
        if pad:                                            # ReplicationPad1d((0, pad))
            last = x_n[:, L - 1:L]
            x_pads.append(jnp.concatenate(
                [x_n, jnp.broadcast_to(last, (C, pad))], axis=1))
        else:
            x_pads.append(x_n)
    blocks = []
    for p in range(P):                                     # static slices: pure address math
        pieces = [xp[:, p * st:p * st + pl_] for xp, (pl_, st, _) in zip(x_pads, patch_cfgs)]
        blk = jnp.dot(jnp.concatenate(pieces, axis=1), w_cat,
                      preferred_element_type=jnp.float32)              # (C, D)
        blocks.append(blk + pe_bias[p:p + 1, :])
    enc_pm = jnp.concatenate(blocks, axis=0)                           # (P*C, D), p-major
    enc = jnp.dot(perm_np, enc_pm, preferred_element_type=jnp.float32)  # (C*P, D), n-major

    # --- temporal Encoder blocks (self-attention over the P patches of each channel) ---
    for lw in temporal:
        (w_qkv, b_qkv, wo, bo, g1, b1, w1, bf1, w2, bf2, g2, b2) = [r[...] for r in lw]
        qkv = jnp.dot(enc, w_qkv, preferred_element_type=jnp.float32) + b_qkv   # (C*P, 3D)
        q = qkv[:, :D] * scale                              # scale folded into q pre-mask
        k = qkv[:, D:2 * D]
        v = qkv[:, 2 * D:]
        attn = _attention(q, k, v, wo, bo, seq_len=P, n_seq=C, n_heads=n_heads)
        enc = _ffn_ln(attn, enc, g1, b1, w1, bf1, w2, bf2, g2, b2)

    # --- channel embedding Conv1d(P*D, D, 1): regroup rows per channel and one matmul ---
    enc_pm2 = jnp.dot(perm_pn, enc, preferred_element_type=jnp.float32)          # p-major
    feat = jnp.concatenate([enc_pm2[p * C:(p + 1) * C, :] for p in range(P)], axis=1)  # (C, P*D)
    emb = jnp.dot(feat, emb_w, preferred_element_type=jnp.float32) + emb_b       # (C, D)

    # --- channel-wise Encoder block (q = emb, k = v = Conv1d(D, D, 1)(emb)) ---
    (wq, bq, wkv, bkv, wo, bo, g1, b1, w1, bf1, w2, bf2, g2, b2) = [r[...] for r in chan]
    kv_in = jnp.dot(emb, wc, preferred_element_type=jnp.float32) + bc
    q = (jnp.dot(emb, wq, preferred_element_type=jnp.float32) + bq) * scale
    kv = jnp.dot(kv_in, wkv, preferred_element_type=jnp.float32) + bkv
    k = kv[:, :D]
    v = kv[:, D:]
    # TODO(synk): the channel-wise MHA reuses the causal TriangularCausalMask across channels
    # (same semantics as the previously validated version); verify vs. the torch reference.
    attn = _attention(q, k, v, wo, bo, seq_len=C, n_seq=1, n_heads=n_heads)
    e1 = _ffn_ln(attn, emb, g1, b1, w1, bf1, w2, bf2, g2, b2)                     # (C, D)

    # --- 8 cascaded forecast heads (pre-composed into one affine map) + de-normalisation ---
    y = jnp.dot(e1, w_eff, preferred_element_type=jnp.float32) + b_eff            # (C, pred)
    out_ref[0] = (y * std + mean).astype(out_ref.dtype)


# ------------------------- eager (outside-jit) weight fusion -------------------------

def fuse_patch_weights(ws, bs):
    """Stack the four Conv1d(1, D/4, k) patch weights block-diagonally."""
    K = sum(w.shape[0] for w in ws)
    N = sum(w.shape[1] for w in ws)
    W = jnp.zeros((K, N), jnp.float32)
    r = c = 0
    for w in ws:
        W = W.at[r:r + w.shape[0], c:c + w.shape[1]].set(w)
        r += w.shape[0]
        c += w.shape[1]
    return W, jnp.concatenate(bs)


def compose_head_weights(out_ws, out_bs, d_model):
    """Fold the 8 cascaded forecast heads (Linear on growing concat features) into a single
    affine map feat0 -> forecast (pure weight preprocessing, semantics unchanged up to float
    re-association)."""
    m_cur = jnp.eye(d_model, dtype=jnp.float32)
    v_cur = jnp.zeros((d_model,), jnp.float32)
    w_pieces, b_pieces = [], []
    for w, b in zip(out_ws, out_bs):
        wp = m_cur @ w
        bp = v_cur @ w + b
        w_pieces.append(wp)
        b_pieces.append(bp)
        m_cur = jnp.concatenate([m_cur, wp], axis=1)
        v_cur = jnp.concatenate([v_cur, bp])
    return jnp.concatenate(w_pieces, axis=1), jnp.concatenate(b_pieces)


def prepare_fused_params(params, cfg, n_channels):
    """Run ONCE outside jit on concrete params.  Returns the flat list of 2-D arrays the
    kernel consumes (order must match _mpf_kernel's parse)."""
    D, P, C = cfg["d_model"], cfg["patch_num1"], n_channels
    r = jnp.arange(C * P)
    perm_np = jnp.zeros((C * P, C * P), jnp.float32).at[r, (r % P) * C + r // P].set(1.0)
    w_cat, b_cat = fuse_patch_weights(params["patch_w"], params["patch_b"])
    fused = [perm_np, perm_np.T, params["pe"][0] + b_cat[None, :], w_cat]
    for l in range(cfg["e_layers"]):
        m, e = params["mha"][l], params["enc"][l]
        w_qkv = jnp.concatenate([m["wq"], m["wk"], m["wv"]], axis=1)
        b_qkv = jnp.concatenate([m["bq"], m["bk"], m["bv"]])[None, :]
        fused += [w_qkv, b_qkv, m["wo"], m["bo"][None, :],
                  e["g1"][None, :], e["b1"][None, :], e["w1"], e["bf1"][None, :],
                  e["w2"], e["bf2"][None, :], e["g2"][None, :], e["b2"][None, :]]
    m, e = params["mha_ch"], params["enc_ch"]
    fused += [params["emb_ch_w"], params["emb_ch_b"][None, :], e["wc"], e["bc"][None, :]]
    w_kv = jnp.concatenate([m["wk"], m["wv"]], axis=1)
    b_kv = jnp.concatenate([m["bk"], m["bv"]])[None, :]
    fused += [m["wq"], m["bq"][None, :], w_kv, b_kv, m["wo"], m["bo"][None, :],
              e["g1"][None, :], e["b1"][None, :], e["w1"], e["bf1"][None, :],
              e["w2"], e["bf2"][None, :], e["g2"][None, :], e["b2"][None, :]]
    w_eff, b_eff = compose_head_weights(params["out_w"], params["out_b"], D)
    fused += [w_eff, b_eff[None, :]]
    return fused


# ------------------------- wrapper -------------------------

def mpf_forward(fused, cfg, x_enc):
    """Model.forward ('long_term_forecast') -> (dec_out[:, -pred_len:, :], 0); one pallas_call
    gridded only over batch ("parallel": v7x's 2 TCs each take one step; serial on v5e/v6e)."""
    B, L, C = x_enc.shape
    D, H, P = cfg["d_model"], cfg["n_heads"], cfg["patch_num1"]
    pred_len = cfg["pred_len"]
    for (plen, stride, pad) in PATCH_CFGS:
        assert (L + pad - plen) // stride + 1 == P, "patch_num mismatch"

    x3 = x_enc.transpose(0, 2, 1).astype(jnp.float32)       # (B, C, L): per-channel time rows

    kernel = functools.partial(_mpf_kernel, e_layers=cfg["e_layers"], n_heads=H,
                               patch_num=P, d_model=D, patch_cfgs=PATCH_CFGS)
    out = pl.pallas_call(
        kernel,
        out_shape=jax.ShapeDtypeStruct((B, C, pred_len), jnp.float32),
        grid=(B,),
        in_specs=([pl.BlockSpec((1, C, L), lambda b: (b, 0, 0))]
                  + [pl.BlockSpec(w.shape, lambda b: (0, 0)) for w in fused]),
        out_specs=pl.BlockSpec((1, C, pred_len), lambda b: (b, 0, 0)),
        compiler_params=pltpu.CompilerParams(dimension_semantics=("parallel",)),
    )(x3, *fused)
    return out.transpose(0, 2, 1)[:, -pred_len:, :], 0


# ------------------------- pure-JAX reference (un-fused) -------------------------

def pad_right_replicate(x2d, n):
    if n == 0:
        return x2d
    return jnp.concatenate([x2d, jnp.repeat(x2d[:, -1:], n, axis=1)], axis=1)


def extract_patches(x2d, patch_len, stride):
    n, lp = x2d.shape
    num = (lp - patch_len) // stride + 1
    idx = stride * jnp.arange(num)[:, None] + jnp.arange(patch_len)[None, :]
    return x2d[:, idx]


def _ref_layernorm(x, g, b):
    mu = jnp.mean(x, axis=-1, keepdims=True)
    var = jnp.mean((x - mu) ** 2, axis=-1, keepdims=True)
    return (x - mu) / jnp.sqrt(var + 1e-5) * g + b


def _ref_encoder_block(x, kv_in, m, e, n_heads):
    Nb, S, D = x.shape
    E = D // n_heads
    q = x @ m["wq"] + m["bq"]
    k = kv_in @ m["wk"] + m["bk"]
    v = kv_in @ m["wv"] + m["bv"]
    qh = q.reshape(Nb, S, n_heads, E)
    kh = k.reshape(Nb, S, n_heads, E)
    vh = v.reshape(Nb, S, n_heads, E)
    s = jnp.einsum("nqhe,nkhe->nhqk", qh, kh) / math.sqrt(E)
    causal = jnp.triu(jnp.ones((S, S), bool), 1)
    s = jnp.where(causal, -1e30, s)
    p = jax.nn.softmax(s, axis=-1)
    o = jnp.einsum("nhqk,nkhe->nqhe", p, vh).reshape(Nb, S, D)
    o = o @ m["wo"] + m["bo"]
    x1 = _ref_layernorm(o + x, e["g1"], e["b1"])
    h = jax.nn.gelu(x1 @ e["w1"] + e["bf1"], approximate=False)
    x2 = h @ e["w2"] + e["bf2"]
    return _ref_layernorm(x2 + x1, e["g2"], e["b2"])


def reference_forward(params, cfg, x_enc):
    B, L, C = x_enc.shape
    D, H, P = cfg["d_model"], cfg["n_heads"], cfg["patch_num1"]
    N = B * C
    x = x_enc.transpose(0, 2, 1).reshape(N, L)
    mean = jnp.mean(x, axis=-1, keepdims=True)
    std = jnp.sqrt(jnp.mean((x - mean) ** 2, axis=-1, keepdims=True) + 1e-5)
    xn = (x - mean) / std
    embs = []
    for (plen, stride, pad), w, b in zip(PATCH_CFGS, params["patch_w"], params["patch_b"]):
        patches = extract_patches(pad_right_replicate(xn, pad), plen, stride)
        embs.append(patches @ w + b)
    enc = jnp.concatenate(embs, axis=-1) + params["pe"]                   # (N, P, D)
    for l in range(cfg["e_layers"]):
        enc = _ref_encoder_block(enc, enc, params["mha"][l], params["enc"][l], H)
    x_patch_c = enc.reshape(B, C, P * D)
    emb = x_patch_c @ params["emb_ch_w"] + params["emb_ch_b"]
    kv_in = emb @ params["enc_ch"]["wc"] + params["enc_ch"]["bc"]
    e1 = _ref_encoder_block(emb, kv_in, params["mha_ch"], params["enc_ch"], H)
    cur = e1.reshape(N, D)
    outs = []
    for w, b in zip(params["out_w"], params["out_b"]):
        y = cur @ w + b
        outs.append(y)
        cur = jnp.concatenate([cur, y], axis=-1)
    forecast = jnp.concatenate(outs, axis=-1) * std + mean                # (N, pred_len)
    return forecast.reshape(B, C, -1).transpose(0, 2, 1)


# ------------------------- parameter construction -------------------------

def sinusoidal_pe(patch_num, d_model):
    pos = jnp.arange(patch_num, dtype=jnp.float32)[:, None]
    i = jnp.arange(0, d_model, 2, dtype=jnp.float32)
    wavelength = 10000.0 ** (2.0 * i / d_model)
    ang = pos / wavelength[None, :]
    pe = jnp.zeros((patch_num, d_model), jnp.float32)
    pe = pe.at[:, 0::2].set(jnp.sin(ang))
    pe = pe.at[:, 1::2].set(jnp.cos(ang))
    return pe[None]                                          # (1, patch_num, d_model)


def init_params(cfg, seed=0):
    key = jax.random.PRNGKey(seed)

    def nrm(shape, scale=0.02):
        nonlocal key
        key, sub = jax.random.split(key)
        return (scale * jax.random.normal(sub, shape)).astype(jnp.float32)

    D, F, P = cfg["d_model"], cfg["d_ff"], cfg["patch_num1"]
    params = {}
    params["patch_w"] = [nrm((plen, D // 4)) for (plen, _, _) in PATCH_CFGS]
    params["patch_b"] = [nrm((D // 4,)) for _ in PATCH_CFGS]
    params["pe"] = sinusoidal_pe(P, D)

    def mha():
        return dict(wq=nrm((D, D)), bq=nrm((D,)), wk=nrm((D, D)), bk=nrm((D,)),
                    wv=nrm((D, D)), bv=nrm((D,)), wo=nrm((D, D)), bo=nrm((D,)))

    def enc(channel_wise):
        p = dict(w1=nrm((D, F)), bf1=nrm((F,)), w2=nrm((F, D)), bf2=nrm((D,)),
                 g1=jnp.ones((D,), jnp.float32), b1=jnp.zeros((D,), jnp.float32),
                 g2=jnp.ones((D,), jnp.float32), b2=jnp.zeros((D,), jnp.float32))
        if channel_wise:
            p["wc"] = nrm((D, D))
            p["bc"] = nrm((D,))
        return p

    params["mha"] = [mha() for _ in range(cfg["e_layers"])]
    params["enc"] = [enc(False) for _ in range(cfg["e_layers"])]
    params["mha_ch"] = mha()
    params["enc_ch"] = enc(True)
    params["emb_ch_w"] = nrm((P * D, D))                      # Conv1d(P*D, D, k=1)
    params["emb_ch_b"] = nrm((D,))

    s = cfg["pred_len"] // 8
    last = cfg["pred_len"] - 7 * s
    out_w, out_b = [], []
    in_dim = D
    for kk in range(8):
        out_dim = s if kk < 7 else last
        out_w.append(nrm((in_dim, out_dim)))
        out_b.append(nrm((out_dim,)))
        in_dim += out_dim
    params["out_w"], params["out_b"] = out_w, out_b
    return params


if __name__ == "__main__":
    cfg = dict(seq_len=96, pred_len=16, enc_in=4, e_layers=1,
               d_model=32, d_ff=64, n_heads=4)
    # patch_num1 = (seq_len - patch_len2)//stride2 + 2 ; all four patch branches give 12
    cfg["patch_num1"] = (cfg["seq_len"] - 16) // 8 + 2

    params = init_params(cfg, seed=0)
    fused = prepare_fused_params(params, cfg, cfg["enc_in"])   # eager, outside jit

    key = jax.random.PRNGKey(0)
    B = 2
    x_enc = jax.random.normal(key, (B, cfg["seq_len"], cfg["enc_in"]), jnp.float32)

    fwd = jax.jit(lambda x: mpf_forward(fused, cfg, x))
    dec_out, _ = fwd(x_enc)
    jax.block_until_ready(dec_out)

    assert dec_out.shape == (B, cfg["pred_len"], cfg["enc_in"]), dec_out.shape
    assert bool(jnp.all(jnp.isfinite(dec_out)))

    ref = reference_forward(params, cfg, x_enc)
    assert bool(jnp.allclose(dec_out, ref, atol=1e-2, rtol=5e-2)), \
        float(jnp.max(jnp.abs(dec_out - ref)))

    print("KERNEL_OK")
</pallas_src>

<mosaic_0001>
module attributes {stable_mosaic.version = 11 : i64} {
  func.func @_mpf_kernel(%arg0: i32, %arg1: memref<1x4x96xf32, #tpu.memory_space<vmem>>, %arg2: memref<48x48xf32, #tpu.memory_space<vmem>>, %arg3: memref<48x48xf32, #tpu.memory_space<vmem>>, %arg4: memref<12x32xf32, #tpu.memory_space<vmem>>, %arg5: memref<80x32xf32, #tpu.memory_space<vmem>>, %arg6: memref<32x96xf32, #tpu.memory_space<vmem>>, %arg7: memref<1x96xf32, #tpu.memory_space<vmem>>, %arg8: memref<32x32xf32, #tpu.memory_space<vmem>>, %arg9: memref<1x32xf32, #tpu.memory_space<vmem>>, %arg10: memref<1x32xf32, #tpu.memory_space<vmem>>, %arg11: memref<1x32xf32, #tpu.memory_space<vmem>>, %arg12: memref<32x64xf32, #tpu.memory_space<vmem>>, %arg13: memref<1x64xf32, #tpu.memory_space<vmem>>, %arg14: memref<64x32xf32, #tpu.memory_space<vmem>>, %arg15: memref<1x32xf32, #tpu.memory_space<vmem>>, %arg16: memref<1x32xf32, #tpu.memory_space<vmem>>, %arg17: memref<1x32xf32, #tpu.memory_space<vmem>>, %arg18: memref<384x32xf32, #tpu.memory_space<vmem>>, %arg19: memref<1x32xf32, #tpu.memory_space<vmem>>, %arg20: memref<32x32xf32, #tpu.memory_space<vmem>>, %arg21: memref<1x32xf32, #tpu.memory_space<vmem>>, %arg22: memref<32x32xf32, #tpu.memory_space<vmem>>, %arg23: memref<1x32xf32, #tpu.memory_space<vmem>>, %arg24: memref<32x64xf32, #tpu.memory_space<vmem>>, %arg25: memref<1x64xf32, #tpu.memory_space<vmem>>, %arg26: memref<32x32xf32, #tpu.memory_space<vmem>>, %arg27: memref<1x32xf32, #tpu.memory_space<vmem>>, %arg28: memref<1x32xf32, #tpu.memory_space<vmem>>, %arg29: memref<1x32xf32, #tpu.memory_space<vmem>>, %arg30: memref<32x64xf32, #tpu.memory_space<vmem>>, %arg31: memref<1x64xf32, #tpu.memory_space<vmem>>, %arg32: memref<64x32xf32, #tpu.memory_space<vmem>>, %arg33: memref<1x32xf32, #tpu.memory_space<vmem>>, %arg34: memref<1x32xf32, #tpu.memory_space<vmem>>, %arg35: memref<1x32xf32, #tpu.memory_space<vmem>>, %arg36: memref<32x16xf32, #tpu.memory_space<vmem>>, %arg37: memref<1x16xf32, #tpu.memory_space<vmem>>, %arg38: memref<1x4x16xf32, #tpu.memory_space<vmem>>) attributes {dimension_semantics = [#tpu.dimension_semantics<parallel>], iteration_bounds = array<i64: 2>, scalar_prefetch = 0 : i64, scratch_operands = 0 : i64, tpu.core_type = #tpu.core_type<tc>, window_params = [{transform_indices = @transform_0, window_bounds = array<i64: 1, 4, 96>}, {pipeline_mode = #tpu.pipeline_mode<synchronous>, transform_indices = @transform_1, window_bounds = array<i64: 48, 48>}, {pipeline_mode = #tpu.pipeline_mode<synchronous>, transform_indices = @transform_2, window_bounds = array<i64: 48, 48>}, {pipeline_mode = #tpu.pipeline_mode<synchronous>, transform_indices = @transform_3, window_bounds = array<i64: 12, 32>}, {pipeline_mode = #tpu.pipeline_mode<synchronous>, transform_indices = @transform_4, window_bounds = array<i64: 80, 32>}, {pipeline_mode = #tpu.pipeline_mode<synchronous>, transform_indices = @transform_5, window_bounds = array<i64: 32, 96>}, {pipeline_mode = #tpu.pipeline_mode<synchronous>, transform_indices = @transform_6, window_bounds = array<i64: 1, 96>}, {pipeline_mode = #tpu.pipeline_mode<synchronous>, transform_indices = @transform_7, window_bounds = array<i64: 32, 32>}, {pipeline_mode = #tpu.pipeline_mode<synchronous>, transform_indices = @transform_8, window_bounds = array<i64: 1, 32>}, {pipeline_mode = #tpu.pipeline_mode<synchronous>, transform_indices = @transform_9, window_bounds = array<i64: 1, 32>}, {pipeline_mode = #tpu.pipeline_mode<synchronous>, transform_indices = @transform_10, window_bounds = array<i64: 1, 32>}, {pipeline_mode = #tpu.pipeline_mode<synchronous>, transform_indices = @transform_11, window_bounds = array<i64: 32, 64>}, {pipeline_mode = #tpu.pipeline_mode<synchronous>, transform_indices = @transform_12, window_bounds = array<i64: 1, 64>}, {pipeline_mode = #tpu.pipeline_mode<synchronous>, transform_indices = @transform_13, window_bounds = array<i64: 64, 32>}, {pipeline_mode = #tpu.pipeline_mode<synchronous>, transform_indices = @transform_14, window_bounds = array<i64: 1, 32>}, {pipeline_mode = #tpu.pipeline_mode<synchronous>, transform_indices = @transform_15, window_bounds = array<i64: 1, 32>}, {pipeline_mode = #tpu.pipeline_mode<synchronous>, transform_indices = @transform_16, window_bounds = array<i64: 1, 32>}, {pipeline_mode = #tpu.pipeline_mode<synchronous>, transform_indices = @transform_17, window_bounds = array<i64: 384, 32>}, {pipeline_mode = #tpu.pipeline_mode<synchronous>, transform_indices = @transform_18, window_bounds = array<i64: 1, 32>}, {pipeline_mode = #tpu.pipeline_mode<synchronous>, transform_indices = @transform_19, window_bounds = array<i64: 32, 32>}, {pipeline_mode = #tpu.pipeline_mode<synchronous>, transform_indices = @transform_20, window_bounds = array<i64: 1, 32>}, {pipeline_mode = #tpu.pipeline_mode<synchronous>, transform_indices = @transform_21, window_bounds = array<i64: 32, 32>}, {pipeline_mode = #tpu.pipeline_mode<synchronous>, transform_indices = @transform_22, window_bounds = array<i64: 1, 32>}, {pipeline_mode = #tpu.pipeline_mode<synchronous>, transform_indices = @transform_23, window_bounds = array<i64: 32, 64>}, {pipeline_mode = #tpu.pipeline_mode<synchronous>, transform_indices = @transform_24, window_bounds = array<i64: 1, 64>}, {pipeline_mode = #tpu.pipeline_mode<synchronous>, transform_indices = @transform_25, window_bounds = array<i64: 32, 32>}, {pipeline_mode = #tpu.pipeline_mode<synchronous>, transform_indices = @transform_26, window_bounds = array<i64: 1, 32>}, {pipeline_mode = #tpu.pipeline_mode<synchronous>, transform_indices = @transform_27, window_bounds = array<i64: 1, 32>}, {pipeline_mode = #tpu.pipeline_mode<synchronous>, transform_indices = @transform_28, window_bounds = array<i64: 1, 32>}, {pipeline_mode = #tpu.pipeline_mode<synchronous>, transform_indices = @transform_29, window_bounds = array<i64: 32, 64>}, {pipeline_mode = #tpu.pipeline_mode<synchronous>, transform_indices = @transform_30, window_bounds = array<i64: 1, 64>}, {pipeline_mode = #tpu.pipeline_mode<synchronous>, transform_indices = @transform_31, window_bounds = array<i64: 64, 32>}, {pipeline_mode = #tpu.pipeline_mode<synchronous>, transform_indices = @transform_32, window_bounds = array<i64: 1, 32>}, {pipeline_mode = #tpu.pipeline_mode<synchronous>, transform_indices = @transform_33, window_bounds = array<i64: 1, 32>}, {pipeline_mode = #tpu.pipeline_mode<synchronous>, transform_indices = @transform_34, window_bounds = array<i64: 1, 32>}, {pipeline_mode = #tpu.pipeline_mode<synchronous>, transform_indices = @transform_35, window_bounds = array<i64: 32, 16>}, {pipeline_mode = #tpu.pipeline_mode<synchronous>, transform_indices = @transform_36, window_bounds = array<i64: 1, 16>}, {transform_indices = @transform_37, window_bounds = array<i64: 1, 4, 16>}]} {
    %c0 = arith.constant 0 : index
    %c0_0 = arith.constant 0 : index
    %0 = vector.load %arg2[%c0, %c0_0] : memref<48x48xf32, #tpu.memory_space<vmem>>, vector<48x48xf32>
    %c0_1 = arith.constant 0 : index
    %c0_2 = arith.constant 0 : index
    %1 = vector.load %arg3[%c0_1, %c0_2] : memref<48x48xf32, #tpu.memory_space<vmem>>, vector<48x48xf32>
    %c0_3 = arith.constant 0 : index
    %c0_4 = arith.constant 0 : index
    %2 = vector.load %arg4[%c0_3, %c0_4] : memref<12x32xf32, #tpu.memory_space<vmem>>, vector<12x32xf32>
    %c0_5 = arith.constant 0 : index
    %c0_6 = arith.constant 0 : index
    %3 = vector.load %arg5[%c0_5, %c0_6] : memref<80x32xf32, #tpu.memory_space<vmem>>, vector<80x32xf32>
    %c0_7 = arith.constant 0 : index
    %c0_8 = arith.constant 0 : index
    %4 = vector.load %arg18[%c0_7, %c0_8] : memref<384x32xf32, #tpu.memory_space<vmem>>, vector<384x32xf32>
    %c0_9 = arith.constant 0 : index
    %c0_10 = arith.constant 0 : index
    %5 = vector.load %arg19[%c0_9, %c0_10] : memref<1x32xf32, #tpu.memory_space<vmem>>, vector<1x32xf32>
    %c0_11 = arith.constant 0 : index
    %c0_12 = arith.constant 0 : index
    %6 = vector.load %arg20[%c0_11, %c0_12] : memref<32x32xf32, #tpu.memory_space<vmem>>, vector<32x32xf32>
    %c0_13 = arith.constant 0 : index
    %c0_14 = arith.constant 0 : index
    %7 = vector.load %arg21[%c0_13, %c0_14] : memref<1x32xf32, #tpu.memory_space<vmem>>, vector<1x32xf32>
    %c0_15 = arith.constant 0 : index
    %c0_16 = arith.constant 0 : index
    %8 = vector.load %arg36[%c0_15, %c0_16] : memref<32x16xf32, #tpu.memory_space<vmem>>, vector<32x16xf32>
    %c0_17 = arith.constant 0 : index
    %c0_18 = arith.constant 0 : index
    %9 = vector.load %arg37[%c0_17, %c0_18] : memref<1x16xf32, #tpu.memory_space<vmem>>, vector<1x16xf32>
    %c0_19 = arith.constant 0 : index
    %c0_20 = arith.constant 0 : index
    %c0_21 = arith.constant 0 : index
    %10 = vector.load %arg1[%c0_19, %c0_20, %c0_21] : memref<1x4x96xf32, #tpu.memory_space<vmem>>, vector<1x4x96xf32>
    %11 = vector.shape_cast %10 : vector<1x4x96xf32> to vector<4x96xf32>
    %cst = arith.constant dense<0.000000e+00> : vector<4xf32>
    %12 = vector.multi_reduction <add>, %11, %cst [1] : vector<4x96xf32> to vector<4xf32>
    %13 = vector.shape_cast %12 : vector<4xf32> to vector<4x1xf32>
    %cst_22 = arith.constant 9.600000e+01 : f32
    %14 = vector.broadcast %cst_22 : f32 to vector<4x1xf32>
    %15 = arith.divf %13, %14 : vector<4x1xf32>
    %16 = vector.broadcast %15 : vector<4x1xf32> to vector<4x96xf32>
    %17 = arith.subf %11, %16 : vector<4x96xf32>
    %18 = arith.mulf %17, %17 : vector<4x96xf32>
    %cst_23 = arith.constant dense<0.000000e+00> : vector<4xf32>
    %19 = vector.multi_reduction <add>, %18, %cst_23 [1] : vector<4x96xf32> to vector<4xf32>
    %20 = vector.shape_cast %19 : vector<4xf32> to vector<4x1xf32>
    %cst_24 = arith.constant 9.600000e+01 : f32
    %21 = vector.broadcast %cst_24 : f32 to vector<4x1xf32>
    %22 = arith.divf %20, %21 : vector<4x1xf32>
    %cst_25 = arith.constant 9.99999974E-6 : f32
    %23 = vector.broadcast %cst_25 : f32 to vector<4x1xf32>
    %24 = arith.addf %22, %23 : vector<4x1xf32>
    %25 = math.sqrt %24 : vector<4x1xf32>
    %26 = vector.broadcast %25 : vector<4x1xf32> to vector<4x96xf32>
    %27 = arith.divf %17, %26 : vector<4x96xf32>
    %28 = vector.extract_strided_slice %27 {offsets = [0, 95], sizes = [4, 1], strides = [1, 1]} : vector<4x96xf32> to vector<4x1xf32>
    %29 = vector.shape_cast %28 : vector<4x1xf32> to vector<4x1xf32>
    %30 = vector.broadcast %29 : vector<4x1xf32> to vector<4x8xf32>
    %31 = tpu.concatenate %27, %30 in 1 : vector<4x96xf32>, vector<4x8xf32> -> vector<4x104xf32>
    %32 = vector.extract_strided_slice %27 {offsets = [0, 95], sizes = [4, 1], strides = [1, 1]} : vector<4x96xf32> to vector<4x1xf32>
    %33 = vector.shape_cast %32 : vector<4x1xf32> to vector<4x1xf32>
    %34 = vector.broadcast %33 : vector<4x1xf32> to vector<4x7xf32>
    %35 = tpu.concatenate %27, %34 in 1 : vector<4x96xf32>, vector<4x7xf32> -> vector<4x103xf32>
    %36 = vector.extract_strided_slice %27 {offsets = [0, 95], sizes = [4, 1], strides = [1, 1]} : vector<4x96xf32> to vector<4x1xf32>
    %37 = vector.shape_cast %36 : vector<4x1xf32> to vector<4x1xf32>
    %38 = vector.broadcast %37 : vector<4x1xf32> to vector<4x6xf32>
    %39 = tpu.concatenate %27, %38 in 1 : vector<4x96xf32>, vector<4x6xf32> -> vector<4x102xf32>
    %40 = vector.extract_strided_slice %27 {offsets = [0, 0], sizes = [4, 8], strides = [1, 1]} : vector<4x96xf32> to vector<4x8xf32>
    %41 = vector.extract_strided_slice %31 {offsets = [0, 0], sizes = [4, 16], strides = [1, 1]} : vector<4x104xf32> to vector<4x16xf32>
    %42 = vector.extract_strided_slice %35 {offsets = [0, 0], sizes = [4, 24], strides = [1, 1]} : vector<4x103xf32> to vector<4x24xf32>
    %43 = vector.extract_strided_slice %39 {offsets = [0, 0], sizes = [4, 32], strides = [1, 1]} : vector<4x102xf32> to vector<4x32xf32>
    %44 = tpu.concatenate %40, %41, %42, %43 in 1 : vector<4x8xf32>, vector<4x16xf32>, vector<4x24xf32>, vector<4x32xf32> -> vector<4x80xf32>
    %cst_26 = arith.constant dense<0.000000e+00> : vector<4x32xf32>
    %45 = tpu.matmul %44, %3, %cst_26 {dimension_numbers = #tpu.dot_dimension_numbers<[1], [0], [0], [1], [0, 0, 1, 1], [], []>} : vector<4x80xf32>, vector<80x32xf32>, vector<4x32xf32> -> vector<4x32xf32>
    %46 = vector.extract_strided_slice %2 {offsets = [0, 0], sizes = [1, 32], strides = [1, 1]} : vector<12x32xf32> to vector<1x32xf32>
    %47 = vector.broadcast %46 : vector<1x32xf32> to vector<4x32xf32>
    %48 = arith.addf %45, %47 : vector<4x32xf32>
    %49 = vector.extract_strided_slice %27 {offsets = [0, 8], sizes = [4, 8], strides = [1, 1]} : vector<4x96xf32> to vector<4x8xf32>
    %50 = vector.extract_strided_slice %31 {offsets = [0, 8], sizes = [4, 16], strides = [1, 1]} : vector<4x104xf32> to vector<4x16xf32>
    %51 = vector.extract_strided_slice %35 {offsets = [0, 7], sizes = [4, 24], strides = [1, 1]} : vector<4x103xf32> to vector<4x24xf32>
    %52 = vector.extract_strided_slice %39 {offsets = [0, 6], sizes = [4, 32], strides = [1, 1]} : vector<4x102xf32> to vector<4x32xf32>
    %53 = tpu.concatenate %49, %50, %51, %52 in 1 : vector<4x8xf32>, vector<4x16xf32>, vector<4x24xf32>, vector<4x32xf32> -> vector<4x80xf32>
    %cst_27 = arith.constant dense<0.000000e+00> : vector<4x32xf32>
    %54 = tpu.matmul %53, %3, %cst_27 {dimension_numbers = #tpu.dot_dimension_numbers<[1], [0], [0], [1], [0, 0, 1, 1], [], []>} : vector<4x80xf32>, vector<80x32xf32>, vector<4x32xf32> -> vector<4x32xf32>
    %55 = vector.extract_strided_slice %2 {offsets = [1, 0], sizes = [1, 32], strides = [1, 1]} : vector<12x32xf32> to vector<1x32xf32>
    %56 = vector.broadcast %55 : vector<1x32xf32> to vector<4x32xf32>
    %57 = arith.addf %54, %56 : vector<4x32xf32>
    %58 = vector.extract_strided_slice %27 {offsets = [0, 16], sizes = [4, 8], strides = [1, 1]} : vector<4x96xf32> to vector<4x8xf32>
    %59 = vector.extract_strided_slice %31 {offsets = [0, 16], sizes = [4, 16], strides = [1, 1]} : vector<4x104xf32> to vector<4x16xf32>
    %60 = vector.extract_strided_slice %35 {offsets = [0, 14], sizes = [4, 24], strides = [1, 1]} : vector<4x103xf32> to vector<4x24xf32>
    %61 = vector.extract_strided_slice %39 {offsets = [0, 12], sizes = [4, 32], strides = [1, 1]} : vector<4x102xf32> to vector<4x32xf32>
    %62 = tpu.concatenate %58, %59, %60, %61 in 1 : vector<4x8xf32>, vector<4x16xf32>, vector<4x24xf32>, vector<4x32xf32> -> vector<4x80xf32>
    %cst_28 = arith.constant dense<0.000000e+00> : vector<4x32xf32>
    %63 = tpu.matmul %62, %3, %cst_28 {dimension_numbers = #tpu.dot_dimension_numbers<[1], [0], [0], [1], [0, 0, 1, 1], [], []>} : vector<4x80xf32>, vector<80x32xf32>, vector<4x32xf32> -> vector<4x32xf32>
    %64 = vector.extract_strided_slice %2 {offsets = [2, 0], sizes = [1, 32], strides = [1, 1]} : vector<12x32xf32> to vector<1x32xf32>
    %65 = vector.broadcast %64 : vector<1x32xf32> to vector<4x32xf32>
    %66 = arith.addf %63, %65 : vector<4x32xf32>
    %67 = vector.extract_strided_slice %27 {offsets = [0, 24], sizes = [4, 8], strides = [1, 1]} : vector<4x96xf32> to vector<4x8xf32>
    %68 = vector.extract_strided_slice %31 {offsets = [0, 24], sizes = [4, 16], strides = [1, 1]} : vector<4x104xf32> to vector<4x16xf32>
    %69 = vector.extract_strided_slice %35 {offsets = [0, 21], sizes = [4, 24], strides = [1, 1]} : vector<4x103xf32> to vector<4x24xf32>
    %70 = vector.extract_strided_slice %39 {offsets = [0, 18], sizes = [4, 32], strides = [1, 1]} : vector<4x102xf32> to vector<4x32xf32>
    %71 = tpu.concatenate %67, %68, %69, %70 in 1 : vector<4x8xf32>, vector<4x16xf32>, vector<4x24xf32>, vector<4x32xf32> -> vector<4x80xf32>
    %cst_29 = arith.constant dense<0.000000e+00> : vector<4x32xf32>
    %72 = tpu.matmul %71, %3, %cst_29 {dimension_numbers = #tpu.dot_dimension_numbers<[1], [0], [0], [1], [0, 0, 1, 1], [], []>} : vector<4x80xf32>, vector<80x32xf32>, vector<4x32xf32> -> vector<4x32xf32>
    %73 = vector.extract_strided_slice %2 {offsets = [3, 0], sizes = [1, 32], strides = [1, 1]} : vector<12x32xf32> to vector<1x32xf32>
    %74 = vector.broadcast %73 : vector<1x32xf32> to vector<4x32xf32>
    %75 = arith.addf %72, %74 : vector<4x32xf32>
    %76 = vector.extract_strided_slice %27 {offsets = [0, 32], sizes = [4, 8], strides = [1, 1]} : vector<4x96xf32> to vector<4x8xf32>
    %77 = vector.extract_strided_slice %31 {offsets = [0, 32], sizes = [4, 16], strides = [1, 1]} : vector<4x104xf32> to vector<4x16xf32>
    %78 = vector.extract_strided_slice %35 {offsets = [0, 28], sizes = [4, 24], strides = [1, 1]} : vector<4x103xf32> to vector<4x24xf32>
    %79 = vector.extract_strided_slice %39 {offsets = [0, 24], sizes = [4, 32], strides = [1, 1]} : vector<4x102xf32> to vector<4x32xf32>
    %80 = tpu.concatenate %76, %77, %78, %79 in 1 : vector<4x8xf32>, vector<4x16xf32>, vector<4x24xf32>, vector<4x32xf32> -> vector<4x80xf32>
    %cst_30 = arith.constant dense<0.000000e+00> : vector<4x32xf32>
    %81 = tpu.matmul %80, %3, %cst_30 {dimension_numbers = #tpu.dot_dimension_numbers<[1], [0], [0], [1], [0, 0, 1, 1], [], []>} : vector<4x80xf32>, vector<80x32xf32>, vector<4x32xf32> -> vector<4x32xf32>
    %82 = vector.extract_strided_slice %2 {offsets = [4, 0], sizes = [1, 32], strides = [1, 1]} : vector<12x32xf32> to vector<1x32xf32>
    %83 = vector.broadcast %82 : vector<1x32xf32> to vector<4x32xf32>
    %84 = arith.addf %81, %83 : vector<4x32xf32>
    %85 = vector.extract_strided_slice %27 {offsets = [0, 40], sizes = [4, 8], strides = [1, 1]} : vector<4x96xf32> to vector<4x8xf32>
    %86 = vector.extract_strided_slice %31 {offsets = [0, 40], sizes = [4, 16], strides = [1, 1]} : vector<4x104xf32> to vector<4x16xf32>
    %87 = vector.extract_strided_slice %35 {offsets = [0, 35], sizes = [4, 24], strides = [1, 1]} : vector<4x103xf32> to vector<4x24xf32>
    %88 = vector.extract_strided_slice %39 {offsets = [0, 30], sizes = [4, 32], strides = [1, 1]} : vector<4x102xf32> to vector<4x32xf32>
    %89 = tpu.concatenate %85, %86, %87, %88 in 1 : vector<4x8xf32>, vector<4x16xf32>, vector<4x24xf32>, vector<4x32xf32> -> vector<4x80xf32>
    %cst_31 = arith.constant dense<0.000000e+00> : vector<4x32xf32>
    %90 = tpu.matmul %89, %3, %cst_31 {dimension_numbers = #tpu.dot_dimension_numbers<[1], [0], [0], [1], [0, 0, 1, 1], [], []>} : vector<4x80xf32>, vector<80x32xf32>, vector<4x32xf32> -> vector<4x32xf32>
    %91 = vector.extract_strided_slice %2 {offsets = [5, 0], sizes = [1, 32], strides = [1, 1]} : vector<12x32xf32> to vector<1x32xf32>
    %92 = vector.broadcast %91 : vector<1x32xf32> to vector<4x32xf32>
    %93 = arith.addf %90, %92 : vector<4x32xf32>
    %94 = vector.extract_strided_slice %27 {offsets = [0, 48], sizes = [4, 8], strides = [1, 1]} : vector<4x96xf32> to vector<4x8xf32>
    %95 = vector.extract_strided_slice %31 {offsets = [0, 48], sizes = [4, 16], strides = [1, 1]} : vector<4x104xf32> to vector<4x16xf32>
    %96 = vector.extract_strided_slice %35 {offsets = [0, 42], sizes = [4, 24], strides = [1, 1]} : vector<4x103xf32> to vector<4x24xf32>
    %97 = vector.extract_strided_slice %39 {offsets = [0, 36], sizes = [4, 32], strides = [1, 1]} : vector<4x102xf32> to vector<4x32xf32>
    %98 = tpu.concatenate %94, %95, %96, %97 in 1 : vector<4x8xf32>, vector<4x16xf32>, vector<4x24xf32>, vector<4x32xf32> -> vector<4x80xf32>
    %cst_32 = arith.constant dense<0.000000e+00> : vector<4x32xf32>
    %99 = tpu.matmul %98, %3, %cst_32 {dimension_numbers = #tpu.dot_dimension_numbers<[1], [0], [0], [1], [0, 0, 1, 1], [], []>} : vector<4x80xf32>, vector<80x32xf32>, vector<4x32xf32> -> vector<4x32xf32>
    %100 = vector.extract_strided_slice %2 {offsets = [6, 0], sizes = [1, 32], strides = [1, 1]} : vector<12x32xf32> to vector<1x32xf32>
    %101 = vector.broadcast %100 : vector<1x32xf32> to vector<4x32xf32>
    %102 = arith.addf %99, %101 : vector<4x32xf32>
    %103 = vector.extract_strided_slice %27 {offsets = [0, 56], sizes = [4, 8], strides = [1, 1]} : vector<4x96xf32> to vector<4x8xf32>
    %104 = vector.extract_strided_slice %31 {offsets = [0, 56], sizes = [4, 16], strides = [1, 1]} : vector<4x104xf32> to vector<4x16xf32>
    %105 = vector.extract_strided_slice %35 {offsets = [0, 49], sizes = [4, 24], strides = [1, 1]} : vector<4x103xf32> to vector<4x24xf32>
    %106 = vector.extract_strided_slice %39 {offsets = [0, 42], sizes = [4, 32], strides = [1, 1]} : vector<4x102xf32> to vector<4x32xf32>
    %107 = tpu.concatenate %103, %104, %105, %106 in 1 : vector<4x8xf32>, vector<4x16xf32>, vector<4x24xf32>, vector<4x32xf32> -> vector<4x80xf32>
    %cst_33 = arith.constant dense<0.000000e+00> : vector<4x32xf32>
    %108 = tpu.matmul %107, %3, %cst_33 {dimension_numbers = #tpu.dot_dimension_numbers<[1], [0], [0], [1], [0, 0, 1, 1], [], []>} : vector<4x80xf32>, vector<80x32xf32>, vector<4x32xf32> -> vector<4x32xf32>
    %109 = vector.extract_strided_slice %2 {offsets = [7, 0], sizes = [1, 32], strides = [1, 1]} : vector<12x32xf32> to vector<1x32xf32>
    %110 = vector.broadcast %109 : vector<1x32xf32> to vector<4x32xf32>
    %111 = arith.addf %108, %110 : vector<4x32xf32>
    %112 = vector.extract_strided_slice %27 {offsets = [0, 64], sizes = [4, 8], strides = [1, 1]} : vector<4x96xf32> to vector<4x8xf32>
    %113 = vector.extract_strided_slice %31 {offsets = [0, 64], sizes = [4, 16], strides = [1, 1]} : vector<4x104xf32> to vector<4x16xf32>
    %114 = vector.extract_strided_slice %35 {offsets = [0, 56], sizes = [4, 24], strides = [1, 1]} : vector<4x103xf32> to vector<4x24xf32>
    %115 = vector.extract_strided_slice %39 {offsets = [0, 48], sizes = [4, 32], strides = [1, 1]} : vector<4x102xf32> to vector<4x32xf32>
    %116 = tpu.concatenate %112, %113, %114, %115 in 1 : vector<4x8xf32>, vector<4x16xf32>, vector<4x24xf32>, vector<4x32xf32> -> vector<4x80xf32>
    %cst_34 = arith.constant dense<0.000000e+00> : vector<4x32xf32>
    %117 = tpu.matmul %116, %3, %cst_34 {dimension_numbers = #tpu.dot_dimension_numbers<[1], [0], [0], [1], [0, 0, 1, 1], [], []>} : vector<4x80xf32>, vector<80x32xf32>, vector<4x32xf32> -> vector<4x32xf32>
    %118 = vector.extract_strided_slice %2 {offsets = [8, 0], sizes = [1, 32], strides = [1, 1]} : vector<12x32xf32> to vector<1x32xf32>
    %119 = vector.broadcast %118 : vector<1x32xf32> to vector<4x32xf32>
    %120 = arith.addf %117, %119 : vector<4x32xf32>
    %121 = vector.extract_strided_slice %27 {offsets = [0, 72], sizes = [4, 8], strides = [1, 1]} : vector<4x96xf32> to vector<4x8xf32>
    %122 = vector.extract_strided_slice %31 {offsets = [0, 72], sizes = [4, 16], strides = [1, 1]} : vector<4x104xf32> to vector<4x16xf32>
    %123 = vector.extract_strided_slice %35 {offsets = [0, 63], sizes = [4, 24], strides = [1, 1]} : vector<4x103xf32> to vector<4x24xf32>
    %124 = vector.extract_strided_slice %39 {offsets = [0, 54], sizes = [4, 32], strides = [1, 1]} : vector<4x102xf32> to vector<4x32xf32>
    %125 = tpu.concatenate %121, %122, %123, %124 in 1 : vector<4x8xf32>, vector<4x16xf32>, vector<4x24xf32>, vector<4x32xf32> -> vector<4x80xf32>
    %cst_35 = arith.constant dense<0.000000e+00> : vector<4x32xf32>
    %126 = tpu.matmul %125, %3, %cst_35 {dimension_numbers = #tpu.dot_dimension_numbers<[1], [0], [0], [1], [0, 0, 1, 1], [], []>} : vector<4x80xf32>, vector<80x32xf32>, vector<4x32xf32> -> vector<4x32xf32>
    %127 = vector.extract_strided_slice %2 {offsets = [9, 0], sizes = [1, 32], strides = [1, 1]} : vector<12x32xf32> to vector<1x32xf32>
    %128 = vector.broadcast %127 : vector<1x32xf32> to vector<4x32xf32>
    %129 = arith.addf %126, %128 : vector<4x32xf32>
    %130 = vector.extract_strided_slice %27 {offsets = [0, 80], sizes = [4, 8], strides = [1, 1]} : vector<4x96xf32> to vector<4x8xf32>
    %131 = vector.extract_strided_slice %31 {offsets = [0, 80], sizes = [4, 16], strides = [1, 1]} : vector<4x104xf32> to vector<4x16xf32>
    %132 = vector.extract_strided_slice %35 {offsets = [0, 70], sizes = [4, 24], strides = [1, 1]} : vector<4x103xf32> to vector<4x24xf32>
    %133 = vector.extract_strided_slice %39 {offsets = [0, 60], sizes = [4, 32], strides = [1, 1]} : vector<4x102xf32> to vector<4x32xf32>
    %134 = tpu.concatenate %130, %131, %132, %133 in 1 : vector<4x8xf32>, vector<4x16xf32>, vector<4x24xf32>, vector<4x32xf32> -> vector<4x80xf32>
    %cst_36 = arith.constant dense<0.000000e+00> : vector<4x32xf32>
    %135 = tpu.matmul %134, %3, %cst_36 {dimension_numbers = #tpu.dot_dimension_numbers<[1], [0], [0], [1], [0, 0, 1, 1], [], []>} : vector<4x80xf32>, vector<80x32xf32>, vector<4x32xf32> -> vector<4x32xf32>
    %136 = vector.extract_strided_slice %2 {offsets = [10, 0], sizes = [1, 32], strides = [1, 1]} : vector<12x32xf32> to vector<1x32xf32>
    %137 = vector.broadcast %136 : vector<1x32xf32> to vector<4x32xf32>
    %138 = arith.addf %135, %137 : vector<4x32xf32>
    %139 = vector.extract_strided_slice %27 {offsets = [0, 88], sizes = [4, 8], strides = [1, 1]} : vector<4x96xf32> to vector<4x8xf32>
    %140 = vector.extract_strided_slice %31 {offsets = [0, 88], sizes = [4, 16], strides = [1, 1]} : vector<4x104xf32> to vector<4x16xf32>
    %141 = vector.extract_strided_slice %35 {offsets = [0, 77], sizes = [4, 24], strides = [1, 1]} : vector<4x103xf32> to vector<4x24xf32>
    %142 = vector.extract_strided_slice %39 {offsets = [0, 66], sizes = [4, 32], strides = [1, 1]} : vector<4x102xf32> to vector<4x32xf32>
    %143 = tpu.concatenate %139, %140, %141, %142 in 1 : vector<4x8xf32>, vector<4x16xf32>, vector<4x24xf32>, vector<4x32xf32> -> vector<4x80xf32>
    %cst_37 = arith.constant dense<0.000000e+00> : vector<4x32xf32>
    %144 = tpu.matmul %143, %3, %cst_37 {dimension_numbers = #tpu.dot_dimension_numbers<[1], [0], [0], [1], [0, 0, 1, 1], [], []>} : vector<4x80xf32>, vector<80x32xf32>, vector<4x32xf32> -> vector<4x32xf32>
    %145 = vector.extract_strided_slice %2 {offsets = [11, 0], sizes = [1, 32], strides = [1, 1]} : vector<12x32xf32> to vector<1x32xf32>
    %146 = vector.broadcast %145 : vector<1x32xf32> to vector<4x32xf32>
    %147 = arith.addf %144, %146 : vector<4x32xf32>
    %148 = tpu.concatenate %48, %57, %66, %75, %84, %93, %102, %111, %120, %129, %138, %147 in 0 : vector<4x32xf32>, vector<4x32xf32>, vector<4x32xf32>, vector<4x32xf32>, vector<4x32xf32>, vector<4x32xf32>, vector<4x32xf32>, vector<4x32xf32>, vector<4x32xf32>, vector<4x32xf32>, vector<4x32xf32>, vector<4x32xf32> -> vector<48x32xf32>
    %cst_38 = arith.constant dense<0.000000e+00> : vector<48x32xf32>
    %149 = tpu.matmul %0, %148, %cst_38 {dimension_numbers = #tpu.dot_dimension_numbers<[1], [0], [0], [1], [0, 0, 1, 1], [], []>} : vector<48x48xf32>, vector<48x32xf32>, vector<48x32xf32> -> vector<48x32xf32>
    %c0_39 = arith.constant 0 : index
    %c0_40 = arith.constant 0 : index
    %150 = vector.load %arg6[%c0_39, %c0_40] : memref<32x96xf32, #tpu.memory_space<vmem>>, vector<32x96xf32>
    %c0_41 = arith.constant 0 : index
    %c0_42 = arith.constant 0 : index
    %151 = vector.load %arg7[%c0_41, %c0_42] : memref<1x96xf32, #tpu.memory_space<vmem>>, vector<1x96xf32>
    %c0_43 = arith.constant 0 : index
    %c0_44 = arith.constant 0 : index
    %152 = vector.load %arg8[%c0_43, %c0_44] : memref<32x32xf32, #tpu.memory_space<vmem>>, vector<32x32xf32>
    %c0_45 = arith.constant 0 : index
    %c0_46 = arith.constant 0 : index
    %153 = vector.load %arg9[%c0_45, %c0_46] : memref<1x32xf32, #tpu.memory_space<vmem>>, vector<1x32xf32>
    %c0_47 = arith.constant 0 : index
    %c0_48 = arith.constant 0 : index
    %154 = vector.load %arg10[%c0_47, %c0_48] : memref<1x32xf32, #tpu.memory_space<vmem>>, vector<1x32xf32>
    %c0_49 = arith.constant 0 : index
    %c0_50 = arith.constant 0 : index
    %155 = vector.load %arg11[%c0_49, %c0_50] : memref<1x32xf32, #tpu.memory_space<vmem>>, vector<1x32xf32>
    %c0_51 = arith.constant 0 : index
    %c0_52 = arith.constant 0 : index
    %156 = vector.load %arg12[%c0_51, %c0_52] : memref<32x64xf32, #tpu.memory_space<vmem>>, vector<32x64xf32>
    %c0_53 = arith.constant 0 : index
    %c0_54 = arith.constant 0 : index
    %157 = vector.load %arg13[%c0_53, %c0_54] : memref<1x64xf32, #tpu.memory_space<vmem>>, vector<1x64xf32>
    %c0_55 = arith.constant 0 : index
    %c0_56 = arith.constant 0 : index
    %158 = vector.load %arg14[%c0_55, %c0_56] : memref<64x32xf32, #tpu.memory_space<vmem>>, vector<64x32xf32>
    %c0_57 = arith.constant 0 : index
    %c0_58 = arith.constant 0 : index
    %159 = vector.load %arg15[%c0_57, %c0_58] : memref<1x32xf32, #tpu.memory_space<vmem>>, vector<1x32xf32>
    %c0_59 = arith.constant 0 : index
    %c0_60 = arith.constant 0 : index
    %160 = vector.load %arg16[%c0_59, %c0_60] : memref<1x32xf32, #tpu.memory_space<vmem>>, vector<1x32xf32>
    %c0_61 = arith.constant 0 : index
    %c0_62 = arith.constant 0 : index
    %161 = vector.load %arg17[%c0_61, %c0_62] : memref<1x32xf32, #tpu.memory_space<vmem>>, vector<1x32xf32>
    %cst_63 = arith.constant dense<0.000000e+00> : vector<48x96xf32>
    %162 = tpu.matmul %149, %150, %cst_63 {dimension_numbers = #tpu.dot_dimension_numbers<[1], [0], [0], [1], [0, 0, 1, 1], [], []>} : vector<48x32xf32>, vector<32x96xf32>, vector<48x96xf32> -> vector<48x96xf32>
    %163 = vector.broadcast %151 : vector<1x96xf32> to vector<48x96xf32>
    %164 = arith.addf %162, %163 : vector<48x96xf32>
    %165 = vector.extract_strided_slice %164 {offsets = [0, 0], sizes = [48, 32], strides = [1, 1]} : vector<48x96xf32> to vector<48x32xf32>
    %cst_64 = arith.constant 0.353553385 : f32
    %166 = vector.broadcast %cst_64 : f32 to vector<48x32xf32>
    %167 = arith.mulf %165, %166 : vector<48x32xf32>
    %168 = vector.extract_strided_slice %164 {offsets = [0, 32], sizes = [48, 32], strides = [1, 1]} : vector<48x96xf32> to vector<48x32xf32>
    %169 = vector.extract_strided_slice %164 {offsets = [0, 64], sizes = [48, 32], strides = [1, 1]} : vector<48x96xf32> to vector<48x32xf32>
    %170 = tpu.iota {dimensions = array<i32: 0>} : vector<12x12xi32>
    %171 = tpu.iota {dimensions = array<i32: 1>} : vector<12x12xi32>
    %172 = arith.cmpi sgt, %171, %170 : vector<12x12xi32>
    %173 = vector.extract_strided_slice %167 {offsets = [0, 0], sizes = [12, 32], strides = [1, 1]} : vector<48x32xf32> to vector<12x32xf32>
    %174 = vector.extract_strided_slice %168 {offsets = [0, 0], sizes = [12, 32], strides = [1, 1]} : vector<48x32xf32> to vector<12x32xf32>
    %175 = vector.extract_strided_slice %169 {offsets = [0, 0], sizes = [12, 32], strides = [1, 1]} : vector<48x32xf32> to vector<12x32xf32>
    %176 = vector.extract_strided_slice %173 {offsets = [0, 0], sizes = [12, 8], strides = [1, 1]} : vector<12x32xf32> to vector<12x8xf32>
    %177 = vector.extract_strided_slice %174 {offsets = [0, 0], sizes = [12, 8], strides = [1, 1]} : vector<12x32xf32> to vector<12x8xf32>
    %178 = vector.extract_strided_slice %175 {offsets = [0, 0], sizes = [12, 8], strides = [1, 1]} : vector<12x32xf32> to vector<12x8xf32>
    %cst_65 = arith.constant dense<0.000000e+00> : vector<12x12xf32>
    %179 = tpu.matmul %176, %177, %cst_65 {dimension_numbers = #tpu.dot_dimension_numbers<[1], [1], [0], [0], [0, 0, 1, 0], [], []>} : vector<12x8xf32>, vector<12x8xf32>, vector<12x12xf32> -> vector<12x12xf32>
    %cst_66 = arith.constant -1.000000e+30 : f32
    %180 = vector.broadcast %cst_66 : f32 to vector<12x12xf32>
    %181 = arith.select %172, %180, %179 : vector<12x12xi1>, vector<12x12xf32>
    %cst_67 = arith.constant dense<0xFF800000> : vector<12xf32>
    %182 = vector.multi_reduction <maximumf>, %181, %cst_67 [1] : vector<12x12xf32> to vector<12xf32>
    %183 = vector.shape_cast %182 : vector<12xf32> to vector<12x1xf32>
    %184 = vector.broadcast %183 : vector<12x1xf32> to vector<12x12xf32>
    %185 = arith.subf %181, %184 : vector<12x12xf32>
    %186 = math.exp %185 : vector<12x12xf32>
    %cst_68 = arith.constant dense<0.000000e+00> : vector<12xf32>
    %187 = vector.multi_reduction <add>, %186, %cst_68 [1] : vector<12x12xf32> to vector<12xf32>
    %188 = vector.shape_cast %187 : vector<12xf32> to vector<12x1xf32>
    %189 = tpu.reciprocal %188 {approx = true} : vector<12x1xf32> -> vector<12x1xf32>
    %190 = vector.broadcast %189 : vector<12x1xf32> to vector<12x12xf32>
    %191 = arith.mulf %186, %190 : vector<12x12xf32>
    %cst_69 = arith.constant dense<0.000000e+00> : vector<12x8xf32>
    %192 = tpu.matmul %191, %178, %cst_69 {dimension_numbers = #tpu.dot_dimension_numbers<[1], [0], [0], [1], [0, 0, 1, 1], [], []>} : vector<12x12xf32>, vector<12x8xf32>, vector<12x8xf32> -> vector<12x8xf32>
    %193 = vector.extract_strided_slice %173 {offsets = [0, 8], sizes = [12, 8], strides = [1, 1]} : vector<12x32xf32> to vector<12x8xf32>
    %194 = vector.extract_strided_slice %174 {offsets = [0, 8], sizes = [12, 8], strides = [1, 1]} : vector<12x32xf32> to vector<12x8xf32>
    %195 = vector.extract_strided_slice %175 {offsets = [0, 8], sizes = [12, 8], strides = [1, 1]} : vector<12x32xf32> to vector<12x8xf32>
    %cst_70 = arith.constant dense<0.000000e+00> : vector<12x12xf32>
    %196 = tpu.matmul %193, %194, %cst_70 {dimension_numbers = #tpu.dot_dimension_numbers<[1], [1], [0], [0], [0, 0, 1, 0], [], []>} : vector<12x8xf32>, vector<12x8xf32>, vector<12x12xf32> -> vector<12x12xf32>
    %cst_71 = arith.constant -1.000000e+30 : f32
    %197 = vector.broadcast %cst_71 : f32 to vector<12x12xf32>
    %198 = arith.select %172, %197, %196 : vector<12x12xi1>, vector<12x12xf32>
    %cst_72 = arith.constant dense<0xFF800000> : vector<12xf32>
    %199 = vector.multi_reduction <maximumf>, %198, %cst_72 [1] : vector<12x12xf32> to vector<12xf32>
    %200 = vector.shape_cast %199 : vector<12xf32> to vector<12x1xf32>
    %201 = vector.broadcast %200 : vector<12x1xf32> to vector<12x12xf32>
    %202 = arith.subf %198, %201 : vector<12x12xf32>
    %203 = math.exp %202 : vector<12x12xf32>
    %cst_73 = arith.constant dense<0.000000e+00> : vector<12xf32>
    %204 = vector.multi_reduction <add>, %203, %cst_73 [1] : vector<12x12xf32> to vector<12xf32>
    %205 = vector.shape_cast %204 : vector<12xf32> to vector<12x1xf32>
    %206 = tpu.reciprocal %205 {approx = true} : vector<12x1xf32> -> vector<12x1xf32>
    %207 = vector.broadcast %206 : vector<12x1xf32> to vector<12x12xf32>
    %208 = arith.mulf %203, %207 : vector<12x12xf32>
    %cst_74 = arith.constant dense<0.000000e+00> : vector<12x8xf32>
    %209 = tpu.matmul %208, %195, %cst_74 {dimension_numbers = #tpu.dot_dimension_numbers<[1], [0], [0], [1], [0, 0, 1, 1], [], []>} : vector<12x12xf32>, vector<12x8xf32>, vector<12x8xf32> -> vector<12x8xf32>
    %210 = vector.extract_strided_slice %173 {offsets = [0, 16], sizes = [12, 8], strides = [1, 1]} : vector<12x32xf32> to vector<12x8xf32>
    %211 = vector.extract_strided_slice %174 {offsets = [0, 16], sizes = [12, 8], strides = [1, 1]} : vector<12x32xf32> to vector<12x8xf32>
    %212 = vector.extract_strided_slice %175 {offsets = [0, 16], sizes = [12, 8], strides = [1, 1]} : vector<12x32xf32> to vector<12x8xf32>
    %cst_75 = arith.constant dense<0.000000e+00> : vector<12x12xf32>
    %213 = tpu.matmul %210, %211, %cst_75 {dimension_numbers = #tpu.dot_dimension_numbers<[1], [1], [0], [0], [0, 0, 1, 0], [], []>} : vector<12x8xf32>, vector<12x8xf32>, vector<12x12xf32> -> vector<12x12xf32>
    %cst_76 = arith.constant -1.000000e+30 : f32
    %214 = vector.broadcast %cst_76 : f32 to vector<12x12xf32>
    %215 = arith.select %172, %214, %213 : vector<12x12xi1>, vector<12x12xf32>
    %cst_77 = arith.constant dense<0xFF800000> : vector<12xf32>
    %216 = vector.multi_reduction <maximumf>, %215, %cst_77 [1] : vector<12x12xf32> to vector<12xf32>
    %217 = vector.shape_cast %216 : vector<12xf32> to vector<12x1xf32>
    %218 = vector.broadcast %217 : vector<12x1xf32> to vector<12x12xf32>
    %219 = arith.subf %215, %218 : vector<12x12xf32>
    %220 = math.exp %219 : vector<12x12xf32>
    %cst_78 = arith.constant dense<0.000000e+00> : vector<12xf32>
    %221 = vector.multi_reduction <add>, %220, %cst_78 [1] : vector<12x12xf32> to vector<12xf32>
    %222 = vector.shape_cast %221 : vector<12xf32> to vector<12x1xf32>
    %223 = tpu.reciprocal %222 {approx = true} : vector<12x1xf32> -> vector<12x1xf32>
    %224 = vector.broadcast %223 : vector<12x1xf32> to vector<12x12xf32>
    %225 = arith.mulf %220, %224 : vector<12x12xf32>
    %cst_79 = arith.constant dense<0.000000e+00> : vector<12x8xf32>
    %226 = tpu.matmul %225, %212, %cst_79 {dimension_numbers = #tpu.dot_dimension_numbers<[1], [0], [0], [1], [0, 0, 1, 1], [], []>} : vector<12x12xf32>, vector<12x8xf32>, vector<12x8xf32> -> vector<12x8xf32>
    %227 = vector.extract_strided_slice %173 {offsets = [0, 24], sizes = [12, 8], strides = [1, 1]} : vector<12x32xf32> to vector<12x8xf32>
    %228 = vector.extract_strided_slice %174 {offsets = [0, 24], sizes = [12, 8], strides = [1, 1]} : vector<12x32xf32> to vector<12x8xf32>
    %229 = vector.extract_strided_slice %175 {offsets = [0, 24], sizes = [12, 8], strides = [1, 1]} : vector<12x32xf32> to vector<12x8xf32>
    %cst_80 = arith.constant dense<0.000000e+00> : vector<12x12xf32>
    %230 = tpu.matmul %227, %228, %cst_80 {dimension_numbers = #tpu.dot_dimension_numbers<[1], [1], [0], [0], [0, 0, 1, 0], [], []>} : vector<12x8xf32>, vector<12x8xf32>, vector<12x12xf32> -> vector<12x12xf32>
    %cst_81 = arith.constant -1.000000e+30 : f32
    %231 = vector.broadcast %cst_81 : f32 to vector<12x12xf32>
    %232 = arith.select %172, %231, %230 : vector<12x12xi1>, vector<12x12xf32>
    %cst_82 = arith.constant dense<0xFF800000> : vector<12xf32>
    %233 = vector.multi_reduction <maximumf>, %232, %cst_82 [1] : vector<12x12xf32> to vector<12xf32>
    %234 = vector.shape_cast %233 : vector<12xf32> to vector<12x1xf32>
    %235 = vector.broadcast %234 : vector<12x1xf32> to vector<12x12xf32>
    %236 = arith.subf %232, %235 : vector<12x12xf32>
    %237 = math.exp %236 : vector<12x12xf32>
    %cst_83 = arith.constant dense<0.000000e+00> : vector<12xf32>
    %238 = vector.multi_reduction <add>, %237, %cst_83 [1] : vector<12x12xf32> to vector<12xf32>
    %239 = vector.shape_cast %238 : vector<12xf32> to vector<12x1xf32>
    %240 = tpu.reciprocal %239 {approx = true} : vector<12x1xf32> -> vector<12x1xf32>
    %241 = vector.broadcast %240 : vector<12x1xf32> to vector<12x12xf32>
    %242 = arith.mulf %237, %241 : vector<12x12xf32>
    %cst_84 = arith.constant dense<0.000000e+00> : vector<12x8xf32>
    %243 = tpu.matmul %242, %229, %cst_84 {dimension_numbers = #tpu.dot_dimension_numbers<[1], [0], [0], [1], [0, 0, 1, 1], [], []>} : vector<12x12xf32>, vector<12x8xf32>, vector<12x8xf32> -> vector<12x8xf32>
    %244 = tpu.concatenate %192, %209, %226, %243 in 1 : vector<12x8xf32>, vector<12x8xf32>, vector<12x8xf32>, vector<12x8xf32> -> vector<12x32xf32>
    %245 = vector.extract_strided_slice %167 {offsets = [12, 0], sizes = [12, 32], strides = [1, 1]} : vector<48x32xf32> to vector<12x32xf32>
    %246 = vector.extract_strided_slice %168 {offsets = [12, 0], sizes = [12, 32], strides = [1, 1]} : vector<48x32xf32> to vector<12x32xf32>
    %247 = vector.extract_strided_slice %169 {offsets = [12, 0], sizes = [12, 32], strides = [1, 1]} : vector<48x32xf32> to vector<12x32xf32>
    %248 = vector.extract_strided_slice %245 {offsets = [0, 0], sizes = [12, 8], strides = [1, 1]} : vector<12x32xf32> to vector<12x8xf32>
    %249 = vector.extract_strided_slice %246 {offsets = [0, 0], sizes = [12, 8], strides = [1, 1]} : vector<12x32xf32> to vector<12x8xf32>
    %250 = vector.extract_strided_slice %247 {offsets = [0, 0], sizes = [12, 8], strides = [1, 1]} : vector<12x32xf32> to vector<12x8xf32>
    %cst_85 = arith.constant dense<0.000000e+00> : vector<12x12xf32>
    %251 = tpu.matmul %248, %249, %cst_85 {dimension_numbers = #tpu.dot_dimension_numbers<[1], [1], [0], [0], [0, 0, 1, 0], [], []>} : vector<12x8xf32>, vector<12x8xf32>, vector<12x12xf32> -> vector<12x12xf32>
    %cst_86 = arith.constant -1.000000e+30 : f32
    %252 = vector.broadcast %cst_86 : f32 to vector<12x12xf32>
    %253 = arith.select %172, %252, %251 : vector<12x12xi1>, vector<12x12xf32>
    %cst_87 = arith.constant dense<0xFF800000> : vector<12xf32>
    %254 = vector.multi_reduction <maximumf>, %253, %cst_87 [1] : vector<12x12xf32> to vector<12xf32>
    %255 = vector.shape_cast %254 : vector<12xf32> to vector<12x1xf32>
    %256 = vector.broadcast %255 : vector<12x1xf32> to vector<12x12xf32>
    %257 = arith.subf %253, %256 : vector<12x12xf32>
    %258 = math.exp %257 : vector<12x12xf32>
    %cst_88 = arith.constant dense<0.000000e+00> : vector<12xf32>
    %259 = vector.multi_reduction <add>, %258, %cst_88 [1] : vector<12x12xf32> to vector<12xf32>
    %260 = vector.shape_cast %259 : vector<12xf32> to vector<12x1xf32>
    %261 = tpu.reciprocal %260 {approx = true} : vector<12x1xf32> -> vector<12x1xf32>
    %262 = vector.broadcast %261 : vector<12x1xf32> to vector<12x12xf32>
    %263 = arith.mulf %258, %262 : vector<12x12xf32>
    %cst_89 = arith.constant dense<0.000000e+00> : vector<12x8xf32>
    %264 = tpu.matmul %263, %250, %cst_89 {dimension_numbers = #tpu.dot_dimension_numbers<[1], [0], [0], [1], [0, 0, 1, 1], [], []>} : vector<12x12xf32>, vector<12x8xf32>, vector<12x8xf32> -> vector<12x8xf32>
    %265 = vector.extract_strided_slice %245 {offsets = [0, 8], sizes = [12, 8], strides = [1, 1]} : vector<12x32xf32> to vector<12x8xf32>
    %266 = vector.extract_strided_slice %246 {offsets = [0, 8], sizes = [12, 8], strides = [1, 1]} : vector<12x32xf32> to vector<12x8xf32>
    %267 = vector.extract_strided_slice %247 {offsets = [0, 8], sizes = [12, 8], strides = [1, 1]} : vector<12x32xf32> to vector<12x8xf32>
    %cst_90 = arith.constant dense<0.000000e+00> : vector<12x12xf32>
    %268 = tpu.matmul %265, %266, %cst_90 {dimension_numbers = #tpu.dot_dimension_numbers<[1], [1], [0], [0], [0, 0, 1, 0], [], []>} : vector<12x8xf32>, vector<12x8xf32>, vector<12x12xf32> -> vector<12x12xf32>
    %cst_91 = arith.constant -1.000000e+30 : f32
    %269 = vector.broadcast %cst_91 : f32 to vector<12x12xf32>
    %270 = arith.select %172, %269, %268 : vector<12x12xi1>, vector<12x12xf32>
    %cst_92 = arith.constant dense<0xFF800000> : vector<12xf32>
    %271 = vector.multi_reduction <maximumf>, %270, %cst_92 [1] : vector<12x12xf32> to vector<12xf32>
    %272 = vector.shape_cast %271 : vector<12xf32> to vector<12x1xf32>
    %273 = vector.broadcast %272 : vector<12x1xf32> to vector<12x12xf32>
    %274 = arith.subf %270, %273 : vector<12x12xf32>
    %275 = math.exp %274 : vector<12x12xf32>
    %cst_93 = arith.constant dense<0.000000e+00> : vector<12xf32>
    %276 = vector.multi_reduction <add>, %275, %cst_93 [1] : vector<12x12xf32> to vector<12xf32>
    %277 = vector.shape_cast %276 : vector<12xf32> to vector<12x1xf32>
    %278 = tpu.reciprocal %277 {approx = true} : vector<12x1xf32> -> vector<12x1xf32>
    %279 = vector.broadcast %278 : vector<12x1xf32> to vector<12x12xf32>
    %280 = arith.mulf %275, %279 : vector<12x12xf32>
    %cst_94 = arith.constant dense<0.000000e+00> : vector<12x8xf32>
    %281 = tpu.matmul %280, %267, %cst_94 {dimension_numbers = #tpu.dot_dimension_numbers<[1], [0], [0], [1], [0, 0, 1, 1], [], []>} : vector<12x12xf32>, vector<12x8xf32>, vector<12x8xf32> -> vector<12x8xf32>
    %282 = vector.extract_strided_slice %245 {offsets = [0, 16], sizes = [12, 8], strides = [1, 1]} : vector<12x32xf32> to vector<12x8xf32>
    %283 = vector.extract_strided_slice %246 {offsets = [0, 16], sizes = [12, 8], strides = [1, 1]} : vector<12x32xf32> to vector<12x8xf32>
    %284 = vector.extract_strided_slice %247 {offsets = [0, 16], sizes = [12, 8], strides = [1, 1]} : vector<12x32xf32> to vector<12x8xf32>
    %cst_95 = arith.constant dense<0.000000e+00> : vector<12x12xf32>
    %285 = tpu.matmul %282, %283, %cst_95 {dimension_numbers = #tpu.dot_dimension_numbers<[1], [1], [0], [0], [0, 0, 1, 0], [], []>} : vector<12x8xf32>, vector<12x8xf32>, vector<12x12xf32> -> vector<12x12xf32>
    %cst_96 = arith.constant -1.000000e+30 : f32
    %286 = vector.broadcast %cst_96 : f32 to vector<12x12xf32>
    %287 = arith.select %172, %286, %285 : vector<12x12xi1>, vector<12x12xf32>
    %cst_97 = arith.constant dense<0xFF800000> : vector<12xf32>
    %288 = vector.multi_reduction <maximumf>, %287, %cst_97 [1] : vector<12x12xf32> to vector<12xf32>
    %289 = vector.shape_cast %288 : vector<12xf32> to vector<12x1xf32>
    %290 = vector.broadcast %289 : vector<12x1xf32> to vector<12x12xf32>
    %291 = arith.subf %287, %290 : vector<12x12xf32>
    %292 = math.exp %291 : vector<12x12xf32>
    %cst_98 = arith.constant dense<0.000000e+00> : vector<12xf32>
    %293 = vector.multi_reduction <add>, %292, %cst_98 [1] : vector<12x12xf32> to vector<12xf32>
    %294 = vector.shape_cast %293 : vector<12xf32> to vector<12x1xf32>
    %295 = tpu.reciprocal %294 {approx = true} : vector<12x1xf32> -> vector<12x1xf32>
    %296 = vector.broadcast %295 : vector<12x1xf32> to vector<12x12xf32>
    %297 = arith.mulf %292, %296 : vector<12x12xf32>
    %cst_99 = arith.constant dense<0.000000e+00> : vector<12x8xf32>
    %298 = tpu.matmul %297, %284, %cst_99 {dimension_numbers = #tpu.dot_dimension_numbers<[1], [0], [0], [1], [0, 0, 1, 1], [], []>} : vector<12x12xf32>, vector<12x8xf32>, vector<12x8xf32> -> vector<12x8xf32>
    %299 = vector.extract_strided_slice %245 {offsets = [0, 24], sizes = [12, 8], strides = [1, 1]} : vector<12x32xf32> to vector<12x8xf32>
    %300 = vector.extract_strided_slice %246 {offsets = [0, 24], sizes = [12, 8], strides = [1, 1]} : vector<12x32xf32> to vector<12x8xf32>
    %301 = vector.extract_strided_slice %247 {offsets = [0, 24], sizes = [12, 8], strides = [1, 1]} : vector<12x32xf32> to vector<12x8xf32>
    %cst_100 = arith.constant dense<0.000000e+00> : vector<12x12xf32>
    %302 = tpu.matmul %299, %300, %cst_100 {dimension_numbers = #tpu.dot_dimension_numbers<[1], [1], [0], [0], [0, 0, 1, 0], [], []>} : vector<12x8xf32>, vector<12x8xf32>, vector<12x12xf32> -> vector<12x12xf32>
    %cst_101 = arith.constant -1.000000e+30 : f32
    %303 = vector.broadcast %cst_101 : f32 to vector<12x12xf32>
    %304 = arith.select %172, %303, %302 : vector<12x12xi1>, vector<12x12xf32>
    %cst_102 = arith.constant dense<0xFF800000> : vector<12xf32>
    %305 = vector.multi_reduction <maximumf>, %304, %cst_102 [1] : vector<12x12xf32> to vector<12xf32>
    %306 = vector.shape_cast %305 : vector<12xf32> to vector<12x1xf32>
    %307 = vector.broadcast %306 : vector<12x1xf32> to vector<12x12xf32>
    %308 = arith.subf %304, %307 : vector<12x12xf32>
    %309 = math.exp %308 : vector<12x12xf32>
    %cst_103 = arith.constant dense<0.000000e+00> : vector<12xf32>
    %310 = vector.multi_reduction <add>, %309, %cst_103 [1] : vector<12x12xf32> to vector<12xf32>
    %311 = vector.shape_cast %310 : vector<12xf32> to vector<12x1xf32>
    %312 = tpu.reciprocal %311 {approx = true} : vector<12x1xf32> -> vector<12x1xf32>
    %313 = vector.broadcast %312 : vector<12x1xf32> to vector<12x12xf32>
    %314 = arith.mulf %309, %313 : vector<12x12xf32>
    %cst_104 = arith.constant dense<0.000000e+00> : vector<12x8xf32>
    %315 = tpu.matmul %314, %301, %cst_104 {dimension_numbers = #tpu.dot_dimension_numbers<[1], [0], [0], [1], [0, 0, 1, 1], [], []>} : vector<12x12xf32>, vector<12x8xf32>, vector<12x8xf32> -> vector<12x8xf32>
    %316 = tpu.concatenate %264, %281, %298, %315 in 1 : vector<12x8xf32>, vector<12x8xf32>, vector<12x8xf32>, vector<12x8xf32> -> vector<12x32xf32>
    %317 = vector.extract_strided_slice %167 {offsets = [24, 0], sizes = [12, 32], strides = [1, 1]} : vector<48x32xf32> to vector<12x32xf32>
    %318 = vector.extract_strided_slice %168 {offsets = [24, 0], sizes = [12, 32], strides = [1, 1]} : vector<48x32xf32> to vector<12x32xf32>
    %319 = vector.extract_strided_slice %169 {offsets = [24, 0], sizes = [12, 32], strides = [1, 1]} : vector<48x32xf32> to vector<12x32xf32>
    %320 = vector.extract_strided_slice %317 {offsets = [0, 0], sizes = [12, 8], strides = [1, 1]} : vector<12x32xf32> to vector<12x8xf32>
    %321 = vector.extract_strided_slice %318 {offsets = [0, 0], sizes = [12, 8], strides = [1, 1]} : vector<12x32xf32> to vector<12x8xf32>
    %322 = vector.extract_strided_slice %319 {offsets = [0, 0], sizes = [12, 8], strides = [1, 1]} : vector<12x32xf32> to vector<12x8xf32>
    %cst_105 = arith.constant dense<0.000000e+00> : vector<12x12xf32>
    %323 = tpu.matmul %320, %321, %cst_105 {dimension_numbers = #tpu.dot_dimension_numbers<[1], [1], [0], [0], [0, 0, 1, 0], [], []>} : vector<12x8xf32>, vector<12x8xf32>, vector<12x12xf32> -> vector<12x12xf32>
    %cst_106 = arith.constant -1.000000e+30 : f32
    %324 = vector.broadcast %cst_106 : f32 to vector<12x12xf32>
    %325 = arith.select %172, %324, %323 : vector<12x12xi1>, vector<12x12xf32>
    %cst_107 = arith.constant dense<0xFF800000> : vector<12xf32>
    %326 = vector.multi_reduction <maximumf>, %325, %cst_107 [1] : vector<12x12xf32> to vector<12xf32>
    %327 = vector.shape_cast %326 : vector<12xf32> to vector<12x1xf32>
    %328 = vector.broadcast %327 : vector<12x1xf32> to vector<12x12xf32>
    %329 = arith.subf %325, %328 : vector<12x12xf32>
    %330 = math.exp %329 : vector<12x12xf32>
    %cst_108 = arith.constant dense<0.000000e+00> : vector<12xf32>
    %331 = vector.multi_reduction <add>, %330, %cst_108 [1] : vector<12x12xf32> to vector<12xf32>
    %332 = vector.shape_cast %331 : vector<12xf32> to vector<12x1xf32>
    %333 = tpu.reciprocal %332 {approx = true} : vector<12x1xf32> -> vector<12x1xf32>
    %334 = vector.broadcast %333 : vector<12x1xf32> to vector<12x12xf32>
    %335 = arith.mulf %330, %334 : vector<12x12xf32>
    %cst_109 = arith.constant dense<0.000000e+00> : vector<12x8xf32>
    %336 = tpu.matmul %335, %322, %cst_109 {dimension_numbers = #tpu.dot_dimension_numbers<[1], [0], [0], [1], [0, 0, 1, 1], [], []>} : vector<12x12xf32>, vector<12x8xf32>, vector<12x8xf32> -> vector<12x8xf32>
    %337 = vector.extract_strided_slice %317 {offsets = [0, 8], sizes = [12, 8], strides = [1, 1]} : vector<12x32xf32> to vector<12x8xf32>
    %338 = vector.extract_strided_slice %318 {offsets = [0, 8], sizes = [12, 8], strides = [1, 1]} : vector<12x32xf32> to vector<12x8xf32>
    %339 = vector.extract_strided_slice %319 {offsets = [0, 8], sizes = [12, 8], strides = [1, 1]} : vector<12x32xf32> to vector<12x8xf32>
    %cst_110 = arith.constant dense<0.000000e+00> : vector<12x12xf32>
    %340 = tpu.matmul %337, %338, %cst_110 {dimension_numbers = #tpu.dot_dimension_numbers<[1], [1], [0], [0], [0, 0, 1, 0], [], []>} : vector<12x8xf32>, vector<12x8xf32>, vector<12x12xf32> -> vector<12x12xf32>
    %cst_111 = arith.constant -1.000000e+30 : f32
    %341 = vector.broadcast %cst_111 : f32 to vector<12x12xf32>
    %342 = arith.select %172, %341, %340 : vector<12x12xi1>, vector<12x12xf32>
    %cst_112 = arith.constant dense<0xFF800000> : vector<12xf32>
    %343 = vector.multi_reduction <maximumf>, %342, %cst_112 [1] : vector<12x12xf32> to vector<12xf32>
    %344 = vector.shape_cast %343 : vector<12xf32> to vector<12x1xf32>
    %345 = vector.broadcast %344 : vector<12x1xf32> to vector<12x12xf32>
    %346 = arith.subf %342, %345 : vector<12x12xf32>
    %347 = math.exp %346 : vector<12x12xf32>
    %cst_113 = arith.constant dense<0.000000e+00> : vector<12xf32>
    %348 = vector.multi_reduction <add>, %347, %cst_113 [1] : vector<12x12xf32> to vector<12xf32>
    %349 = vector.shape_cast %348 : vector<12xf32> to vector<12x1xf32>
    %350 = tpu.reciprocal %349 {approx = true} : vector<12x1xf32> -> vector<12x1xf32>
    %351 = vector.broadcast %350 : vector<12x1xf32> to vector<12x12xf32>
    %352 = arith.mulf %347, %351 : vector<12x12xf32>
    %cst_114 = arith.constant dense<0.000000e+00> : vector<12x8xf32>
    %353 = tpu.matmul %352, %339, %cst_114 {dimension_numbers = #tpu.dot_dimension_numbers<[1], [0], [0], [1], [0, 0, 1, 1], [], []>} : vector<12x12xf32>, vector<12x8xf32>, vector<12x8xf32> -> vector<12x8xf32>
    %354 = vector.extract_strided_slice %317 {offsets = [0, 16], sizes = [12, 8], strides = [1, 1]} : vector<12x32xf32> to vector<12x8xf32>
    %355 = vector.extract_strided_slice %318 {offsets = [0, 16], sizes = [12, 8], strides = [1, 1]} : vector<12x32xf32> to vector<12x8xf32>
    %356 = vector.extract_strided_slice %319 {offsets = [0, 16], sizes = [12, 8], strides = [1, 1]} : vector<12x32xf32> to vector<12x8xf32>
    %cst_115 = arith.constant dense<0.000000e+00> : vector<12x12xf32>
    %357 = tpu.matmul %354, %355, %cst_115 {dimension_numbers = #tpu.dot_dimension_numbers<[1], [1], [0], [0], [0, 0, 1, 0], [], []>} : vector<12x8xf32>, vector<12x8xf32>, vector<12x12xf32> -> vector<12x12xf32>
    %cst_116 = arith.constant -1.000000e+30 : f32
    %358 = vector.broadcast %cst_116 : f32 to vector<12x12xf32>
    %359 = arith.select %172, %358, %357 : vector<12x12xi1>, vector<12x12xf32>
    %cst_117 = arith.constant dense<0xFF800000> : vector<12xf32>
    %360 = vector.multi_reduction <maximumf>, %359, %cst_117 [1] : vector<12x12xf32> to vector<12xf32>
    %361 = vector.shape_cast %360 : vector<12xf32> to vector<12x1xf32>
    %362 = vector.broadcast %361 : vector<12x1xf32> to vector<12x12xf32>
    %363 = arith.subf %359, %362 : vector<12x12xf32>
    %364 = math.exp %363 : vector<12x12xf32>
    %cst_118 = arith.constant dense<0.000000e+00> : vector<12xf32>
    %365 = vector.multi_reduction <add>, %364, %cst_118 [1] : vector<12x12xf32> to vector<12xf32>
    %366 = vector.shape_cast %365 : vector<12xf32> to vector<12x1xf32>
    %367 = tpu.reciprocal %366 {approx = true} : vector<12x1xf32> -> vector<12x1xf32>
    %368 = vector.broadcast %367 : vector<12x1xf32> to vector<12x12xf32>
    %369 = arith.mulf %364, %368 : vector<12x12xf32>
    %cst_119 = arith.constant dense<0.000000e+00> : vector<12x8xf32>
    %370 = tpu.matmul %369, %356, %cst_119 {dimension_numbers = #tpu.dot_dimension_numbers<[1], [0], [0], [1], [0, 0, 1, 1], [], []>} : vector<12x12xf32>, vector<12x8xf32>, vector<12x8xf32> -> vector<12x8xf32>
    %371 = vector.extract_strided_slice %317 {offsets = [0, 24], sizes = [12, 8], strides = [1, 1]} : vector<12x32xf32> to vector<12x8xf32>
    %372 = vector.extract_strided_slice %318 {offsets = [0, 24], sizes = [12, 8], strides = [1, 1]} : vector<12x32xf32> to vector<12x8xf32>
    %373 = vector.extract_strided_slice %319 {offsets = [0, 24], sizes = [12, 8], strides = [1, 1]} : vector<12x32xf32> to vector<12x8xf32>
    %cst_120 = arith.constant dense<0.000000e+00> : vector<12x12xf32>
    %374 = tpu.matmul %371, %372, %cst_120 {dimension_numbers = #tpu.dot_dimension_numbers<[1], [1], [0], [0], [0, 0, 1, 0], [], []>} : vector<12x8xf32>, vector<12x8xf32>, vector<12x12xf32> -> vector<12x12xf32>
    %cst_121 = arith.constant -1.000000e+30 : f32
    %375 = vector.broadcast %cst_121 : f32 to vector<12x12xf32>
    %376 = arith.select %172, %375, %374 : vector<12x12xi1>, vector<12x12xf32>
    %cst_122 = arith.constant dense<0xFF800000> : vector<12xf32>
    %377 = vector.multi_reduction <maximumf>, %376, %cst_122 [1] : vector<12x12xf32> to vector<12xf32>
    %378 = vector.shape_cast %377 : vector<12xf32> to vector<12x1xf32>
    %379 = vector.broadcast %378 : vector<12x1xf32> to vector<12x12xf32>
    %380 = arith.subf %376, %379 : vector<12x12xf32>
    %381 = math.exp %380 : vector<12x12xf32>
    %cst_123 = arith.constant dense<0.000000e+00> : vector<12xf32>
    %382 = vector.multi_reduction <add>, %381, %cst_123 [1] : vector<12x12xf32> to vector<12xf32>
    %383 = vector.shape_cast %382 : vector<12xf32> to vector<12x1xf32>
    %384 = tpu.reciprocal %383 {approx = true} : vector<12x1xf32> -> vector<12x1xf32>
    %385 = vector.broadcast %384 : vector<12x1xf32> to vector<12x12xf32>
    %386 = arith.mulf %381, %385 : vector<12x12xf32>
    %cst_124 = arith.constant dense<0.000000e+00> : vector<12x8xf32>
    %387 = tpu.matmul %386, %373, %cst_124 {dimension_numbers = #tpu.dot_dimension_numbers<[1], [0], [0], [1], [0, 0, 1, 1], [], []>} : vector<12x12xf32>, vector<12x8xf32>, vector<12x8xf32> -> vector<12x8xf32>
    %388 = tpu.concatenate %336, %353, %370, %387 in 1 : vector<12x8xf32>, vector<12x8xf32>, vector<12x8xf32>, vector<12x8xf32> -> vector<12x32xf32>
    %389 = vector.extract_strided_slice %167 {offsets = [36, 0], sizes = [12, 32], strides = [1, 1]} : vector<48x32xf32> to vector<12x32xf32>
    %390 = vector.extract_strided_slice %168 {offsets = [36, 0], sizes = [12, 32], strides = [1, 1]} : vector<48x32xf32> to vector<12x32xf32>
    %391 = vector.extract_strided_slice %169 {offsets = [36, 0], sizes = [12, 32], strides = [1, 1]} : vector<48x32xf32> to vector<12x32xf32>
    %392 = vector.extract_strided_slice %389 {offsets = [0, 0], sizes = [12, 8], strides = [1, 1]} : vector<12x32xf32> to vector<12x8xf32>
    %393 = vector.extract_strided_slice %390 {offsets = [0, 0], sizes = [12, 8], strides = [1, 1]} : vector<12x32xf32> to vector<12x8xf32>
    %394 = vector.extract_strided_slice %391 {offsets = [0, 0], sizes = [12, 8], strides = [1, 1]} : vector<12x32xf32> to vector<12x8xf32>
    %cst_125 = arith.constant dense<0.000000e+00> : vector<12x12xf32>
    %395 = tpu.matmul %392, %393, %cst_125 {dimension_numbers = #tpu.dot_dimension_numbers<[1], [1], [0], [0], [0, 0, 1, 0], [], []>} : vector<12x8xf32>, vector<12x8xf32>, vector<12x12xf32> -> vector<12x12xf32>
    %cst_126 = arith.constant -1.000000e+30 : f32
    %396 = vector.broadcast %cst_126 : f32 to vector<12x12xf32>
    %397 = arith.select %172, %396, %395 : vector<12x12xi1>, vector<12x12xf32>
    %cst_127 = arith.constant dense<0xFF800000> : vector<12xf32>
    %398 = vector.multi_reduction <maximumf>, %397, %cst_127 [1] : vector<12x12xf32> to vector<12xf32>
    %399 = vector.shape_cast %398 : vector<12xf32> to vector<12x1xf32>
    %400 = vector.broadcast %399 : vector<12x1xf32> to vector<12x12xf32>
    %401 = arith.subf %397, %400 : vector<12x12xf32>
    %402 = math.exp %401 : vector<12x12xf32>
    %cst_128 = arith.constant dense<0.000000e+00> : vector<12xf32>
    %403 = vector.multi_reduction <add>, %402, %cst_128 [1] : vector<12x12xf32> to vector<12xf32>
    %404 = vector.shape_cast %403 : vector<12xf32> to vector<12x1xf32>
    %405 = tpu.reciprocal %404 {approx = true} : vector<12x1xf32> -> vector<12x1xf32>
    %406 = vector.broadcast %405 : vector<12x1xf32> to vector<12x12xf32>
    %407 = arith.mulf %402, %406 : vector<12x12xf32>
    %cst_129 = arith.constant dense<0.000000e+00> : vector<12x8xf32>
    %408 = tpu.matmul %407, %394, %cst_129 {dimension_numbers = #tpu.dot_dimension_numbers<[1], [0], [0], [1], [0, 0, 1, 1], [], []>} : vector<12x12xf32>, vector<12x8xf32>, vector<12x8xf32> -> vector<12x8xf32>
    %409 = vector.extract_strided_slice %389 {offsets = [0, 8], sizes = [12, 8], strides = [1, 1]} : vector<12x32xf32> to vector<12x8xf32>
    %410 = vector.extract_strided_slice %390 {offsets = [0, 8], sizes = [12, 8], strides = [1, 1]} : vector<12x32xf32> to vector<12x8xf32>
    %411 = vector.extract_strided_slice %391 {offsets = [0, 8], sizes = [12, 8], strides = [1, 1]} : vector<12x32xf32> to vector<12x8xf32>
    %cst_130 = arith.constant dense<0.000000e+00> : vector<12x12xf32>
    %412 = tpu.matmul %409, %410, %cst_130 {dimension_numbers = #tpu.dot_dimension_numbers<[1], [1], [0], [0], [0, 0, 1, 0], [], []>} : vector<12x8xf32>, vector<12x8xf32>, vector<12x12xf32> -> vector<12x12xf32>
    %cst_131 = arith.constant -1.000000e+30 : f32
    %413 = vector.broadcast %cst_131 : f32 to vector<12x12xf32>
    %414 = arith.select %172, %413, %412 : vector<12x12xi1>, vector<12x12xf32>
    %cst_132 = arith.constant dense<0xFF800000> : vector<12xf32>
    %415 = vector.multi_reduction <maximumf>, %414, %cst_132 [1] : vector<12x12xf32> to vector<12xf32>
    %416 = vector.shape_cast %415 : vector<12xf32> to vector<12x1xf32>
    %417 = vector.broadcast %416 : vector<12x1xf32> to vector<12x12xf32>
    %418 = arith.subf %414, %417 : vector<12x12xf32>
    %419 = math.exp %418 : vector<12x12xf32>
    %cst_133 = arith.constant dense<0.000000e+00> : vector<12xf32>
    %420 = vector.multi_reduction <add>, %419, %cst_133 [1] : vector<12x12xf32> to vector<12xf32>
    %421 = vector.shape_cast %420 : vector<12xf32> to vector<12x1xf32>
    %422 = tpu.reciprocal %421 {approx = true} : vector<12x1xf32> -> vector<12x1xf32>
    %423 = vector.broadcast %422 : vector<12x1xf32> to vector<12x12xf32>
    %424 = arith.mulf %419, %423 : vector<12x12xf32>
    %cst_134 = arith.constant dense<0.000000e+00> : vector<12x8xf32>
    %425 = tpu.matmul %424, %411, %cst_134 {dimension_numbers = #tpu.dot_dimension_numbers<[1], [0], [0], [1], [0, 0, 1, 1], [], []>} : vector<12x12xf32>, vector<12x8xf32>, vector<12x8xf32> -> vector<12x8xf32>
    %426 = vector.extract_strided_slice %389 {offsets = [0, 16], sizes = [12, 8], strides = [1, 1]} : vector<12x32xf32> to vector<12x8xf32>
    %427 = vector.extract_strided_slice %390 {offsets = [0, 16], sizes = [12, 8], strides = [1, 1]} : vector<12x32xf32> to vector<12x8xf32>
    %428 = vector.extract_strided_slice %391 {offsets = [0, 16], sizes = [12, 8], strides = [1, 1]} : vector<12x32xf32> to vector<12x8xf32>
    %cst_135 = arith.constant dense<0.000000e+00> : vector<12x12xf32>
    %429 = tpu.matmul %426, %427, %cst_135 {dimension_numbers = #tpu.dot_dimension_numbers<[1], [1], [0], [0], [0, 0, 1, 0], [], []>} : vector<12x8xf32>, vector<12x8xf32>, vector<12x12xf32> -> vector<12x12xf32>
    %cst_136 = arith.constant -1.000000e+30 : f32
    %430 = vector.broadcast %cst_136 : f32 to vector<12x12xf32>
    %431 = arith.select %172, %430, %429 : vector<12x12xi1>, vector<12x12xf32>
    %cst_137 = arith.constant dense<0xFF800000> : vector<12xf32>
    %432 = vector.multi_reduction <maximumf>, %431, %cst_137 [1] : vector<12x12xf32> to vector<12xf32>
    %433 = vector.shape_cast %432 : vector<12xf32> to vector<12x1xf32>
    %434 = vector.broadcast %433 : vector<12x1xf32> to vector<12x12xf32>
    %435 = arith.subf %431, %434 : vector<12x12xf32>
    %436 = math.exp %435 : vector<12x12xf32>
    %cst_138 = arith.constant dense<0.000000e+00> : vector<12xf32>
    %437 = vector.multi_reduction <add>, %436, %cst_138 [1] : vector<12x12xf32> to vector<12xf32>
    %438 = vector.shape_cast %437 : vector<12xf32> to vector<12x1xf32>
    %439 = tpu.reciprocal %438 {approx = true} : vector<12x1xf32> -> vector<12x1xf32>
    %440 = vector.broadcast %439 : vector<12x1xf32> to vector<12x12xf32>
    %441 = arith.mulf %436, %440 : vector<12x12xf32>
    %cst_139 = arith.constant dense<0.000000e+00> : vector<12x8xf32>
    %442 = tpu.matmul %441, %428, %cst_139 {dimension_numbers = #tpu.dot_dimension_numbers<[1], [0], [0], [1], [0, 0, 1, 1], [], []>} : vector<12x12xf32>, vector<12x8xf32>, vector<12x8xf32> -> vector<12x8xf32>
    %443 = vector.extract_strided_slice %389 {offsets = [0, 24], sizes = [12, 8], strides = [1, 1]} : vector<12x32xf32> to vector<12x8xf32>
    %444 = vector.extract_strided_slice %390 {offsets = [0, 24], sizes = [12, 8], strides = [1, 1]} : vector<12x32xf32> to vector<12x8xf32>
    %445 = vector.extract_strided_slice %391 {offsets = [0, 24], sizes = [12, 8], strides = [1, 1]} : vector<12x32xf32> to vector<12x8xf32>
    %cst_140 = arith.constant dense<0.000000e+00> : vector<12x12xf32>
    %446 = tpu.matmul %443, %444, %cst_140 {dimension_numbers = #tpu.dot_dimension_numbers<[1], [1], [0], [0], [0, 0, 1, 0], [], []>} : vector<12x8xf32>, vector<12x8xf32>, vector<12x12xf32> -> vector<12x12xf32>
    %cst_141 = arith.constant -1.000000e+30 : f32
    %447 = vector.broadcast %cst_141 : f32 to vector<12x12xf32>
    %448 = arith.select %172, %447, %446 : vector<12x12xi1>, vector<12x12xf32>
    %cst_142 = arith.constant dense<0xFF800000> : vector<12xf32>
    %449 = vector.multi_reduction <maximumf>, %448, %cst_142 [1] : vector<12x12xf32> to vector<12xf32>
    %450 = vector.shape_cast %449 : vector<12xf32> to vector<12x1xf32>
    %451 = vector.broadcast %450 : vector<12x1xf32> to vector<12x12xf32>
    %452 = arith.subf %448, %451 : vector<12x12xf32>
    %453 = math.exp %452 : vector<12x12xf32>
    %cst_143 = arith.constant dense<0.000000e+00> : vector<12xf32>
    %454 = vector.multi_reduction <add>, %453, %cst_143 [1] : vector<12x12xf32> to vector<12xf32>
    %455 = vector.shape_cast %454 : vector<12xf32> to vector<12x1xf32>
    %456 = tpu.reciprocal %455 {approx = true} : vector<12x1xf32> -> vector<12x1xf32>
    %457 = vector.broadcast %456 : vector<12x1xf32> to vector<12x12xf32>
    %458 = arith.mulf %453, %457 : vector<12x12xf32>
    %cst_144 = arith.constant dense<0.000000e+00> : vector<12x8xf32>
    %459 = tpu.matmul %458, %445, %cst_144 {dimension_numbers = #tpu.dot_dimension_numbers<[1], [0], [0], [1], [0, 0, 1, 1], [], []>} : vector<12x12xf32>, vector<12x8xf32>, vector<12x8xf32> -> vector<12x8xf32>
    %460 = tpu.concatenate %408, %425, %442, %459 in 1 : vector<12x8xf32>, vector<12x8xf32>, vector<12x8xf32>, vector<12x8xf32> -> vector<12x32xf32>
    %461 = tpu.concatenate %244, %316, %388, %460 in 0 : vector<12x32xf32>, vector<12x32xf32>, vector<12x32xf32>, vector<12x32xf32> -> vector<48x32xf32>
    %cst_145 = arith.constant dense<0.000000e+00> : vector<48x32xf32>
    %462 = tpu.matmul %461, %152, %cst_145 {dimension_numbers = #tpu.dot_dimension_numbers<[1], [0], [0], [1], [0, 0, 1, 1], [], []>} : vector<48x32xf32>, vector<32x32xf32>, vector<48x32xf32> -> vector<48x32xf32>
    %463 = vector.broadcast %153 : vector<1x32xf32> to vector<48x32xf32>
    %464 = arith.addf %462, %463 : vector<48x32xf32>
    %465 = arith.addf %464, %149 : vector<48x32xf32>
    %cst_146 = arith.constant dense<0.000000e+00> : vector<48xf32>
    %466 = vector.multi_reduction <add>, %465, %cst_146 [1] : vector<48x32xf32> to vector<48xf32>
    %467 = vector.shape_cast %466 : vector<48xf32> to vector<48x1xf32>
    %cst_147 = arith.constant 3.200000e+01 : f32
    %468 = vector.broadcast %cst_147 : f32 to vector<48x1xf32>
    %469 = arith.divf %467, %468 : vector<48x1xf32>
    %470 = vector.broadcast %469 : vector<48x1xf32> to vector<48x32xf32>
    %471 = arith.subf %465, %470 : vector<48x32xf32>
    %472 = arith.mulf %471, %471 : vector<48x32xf32>
    %cst_148 = arith.constant dense<0.000000e+00> : vector<48xf32>
    %473 = vector.multi_reduction <add>, %472, %cst_148 [1] : vector<48x32xf32> to vector<48xf32>
    %474 = vector.shape_cast %473 : vector<48xf32> to vector<48x1xf32>
    %cst_149 = arith.constant 3.200000e+01 : f32
    %475 = vector.broadcast %cst_149 : f32 to vector<48x1xf32>
    %476 = arith.divf %474, %475 : vector<48x1xf32>
    %cst_150 = arith.constant 9.99999974E-6 : f32
    %477 = vector.broadcast %cst_150 : f32 to vector<48x1xf32>
    %478 = arith.addf %476, %477 : vector<48x1xf32>
    %479 = math.rsqrt %478 : vector<48x1xf32>
    %480 = vector.broadcast %479 : vector<48x1xf32> to vector<48x32xf32>
    %481 = arith.mulf %471, %480 : vector<48x32xf32>
    %482 = vector.broadcast %154 : vector<1x32xf32> to vector<48x32xf32>
    %483 = arith.mulf %481, %482 : vector<48x32xf32>
    %484 = vector.broadcast %155 : vector<1x32xf32> to vector<48x32xf32>
    %485 = arith.addf %483, %484 : vector<48x32xf32>
    %cst_151 = arith.constant dense<0.000000e+00> : vector<48x64xf32>
    %486 = tpu.matmul %485, %156, %cst_151 {dimension_numbers = #tpu.dot_dimension_numbers<[1], [0], [0], [1], [0, 0, 1, 1], [], []>} : vector<48x32xf32>, vector<32x64xf32>, vector<48x64xf32> -> vector<48x64xf32>
    %487 = vector.broadcast %157 : vector<1x64xf32> to vector<48x64xf32>
    %488 = arith.addf %486, %487 : vector<48x64xf32>
    %cst_152 = arith.constant 5.000000e-01 : f32
    %489 = vector.broadcast %cst_152 : f32 to vector<48x64xf32>
    %490 = arith.mulf %489, %488 : vector<48x64xf32>
    %cst_153 = arith.constant 0.707106769 : f32
    %491 = vector.broadcast %cst_153 : f32 to vector<48x64xf32>
    %492 = arith.mulf %488, %491 : vector<48x64xf32>
    %493 = math.absf %492 : vector<48x64xf32>
    %cst_154 = arith.constant 0.327591091 : f32
    %494 = vector.broadcast %cst_154 : f32 to vector<48x64xf32>
    %495 = arith.mulf %494, %493 : vector<48x64xf32>
    %cst_155 = arith.constant 1.000000e+00 : f32
    %496 = vector.broadcast %cst_155 : f32 to vector<48x64xf32>
    %497 = arith.addf %496, %495 : vector<48x64xf32>
    %cst_156 = arith.constant 1.000000e+00 : f32
    %498 = vector.broadcast %cst_156 : f32 to vector<48x64xf32>
    %499 = arith.divf %498, %497 : vector<48x64xf32>
    %cst_157 = arith.constant 1.06140542 : f32
    %500 = vector.broadcast %cst_157 : f32 to vector<48x64xf32>
    %501 = arith.mulf %500, %499 : vector<48x64xf32>
    %cst_158 = arith.constant -1.45315206 : f32
    %502 = vector.broadcast %cst_158 : f32 to vector<48x64xf32>
    %503 = arith.addf %501, %502 : vector<48x64xf32>
    %504 = arith.mulf %503, %499 : vector<48x64xf32>
    %cst_159 = arith.constant 1.42141378 : f32
    %505 = vector.broadcast %cst_159 : f32 to vector<48x64xf32>
    %506 = arith.addf %504, %505 : vector<48x64xf32>
    %507 = arith.mulf %506, %499 : vector<48x64xf32>
    %cst_160 = arith.constant -0.284496725 : f32
    %508 = vector.broadcast %cst_160 : f32 to vector<48x64xf32>
    %509 = arith.addf %507, %508 : vector<48x64xf32>
    %510 = arith.mulf %509, %499 : vector<48x64xf32>
    %cst_161 = arith.constant 0.254829586 : f32
    %511 = vector.broadcast %cst_161 : f32 to vector<48x64xf32>
    %512 = arith.addf %510, %511 : vector<48x64xf32>
    %513 = arith.mulf %512, %499 : vector<48x64xf32>
    %cst_162 = arith.constant 0.000000e+00 : f32
    %514 = vector.broadcast %cst_162 : f32 to vector<48x64xf32>
    %515 = arith.subf %514, %493 : vector<48x64xf32>
    %516 = arith.mulf %515, %493 : vector<48x64xf32>
    %517 = math.exp %516 : vector<48x64xf32>
    %518 = arith.mulf %513, %517 : vector<48x64xf32>
    %cst_163 = arith.constant 1.000000e+00 : f32
    %519 = vector.broadcast %cst_163 : f32 to vector<48x64xf32>
    %520 = arith.subf %519, %518 : vector<48x64xf32>
    %cst_164 = arith.constant 0.000000e+00 : f32
    %521 = vector.broadcast %cst_164 : f32 to vector<48x64xf32>
    %522 = arith.cmpf olt, %492, %521 : vector<48x64xf32>
    %cst_165 = arith.constant 0.000000e+00 : f32
    %523 = vector.broadcast %cst_165 : f32 to vector<48x64xf32>
    %524 = arith.subf %523, %520 : vector<48x64xf32>
    %525 = arith.select %522, %524, %520 : vector<48x64xi1>, vector<48x64xf32>
    %cst_166 = arith.constant 1.000000e+00 : f32
    %526 = vector.broadcast %cst_166 : f32 to vector<48x64xf32>
    %527 = arith.addf %526, %525 : vector<48x64xf32>
    %528 = arith.mulf %490, %527 : vector<48x64xf32>
    %cst_167 = arith.constant dense<0.000000e+00> : vector<48x32xf32>
    %529 = tpu.matmul %528, %158, %cst_167 {dimension_numbers = #tpu.dot_dimension_numbers<[1], [0], [0], [1], [0, 0, 1, 1], [], []>} : vector<48x64xf32>, vector<64x32xf32>, vector<48x32xf32> -> vector<48x32xf32>
    %530 = vector.broadcast %159 : vector<1x32xf32> to vector<48x32xf32>
    %531 = arith.addf %529, %530 : vector<48x32xf32>
    %532 = arith.addf %531, %485 : vector<48x32xf32>
    %cst_168 = arith.constant dense<0.000000e+00> : vector<48xf32>
    %533 = vector.multi_reduction <add>, %532, %cst_168 [1] : vector<48x32xf32> to vector<48xf32>
    %534 = vector.shape_cast %533 : vector<48xf32> to vector<48x1xf32>
    %cst_169 = arith.constant 3.200000e+01 : f32
    %535 = vector.broadcast %cst_169 : f32 to vector<48x1xf32>
    %536 = arith.divf %534, %535 : vector<48x1xf32>
    %537 = vector.broadcast %536 : vector<48x1xf32> to vector<48x32xf32>
    %538 = arith.subf %532, %537 : vector<48x32xf32>
    %539 = arith.mulf %538, %538 : vector<48x32xf32>
    %cst_170 = arith.constant dense<0.000000e+00> : vector<48xf32>
    %540 = vector.multi_reduction <add>, %539, %cst_170 [1] : vector<48x32xf32> to vector<48xf32>
    %541 = vector.shape_cast %540 : vector<48xf32> to vector<48x1xf32>
    %cst_171 = arith.constant 3.200000e+01 : f32
    %542 = vector.broadcast %cst_171 : f32 to vector<48x1xf32>
    %543 = arith.divf %541, %542 : vector<48x1xf32>
    %cst_172 = arith.constant 9.99999974E-6 : f32
    %544 = vector.broadcast %cst_172 : f32 to vector<48x1xf32>
    %545 = arith.addf %543, %544 : vector<48x1xf32>
    %546 = math.rsqrt %545 : vector<48x1xf32>
    %547 = vector.broadcast %546 : vector<48x1xf32> to vector<48x32xf32>
    %548 = arith.mulf %538, %547 : vector<48x32xf32>
    %549 = vector.broadcast %160 : vector<1x32xf32> to vector<48x32xf32>
    %550 = arith.mulf %548, %549 : vector<48x32xf32>
    %551 = vector.broadcast %161 : vector<1x32xf32> to vector<48x32xf32>
    %552 = arith.addf %550, %551 : vector<48x32xf32>
    %cst_173 = arith.constant dense<0.000000e+00> : vector<48x32xf32>
    %553 = tpu.matmul %1, %552, %cst_173 {dimension_numbers = #tpu.dot_dimension_numbers<[1], [0], [0], [1], [0, 0, 1, 1], [], []>} : vector<48x48xf32>, vector<48x32xf32>, vector<48x32xf32> -> vector<48x32xf32>
    %554 = vector.extract_strided_slice %553 {offsets = [0, 0], sizes = [4, 32], strides = [1, 1]} : vector<48x32xf32> to vector<4x32xf32>
    %555 = vector.extract_strided_slice %553 {offsets = [4, 0], sizes = [4, 32], strides = [1, 1]} : vector<48x32xf32> to vector<4x32xf32>
    %556 = vector.extract_strided_slice %553 {offsets = [8, 0], sizes = [4, 32], strides = [1, 1]} : vector<48x32xf32> to vector<4x32xf32>
    %557 = vector.extract_strided_slice %553 {offsets = [12, 0], sizes = [4, 32], strides = [1, 1]} : vector<48x32xf32> to vector<4x32xf32>
    %558 = vector.extract_strided_slice %553 {offsets = [16, 0], sizes = [4, 32], strides = [1, 1]} : vector<48x32xf32> to vector<4x32xf32>
    %559 = vector.extract_strided_slice %553 {offsets = [20, 0], sizes = [4, 32], strides = [1, 1]} : vector<48x32xf32> to vector<4x32xf32>
    %560 = vector.extract_strided_slice %553 {offsets = [24, 0], sizes = [4, 32], strides = [1, 1]} : vector<48x32xf32> to vector<4x32xf32>
    %561 = vector.extract_strided_slice %553 {offsets = [28, 0], sizes = [4, 32], strides = [1, 1]} : vector<48x32xf32> to vector<4x32xf32>
    %562 = vector.extract_strided_slice %553 {offsets = [32, 0], sizes = [4, 32], strides = [1, 1]} : vector<48x32xf32> to vector<4x32xf32>
    %563 = vector.extract_strided_slice %553 {offsets = [36, 0], sizes = [4, 32], strides = [1, 1]} : vector<48x32xf32> to vector<4x32xf32>
    %564 = vector.extract_strided_slice %553 {offsets = [40, 0], sizes = [4, 32], strides = [1, 1]} : vector<48x32xf32> to vector<4x32xf32>
    %565 = vector.extract_strided_slice %553 {offsets = [44, 0], sizes = [4, 32], strides = [1, 1]} : vector<48x32xf32> to vector<4x32xf32>
    %566 = tpu.concatenate %554, %555, %556, %557, %558, %559, %560, %561, %562, %563, %564, %565 in 1 : vector<4x32xf32>, vector<4x32xf32>, vector<4x32xf32>, vector<4x32xf32>, vector<4x32xf32>, vector<4x32xf32>, vector<4x32xf32>, vector<4x32xf32>, vector<4x32xf32>, vector<4x32xf32>, vector<4x32xf32>, vector<4x32xf32> -> vector<4x384xf32>
    %cst_174 = arith.constant dense<0.000000e+00> : vector<4x32xf32>
    %567 = tpu.matmul %566, %4, %cst_174 {dimension_numbers = #tpu.dot_dimension_numbers<[1], [0], [0], [1], [0, 0, 1, 1], [], []>} : vector<4x384xf32>, vector<384x32xf32>, vector<4x32xf32> -> vector<4x32xf32>
    %568 = vector.broadcast %5 : vector<1x32xf32> to vector<4x32xf32>
    %569 = arith.addf %567, %568 : vector<4x32xf32>
    %c0_175 = arith.constant 0 : index
    %c0_176 = arith.constant 0 : index
    %570 = vector.load %arg22[%c0_175, %c0_176] : memref<32x32xf32, #tpu.memory_space<vmem>>, vector<32x32xf32>
    %c0_177 = arith.constant 0 : index
    %c0_178 = arith.constant 0 : index
    %571 = vector.load %arg23[%c0_177, %c0_178] : memref<1x32xf32, #tpu.memory_space<vmem>>, vector<1x32xf32>
    %c0_179 = arith.constant 0 : index
    %c0_180 = arith.constant 0 : index
    %572 = vector.load %arg24[%c0_179, %c0_180] : memref<32x64xf32, #tpu.memory_space<vmem>>, vector<32x64xf32>
    %c0_181 = arith.constant 0 : index
    %c0_182 = arith.constant 0 : index
    %573 = vector.load %arg25[%c0_181, %c0_182] : memref<1x64xf32, #tpu.memory_space<vmem>>, vector<1x64xf32>
    %c0_183 = arith.constant 0 : index
    %c0_184 = arith.constant 0 : index
    %574 = vector.load %arg26[%c0_183, %c0_184] : memref<32x32xf32, #tpu.memory_space<vmem>>, vector<32x32xf32>
    %c0_185 = arith.constant 0 : index
    %c0_186 = arith.constant 0 : index
    %575 = vector.load %arg27[%c0_185, %c0_186] : memref<1x32xf32, #tpu.memory_space<vmem>>, vector<1x32xf32>
    %c0_187 = arith.constant 0 : index
    %c0_188 = arith.constant 0 : index
    %576 = vector.load %arg28[%c0_187, %c0_188] : memref<1x32xf32, #tpu.memory_space<vmem>>, vector<1x32xf32>
    %c0_189 = arith.constant 0 : index
    %c0_190 = arith.constant 0 : index
    %577 = vector.load %arg29[%c0_189, %c0_190] : memref<1x32xf32, #tpu.memory_space<vmem>>, vector<1x32xf32>
    %c0_191 = arith.constant 0 : index
    %c0_192 = arith.constant 0 : index
    %578 = vector.load %arg30[%c0_191, %c0_192] : memref<32x64xf32, #tpu.memory_space<vmem>>, vector<32x64xf32>
    %c0_193 = arith.constant 0 : index
    %c0_194 = arith.constant 0 : index
    %579 = vector.load %arg31[%c0_193, %c0_194] : memref<1x64xf32, #tpu.memory_space<vmem>>, vector<1x64xf32>
    %c0_195 = arith.constant 0 : index
    %c0_196 = arith.constant 0 : index
    %580 = vector.load %arg32[%c0_195, %c0_196] : memref<64x32xf32, #tpu.memory_space<vmem>>, vector<64x32xf32>
    %c0_197 = arith.constant 0 : index
    %c0_198 = arith.constant 0 : index
    %581 = vector.load %arg33[%c0_197, %c0_198] : memref<1x32xf32, #tpu.memory_space<vmem>>, vector<1x32xf32>
    %c0_199 = arith.constant 0 : index
    %c0_200 = arith.constant 0 : index
    %582 = vector.load %arg34[%c0_199, %c0_200] : memref<1x32xf32, #tpu.memory_space<vmem>>, vector<1x32xf32>
    %c0_201 = arith.constant 0 : index
    %c0_202 = arith.constant 0 : index
    %583 = vector.load %arg35[%c0_201, %c0_202] : memref<1x32xf32, #tpu.memory_space<vmem>>, vector<1x32xf32>
    %cst_203 = arith.constant dense<0.000000e+00> : vector<4x32xf32>
    %584 = tpu.matmul %569, %6, %cst_203 {dimension_numbers = #tpu.dot_dimension_numbers<[1], [0], [0], [1], [0, 0, 1, 1], [], []>} : vector<4x32xf32>, vector<32x32xf32>, vector<4x32xf32> -> vector<4x32xf32>
    %585 = vector.broadcast %7 : vector<1x32xf32> to vector<4x32xf32>
    %586 = arith.addf %584, %585 : vector<4x32xf32>
    %cst_204 = arith.constant dense<0.000000e+00> : vector<4x32xf32>
    %587 = tpu.matmul %569, %570, %cst_204 {dimension_numbers = #tpu.dot_dimension_numbers<[1], [0], [0], [1], [0, 0, 1, 1], [], []>} : vector<4x32xf32>, vector<32x32xf32>, vector<4x32xf32> -> vector<4x32xf32>
    %588 = vector.broadcast %571 : vector<1x32xf32> to vector<4x32xf32>
    %589 = arith.addf %587, %588 : vector<4x32xf32>
    %cst_205 = arith.constant 0.353553385 : f32
    %590 = vector.broadcast %cst_205 : f32 to vector<4x32xf32>
    %591 = arith.mulf %589, %590 : vector<4x32xf32>
    %cst_206 = arith.constant dense<0.000000e+00> : vector<4x64xf32>
    %592 = tpu.matmul %586, %572, %cst_206 {dimension_numbers = #tpu.dot_dimension_numbers<[1], [0], [0], [1], [0, 0, 1, 1], [], []>} : vector<4x32xf32>, vector<32x64xf32>, vector<4x64xf32> -> vector<4x64xf32>
    %593 = vector.broadcast %573 : vector<1x64xf32> to vector<4x64xf32>
    %594 = arith.addf %592, %593 : vector<4x64xf32>
    %595 = vector.extract_strided_slice %594 {offsets = [0, 0], sizes = [4, 32], strides = [1, 1]} : vector<4x64xf32> to vector<4x32xf32>
    %596 = vector.extract_strided_slice %594 {offsets = [0, 32], sizes = [4, 32], strides = [1, 1]} : vector<4x64xf32> to vector<4x32xf32>
    %597 = tpu.iota {dimensions = array<i32: 0>} : vector<4x4xi32>
    %598 = tpu.iota {dimensions = array<i32: 1>} : vector<4x4xi32>
    %599 = arith.cmpi sgt, %598, %597 : vector<4x4xi32>
    %600 = vector.extract_strided_slice %591 {offsets = [0, 0], sizes = [4, 8], strides = [1, 1]} : vector<4x32xf32> to vector<4x8xf32>
    %601 = vector.extract_strided_slice %595 {offsets = [0, 0], sizes = [4, 8], strides = [1, 1]} : vector<4x32xf32> to vector<4x8xf32>
    %602 = vector.extract_strided_slice %596 {offsets = [0, 0], sizes = [4, 8], strides = [1, 1]} : vector<4x32xf32> to vector<4x8xf32>
    %cst_207 = arith.constant dense<0.000000e+00> : vector<4x4xf32>
    %603 = tpu.matmul %600, %601, %cst_207 {dimension_numbers = #tpu.dot_dimension_numbers<[1], [1], [0], [0], [0, 0, 1, 0], [], []>} : vector<4x8xf32>, vector<4x8xf32>, vector<4x4xf32> -> vector<4x4xf32>
    %cst_208 = arith.constant -1.000000e+30 : f32
    %604 = vector.broadcast %cst_208 : f32 to vector<4x4xf32>
    %605 = arith.select %599, %604, %603 : vector<4x4xi1>, vector<4x4xf32>
    %cst_209 = arith.constant dense<0xFF800000> : vector<4xf32>
    %606 = vector.multi_reduction <maximumf>, %605, %cst_209 [1] : vector<4x4xf32> to vector<4xf32>
    %607 = vector.shape_cast %606 : vector<4xf32> to vector<4x1xf32>
    %608 = vector.broadcast %607 : vector<4x1xf32> to vector<4x4xf32>
    %609 = arith.subf %605, %608 : vector<4x4xf32>
    %610 = math.exp %609 : vector<4x4xf32>
    %cst_210 = arith.constant dense<0.000000e+00> : vector<4xf32>
    %611 = vector.multi_reduction <add>, %610, %cst_210 [1] : vector<4x4xf32> to vector<4xf32>
    %612 = vector.shape_cast %611 : vector<4xf32> to vector<4x1xf32>
    %613 = tpu.reciprocal %612 {approx = true} : vector<4x1xf32> -> vector<4x1xf32>
    %614 = vector.broadcast %613 : vector<4x1xf32> to vector<4x4xf32>
    %615 = arith.mulf %610, %614 : vector<4x4xf32>
    %cst_211 = arith.constant dense<0.000000e+00> : vector<4x8xf32>
    %616 = tpu.matmul %615, %602, %cst_211 {dimension_numbers = #tpu.dot_dimension_numbers<[1], [0], [0], [1], [0, 0, 1, 1], [], []>} : vector<4x4xf32>, vector<4x8xf32>, vector<4x8xf32> -> vector<4x8xf32>
    %617 = vector.extract_strided_slice %591 {offsets = [0, 8], sizes = [4, 8], strides = [1, 1]} : vector<4x32xf32> to vector<4x8xf32>
    %618 = vector.extract_strided_slice %595 {offsets = [0, 8], sizes = [4, 8], strides = [1, 1]} : vector<4x32xf32> to vector<4x8xf32>
    %619 = vector.extract_strided_slice %596 {offsets = [0, 8], sizes = [4, 8], strides = [1, 1]} : vector<4x32xf32> to vector<4x8xf32>
    %cst_212 = arith.constant dense<0.000000e+00> : vector<4x4xf32>
    %620 = tpu.matmul %617, %618, %cst_212 {dimension_numbers = #tpu.dot_dimension_numbers<[1], [1], [0], [0], [0, 0, 1, 0], [], []>} : vector<4x8xf32>, vector<4x8xf32>, vector<4x4xf32> -> vector<4x4xf32>
    %cst_213 = arith.constant -1.000000e+30 : f32
    %621 = vector.broadcast %cst_213 : f32 to vector<4x4xf32>
    %622 = arith.select %599, %621, %620 : vector<4x4xi1>, vector<4x4xf32>
    %cst_214 = arith.constant dense<0xFF800000> : vector<4xf32>
    %623 = vector.multi_reduction <maximumf>, %622, %cst_214 [1] : vector<4x4xf32> to vector<4xf32>
    %624 = vector.shape_cast %623 : vector<4xf32> to vector<4x1xf32>
    %625 = vector.broadcast %624 : vector<4x1xf32> to vector<4x4xf32>
    %626 = arith.subf %622, %625 : vector<4x4xf32>
    %627 = math.exp %626 : vector<4x4xf32>
    %cst_215 = arith.constant dense<0.000000e+00> : vector<4xf32>
    %628 = vector.multi_reduction <add>, %627, %cst_215 [1] : vector<4x4xf32> to vector<4xf32>
    %629 = vector.shape_cast %628 : vector<4xf32> to vector<4x1xf32>
    %630 = tpu.reciprocal %629 {approx = true} : vector<4x1xf32> -> vector<4x1xf32>
    %631 = vector.broadcast %630 : vector<4x1xf32> to vector<4x4xf32>
    %632 = arith.mulf %627, %631 : vector<4x4xf32>
    %cst_216 = arith.constant dense<0.000000e+00> : vector<4x8xf32>
    %633 = tpu.matmul %632, %619, %cst_216 {dimension_numbers = #tpu.dot_dimension_numbers<[1], [0], [0], [1], [0, 0, 1, 1], [], []>} : vector<4x4xf32>, vector<4x8xf32>, vector<4x8xf32> -> vector<4x8xf32>
    %634 = vector.extract_strided_slice %591 {offsets = [0, 16], sizes = [4, 8], strides = [1, 1]} : vector<4x32xf32> to vector<4x8xf32>
    %635 = vector.extract_strided_slice %595 {offsets = [0, 16], sizes = [4, 8], strides = [1, 1]} : vector<4x32xf32> to vector<4x8xf32>
    %636 = vector.extract_strided_slice %596 {offsets = [0, 16], sizes = [4, 8], strides = [1, 1]} : vector<4x32xf32> to vector<4x8xf32>
    %cst_217 = arith.constant dense<0.000000e+00> : vector<4x4xf32>
    %637 = tpu.matmul %634, %635, %cst_217 {dimension_numbers = #tpu.dot_dimension_numbers<[1], [1], [0], [0], [0, 0, 1, 0], [], []>} : vector<4x8xf32>, vector<4x8xf32>, vector<4x4xf32> -> vector<4x4xf32>
    %cst_218 = arith.constant -1.000000e+30 : f32
    %638 = vector.broadcast %cst_218 : f32 to vector<4x4xf32>
    %639 = arith.select %599, %638, %637 : vector<4x4xi1>, vector<4x4xf32>
    %cst_219 = arith.constant dense<0xFF800000> : vector<4xf32>
    %640 = vector.multi_reduction <maximumf>, %639, %cst_219 [1] : vector<4x4xf32> to vector<4xf32>
    %641 = vector.shape_cast %640 : vector<4xf32> to vector<4x1xf32>
    %642 = vector.broadcast %641 : vector<4x1xf32> to vector<4x4xf32>
    %643 = arith.subf %639, %642 : vector<4x4xf32>
    %644 = math.exp %643 : vector<4x4xf32>
    %cst_220 = arith.constant dense<0.000000e+00> : vector<4xf32>
    %645 = vector.multi_reduction <add>, %644, %cst_220 [1] : vector<4x4xf32> to vector<4xf32>
    %646 = vector.shape_cast %645 : vector<4xf32> to vector<4x1xf32>
    %647 = tpu.reciprocal %646 {approx = true} : vector<4x1xf32> -> vector<4x1xf32>
    %648 = vector.broadcast %647 : vector<4x1xf32> to vector<4x4xf32>
    %649 = arith.mulf %644, %648 : vector<4x4xf32>
    %cst_221 = arith.constant dense<0.000000e+00> : vector<4x8xf32>
    %650 = tpu.matmul %649, %636, %cst_221 {dimension_numbers = #tpu.dot_dimension_numbers<[1], [0], [0], [1], [0, 0, 1, 1], [], []>} : vector<4x4xf32>, vector<4x8xf32>, vector<4x8xf32> -> vector<4x8xf32>
    %651 = vector.extract_strided_slice %591 {offsets = [0, 24], sizes = [4, 8], strides = [1, 1]} : vector<4x32xf32> to vector<4x8xf32>
    %652 = vector.extract_strided_slice %595 {offsets = [0, 24], sizes = [4, 8], strides = [1, 1]} : vector<4x32xf32> to vector<4x8xf32>
    %653 = vector.extract_strided_slice %596 {offsets = [0, 24], sizes = [4, 8], strides = [1, 1]} : vector<4x32xf32> to vector<4x8xf32>
    %cst_222 = arith.constant dense<0.000000e+00> : vector<4x4xf32>
    %654 = tpu.matmul %651, %652, %cst_222 {dimension_numbers = #tpu.dot_dimension_numbers<[1], [1], [0], [0], [0, 0, 1, 0], [], []>} : vector<4x8xf32>, vector<4x8xf32>, vector<4x4xf32> -> vector<4x4xf32>
    %cst_223 = arith.constant -1.000000e+30 : f32
    %655 = vector.broadcast %cst_223 : f32 to vector<4x4xf32>
    %656 = arith.select %599, %655, %654 : vector<4x4xi1>, vector<4x4xf32>
    %cst_224 = arith.constant dense<0xFF800000> : vector<4xf32>
    %657 = vector.multi_reduction <maximumf>, %656, %cst_224 [1] : vector<4x4xf32> to vector<4xf32>
    %658 = vector.shape_cast %657 : vector<4xf32> to vector<4x1xf32>
    %659 = vector.broadcast %658 : vector<4x1xf32> to vector<4x4xf32>
    %660 = arith.subf %656, %659 : vector<4x4xf32>
    %661 = math.exp %660 : vector<4x4xf32>
    %cst_225 = arith.constant dense<0.000000e+00> : vector<4xf32>
    %662 = vector.multi_reduction <add>, %661, %cst_225 [1] : vector<4x4xf32> to vector<4xf32>
    %663 = vector.shape_cast %662 : vector<4xf32> to vector<4x1xf32>
    %664 = tpu.reciprocal %663 {approx = true} : vector<4x1xf32> -> vector<4x1xf32>
    %665 = vector.broadcast %664 : vector<4x1xf32> to vector<4x4xf32>
    %666 = arith.mulf %661, %665 : vector<4x4xf32>
    %cst_226 = arith.constant dense<0.000000e+00> : vector<4x8xf32>
    %667 = tpu.matmul %666, %653, %cst_226 {dimension_numbers = #tpu.dot_dimension_numbers<[1], [0], [0], [1], [0, 0, 1, 1], [], []>} : vector<4x4xf32>, vector<4x8xf32>, vector<4x8xf32> -> vector<4x8xf32>
    %668 = tpu.concatenate %616, %633, %650, %667 in 1 : vector<4x8xf32>, vector<4x8xf32>, vector<4x8xf32>, vector<4x8xf32> -> vector<4x32xf32>
    %cst_227 = arith.constant dense<0.000000e+00> : vector<4x32xf32>
    %669 = tpu.matmul %668, %574, %cst_227 {dimension_numbers = #tpu.dot_dimension_numbers<[1], [0], [0], [1], [0, 0, 1, 1], [], []>} : vector<4x32xf32>, vector<32x32xf32>, vector<4x32xf32> -> vector<4x32xf32>
    %670 = vector.broadcast %575 : vector<1x32xf32> to vector<4x32xf32>
    %671 = arith.addf %669, %670 : vector<4x32xf32>
    %672 = arith.addf %671, %569 : vector<4x32xf32>
    %cst_228 = arith.constant dense<0.000000e+00> : vector<4xf32>
    %673 = vector.multi_reduction <add>, %672, %cst_228 [1] : vector<4x32xf32> to vector<4xf32>
    %674 = vector.shape_cast %673 : vector<4xf32> to vector<4x1xf32>
    %cst_229 = arith.constant 3.200000e+01 : f32
    %675 = vector.broadcast %cst_229 : f32 to vector<4x1xf32>
    %676 = arith.divf %674, %675 : vector<4x1xf32>
    %677 = vector.broadcast %676 : vector<4x1xf32> to vector<4x32xf32>
    %678 = arith.subf %672, %677 : vector<4x32xf32>
    %679 = arith.mulf %678, %678 : vector<4x32xf32>
    %cst_230 = arith.constant dense<0.000000e+00> : vector<4xf32>
    %680 = vector.multi_reduction <add>, %679, %cst_230 [1] : vector<4x32xf32> to vector<4xf32>
    %681 = vector.shape_cast %680 : vector<4xf32> to vector<4x1xf32>
    %cst_231 = arith.constant 3.200000e+01 : f32
    %682 = vector.broadcast %cst_231 : f32 to vector<4x1xf32>
    %683 = arith.divf %681, %682 : vector<4x1xf32>
    %cst_232 = arith.constant 9.99999974E-6 : f32
    %684 = vector.broadcast %cst_232 : f32 to vector<4x1xf32>
    %685 = arith.addf %683, %684 : vector<4x1xf32>
    %686 = math.rsqrt %685 : vector<4x1xf32>
    %687 = vector.broadcast %686 : vector<4x1xf32> to vector<4x32xf32>
    %688 = arith.mulf %678, %687 : vector<4x32xf32>
    %689 = vector.broadcast %576 : vector<1x32xf32> to vector<4x32xf32>
    %690 = arith.mulf %688, %689 : vector<4x32xf32>
    %691 = vector.broadcast %577 : vector<1x32xf32> to vector<4x32xf32>
    %692 = arith.addf %690, %691 : vector<4x32xf32>
    %cst_233 = arith.constant dense<0.000000e+00> : vector<4x64xf32>
    %693 = tpu.matmul %692, %578, %cst_233 {dimension_numbers = #tpu.dot_dimension_numbers<[1], [0], [0], [1], [0, 0, 1, 1], [], []>} : vector<4x32xf32>, vector<32x64xf32>, vector<4x64xf32> -> vector<4x64xf32>
    %694 = vector.broadcast %579 : vector<1x64xf32> to vector<4x64xf32>
    %695 = arith.addf %693, %694 : vector<4x64xf32>
    %cst_234 = arith.constant 5.000000e-01 : f32
    %696 = vector.broadcast %cst_234 : f32 to vector<4x64xf32>
    %697 = arith.mulf %696, %695 : vector<4x64xf32>
    %cst_235 = arith.constant 0.707106769 : f32
    %698 = vector.broadcast %cst_235 : f32 to vector<4x64xf32>
    %699 = arith.mulf %695, %698 : vector<4x64xf32>
    %700 = math.absf %699 : vector<4x64xf32>
    %cst_236 = arith.constant 0.327591091 : f32
    %701 = vector.broadcast %cst_236 : f32 to vector<4x64xf32>
    %702 = arith.mulf %701, %700 : vector<4x64xf32>
    %cst_237 = arith.constant 1.000000e+00 : f32
    %703 = vector.broadcast %cst_237 : f32 to vector<4x64xf32>
    %704 = arith.addf %703, %702 : vector<4x64xf32>
    %cst_238 = arith.constant 1.000000e+00 : f32
    %705 = vector.broadcast %cst_238 : f32 to vector<4x64xf32>
    %706 = arith.divf %705, %704 : vector<4x64xf32>
    %cst_239 = arith.constant 1.06140542 : f32
    %707 = vector.broadcast %cst_239 : f32 to vector<4x64xf32>
    %708 = arith.mulf %707, %706 : vector<4x64xf32>
    %cst_240 = arith.constant -1.45315206 : f32
    %709 = vector.broadcast %cst_240 : f32 to vector<4x64xf32>
    %710 = arith.addf %708, %709 : vector<4x64xf32>
    %711 = arith.mulf %710, %706 : vector<4x64xf32>
    %cst_241 = arith.constant 1.42141378 : f32
    %712 = vector.broadcast %cst_241 : f32 to vector<4x64xf32>
    %713 = arith.addf %711, %712 : vector<4x64xf32>
    %714 = arith.mulf %713, %706 : vector<4x64xf32>
    %cst_242 = arith.constant -0.284496725 : f32
    %715 = vector.broadcast %cst_242 : f32 to vector<4x64xf32>
    %716 = arith.addf %714, %715 : vector<4x64xf32>
    %717 = arith.mulf %716, %706 : vector<4x64xf32>
    %cst_243 = arith.constant 0.254829586 : f32
    %718 = vector.broadcast %cst_243 : f32 to vector<4x64xf32>
    %719 = arith.addf %717, %718 : vector<4x64xf32>
    %720 = arith.mulf %719, %706 : vector<4x64xf32>
    %cst_244 = arith.constant 0.000000e+00 : f32
    %721 = vector.broadcast %cst_244 : f32 to vector<4x64xf32>
    %722 = arith.subf %721, %700 : vector<4x64xf32>
    %723 = arith.mulf %722, %700 : vector<4x64xf32>
    %724 = math.exp %723 : vector<4x64xf32>
    %725 = arith.mulf %720, %724 : vector<4x64xf32>
    %cst_245 = arith.constant 1.000000e+00 : f32
    %726 = vector.broadcast %cst_245 : f32 to vector<4x64xf32>
    %727 = arith.subf %726, %725 : vector<4x64xf32>
    %cst_246 = arith.constant 0.000000e+00 : f32
    %728 = vector.broadcast %cst_246 : f32 to vector<4x64xf32>
    %729 = arith.cmpf olt, %699, %728 : vector<4x64xf32>
    %cst_247 = arith.constant 0.000000e+00 : f32
    %730 = vector.broadcast %cst_247 : f32 to vector<4x64xf32>
    %731 = arith.subf %730, %727 : vector<4x64xf32>
    %732 = arith.select %729, %731, %727 : vector<4x64xi1>, vector<4x64xf32>
    %cst_248 = arith.constant 1.000000e+00 : f32
    %733 = vector.broadcast %cst_248 : f32 to vector<4x64xf32>
    %734 = arith.addf %733, %732 : vector<4x64xf32>
    %735 = arith.mulf %697, %734 : vector<4x64xf32>
    %cst_249 = arith.constant dense<0.000000e+00> : vector<4x32xf32>
    %736 = tpu.matmul %735, %580, %cst_249 {dimension_numbers = #tpu.dot_dimension_numbers<[1], [0], [0], [1], [0, 0, 1, 1], [], []>} : vector<4x64xf32>, vector<64x32xf32>, vector<4x32xf32> -> vector<4x32xf32>
    %737 = vector.broadcast %581 : vector<1x32xf32> to vector<4x32xf32>
    %738 = arith.addf %736, %737 : vector<4x32xf32>
    %739 = arith.addf %738, %692 : vector<4x32xf32>
    %cst_250 = arith.constant dense<0.000000e+00> : vector<4xf32>
    %740 = vector.multi_reduction <add>, %739, %cst_250 [1] : vector<4x32xf32> to vector<4xf32>
    %741 = vector.shape_cast %740 : vector<4xf32> to vector<4x1xf32>
    %cst_251 = arith.constant 3.200000e+01 : f32
    %742 = vector.broadcast %cst_251 : f32 to vector<4x1xf32>
    %743 = arith.divf %741, %742 : vector<4x1xf32>
    %744 = vector.broadcast %743 : vector<4x1xf32> to vector<4x32xf32>
    %745 = arith.subf %739, %744 : vector<4x32xf32>
    %746 = arith.mulf %745, %745 : vector<4x32xf32>
    %cst_252 = arith.constant dense<0.000000e+00> : vector<4xf32>
    %747 = vector.multi_reduction <add>, %746, %cst_252 [1] : vector<4x32xf32> to vector<4xf32>
    %748 = vector.shape_cast %747 : vector<4xf32> to vector<4x1xf32>
    %cst_253 = arith.constant 3.200000e+01 : f32
    %749 = vector.broadcast %cst_253 : f32 to vector<4x1xf32>
    %750 = arith.divf %748, %749 : vector<4x1xf32>
    %cst_254 = arith.constant 9.99999974E-6 : f32
    %751 = vector.broadcast %cst_254 : f32 to vector<4x1xf32>
    %752 = arith.addf %750, %751 : vector<4x1xf32>
    %753 = math.rsqrt %752 : vector<4x1xf32>
    %754 = vector.broadcast %753 : vector<4x1xf32> to vector<4x32xf32>
    %755 = arith.mulf %745, %754 : vector<4x32xf32>
    %756 = vector.broadcast %582 : vector<1x32xf32> to vector<4x32xf32>
    %757 = arith.mulf %755, %756 : vector<4x32xf32>
    %758 = vector.broadcast %583 : vector<1x32xf32> to vector<4x32xf32>
    %759 = arith.addf %757, %758 : vector<4x32xf32>
    %cst_255 = arith.constant dense<0.000000e+00> : vector<4x16xf32>
    %760 = tpu.matmul %759, %8, %cst_255 {dimension_numbers = #tpu.dot_dimension_numbers<[1], [0], [0], [1], [0, 0, 1, 1], [], []>} : vector<4x32xf32>, vector<32x16xf32>, vector<4x16xf32> -> vector<4x16xf32>
    %761 = vector.broadcast %9 : vector<1x16xf32> to vector<4x16xf32>
    %762 = arith.addf %760, %761 : vector<4x16xf32>
    %763 = vector.broadcast %25 : vector<4x1xf32> to vector<4x16xf32>
    %764 = arith.mulf %762, %763 : vector<4x16xf32>
    %765 = vector.broadcast %15 : vector<4x1xf32> to vector<4x16xf32>
    %766 = arith.addf %764, %765 : vector<4x16xf32>
    %c0_256 = arith.constant 0 : index
    %c0_257 = arith.constant 0 : index
    %c0_258 = arith.constant 0 : index
    %767 = vector.load %arg38[%c0_256, %c0_257, %c0_258] : memref<1x4x16xf32, #tpu.memory_space<vmem>>, vector<1x4x16xf32>
    %768 = vector.shape_cast %767 : vector<1x4x16xf32> to vector<4x16xf32>
    %769 = vector.shape_cast %766 : vector<4x16xf32> to vector<1x4x16xf32>
    tpu.vector_store %arg38[%c0_256, %c0_257, %c0_258], %769 {strides = array<i32>} : memref<1x4x16xf32, #tpu.memory_space<vmem>>, vector<1x4x16xf32>,
    return
  }
  func.func @transform_0(%arg0: i32) -> (i32, i32, i32) {
    %c0_i32 = arith.constant 0 : i32
    %c0_i32_0 = arith.constant 0 : i32
    %c0_i32_1 = arith.constant 0 : i32
    return %arg0, %c0_i32, %c0_i32_0 : i32, i32, i32
  }
  func.func @transform_1(%arg0: i32) -> (i32, i32) {
    %c0_i32 = arith.constant 0 : i32
    %c0_i32_0 = arith.constant 0 : i32
    %c0_i32_1 = arith.constant 0 : i32
    return %c0_i32, %c0_i32_0 : i32, i32
  }
  func.func @transform_2(%arg0: i32) -> (i32, i32) {
    %c0_i32 = arith.constant 0 : i32
    %c0_i32_0 = arith.constant 0 : i32
    %c0_i32_1 = arith.constant 0 : i32
    return %c0_i32, %c0_i32_0 : i32, i32
  }
  func.func @transform_3(%arg0: i32) -> (i32, i32) {
    %c0_i32 = arith.constant 0 : i32
    %c0_i32_0 = arith.constant 0 : i32
    %c0_i32_1 = arith.constant 0 : i32
    return %c0_i32, %c0_i32_0 : i32, i32
  }
  func.func @transform_4(%arg0: i32) -> (i32, i32) {
    %c0_i32 = arith.constant 0 : i32
    %c0_i32_0 = arith.constant 0 : i32
    %c0_i32_1 = arith.constant 0 : i32
    return %c0_i32, %c0_i32_0 : i32, i32
  }
  func.func @transform_5(%arg0: i32) -> (i32, i32) {
    %c0_i32 = arith.constant 0 : i32
    %c0_i32_0 = arith.constant 0 : i32
    %c0_i32_1 = arith.constant 0 : i32
    return %c0_i32, %c0_i32_0 : i32, i32
  }
  func.func @transform_6(%arg0: i32) -> (i32, i32) {
    %c0_i32 = arith.constant 0 : i32
    %c0_i32_0 = arith.constant 0 : i32
    %c0_i32_1 = arith.constant 0 : i32
    return %c0_i32, %c0_i32_0 : i32, i32
  }
  func.func @transform_7(%arg0: i32) -> (i32, i32) {
    %c0_i32 = arith.constant 0 : i32
    %c0_i32_0 = arith.constant 0 : i32
    %c0_i32_1 = arith.constant 0 : i32
    return %c0_i32, %c0_i32_0 : i32, i32
  }
  func.func @transform_8(%arg0: i32) -> (i32, i32) {
    %c0_i32 = arith.constant 0 : i32
    %c0_i32_0 = arith.constant 0 : i32
    %c0_i32_1 = arith.constant 0 : i32
    return %c0_i32, %c0_i32_0 : i32, i32
  }
  func.func @transform_9(%arg0: i32) -> (i32, i32) {
    %c0_i32 = arith.constant 0 : i32
    %c0_i32_0 = arith.constant 0 : i32
    %c0_i32_1 = arith.constant 0 : i32
    return %c0_i32, %c0_i32_0 : i32, i32
  }
  func.func @transform_10(%arg0: i32) -> (i32, i32) {
    %c0_i32 = arith.constant 0 : i32
    %c0_i32_0 = arith.constant 0 : i32
    %c0_i32_1 = arith.constant 0 : i32
    return %c0_i32, %c0_i32_0 : i32, i32
  }
  func.func @transform_11(%arg0: i32) -> (i32, i32) {
    %c0_i32 = arith.constant 0 : i32
    %c0_i32_0 = arith.constant 0 : i32
    %c0_i32_1 = arith.constant 0 : i32
    return %c0_i32, %c0_i32_0 : i32, i32
  }
  func.func @transform_12(%arg0: i32) -> (i32, i32) {
    %c0_i32 = arith.constant 0 : i32
    %c0_i32_0 = arith.constant 0 : i32
    %c0_i32_1 = arith.constant 0 : i32
    return %c0_i32, %c0_i32_0 : i32, i32
  }
  func.func @transform_13(%arg0: i32) -> (i32, i32) {
    %c0_i32 = arith.constant 0 : i32
    %c0_i32_0 = arith.constant 0 : i32
    %c0_i32_1 = arith.constant 0 : i32
    return %c0_i32, %c0_i32_0 : i32, i32
  }
  func.func @transform_14(%arg0: i32) -> (i32, i32) {
    %c0_i32 = arith.constant 0 : i32
    %c0_i32_0 = arith.constant 0 : i32
    %c0_i32_1 = arith.constant 0 : i32
    return %c0_i32, %c0_i32_0 : i32, i32
  }
  func.func @transform_15(%arg0: i32) -> (i32, i32) {
    %c0_i32 = arith.constant 0 : i32
    %c0_i32_0 = arith.constant 0 : i32
    %c0_i32_1 = arith.constant 0 : i32
    return %c0_i32, %c0_i32_0 : i32, i32
  }
  func.func @transform_16(%arg0: i32) -> (i32, i32) {
    %c0_i32 = arith.constant 0 : i32
    %c0_i32_0 = arith.constant 0 : i32
    %c0_i32_1 = arith.constant 0 : i32
    return %c0_i32, %c0_i32_0 : i32, i32
  }
  func.func @transform_17(%arg0: i32) -> (i32, i32) {
    %c0_i32 = arith.constant 0 : i32
    %c0_i32_0 = arith.constant 0 : i32
    %c0_i32_1 = arith.constant 0 : i32
    return %c0_i32, %c0_i32_0 : i32, i32
  }
  func.func @transform_18(%arg0: i32) -> (i32, i32) {
    %c0_i32 = arith.constant 0 : i32
    %c0_i32_0 = arith.constant 0 : i32
    %c0_i32_1 = arith.constant 0 : i32
    return %c0_i32, %c0_i32_0 : i32, i32
  }
  func.func @transform_19(%arg0: i32) -> (i32, i32) {
    %c0_i32 = arith.constant 0 : i32
    %c0_i32_0 = arith.constant 0 : i32
    %c0_i32_1 = arith.constant 0 : i32
    return %c0_i32, %c0_i32_0 : i32, i32
  }
  func.func @transform_20(%arg0: i32) -> (i32, i32) {
    %c0_i32 = arith.constant 0 : i32
    %c0_i32_0 = arith.constant 0 : i32
    %c0_i32_1 = arith.constant 0 : i32
    return %c0_i32, %c0_i32_0 : i32, i32
  }
  func.func @transform_21(%arg0: i32) -> (i32, i32) {
    %c0_i32 = arith.constant 0 : i32
    %c0_i32_0 = arith.constant 0 : i32
    %c0_i32_1 = arith.constant 0 : i32
    return %c0_i32, %c0_i32_0 : i32, i32
  }
  func.func @transform_22(%arg0: i32) -> (i32, i32) {
    %c0_i32 = arith.constant 0 : i32
    %c0_i32_0 = arith.constant 0 : i32
    %c0_i32_1 = arith.constant 0 : i32
    return %c0_i32, %c0_i32_0 : i32, i32
  }
  func.func @transform_23(%arg0: i32) -> (i32, i32) {
    %c0_i32 = arith.constant 0 : i32
    %c0_i32_0 = arith.constant 0 : i32
    %c0_i32_1 = arith.constant 0 : i32
    return %c0_i32, %c0_i32_0 : i32, i32
  }
  func.func @transform_24(%arg0: i32) -> (i32, i32) {
    %c0_i32 = arith.constant 0 : i32
    %c0_i32_0 = arith.constant 0 : i32
    %c0_i32_1 = arith.constant 0 : i32
    return %c0_i32, %c0_i32_0 : i32, i32
  }
  func.func @transform_25(%arg0: i32) -> (i32, i32) {
    %c0_i32 = arith.constant 0 : i32
    %c0_i32_0 = arith.constant 0 : i32
    %c0_i32_1 = arith.constant 0 : i32
    return %c0_i32, %c0_i32_0 : i32, i32
  }
  func.func @transform_26(%arg0: i32) -> (i32, i32) {
    %c0_i32 = arith.constant 0 : i32
    %c0_i32_0 = arith.constant 0 : i32
    %c0_i32_1 = arith.constant 0 : i32
    return %c0_i32, %c0_i32_0 : i32, i32
  }
  func.func @transform_27(%arg0: i32) -> (i32, i32) {
    %c0_i32 = arith.constant 0 : i32
    %c0_i32_0 = arith.constant 0 : i32
    %c0_i32_1 = arith.constant 0 : i32
    return %c0_i32, %c0_i32_0 : i32, i32
  }
  func.func @transform_28(%arg0: i32) -> (i32, i32) {
    %c0_i32 = arith.constant 0 : i32
    %c0_i32_0 = arith.constant 0 : i32
    %c0_i32_1 = arith.constant 0 : i32
    return %c0_i32, %c0_i32_0 : i32, i32
  }
  func.func @transform_29(%arg0: i32) -> (i32, i32) {
    %c0_i32 = arith.constant 0 : i32
    %c0_i32_0 = arith.constant 0 : i32
    %c0_i32_1 = arith.constant 0 : i32
    return %c0_i32, %c0_i32_0 : i32, i32
  }
  func.func @transform_30(%arg0: i32) -> (i32, i32) {
    %c0_i32 = arith.constant 0 : i32
    %c0_i32_0 = arith.constant 0 : i32
    %c0_i32_1 = arith.constant 0 : i32
    return %c0_i32, %c0_i32_0 : i32, i32
  }
  func.func @transform_31(%arg0: i32) -> (i32, i32) {
    %c0_i32 = arith.constant 0 : i32
    %c0_i32_0 = arith.constant 0 : i32
    %c0_i32_1 = arith.constant 0 : i32
    return %c0_i32, %c0_i32_0 : i32, i32
  }
  func.func @transform_32(%arg0: i32) -> (i32, i32) {
    %c0_i32 = arith.constant 0 : i32
    %c0_i32_0 = arith.constant 0 : i32
    %c0_i32_1 = arith.constant 0 : i32
    return %c0_i32, %c0_i32_0 : i32, i32
  }
  func.func @transform_33(%arg0: i32) -> (i32, i32) {
    %c0_i32 = arith.constant 0 : i32
    %c0_i32_0 = arith.constant 0 : i32
    %c0_i32_1 = arith.constant 0 : i32
    return %c0_i32, %c0_i32_0 : i32, i32
  }
  func.func @transform_34(%arg0: i32) -> (i32, i32) {
    %c0_i32 = arith.constant 0 : i32
    %c0_i32_0 = arith.constant 0 : i32
    %c0_i32_1 = arith.constant 0 : i32
    return %c0_i32, %c0_i32_0 : i32, i32
  }
  func.func @transform_35(%arg0: i32) -> (i32, i32) {
    %c0_i32 = arith.constant 0 : i32
    %c0_i32_0 = arith.constant 0 : i32
    %c0_i32_1 = arith.constant 0 : i32
    return %c0_i32, %c0_i32_0 : i32, i32
  }
  func.func @transform_36(%arg0: i32) -> (i32, i32) {
    %c0_i32 = arith.constant 0 : i32
    %c0_i32_0 = arith.constant 0 : i32
    %c0_i32_1 = arith.constant 0 : i32
    return %c0_i32, %c0_i32_0 : i32, i32
  }
  func.func @transform_37(%arg0: i32) -> (i32, i32, i32) {
    %c0_i32 = arith.constant 0 : i32
    %c0_i32_0 = arith.constant 0 : i32
    %c0_i32_1 = arith.constant 0 : i32
    return %arg0, %c0_i32, %c0_i32_0 : i32, i32, i32
  }
}

</mosaic_0001>

<bundles_post_ra>
// kernel: _lambda_.1
= control target key start
LH: loop header
LB: loop body
LE: loop exit
PB: predicated region body
PF: predicated region fallthrough
CT: control target
= control target key end

     0   :  { %s12427_s6 = smov 1   ;;  %s12428_s10 = smov 2   ;;  %s14465_s0 = inlined_call_operand.smem [shape: u32[38], index: -1, kind: input, shape index: {}] }
   0x1   :  { %s12534_s5 = sld [smem:[%s14465_s0]]   ;;  %s12429_s14 = smov 3  }
   0x2   :  { %s12539_s9 = sld [smem:[%s14465_s0 + %s12427_s6]]   ;;  %s12430_s18 = smov 4  }
   0x3   :  { %s12544_s13 = sld [smem:[%s14465_s0 + %s12428_s10]]   ;;  %s12431_s22 = smov 5  }
   0x4   :  { %s12549_s17 = sld [smem:[%s14465_s0 + %s12429_s14]]   ;;  %s12432_s26 = smov 6  }
   0x5   :  { %s12554_s21 = sld [smem:[%s14465_s0 + %s12430_s18]]   ;;  %s12433_s30 = smov 7  }
   0x6   :  { %s12559_s25 = sld [smem:[%s14465_s0 + %s12431_s22]]   ;;  %s12434_s4 = smov 8  }
   0x7   :  { %14512 = sst [smem:[#allocation48_spill]] %s12534_s5  ;;  %s12435_s10 = smov 9  }
   0x8   :  { %14513 = sst [smem:[#allocation49_spill]] %s12539_s9  ;;  %s12436_s15 = smov 10  }
   0x9   :  { %14514 = sst [smem:[#allocation50_spill]] %s12544_s13  ;;  %s12437_s20 = smov 11  }
   0xa   :  { %14515 = sst [smem:[#allocation51_spill]] %s12549_s17  ;;  %s12439_s1 = smov 13  }
   0xb   :  { %14516 = sst [smem:[#allocation52_spill]] %s12554_s21  ;;  %s12440_s7 = smov 14  }
   0xc   :  { %s12564_s29 = sld [smem:[%s14465_s0 + %s12432_s26]]   ;;  %s12438_s26 = smov 12  }
   0xd   :  { %s12569_s3 = sld [smem:[%s14465_s0 + %s12433_s30]]   ;;  %s12442_s22 = smov 16  }
   0xe   :  { %s12574_s8 = sld [smem:[%s14465_s0 + %s12434_s4]]   ;;  %s12443_s28 = smov 17  }
   0xf   :  { %s12579_s14 = sld [smem:[%s14465_s0 + %s12435_s10]]  }
  0x10   :  { %s12584_s19 = sld [smem:[%s14465_s0 + %s12436_s15]]   ;;  %s12441_s15 = smov 15  }
  0x11   :  { %s12589_s24 = sld [smem:[%s14465_s0 + %s12437_s20]]  }
  0x12   :  { %14517 = sst [smem:[#allocation53_spill]] %s12564_s29 }
  0x13   :  { %14518 = sst [smem:[#allocation54_spill]] %s12569_s3 }
  0x14   :  { %14519 = sst [smem:[#allocation55_spill]] %s12574_s8 }
  0x15   :  { %14520 = sst [smem:[#allocation56_spill]] %s12579_s14 }
  0x16   :  { %14521 = sst [smem:[#allocation57_spill]] %s12584_s19 }
  0x17   :  { %s12594_s30 = sld [smem:[%s14465_s0 + %s12438_s26]]  }
  0x18   :  { %s12599_s6 = sld [smem:[%s14465_s0 + %s12439_s1]]  }
  0x19   :  { %s12604_s12 = sld [smem:[%s14465_s0 + %s12440_s7]]   ;;  %s12444_s7 = smov 18  }
  0x1a   :  { %s12609_s20 = sld [smem:[%s14465_s0 + %s12441_s15]]   ;;  %s12445_s15 = smov 19  }
  0x1b   :  { %s12614_s27 = sld [smem:[%s14465_s0 + %s12442_s22]]   ;;  %s12446_s22 = smov 20  }
  0x1c   :  { %s12619_s4 = sld [smem:[%s14465_s0 + %s12443_s28]]   ;;  %s12447_s28 = smov 21  }
  0x1d   :  { %14522 = sst [smem:[#allocation58_spill]] %s12594_s30 }
  0x1e   :  { %14523 = sst [smem:[#allocation59_spill]] %s12599_s6 }
  0x1f   :  { %14524 = sst [smem:[#allocation60_spill]] %s12604_s12 }
  0x20   :  { %14525 = sst [smem:[#allocation61_spill]] %s12609_s20 }
  0x21   :  { %14526 = sst [smem:[#allocation62_spill]] %s12614_s27 }
  0x22   :  { %14527 = sst [smem:[#allocation63_spill]] %s12619_s4 }
  0x23   :  { %s12624_s12 = sld [smem:[%s14465_s0 + %s12444_s7]]   ;;  %s12448_s7 = smov 22  }
  0x24   :  { %s12629_s20 = sld [smem:[%s14465_s0 + %s12445_s15]]   ;;  %s12449_s15 = smov 23  }
  0x25   :  { %s12634_s27 = sld [smem:[%s14465_s0 + %s12446_s22]]   ;;  %s12450_s22 = smov 24  }
  0x26   :  { %s12639_s30 = sld [smem:[%s14465_s0 + %s12447_s28]]   ;;  %s12451_s28 = smov 25  }
  0x27   :  { %s12649_s19 = sld [smem:[%s14465_s0 + %s12449_s15]]   ;;  %s12453_s15 = smov 27  }
  0x28   :  { %s12654_s14 = sld [smem:[%s14465_s0 + %s12450_s22]]   ;;  %s12454_s22 = smov 28  }
  0x29   :  { %14528 = sst [smem:[#allocation64_spill]] %s12624_s12 }
  0x2a   :  { %s12644_s12 = sld [smem:[%s14465_s0 + %s12448_s7]]   ;;  %s12452_s7 = smov 26  }
  0x2b   :  { %s12659_s8 = sld [smem:[%s14465_s0 + %s12451_s28]]   ;;  %s12455_s28 = smov 29  }
  0x2c   :  { %s12664_s29 = sld [smem:[%s14465_s0 + %s12452_s7]]   ;;  %s12456_s7 = smov 30  }
  0x2d   :  { %s12669_s17 = sld [smem:[%s14465_s0 + %s12453_s15]]   ;;  %s12457_s15 = smov 31  }
  0x2e   :  { %14530 = sst [smem:[#allocation66_spill]] %s12654_s14 }
  0x2f   :  { %s12674_s21 = sld [smem:[%s14465_s0 + %s12454_s22]]   ;;  %s12458_s22 = smov 32  }
  0x30   :  { %14529 = sst [smem:[#allocation65_spill]] %s12644_s12 }
  0x31   :  { %14531 = sst [smem:[#allocation67_spill]] %s12659_s8 }
  0x32   :  { %14532 = sst [smem:[#allocation68_spill]] %s12664_s29 }
  0x33   :  { %14533 = sst [smem:[#allocation69_spill]] %s12669_s17 }
  0x34   :  { %s12679_s5 = sld [smem:[%s14465_s0 + %s12455_s28]]   ;;  %s12459_s28 = smov 33  }
  0x35   :  { %14534 = sst [smem:[#allocation70_spill]] %s12674_s21 }
  0x36   :  { %s12684_s29 = sld [smem:[%s14465_s0 + %s12456_s7]]   ;;  %s12460_s7 = smov 34  }
  0x37   :  { %s12689_s17 = sld [smem:[%s14465_s0 + %s12457_s15]]   ;;  %s12461_s15 = smov 35  }
  0x38   :  { %s12694_s21 = sld [smem:[%s14465_s0 + %s12458_s22]]   ;;  %s12462_s22 = smov 36  }
  0x39   :  { %s12699_s14 = sld [smem:[%s14465_s0 + %s12459_s28]]   ;;  %s12463_s28 = smov 37  }
  0x3a   :  { %14535 = sst [smem:[#allocation71_spill]] %s12679_s5 }
  0x3b   :  { %s12709_s12 = sld [smem:[%s14465_s0 + %s12461_s15]]  }
  0x3c   :  { %14536 = sst [smem:[#allocation72_spill]] %s12684_s29 }
  0x3d   :  { %s12704_s29 = sld [smem:[%s14465_s0 + %s12460_s7]]  }
  0x3e   :  { %14537 = sst [smem:[#allocation73_spill]] %s12694_s21 }
  0x3f   :  { %14538 = sst [smem:[#allocation74_spill]] %s12699_s14 }
  0x40   :  { %s12714_s21 = sld [smem:[%s14465_s0 + %s12462_s22]]  }
  0x41   :  { %s12719_s14 = sld [smem:[%s14465_s0 + %s12463_s28]]  }
  0x42   :  { %80 = vsyncpa [#allocation3], 0 }
  0x43   :  { %81 = vsyncpa [#allocation6], 0 }
  0x44   :  { %82 = vsyncpa [#allocation9], 0 }
  0x45   :  { %83 = vsyncpa [#allocation12], 0 }
  0x46   :  { %84 = vsyncpa [#allocation15], 0 }
  0x47   :  { %85 = vsyncpa [#allocation18], 0 }
  0x48   :  { %86 = vsyncpa [#allocation21], 0 }
  0x49   :  { %87 = vsyncpa [#allocation24], 0 }
  0x4a   :  { %88 = vsyncpa [#allocation27], 0 }
  0x4b   :  { %89 = vsyncpa [#allocation30], 0 }
  0x4c   :  { %90 = vsyncpa [#allocation33], 0 }
  0x4d   :  { %91 = vsyncpa [#allocation4], 0 }
  0x4e   :  { %93 = vsyncpa [#allocation4 + $0x1], 0  ;;  %s12721_s7 = smov 0   ;;  %s12723_s10 = smov 0  }
  0x4f   :  { %s12725_s11 = smov 0   ;;  %s12727_s0 = smov 0  }
  0x50 LB: > { %s14539_s9 = sld [smem:[#allocation49_spill]]  ;;  %s14540_s8 = sld [smem:[#allocation67_spill]]  ;;  %s12421_s11 = sphi %s12725_s11, %s14629_s11   ;;  %s12417_s10 = sphi %s12723_s10, %s14631_s10   ;;  %s12413_s7 = sphi %s12721_s7, %s14630_s7   ;;  %s12425_s0 = sphi %s12727_s0, %s14627_s0  }
  0x51   : > { %s14541_s6 = sld [smem:[#allocation59_spill]]  ;;  %s14542_s5 = sld [smem:[#allocation71_spill]] }
  0x52   : > { %s14543_s4 = sld [smem:[#allocation63_spill]]  ;;  %s14544_s13 = sld [smem:[#allocation50_spill]] }
  0x53   : > { %s14545_s3 = sld [smem:[#allocation54_spill]]  ;;  %14547 = sst [smem:[#allocation76_spill]] %s12421_s11 }
  0x54   : > { %14546 = sst [smem:[#allocation75_spill]] %s12413_s7  ;;  %s12742_s15 = sadd.s32 4294967295, %s12425_s0  }
  0x55   : > { %14548 = sst [smem:[#allocation77_spill]] %s12425_s0  ;;  %s9015_s16 = sadd.s32 4294967294, %s12425_s0  }
  0x56   : > { %s12746_s18 = sadd.s32 1, %s12425_s0   ;;  %s888_s22 = sadd.s32 1, %s12421_s11 }
  0x57   : > { %14549 = sst [smem:[#allocation78_spill]] %s12746_s18  ;;  %s885_s23 = ssub.s32 %s12425_s0, %s12746_s18 }
  0x58   : > { %p898_p0 = scmp.ne.s32.totalorder %s12421_s11, %s12417_s10  ;;  %p886_p1 = scmp.eq.s32.totalorder %s885_s23, 0 }
  0x59   : > { %p899_p2 = scmp.eq.s32.totalorder %s12742_s15, 1  ;;  %p904_p3 = scmp.ne.s32.totalorder %s12417_s10, %s12413_s7 }
  0x5a   : > { %p905_p4 = scmp.eq.s32.totalorder %s9015_s16, 1  ;;  %p9016_p7 = scmp.ge.s32.totalorder %s12425_s0, 1 }
  0x5b   : > { %s12757_s26 = scalar_select %p886_p1, %s12421_s11, %s888_s22  }
  0x5c   : > { %p12759_p5 = por %p899_p2, %p898_p0  ;;  %p12763_p6 = por %p905_p4, %p904_p3 }
  0x5d   : > { %14550 = sst [smem:[#allocation79_spill]] %s12757_s26  ;;  %p912_p8 = scmp.lt.s32.totalorder %s12425_s0, 3 }
  0x5e   : > { %s14551_s28 = scalar_select %p12759_p5, 1, 0 }
  0x5f   : > { %s14552_s1 = scalar_select %p12763_p6, 1, 0 }
  0x60   : > { %p14478_p9 = scmp.eq.s32.totalorder %s12742_s15, 0  ;;  %p12770_p10 = pnand %p9016_p7, %p912_p8 }
  0x61   : > { %14553 = sst [smem:[#allocation80_spill]] %s14552_s1  ;;  %s12464_s16 = smov [#allocation5]  }
  0x62   : > { %s14554_s2 = scalar_select %p12770_p10, 1, 0 }
  0x63   : > { %p11109_p11 = pneg %p12770_p10  ;;  %s937_s22 = sshll.u32 %s12464_s16, 4  ;;  %s12776_s22 = int_to_ptr.vmem [resolvable:$true] %s937_s22 }
  0x64   : > { %s12465_s26 = smov [#allocation8]   ;;  %s12466_s18 = smov [#allocation11]  }
  0x65   : > { %p12780_p12 = pnand %p14478_p9, %p11109_p11  ;;  %s972_s11 = sshll.u32 %s12465_s26, 4  ;;  %s12784_s11 = int_to_ptr.vmem [resolvable:$true] %s972_s11 }
  0x66   : > { %s12786_s1 = sshll.u32 %s12466_s18, 4  ;;  %s11731_s7 = scalar_lea.hbm %s14544_s13, 768  ;;  %s1011_s1 = int_to_ptr.vmem [resolvable:$true] %s12786_s1 }
  0x67   : > { %p11732_p13 = scmp.ne.s32.totalorder %s14544_s13, %s11731_s7  ;;  %p12792_p0 = pneg %p12780_p12 }
  0x68   : > { %p11738_p3 = scmp.lt.u32.totalorder %s11731_s7, %s14544_s13 }
  0x69   : > { %p11734_p1 = pnand %p12792_p0, %p11732_p13 }
  0x6b   : > { %p11735_p2 = pneg %p11734_p1 }
  0x6d   : > { %p11740_p4 = pnand %p11738_p3, %p11735_p2 }
  0x6f   : > { %11743 = shalt.err (!%p11740_p4)
}
  0x70   : > { %s11744_s18 = scalar_lea.vmem %s12776_s22, 768  ;;  %p11752_p9 = scmp.lt.s32.totalorder %s12776_s22, %s12776_s22 }
  0x71   : > { %p11745_p7 = scmp.ne.s32.totalorder %s12776_s22, %s11744_s18  ;;  %p11753_p6 = scmp.lt.s32.totalorder %s11744_s18, %s11744_s18 }
  0x73   : > { %p11747_p8 = pnand %p11745_p7, %p12792_p0  ;;  %p11754_p5 = por %p11753_p6, %p11752_p9 }
  0x75   : > { %p11748_p11 = pneg %p11747_p8 }
  0x77   : > { %p11755_p10 = pnand %p11754_p5, %p11748_p11 }
  0x79   : > { %11758 = shalt.err (!%p11755_p10)
}
  0x7a   : > { %s12467_s26 = smov 128   ;;  %s12468_s7 = smov 8  }
  0x7b   : > { %11115 = dma.hbm_to_vmem [thread:$0]  (!%p12780_p12), %s14544_s13, 768, %s12776_s22, [#allocation6], %s12467_s26, %s12467_s26, %s12468_s7  }
  0x7c   : > { %s11759_s0 = scalar_lea.hbm %s14545_s3, 512 }
  0x7d   : > { %p11760_p13 = scmp.ne.s32.totalorder %s14545_s3, %s11759_s0  ;;  %p11766_p9 = scmp.lt.u32.totalorder %s11759_s0, %s14545_s3 }
  0x7f   : > { %p11762_p6 = pnand %p11760_p13, %p12792_p0 }
  0x81   : > { %p11763_p5 = pneg %p11762_p6 }
  0x83   : > { %p11768_p10 = pnand %p11766_p9, %p11763_p5 }
  0x85   : > { %11771 = shalt.err (!%p11768_p10)
}
  0x86   : > { %s11772_s18 = scalar_lea.vmem %s12784_s11, 512  ;;  %p11780_p4 = scmp.lt.s32.totalorder %s12784_s11, %s12784_s11 }
  0x87   : > { %p11773_p1 = scmp.ne.s32.totalorder %s12784_s11, %s11772_s18  ;;  %p11781_p7 = scmp.lt.s32.totalorder %s11772_s18, %s11772_s18 }
  0x89   : > { %p11775_p2 = pnand %p11773_p1, %p12792_p0  ;;  %p11782_p8 = por %p11781_p7, %p11780_p4 }
  0x8b   : > { %p11776_p3 = pneg %p11775_p2 }
  0x8d   : > { %p11783_p11 = pnand %p11782_p8, %p11776_p3 }
  0x8f   : > { %11786 = shalt.err (!%p11783_p11)
}
  0x90   : > { %11121 = dma.hbm_to_vmem [thread:$0]  (!%p12780_p12), %s14545_s3, 512, %s12784_s11, [#allocation9], %s12467_s26, %s12467_s26, %s12468_s7  }
  0x91   : > { %s11787_s0 = scalar_lea.hbm %s14541_s6, 1024 }
  0x92   : > { %p11788_p13 = scmp.ne.s32.totalorder %s14541_s6, %s11787_s0  ;;  %p11794_p9 = scmp.lt.u32.totalorder %s11787_s0, %s14541_s6 }
  0x94   : > { %p11790_p6 = pnand %p11788_p13, %p12792_p0 }
  0x96   : > { %p11791_p5 = pneg %p11790_p6 }
  0x98   : > { %p11796_p10 = pnand %p11794_p9, %p11791_p5 }
  0x9a   : > { %11799 = shalt.err (!%p11796_p10)
}
  0x9b   : > { %s11800_s22 = scalar_lea.vmem %s1011_s1, 1024  ;;  %p11808_p4 = scmp.lt.s32.totalorder %s1011_s1, %s1011_s1 }
  0x9c   : > { %p11801_p1 = scmp.ne.s32.totalorder %s1011_s1, %s11800_s22  ;;  %p11809_p7 = scmp.lt.s32.totalorder %s11800_s22, %s11800_s22 }
  0x9e   : > { %p11803_p2 = pnand %p11801_p1, %p12792_p0  ;;  %p11810_p8 = por %p11809_p7, %p11808_p4 }
  0xa0   : > { %p11804_p3 = pneg %p11803_p2 }
  0xa2   : > { %p11811_p11 = pnand %p11810_p8, %p11804_p3 }
  0xa4   : > { %11814 = shalt.err (!%p11811_p11)
}
  0xa5   : > { %11127 = dma.hbm_to_vmem [thread:$0]  (!%p12780_p12), %s14541_s6, 1024, %s1011_s1, [#allocation12], %s12467_s26, %s12467_s26, %s12468_s7  }
  0xa6   : > { %s12469_s11 = smov [#allocation14]   ;;  %s12470_s0 = smov [#allocation17]  }
  0xa7   : > { %s1048_s18 = sshll.u32 %s12469_s11, 4  ;;  %s1072_s3 = sshll.u32 %s12470_s0, 4  ;;  %s1049_s18 = int_to_ptr.vmem [resolvable:$true] %s1048_s18  ;;  %s1073_s3 = int_to_ptr.vmem [resolvable:$true] %s1072_s3 }
  0xa8   : > { %s11815_s22 = scalar_lea.hbm %s12629_s20, 512 }
  0xa9   : > { %p11816_p13 = scmp.ne.s32.totalorder %s12629_s20, %s11815_s22  ;;  %p11822_p9 = scmp.lt.u32.totalorder %s11815_s22, %s12629_s20 }
  0xab   : > { %p11818_p6 = pnand %p11816_p13, %p12792_p0 }
  0xad   : > { %p11819_p5 = pneg %p11818_p6 }
  0xaf   : > { %p11824_p10 = pnand %p11822_p9, %p11819_p5 }
  0xb1   : > { %11827 = shalt.err (!%p11824_p10)
}
  0xb2   : > { %s11828_s13 = scalar_lea.vmem %s1049_s18, 512  ;;  %p11836_p4 = scmp.lt.s32.totalorder %s1049_s18, %s1049_s18 }
  0xb3   : > { %p11829_p1 = scmp.ne.s32.totalorder %s1049_s18, %s11828_s13  ;;  %p11837_p7 = scmp.lt.s32.totalorder %s11828_s13, %s11828_s13 }
  0xb5   : > { %p11831_p2 = pnand %p11829_p1, %p12792_p0  ;;  %p11838_p8 = por %p11837_p7, %p11836_p4 }
  0xb7   : > { %p11832_p3 = pneg %p11831_p2 }
  0xb9   : > { %p11839_p11 = pnand %p11838_p8, %p11832_p3 }
  0xbb   : > { %11842 = shalt.err (!%p11839_p11)
}
  0xbc   : > { %11133 = dma.hbm_to_vmem [thread:$0]  (!%p12780_p12), %s12629_s20, 512, %s1049_s18, [#allocation15], %s12467_s26, %s12467_s26, %s12468_s7  }
  0xbd   : > { %s11843_s1 = scalar_lea.hbm %s12639_s30, 512 }
  0xbe   : > { %p11844_p13 = scmp.ne.s32.totalorder %s12639_s30, %s11843_s1  ;;  %p11850_p9 = scmp.lt.u32.totalorder %s11843_s1, %s12639_s30 }
  0xc0   : > { %p11846_p6 = pnand %p11844_p13, %p12792_p0 }
  0xc2   : > { %p11847_p5 = pneg %p11846_p6 }
  0xc4   : > { %p11852_p10 = pnand %p11850_p9, %p11847_p5 }
  0xc6   : > { %11855 = shalt.err (!%p11852_p10)
}
  0xc7   : > { %s11856_s13 = scalar_lea.vmem %s1073_s3, 512  ;;  %p11864_p4 = scmp.lt.s32.totalorder %s1073_s3, %s1073_s3 }
  0xc8   : > { %p11857_p1 = scmp.ne.s32.totalorder %s1073_s3, %s11856_s13  ;;  %p11865_p7 = scmp.lt.s32.totalorder %s11856_s13, %s11856_s13 }
  0xca   : > { %p11859_p2 = pnand %p11857_p1, %p12792_p0  ;;  %p11866_p8 = por %p11865_p7, %p11864_p4 }
  0xcc   : > { %p11860_p3 = pneg %p11859_p2 }
  0xce   : > { %p11867_p11 = pnand %p11866_p8, %p11860_p3 }
  0xd0   : > { %11870 = shalt.err (!%p11867_p11)
}
  0xd1   : > { %11139 = dma.hbm_to_vmem [thread:$0]  (!%p12780_p12), %s12639_s30, 512, %s1073_s3, [#allocation18], %s12467_s26, %s12467_s26, %s12468_s7  }
  0xd2   : > { %s12471_s11 = smov [#allocation20]   ;;  %s12472_s0 = smov [#allocation23]  }
  0xd3   : > { %s1096_s18 = sshll.u32 %s12471_s11, 4  ;;  %s1120_s22 = sshll.u32 %s12472_s0, 4  ;;  %s1097_s18 = int_to_ptr.vmem [resolvable:$true] %s1096_s18  ;;  %s1121_s22 = int_to_ptr.vmem [resolvable:$true] %s1120_s22 }
  0xd4   : > { %s11871_s1 = scalar_lea.hbm %s12649_s19, 512 }
  0xd5   : > { %p11872_p13 = scmp.ne.s32.totalorder %s12649_s19, %s11871_s1  ;;  %p11878_p9 = scmp.lt.u32.totalorder %s11871_s1, %s12649_s19 }
  0xd7   : > { %p11874_p6 = pnand %p11872_p13, %p12792_p0 }
  0xd9   : > { %p11875_p5 = pneg %p11874_p6 }
  0xdb   : > { %p11880_p10 = pnand %p11878_p9, %p11875_p5 }
  0xdd   : > { %11883 = shalt.err (!%p11880_p10)
}
  0xde   : > { %s11884_s13 = scalar_lea.vmem %s1097_s18, 512  ;;  %p11892_p4 = scmp.lt.s32.totalorder %s1097_s18, %s1097_s18 }
  0xdf   : > { %p11885_p1 = scmp.ne.s32.totalorder %s1097_s18, %s11884_s13  ;;  %p11893_p7 = scmp.lt.s32.totalorder %s11884_s13, %s11884_s13 }
  0xe1   : > { %p11887_p2 = pnand %p11885_p1, %p12792_p0  ;;  %p11894_p8 = por %p11893_p7, %p11892_p4 }
  0xe3   : > { %p11888_p3 = pneg %p11887_p2 }
  0xe5   : > { %p11895_p11 = pnand %p11894_p8, %p11888_p3 }
  0xe7   : > { %11898 = shalt.err (!%p11895_p11)
}
  0xe8   : > { %11145 = dma.hbm_to_vmem [thread:$0]  (!%p12780_p12), %s12649_s19, 512, %s1097_s18, [#allocation21], %s12467_s26, %s12467_s26, %s12468_s7  }
  0xe9   : > { %s11899_s3 = scalar_lea.hbm %s14540_s8, 512 }
  0xea   : > { %p11900_p13 = scmp.ne.s32.totalorder %s14540_s8, %s11899_s3  ;;  %p11906_p9 = scmp.lt.u32.totalorder %s11899_s3, %s14540_s8 }
  0xec   : > { %p11902_p6 = pnand %p11900_p13, %p12792_p0 }
  0xee   : > { %p11903_p5 = pneg %p11902_p6 }
  0xf0   : > { %p11908_p10 = pnand %p11906_p9, %p11903_p5 }
  0xf2   : > { %11911 = shalt.err (!%p11908_p10)
}
  0xf3   : > { %s11912_s11 = scalar_lea.vmem %s1121_s22, 512  ;;  %p11920_p4 = scmp.lt.s32.totalorder %s1121_s22, %s1121_s22 }
  0xf4   : > { %p11913_p1 = scmp.ne.s32.totalorder %s1121_s22, %s11912_s11  ;;  %p11921_p7 = scmp.lt.s32.totalorder %s11912_s11, %s11912_s11 }
  0xf6   : > { %p11915_p2 = pnand %p11913_p1, %p12792_p0  ;;  %p11922_p8 = por %p11921_p7, %p11920_p4 }
  0xf8   : > { %p11916_p3 = pneg %p11915_p2 }
  0xfa   : > { %p11923_p11 = pnand %p11922_p8, %p11916_p3 }
  0xfc   : > { %11926 = shalt.err (!%p11923_p11)
}
  0xfd   : > { %11151 = dma.hbm_to_vmem [thread:$0]  (!%p12780_p12), %s14540_s8, 512, %s1121_s22, [#allocation24], %s12467_s26, %s12467_s26, %s12468_s7  }
  0xfe   : > { %s12473_s18 = smov [#allocation26]   ;;  %s12474_s1 = smov [#allocation29]  }
  0xff   : > { %s1150_s0 = sshll.u32 %s12473_s18, 4  ;;  %s1174_s13 = sshll.u32 %s12474_s1, 4  ;;  %s1151_s0 = int_to_ptr.vmem [resolvable:$true] %s1150_s0  ;;  %s1175_s13 = int_to_ptr.vmem [resolvable:$true] %s1174_s13 }
 0x100   : > { %s11927_s3 = scalar_lea.hbm %s14542_s5, 512 }
 0x101   : > { %p11928_p13 = scmp.ne.s32.totalorder %s14542_s5, %s11927_s3  ;;  %p11934_p9 = scmp.lt.u32.totalorder %s11927_s3, %s14542_s5 }
 0x103   : > { %p11930_p6 = pnand %p11928_p13, %p12792_p0 }
 0x105   : > { %p11931_p5 = pneg %p11930_p6 }
 0x107   : > { %p11936_p10 = pnand %p11934_p9, %p11931_p5 }
 0x109   : > { %11939 = shalt.err (!%p11936_p10)
}
 0x10a   : > { %s11940_s11 = scalar_lea.vmem %s1151_s0, 512  ;;  %p11948_p4 = scmp.lt.s32.totalorder %s1151_s0, %s1151_s0 }
 0x10b   : > { %p11941_p1 = scmp.ne.s32.totalorder %s1151_s0, %s11940_s11  ;;  %p11949_p7 = scmp.lt.s32.totalorder %s11940_s11, %s11940_s11 }
 0x10d   : > { %p11943_p2 = pnand %p11941_p1, %p12792_p0  ;;  %p11950_p8 = por %p11949_p7, %p11948_p4 }
 0x10f   : > { %p11944_p3 = pneg %p11943_p2 }
 0x111   : > { %p11951_p11 = pnand %p11950_p8, %p11944_p3 }
 0x113   : > { %11954 = shalt.err (!%p11951_p11)
}
 0x114   : > { %11157 = dma.hbm_to_vmem [thread:$0]  (!%p12780_p12), %s14542_s5, 512, %s1151_s0, [#allocation27], %s12467_s26, %s12467_s26, %s12468_s7  }
 0x115   : > { %s11955_s22 = scalar_lea.hbm %s12689_s17, 1024 }
 0x116   : > { %p11956_p13 = scmp.ne.s32.totalorder %s12689_s17, %s11955_s22  ;;  %p11962_p9 = scmp.lt.u32.totalorder %s11955_s22, %s12689_s17 }
 0x118   : > { %p11958_p6 = pnand %p11956_p13, %p12792_p0 }
 0x11a   : > { %p11959_p5 = pneg %p11958_p6 }
 0x11c   : > { %p11964_p10 = pnand %p11962_p9, %p11959_p5 }
 0x11e   : > { %11967 = shalt.err (!%p11964_p10)
}
 0x11f   : > { %s11968_s18 = scalar_lea.vmem %s1175_s13, 1024  ;;  %p11976_p4 = scmp.lt.s32.totalorder %s1175_s13, %s1175_s13 }
 0x120   : > { %p11969_p1 = scmp.ne.s32.totalorder %s1175_s13, %s11968_s18  ;;  %p11977_p7 = scmp.lt.s32.totalorder %s11968_s18, %s11968_s18 }
 0x122   : > { %p11971_p2 = pnand %p11969_p1, %p12792_p0  ;;  %p11978_p8 = por %p11977_p7, %p11976_p4 }
 0x124   : > { %p11972_p3 = pneg %p11971_p2 }
 0x126   : > { %p11979_p11 = pnand %p11978_p8, %p11972_p3 }
 0x128   : > { %11982 = shalt.err (!%p11979_p11)
}
 0x129   : > { %11163 = dma.hbm_to_vmem [thread:$0]  (!%p12780_p12), %s12689_s17, 1024, %s1175_s13, [#allocation30], %s12467_s26, %s12467_s26, %s12468_s7  }
 0x12a   : > { %s12475_s0 = smov [#allocation32]   ;;  %s12476_s3 = smov [#allocation2]  }
 0x12b   : > { %s1204_s1 = sshll.u32 %s12475_s0, 4  ;;  %s924_s11 = sshll.u32 %s12476_s3, 4  ;;  %s1205_s1 = int_to_ptr.vmem [resolvable:$true] %s1204_s1  ;;  %s925_s11 = int_to_ptr.vmem [resolvable:$true] %s924_s11 }
 0x12c   : > { %s11983_s22 = scalar_lea.hbm %s12709_s12, 512 }
 0x12d   : > { %p11984_p13 = scmp.ne.s32.totalorder %s12709_s12, %s11983_s22  ;;  %p11990_p9 = scmp.lt.u32.totalorder %s11983_s22, %s12709_s12 }
 0x12f   : > { %p11986_p6 = pnand %p11984_p13, %p12792_p0 }
 0x131   : > { %p11987_p5 = pneg %p11986_p6 }
 0x133   : > { %p11992_p10 = pnand %p11990_p9, %p11987_p5 }
 0x135   : > { %11995 = shalt.err (!%p11992_p10)
}
 0x136   : > { %s11996_s18 = scalar_lea.vmem %s1205_s1, 512  ;;  %p12004_p4 = scmp.lt.s32.totalorder %s1205_s1, %s1205_s1 }
 0x137   : > { %p11997_p1 = scmp.ne.s32.totalorder %s1205_s1, %s11996_s18  ;;  %p12005_p7 = scmp.lt.s32.totalorder %s11996_s18, %s11996_s18 }
 0x139   : > { %p11999_p2 = pnand %p11997_p1, %p12792_p0  ;;  %p12006_p8 = por %p12005_p7, %p12004_p4 }
 0x13b   : > { %p12000_p3 = pneg %p11999_p2 }
 0x13d   : > { %p12007_p11 = pnand %p12006_p8, %p12000_p3 }
 0x13f   : > { %12010 = shalt.err (!%p12007_p11)
}
 0x140   : > { %11169 = dma.hbm_to_vmem [thread:$0]  (!%p12780_p12), %s12709_s12, 512, %s1205_s1, [#allocation33], %s12467_s26, %s12467_s26, %s12468_s7  }
 0x141   : > { %s12011_s13 = scalar_lea.hbm %s14539_s9, 768 }
 0x142   : > { %p12012_p13 = scmp.ne.s32.totalorder %s14539_s9, %s12011_s13  ;;  %p12018_p9 = scmp.lt.u32.totalorder %s12011_s13, %s14539_s9 }
 0x144   : > { %p12014_p6 = pnand %p12012_p13, %p12792_p0 }
 0x146   : > { %p12015_p5 = pneg %p12014_p6 }
 0x148   : > { %p12020_p10 = pnand %p12018_p9, %p12015_p5 }
 0x14a   : > { %12023 = shalt.err (!%p12020_p10)
}
 0x14b   : > { %s12024_s0 = scalar_lea.vmem %s925_s11, 768  ;;  %p12032_p4 = scmp.lt.s32.totalorder %s925_s11, %s925_s11 }
 0x14c   : > { %p12025_p1 = scmp.ne.s32.totalorder %s925_s11, %s12024_s0  ;;  %p12033_p7 = scmp.lt.s32.totalorder %s12024_s0, %s12024_s0 }
 0x14e   : > { %p12027_p2 = pnand %p12025_p1, %p12792_p0  ;;  %p12034_p8 = por %p12033_p7, %p12032_p4 }
 0x150   : > { %p12028_p3 = pneg %p12027_p2 }
 0x152   : > { %p12035_p11 = pnand %p12034_p8, %p12028_p3 }
 0x154   : > { %12038 = shalt.err (!%p12035_p11)
}
 0x155   : > { %11112 = dma.hbm_to_vmem [thread:$0]  (!%p12780_p12), %s14539_s9, 768, %s925_s11, [#allocation3], %s12467_s26, %s12467_s26, %s12468_s7  }
 0x156   : > { %s12477_s1 = smov [#allocation7]   ;;  %s12478_s22 = smov [#allocation10]  }
 0x157   : > { %s956_s3 = sshll.u32 %s12477_s1, 4  ;;  %s994_s18 = sshll.u32 %s12478_s22, 4  ;;  %s957_s3 = int_to_ptr.vmem [resolvable:$true] %s956_s3  ;;  %s995_s18 = int_to_ptr.vmem [resolvable:$true] %s994_s18 }
 0x158   : > { %s12039_s13 = scalar_lea.hbm %s12559_s25, 512 }
 0x159   : > { %p12040_p13 = scmp.ne.s32.totalorder %s12559_s25, %s12039_s13  ;;  %p12046_p9 = scmp.lt.u32.totalorder %s12039_s13, %s12559_s25 }
 0x15b   : > { %p12042_p6 = pnand %p12040_p13, %p12792_p0 }
 0x15d   : > { %p12043_p5 = pneg %p12042_p6 }
 0x15f   : > { %p12048_p10 = pnand %p12046_p9, %p12043_p5 }
 0x161   : > { %12051 = shalt.err (!%p12048_p10)
}
 0x162   : > { %s12052_s0 = scalar_lea.vmem %s957_s3, 512  ;;  %p12060_p4 = scmp.lt.s32.totalorder %s957_s3, %s957_s3 }
 0x163   : > { %p12053_p1 = scmp.ne.s32.totalorder %s957_s3, %s12052_s0  ;;  %p12061_p7 = scmp.lt.s32.totalorder %s12052_s0, %s12052_s0 }
 0x165   : > { %p12055_p2 = pnand %p12053_p1, %p12792_p0  ;;  %p12062_p8 = por %p12061_p7, %p12060_p4 }
 0x167   : > { %p12056_p3 = pneg %p12055_p2 }
 0x169   : > { %p12063_p11 = pnand %p12062_p8, %p12056_p3 }
 0x16b   : > { %12066 = shalt.err (!%p12063_p11)
}
 0x16c   : > { %11118 = dma.hbm_to_vmem [thread:$0]  (!%p12780_p12), %s12559_s25, 512, %s957_s3, [#allocation6], %s12467_s26, %s12467_s26, %s12468_s7  }
 0x16d   : > { %s12067_s11 = scalar_lea.hbm %s12589_s24, 512 }
 0x16e   : > { %p12068_p13 = scmp.ne.s32.totalorder %s12589_s24, %s12067_s11  ;;  %p12074_p9 = scmp.lt.u32.totalorder %s12067_s11, %s12589_s24 }
 0x170   : > { %p12070_p6 = pnand %p12068_p13, %p12792_p0 }
 0x172   : > { %p12071_p5 = pneg %p12070_p6 }
 0x174   : > { %p12076_p10 = pnand %p12074_p9, %p12071_p5 }
 0x176   : > { %12079 = shalt.err (!%p12076_p10)
}
 0x177   : > { %s12080_s1 = scalar_lea.vmem %s995_s18, 512  ;;  %p12088_p4 = scmp.lt.s32.totalorder %s995_s18, %s995_s18 }
 0x178   : > { %p12081_p1 = scmp.ne.s32.totalorder %s995_s18, %s12080_s1  ;;  %p12089_p7 = scmp.lt.s32.totalorder %s12080_s1, %s12080_s1 }
 0x17a   : > { %p12083_p2 = pnand %p12081_p1, %p12792_p0  ;;  %p12090_p8 = por %p12089_p7, %p12088_p4 }
 0x17c   : > { %p12084_p3 = pneg %p12083_p2 }
 0x17e   : > { %p12091_p11 = pnand %p12090_p8, %p12084_p3 }
 0x180   : > { %12094 = shalt.err (!%p12091_p11)
}
 0x181   : > { %11124 = dma.hbm_to_vmem [thread:$0]  (!%p12780_p12), %s12589_s24, 512, %s995_s18, [#allocation9], %s12467_s26, %s12467_s26, %s12468_s7  }
 0x182   : > { %s12479_s3 = smov [#allocation13]   ;;  %s12480_s13 = smov [#allocation16]  }
 0x183   : > { %s1032_s22 = sshll.u32 %s12479_s3, 4  ;;  %s1062_s0 = sshll.u32 %s12480_s13, 4  ;;  %s1033_s22 = int_to_ptr.vmem [resolvable:$true] %s1032_s22  ;;  %s1063_s0 = int_to_ptr.vmem [resolvable:$true] %s1062_s0 }
 0x184   : > { %s12095_s11 = scalar_lea.hbm %s14543_s4, 6144 }
 0x185   : > { %p12096_p13 = scmp.ne.s32.totalorder %s14543_s4, %s12095_s11  ;;  %p12102_p9 = scmp.lt.u32.totalorder %s12095_s11, %s14543_s4 }
 0x187   : > { %p12098_p6 = pnand %p12096_p13, %p12792_p0 }
 0x189   : > { %p12099_p5 = pneg %p12098_p6 }
 0x18b   : > { %p12104_p10 = pnand %p12102_p9, %p12099_p5 }
 0x18d   : > { %12107 = shalt.err (!%p12104_p10)
}
 0x18e   : > { %s12108_s1 = scalar_lea.vmem %s1033_s22, 6144  ;;  %p12116_p4 = scmp.lt.s32.totalorder %s1033_s22, %s1033_s22 }
 0x18f   : > { %p12109_p1 = scmp.ne.s32.totalorder %s1033_s22, %s12108_s1  ;;  %p12117_p7 = scmp.lt.s32.totalorder %s12108_s1, %s12108_s1 }
 0x191   : > { %p12111_p2 = pnand %p12109_p1, %p12792_p0  ;;  %p12118_p8 = por %p12117_p7, %p12116_p4 }
 0x193   : > { %p12112_p3 = pneg %p12111_p2 }
 0x195   : > { %p12119_p11 = pnand %p12118_p8, %p12112_p3 }
 0x197   : > { %12122 = shalt.err (!%p12119_p11)
}
 0x198   : > { %11130 = dma.hbm_to_vmem [thread:$0]  (!%p12780_p12), %s14543_s4, 6144, %s1033_s22, [#allocation12], %s12467_s26, %s12467_s26, %s12468_s7  }
 0x199   : > { %s12123_s18 = scalar_lea.hbm %s12634_s27, 16 }
 0x19a   : > { %p12124_p13 = scmp.ne.s32.totalorder %s12634_s27, %s12123_s18  ;;  %p12130_p9 = scmp.lt.u32.totalorder %s12123_s18, %s12634_s27 }
 0x19c   : > { %p12126_p6 = pnand %p12124_p13, %p12792_p0 }
 0x19e   : > { %p12127_p5 = pneg %p12126_p6 }
 0x1a0   : > { %p12132_p10 = pnand %p12130_p9, %p12127_p5 }
 0x1a2   : > { %12135 = shalt.err (!%p12132_p10)
}
 0x1a3   : > { %s12136_s3 = scalar_lea.vmem %s1063_s0, 16  ;;  %s12143_s13 = scalar_lea.vmem %s1063_s0, 32 }
 0x1a4   : > { %p12137_p1 = scmp.ne.s32.totalorder %s1063_s0, %s12136_s3  ;;  %p12144_p4 = scmp.lt.s32.totalorder %s1063_s0, %s1063_s0 }
 0x1a5   : > { %p12145_p7 = scmp.lt.s32.totalorder %s12143_s13, %s12136_s3 }
 0x1a6   : > { %p12139_p2 = pnand %p12137_p1, %p12792_p0 }
 0x1a7   : > { %p12146_p8 = por %p12145_p7, %p12144_p4 }
 0x1a8   : > { %p12140_p3 = pneg %p12139_p2 }
 0x1aa   : > { %p12147_p11 = pnand %p12146_p8, %p12140_p3 }
 0x1ac   : > { %12150 = shalt.err (!%p12147_p11)
}
 0x1ad   : > { %s14557_s26 = sld [smem:[#allocation65_spill]]  ;;  %s12481_s7 = smov [#allocation19]  }
 0x1ae   : > { %11136 = dma.hbm_to_vmem [thread:$0]  (!%p12780_p12), %s12634_s27, 16, %s1063_s0, [#allocation15]  }
 0x1af   : > { %s1086_s22 = sshll.u32 %s12481_s7, 4  ;;  %s12482_s11 = smov [#allocation22]   ;;  %s1087_s22 = int_to_ptr.vmem [resolvable:$true] %s1086_s22 }
 0x1b0   : > { %s1110_s1 = sshll.u32 %s12482_s11, 4  ;;  %s1111_s1 = int_to_ptr.vmem [resolvable:$true] %s1110_s1 }
 0x1b3   : > { %s12151_s18 = scalar_lea.hbm %s14557_s26, 16 }
 0x1b4   : > { %p12152_p13 = scmp.ne.s32.totalorder %s14557_s26, %s12151_s18  ;;  %p12158_p9 = scmp.lt.u32.totalorder %s12151_s18, %s14557_s26 }
 0x1b6   : > { %p12154_p6 = pnand %p12152_p13, %p12792_p0 }
 0x1b8   : > { %p12155_p5 = pneg %p12154_p6 }
 0x1ba   : > { %p12160_p10 = pnand %p12158_p9, %p12155_p5 }
 0x1bc   : > { %12163 = shalt.err (!%p12160_p10)
}
 0x1bd   : > { %s12164_s3 = scalar_lea.vmem %s1087_s22, 16  ;;  %s12171_s0 = scalar_lea.vmem %s1087_s22, 32 }
 0x1be   : > { %p12165_p1 = scmp.ne.s32.totalorder %s1087_s22, %s12164_s3  ;;  %p12172_p4 = scmp.lt.s32.totalorder %s1087_s22, %s1087_s22 }
 0x1bf   : > { %p12173_p7 = scmp.lt.s32.totalorder %s12171_s0, %s12164_s3 }
 0x1c0   : > { %p12167_p2 = pnand %p12165_p1, %p12792_p0 }
 0x1c1   : > { %p12174_p8 = por %p12173_p7, %p12172_p4 }
 0x1c2   : > { %p12168_p3 = pneg %p12167_p2 }
 0x1c4   : > { %p12175_p11 = pnand %p12174_p8, %p12168_p3 }
 0x1c6   : > { %12178 = shalt.err (!%p12175_p11)
}
 0x1c7   : > { %s14558_s13 = sld [smem:[#allocation66_spill]] }
 0x1c8   : > { %11142 = dma.hbm_to_vmem [thread:$0]  (!%p12780_p12), %s14557_s26, 16, %s1087_s22, [#allocation18]  }
 0x1cd   : > { %s12179_s7 = scalar_lea.hbm %s14558_s13, 16 }
 0x1ce   : > { %p12180_p13 = scmp.ne.s32.totalorder %s14558_s13, %s12179_s7  ;;  %p12186_p9 = scmp.lt.u32.totalorder %s12179_s7, %s14558_s13 }
 0x1d0   : > { %p12182_p6 = pnand %p12180_p13, %p12792_p0 }
 0x1d2   : > { %p12183_p5 = pneg %p12182_p6 }
 0x1d4   : > { %p12188_p10 = pnand %p12186_p9, %p12183_p5 }
 0x1d6   : > { %12191 = shalt.err (!%p12188_p10)
}
 0x1d7   : > { %s12192_s11 = scalar_lea.vmem %s1111_s1, 16  ;;  %s12199_s18 = scalar_lea.vmem %s1111_s1, 32 }
 0x1d8   : > { %p12193_p1 = scmp.ne.s32.totalorder %s1111_s1, %s12192_s11  ;;  %p12200_p4 = scmp.lt.s32.totalorder %s1111_s1, %s1111_s1 }
 0x1d9   : > { %p12201_p7 = scmp.lt.s32.totalorder %s12199_s18, %s12192_s11 }
 0x1da   : > { %p12195_p2 = pnand %p12193_p1, %p12792_p0 }
 0x1db   : > { %p12202_p8 = por %p12201_p7, %p12200_p4 }
 0x1dc   : > { %p12196_p3 = pneg %p12195_p2 }
 0x1de   : > { %p12203_p11 = pnand %p12202_p8, %p12196_p3 }
 0x1e0   : > { %12206 = shalt.err (!%p12203_p11)
}
 0x1e1   : > { %s14559_s22 = sld [smem:[#allocation68_spill]]  ;;  %s12483_s3 = smov [#allocation25]  }
 0x1e2   : > { %11148 = dma.hbm_to_vmem [thread:$0]  (!%p12780_p12), %s14558_s13, 16, %s1111_s1, [#allocation21]  }
 0x1e3   : > { %s1134_s0 = sshll.u32 %s12483_s3, 4  ;;  %s12484_s7 = smov [#allocation28]   ;;  %s1135_s0 = int_to_ptr.vmem [resolvable:$true] %s1134_s0 }
 0x1e4   : > { %s1164_s4 = sshll.u32 %s12484_s7, 4  ;;  %s1165_s4 = int_to_ptr.vmem [resolvable:$true] %s1164_s4 }
 0x1e7   : > { %s12207_s5 = scalar_lea.hbm %s14559_s22, 16 }
 0x1e8   : > { %p12208_p13 = scmp.ne.s32.totalorder %s14559_s22, %s12207_s5  ;;  %p12214_p9 = scmp.lt.u32.totalorder %s12207_s5, %s14559_s22 }
 0x1ea   : > { %p12210_p6 = pnand %p12208_p13, %p12792_p0 }
 0x1ec   : > { %p12211_p5 = pneg %p12210_p6 }
 0x1ee   : > { %p12216_p10 = pnand %p12214_p9, %p12211_p5 }
 0x1f0   : > { %12219 = shalt.err (!%p12216_p10)
}
 0x1f1   : > { %s12220_s11 = scalar_lea.vmem %s1135_s0, 16  ;;  %s12227_s1 = scalar_lea.vmem %s1135_s0, 32 }
 0x1f2   : > { %p12221_p1 = scmp.ne.s32.totalorder %s1135_s0, %s12220_s11  ;;  %p12228_p4 = scmp.lt.s32.totalorder %s1135_s0, %s1135_s0 }
 0x1f3   : > { %p12229_p7 = scmp.lt.s32.totalorder %s12227_s1, %s12220_s11 }
 0x1f4   : > { %p12223_p2 = pnand %p12221_p1, %p12792_p0 }
 0x1f5   : > { %p12230_p8 = por %p12229_p7, %p12228_p4 }
 0x1f6   : > { %p12224_p3 = pneg %p12223_p2 }
 0x1f8   : > { %p12231_p11 = pnand %p12230_p8, %p12224_p3 }
 0x1fa   : > { %12234 = shalt.err (!%p12231_p11)
}
 0x1fb   : > { %s14560_s18 = sld [smem:[#allocation72_spill]] }
 0x1fc   : > { %11154 = dma.hbm_to_vmem [thread:$0]  (!%p12780_p12), %s14559_s22, 16, %s1135_s0, [#allocation24]  }
 0x201   : > { %s12235_s5 = scalar_lea.hbm %s14560_s18, 16 }
 0x202   : > { %p12236_p13 = scmp.ne.s32.totalorder %s14560_s18, %s12235_s5  ;;  %p12242_p9 = scmp.lt.u32.totalorder %s12235_s5, %s14560_s18 }
 0x204   : > { %p12238_p6 = pnand %p12236_p13, %p12792_p0 }
 0x206   : > { %p12239_p5 = pneg %p12238_p6 }
 0x208   : > { %p12244_p10 = pnand %p12242_p9, %p12239_p5 }
 0x20a   : > { %12247 = shalt.err (!%p12244_p10)
}
 0x20b   : > { %s12248_s3 = scalar_lea.vmem %s1165_s4, 16  ;;  %s12255_s7 = scalar_lea.vmem %s1165_s4, 32 }
 0x20c   : > { %p12249_p1 = scmp.ne.s32.totalorder %s1165_s4, %s12248_s3  ;;  %p12256_p4 = scmp.lt.s32.totalorder %s1165_s4, %s1165_s4 }
 0x20d   : > { %p12257_p7 = scmp.lt.s32.totalorder %s12255_s7, %s12248_s3 }
 0x20e   : > { %p12251_p2 = pnand %p12249_p1, %p12792_p0 }
 0x20f   : > { %p12258_p8 = por %p12257_p7, %p12256_p4 }
 0x210   : > { %p12252_p3 = pneg %p12251_p2 }
 0x212   : > { %p12259_p11 = pnand %p12258_p8, %p12252_p3 }
 0x214   : > { %12262 = shalt.err (!%p12259_p11)
}
 0x215   : > { %s14561_s0 = sld [smem:[#allocation73_spill]]  ;;  %s12485_s11 = smov [#allocation31]  }
 0x216   : > { %11160 = dma.hbm_to_vmem [thread:$0]  (!%p12780_p12), %s14560_s18, 16, %s1165_s4, [#allocation27]  }
 0x217   : > { %s1188_s5 = sshll.u32 %s12485_s11, 4  ;;  %s12486_s6 = smov [#allocation34]   ;;  %s1189_s5 = int_to_ptr.vmem [resolvable:$true] %s1188_s5 }
 0x218   : > { %s1218_s8 = sshll.u32 %s12486_s6, 4  ;;  %s1219_s8 = int_to_ptr.vmem [resolvable:$true] %s1218_s8 }
 0x21b   : > { %s14562_s1 = smov %s14561_s0  ;;  %s12263_s9 = scalar_lea.hbm %s14561_s0, 16 }
 0x21c   : > { %p12264_p13 = scmp.ne.s32.totalorder %s14562_s1, %s12263_s9  ;;  %p12270_p9 = scmp.lt.u32.totalorder %s12263_s9, %s14562_s1 }
 0x21e   : > { %p12266_p6 = pnand %p12264_p13, %p12792_p0 }
 0x220   : > { %p12267_p5 = pneg %p12266_p6 }
 0x222   : > { %p12272_p10 = pnand %p12270_p9, %p12267_p5 }
 0x224   : > { %12275 = shalt.err (!%p12272_p10)
}
 0x225   : > { %s12276_s3 = scalar_lea.vmem %s1189_s5, 16  ;;  %s12283_s4 = scalar_lea.vmem %s1189_s5, 32 }
 0x226   : > { %p12277_p1 = scmp.ne.s32.totalorder %s1189_s5, %s12276_s3  ;;  %p12284_p4 = scmp.lt.s32.totalorder %s1189_s5, %s1189_s5 }
 0x227   : > { %p12285_p7 = scmp.lt.s32.totalorder %s12283_s4, %s12276_s3 }
 0x228   : > { %p12279_p2 = pnand %p12277_p1, %p12792_p0 }
 0x229   : > { %p12286_p8 = por %p12285_p7, %p12284_p4 }
 0x22a   : > { %p12280_p3 = pneg %p12279_p2 }
 0x22c   : > { %p12287_p11 = pnand %p12286_p8, %p12280_p3 }
 0x22e   : > { %12290 = shalt.err (!%p12287_p11)
}
 0x22f   : > { %11166 = dma.hbm_to_vmem [thread:$0]  (!%p12780_p12), %s14562_s1, 16, %s1189_s5, [#allocation30]  }
 0x230   : > { %s12291_s9 = scalar_lea.hbm %s12714_s21, 16 }
 0x231   : > { %p12292_p13 = scmp.ne.s32.totalorder %s12714_s21, %s12291_s9  ;;  %p12298_p9 = scmp.lt.u32.totalorder %s12291_s9, %s12714_s21 }
 0x233   : > { %p12294_p6 = pnand %p12292_p13, %p12792_p0 }
 0x235   : > { %p12295_p5 = pneg %p12294_p6 }
 0x237   : > { %p12300_p10 = pnand %p12298_p9, %p12295_p5 }
 0x239   : > { %12303 = shalt.err (!%p12300_p10)
}
 0x23a   : > { %s12304_s6 = scalar_lea.vmem %s1219_s8, 16  ;;  %s12311_s7 = scalar_lea.vmem %s1219_s8, 32 }
 0x23b   : > { %p12305_p1 = scmp.ne.s32.totalorder %s1219_s8, %s12304_s6  ;;  %p12312_p4 = scmp.lt.s32.totalorder %s1219_s8, %s1219_s8 }
 0x23c   : > { %p12313_p7 = scmp.lt.s32.totalorder %s12311_s7, %s12304_s6 }
 0x23d   : > { %p12307_p2 = pnand %p12305_p1, %p12792_p0 }
 0x23e   : > { %p12314_p8 = por %p12313_p7, %p12312_p4 }
 0x23f   : > { %p12308_p3 = pneg %p12307_p2 }
 0x241   : > { %p12315_p11 = pnand %p12314_p8, %p12308_p3 }
 0x243   : > { %12318 = shalt.err (!%p12315_p11)
}
 0x244   : > { %11172 = dma.hbm_to_vmem [thread:$0]  (!%p12780_p12), %s12714_s21, 16, %s1219_s8, [#allocation33]  }
 0x245   : > { %p14563_p13 = scmp.ne.s32.totalorder %s14554_s2, 0 }
 0x246   : > { %p14564_p6 = scmp.eq.s32.totalorder (!%p14563_p13), %s12742_s15, 0 }
 0x247   : > { %1238 = sbr.rel (%p14563_p13) target bundleno = 15374 (0x3c0e), region = 168 }
 0x24e   : > { %12364 = dma.done.wait (%p14564_p6), [#allocation3], 768   ;;  %p14565_p5 = pmov %p14564_p6 }
 0x250   : > { %12366 = vsyncadd (%p14565_p5), [#allocation3], 4294966528  ;;  %p14566_p0 = pmov %p14565_p5 }
 0x252   : > { %12368 = dma.done.wait (%p14566_p0), [#allocation6], 1280   ;;  %p14567_p9 = pmov %p14566_p0 }
 0x253   : > { %p14568_p10 = pmov %p14566_p0 }
 0x254   : > { %12370 = vsyncadd (%p14567_p9), [#allocation6], 4294966016 }
 0x255   : > { %12372 = dma.done.wait (%p14568_p10), [#allocation9], 1024   ;;  %p14569_p12 = pmov %p14566_p0 }
 0x256   : > { %p14570_p1 = pmov %p14566_p0 }
 0x257   : > { %12374 = vsyncadd (%p14569_p12), [#allocation9], 4294966272 }
 0x258   : > { %12376 = dma.done.wait (%p14570_p1), [#allocation12], 7168   ;;  %p14571_p2 = pmov %p14566_p0 }
 0x259   : > { %p14572_p3 = pmov %p14566_p0 }
 0x25a   : > { %12378 = vsyncadd (%p14571_p2), [#allocation12], 4294960128 }
 0x25b   : > { %12380 = dma.done.wait (%p14572_p3), [#allocation15], 528   ;;  %p14573_p4 = pmov %p14566_p0 }
 0x25c   : > { %p14574_p7 = pmov %p14566_p0 }
 0x25d   : > { %12382 = vsyncadd (%p14573_p4), [#allocation15], 4294966768 }
 0x25e   : > { %12384 = dma.done.wait (%p14574_p7), [#allocation18], 528   ;;  %p14575_p8 = pmov %p14566_p0 }
 0x25f   : > { %p14576_p11 = pmov %p14566_p0 }
 0x260   : > { %12386 = vsyncadd (%p14575_p8), [#allocation18], 4294966768 }
 0x261   : > { %12388 = dma.done.wait (%p14576_p11), [#allocation21], 528   ;;  %p14577_p13 = pmov %p14566_p0 }
 0x262   : > { %p14578_p6 = pmov %p14566_p0 }
 0x263   : > { %12390 = vsyncadd (%p14577_p13), [#allocation21], 4294966768 }
 0x264   : > { %12392 = dma.done.wait (%p14578_p6), [#allocation24], 528   ;;  %p14579_p5 = pmov %p14566_p0 }
 0x266   : > { %12394 = vsyncadd (%p14579_p5), [#allocation24], 4294966768 }
 0x267   : > { %12396 = dma.done.wait (%p14566_p0), [#allocation27], 528   ;;  %p14580_p9 = pmov %p14566_p0 }
 0x268   : > { %p14581_p10 = pmov %p14566_p0 }
 0x269   : > { %12398 = vsyncadd (%p14580_p9), [#allocation27], 4294966768 }
 0x26a   : > { %12400 = dma.done.wait (%p14581_p10), [#allocation30], 1040   ;;  %p14582_p12 = pmov %p14566_p0 }
 0x26b   : > { %p14583_p1 = pmov %p14566_p0 }
 0x26c   : > { %12402 = vsyncadd (%p14582_p12), [#allocation30], 4294966256 }
 0x26d   : > { %12404 = dma.done.wait (%p14583_p1), [#allocation33], 528   ;;  %p14584_p2 = pmov %p14566_p0 }
 0x26e   : > { %s14585_s8 = sld [smem:[#allocation48_spill]]  ;;  %p1409_p3 = scmp.lt.s32.totalorder %s12742_s15, 1  ;;  %vm1497_vm0 = vcmask 781312   ;;  %v12487_v7 = vmov 95   ;;  %v12489_v21 = vmov 0.0|0.0   ;;  %vm12490_vm3 = vmmov 0  }
 0x26f   : > { %12406 = vsyncadd (%p14584_p2), [#allocation33], 4294966768  ;;  %11350 = vset.pattern.permute.xlu1 %v12487_v7  ;;  %11526 = vset.pattern.permute.xlu0 %v12487_v7  ;;  %s14586_s0 = sld [smem:[#allocation52_spill]]  ;;  %s14509_s11 = smov 120   ;;  %v12491_v34 = vmov 0.0   ;;  %vm1524_vm4 = vcmask 785408  }
 0x270   : > { %s1410_s2 = scalar_select %p1409_p3, %s12742_s15, 1  ;;  %10498 = vmatprep.subr.bf16.mxu1 %v12489_v21  ;;  %10483 = vmatprep.subr.bf16.mxu0 %v12489_v21  ;;  %vm1536_vm5 = vcmask 64512   ;;  %vm1538_vm6 = vcmask 195584   ;;  %vm1540_vm7 = vcmask 392192   ;;  %vm1546_vm8 = vcmask 654336  }
 0x271   : > { %9748 = vmatprep.mubr.msk.f32.mxu1 %vm12490_vm3, %v12491_v34  ;;  %9725 = vmatprep.mubr.msk.f32.mxu0 %vm12490_vm3, %v12491_v34  ;;  %s14491_s3 = smov 8   ;;  %s12493_s4 = smov 17   ;;  %vm2632_vm9 = vcmask 1043456   ;;  %vm2786_vm10 = vcmask 261120   ;;  %vm13488_vm11 = vmpackc.low %vm1536_vm5, %vm1536_vm5  ;;  %vm3010_vm14 = vcmask 93184   ;;  %vm3006_vm15 = vcmask 97280  }
 0x272   : > { %s9062_s23 = sshll.u32 %s1410_s2, 2  ;;  %s12494_s9 = smov 42  }
 0x273   : > { %s12495_s6 = smov 3   ;;  %s14489_s7 = smov 24  }
 0x274   : > { %s1412_s16 = scalar_lea.vmem %s14585_s8, %s9062_s23  ;;  %s12497_s8 = smov 48  }
 0x275   : > { %v1496_v0 = vld [vmem:[%s1412_s16] sm:$0xf]  ;;  %s14587_s5 = smov %s14586_s0  ;;  %s12498_s2 = smov 10  }
 0x276   : > { %v1498_v1 = vsel %vm1497_vm0, %v1496_v0, 0.0  ;;  %v1427_v18 = vld [vmem:[%s14586_s0] sm:$0xff]  ;;  %v1428_v19 = vld [vmem:[%s14587_s5 + $0x8] sm:$0xff]  ;;  %v1429_v20 = vld [vmem:[%s14587_s5 + $0x10] sm:$0xff]  ;;  %s14493_s23 = smov 104   ;;  %s14503_s16 = smov 88  }
 0x277   : > { %1499 = vadd.xlane.f32.xlu0 %v1498_v1  ;;  %v13121_v22 = vpack.c.bf16 %v1428_v19, %v1427_v18  ;;  %v1430_v23 = vld [vmem:[%s14587_s5 + $0x18] sm:$0xff]  ;;  %v1431_v25 = vld [vmem:[%s14587_s5 + $0x20] sm:$0xff]  ;;  %v1432_v26 = vld [vmem:[%s14587_s5 + $0x28] sm:$0xff]  ;;  %s14495_s0 = smov 112   ;;  %p14622_p7 = scmp.ne.s32.totalorder %s14551_s28, 0 }
 0x278   : > { %v13126_v24 = vpack.c.bf16 %v1430_v23, %v1429_v20  ;;  %v13134_v27 = vpack.c.bf16 %v1432_v26, %v1431_v25  ;;  %v1433_v28 = vld [vmem:[%s14587_s5 + $0x30] sm:$0xff]  ;;  %v1434_v29 = vld [vmem:[%s14587_s5 + $0x38] sm:$0xff]  ;;  %v1435_v31 = vld [vmem:[%s14587_s5 + $0x40] sm:$0xff] }
 0x279   : > { %10500 = vmatpush3.bf16.msra.mxu1 %v13121_v22  ;;  %10485 = vmatpush3.bf16.msra.mxu0 %v13121_v22  ;;  %v13142_v30 = vpack.c.bf16 %v1434_v29, %v1433_v28  ;;  %v1436_v32 = vld [vmem:[%s14587_s5 + $0x48] sm:$0xff] }
 0x27a   : > { %10501 = vmatprep.subr.bf16.mxu1 %v12489_v21  ;;  %10486 = vmatprep.subr.bf16.mxu0 %v12489_v21  ;;  %v13153_v33 = vpack.c.bf16 %v1436_v32, %v1435_v31 }
 0x27d   : > { %10503 = vmatpush3.bf16.msra.mxu1 %v13126_v24  ;;  %10488 = vmatpush3.bf16.msra.mxu0 %v13126_v24 }
 0x27e   : > { %10504 = vmatprep.subr.bf16.mxu1 %v12489_v21  ;;  %10489 = vmatprep.subr.bf16.mxu0 %v12489_v21 }
 0x281   : > { %10506 = vmatpush3.bf16.msra.mxu1 %v13134_v27  ;;  %10491 = vmatpush3.bf16.msra.mxu0 %v13134_v27 }
 0x282   : > { %10507 = vmatprep.subr.bf16.mxu1 %v12489_v21  ;;  %10492 = vmatprep.subr.bf16.mxu0 %v12489_v21 }
 0x285   : > { %10509 = vmatpush3.bf16.msra.mxu1 %v13142_v30  ;;  %10494 = vmatpush3.bf16.msra.mxu0 %v13142_v30 }
 0x286   : > { %10510 = vmatprep.subr.bf16.mxu1 %v12489_v21  ;;  %10495 = vmatprep.subr.bf16.mxu0 %v12489_v21 }
 0x289   : > { %10512 = vmatpush3.bf16.msra.mxu1 %v13153_v33  ;;  %10497 = vmatpush3.bf16.msra.mxu0 %v13153_v33 }
 0x28a   : > { %10528 = vmatprep.subr.bf16.mxu1 %v12489_v21  ;;  %10513 = vmatprep.subr.bf16.mxu0 %v12489_v21 }
 0x304   : > { %v1500_v2 = vpop.xlane.xlu0 %1499 }
 0x305   : > { %v13106_v3 = vmul.f32 0.010416667, %v1500_v2 }
 0x307   : > { %v1503_v4 = vsub.f32 %v1496_v0, %v13106_v3 }
 0x309   : > { %v1504_v5 = vmul.f32 %v1503_v4, %v1503_v4 }
 0x30b   : > { %v1505_v6 = vsel %vm1497_vm0, %v1504_v5, 0.0  ;;  %vm12522_vm0 = vmmov 1  }
 0x30c   : > { %1506 = vadd.xlane.f32.xlu0 %v1505_v6 }
 0x399   : > { %v1507_v8 = vpop.xlane.xlu0 %1506 }
 0x39a   : > { %v1508_v9 = vmul.f32 0.010416667, %v1507_v8 }
 0x39c   : > { %v1509_v10 = vadd.f32 1e-05, %v1508_v9 }
 0x39e   : > { %11527 = vrsqrt.f32 %v1509_v10  ;;  %vm1512_vm1 = vcmp.eq.f32.partialorder %v1509_v10, inf  ;;  %v1515_v13 = vand.u32 2147483648, %v1509_v10  ;;  %vm1514_vm2 = vcmp.eq.f32.partialorder %v1509_v10, 0.0 }
 0x3a8   : > { %v11528_v11 = vpop.eup %11527 }
 0x3a9   : > { %v1511_v12 = vmul.f32 %v11528_v11, %v1509_v10 }
 0x3ab   : > { %v1513_v14 = vsel %vm1512_vm1, %v1509_v10, %v1511_v12  ;;  %vm13557_vm1 = vmpackc.low %vm2632_vm9, %vm12522_vm0 }
 0x3ac   : > { %v13109_v15 = vsel %vm1514_vm2, %v1515_v13, %v1513_v14  ;;  %vm3753_vm2 = vcmask 130048  }
 0x3ad   : > { %11529 = vrcp.f32 %v13109_v15 }
 0x3b7   : > { %v11530_v16 = vpop.eup %11529 }
 0x3b8   : > { %v13112_v17 = vmul.f32 %v11530_v16, %v1503_v4 }
 0x3ba   : > { %1521 = vperm.xlu1 %11350, %v13112_v17  }
 0x3be   : > { %1620 = vrot.lane.b32.xlu1 %v13112_v17, %s14509_s11 }
 0x439   : > { %v1522_v35 = vpop.permute.xlu1 %1521 }
 0x43a   : > { %v13165_v36 = vsel %vm1524_vm4, %v13112_v17, %v1522_v35 }
 0x43b   : > { %1527 = vrot.lane.b32.xlu1 %v13165_v36, %s14491_s3  ;;  %1623 = vrot.lane.b32.xlu0 %v13165_v36, %s12493_s4  ;;  %s12502_s4 = smov 117   ;;  %s14508_s3 = smov 72  }
 0x43d   : > { %v1621_v37 = vpop.permute.xlu1 %1620 }
 0x43e   : > { %v1629_v40 = vsel %vm1536_vm5, %v1621_v37, %v13165_v36 }
 0x43f   : > { %1626 = vrot.lane.b32.xlu1 %v13165_v36, %s12494_s9  ;;  %1807 = vrot.lane.b32.xlu0 %v13165_v36, %s12495_s6  ;;  %s12503_s9 = smov 30   ;;  %s12504_s6 = smov 124  }
 0x443   : > { %1530 = vrot.lane.b32.xlu1 %v13165_v36, %s14489_s7  ;;  %1712 = vrot.lane.b32.xlu0 %v13165_v36, %s14509_s11  ;;  %s14497_s7 = smov 80  }
 0x447   : > { %1533 = vrot.lane.b32.xlu1 %v13165_v36, %s12497_s8  ;;  %1715 = vrot.lane.b32.xlu0 %v13165_v36, %s12498_s2  ;;  %s12505_s2 = smov 36  }
 0x44b   : > { %1801 = vrot.lane.b32.xlu1 %v13112_v17, %s14493_s23  ;;  %1982 = vrot.lane.b32.xlu0 %v13112_v17, %s14503_s16 }
 0x44f   : > { %1709 = vrot.lane.b32.xlu1 %v13112_v17, %s14495_s0  ;;  %1988 = vrot.lane.b32.xlu0 %v13165_v36, %s12502_s4  ;;  %s14505_s4 = smov 96  }
 0x453   : > { %1804 = vrot.lane.b32.xlu1 %v13165_v36, %s14495_s0  ;;  %1896 = vrot.lane.b32.xlu0 %v13165_v36, %s14493_s23  ;;  %s14499_s23 = smov 64   ;;  %s12513_s0 = smov 103  }
 0x457   : > { %1810 = vrot.lane.b32.xlu1 %v13165_v36, %s12503_s9  ;;  %1899 = vrot.lane.b32.xlu0 %v13165_v36, %s12504_s6  ;;  %s12508_s9 = smov 6   ;;  %s12509_s6 = smov 18  }
 0x45b   : > { %1718 = vrot.lane.b32.xlu1 %v13165_v36, %s12505_s2  ;;  %2074 = vrot.lane.b32.xlu0 %v13112_v17, %s14497_s7  ;;  %s12510_s2 = smov 12  }
 0x45f   : > { %1893 = vrot.lane.b32.xlu1 %v13112_v17, %s14505_s4  ;;  %2169 = vrot.lane.b32.xlu0 %v13165_v36, %s14497_s7  ;;  %s14501_s7 = smov 56  }
 0x463   : > { %1985 = vrot.lane.b32.xlu1 %v13165_v36, %s14505_s4  ;;  %2175 = vrot.lane.b32.xlu0 %v13165_v36, %s12508_s9  ;;  %s12514_s9 = smov 122  }
 0x467   : > { %1991 = vrot.lane.b32.xlu1 %v13165_v36, %s12509_s6  ;;  %2083 = vrot.lane.b32.xlu0 %v13165_v36, %s12510_s2  ;;  %s12515_s6 = smov 110   ;;  %s12516_s2 = smov 75  }
 0x46b   : > { %2166 = vrot.lane.b32.xlu1 %v13112_v17, %s14508_s3  ;;  %2258 = vrot.lane.b32.xlu0 %v13112_v17, %s14499_s23 }
 0x46f   : > { %2172 = vrot.lane.b32.xlu1 %v13165_v36, %s12513_s0  ;;  %2347 = vrot.lane.b32.xlu0 %v13165_v36, %s14499_s23  ;;  %s12518_s0 = smov 89   ;;  %s12519_s23 = smov 116  }
 0x473   : > { %2077 = vrot.lane.b32.xlu1 %v13165_v36, %s14503_s16  ;;  %2353 = vrot.lane.b32.xlu0 %v13165_v36, %s12514_s9  ;;  %s14507_s9 = smov 40  }
 0x477   : > { %2080 = vrot.lane.b32.xlu1 %v13165_v36, %s12515_s6  ;;  %2531 = vrot.lane.b32.xlu0 %v13165_v36, %s12516_s2  ;;  %s12521_s6 = smov 82   ;;  %s14589_s2 = sld [smem:[#allocation53_spill]] }
 0x47b   : > { %2344 = vrot.lane.b32.xlu1 %v13112_v17, %s14501_s7  ;;  %2439 = vrot.lane.b32.xlu0 %v13165_v36, %s14501_s7 }
 0x47f   : > { %2350 = vrot.lane.b32.xlu1 %v13165_v36, %s12518_s0  ;;  %2445 = vrot.lane.b32.xlu0 %v13165_v36, %s12519_s23  ;;  %s14588_s23 = sld [smem:[#allocation51_spill]]  ;;  %s14596_s0 = smov 80  }
 0x483   : > { %2261 = vrot.lane.b32.xlu1 %v13165_v36, %s14508_s3 }
 0x487   : > { %2528 = vrot.lane.b32.xlu1 %v13112_v17, %s14507_s9 }
 0x48b   : > { %2436 = vrot.lane.b32.xlu1 %v13112_v17, %s12497_s8 }
 0x48f   : > { %2442 = vrot.lane.b32.xlu1 %v13165_v36, %s12521_s6  ;;  %s14597_s6 = smov 64  }
 0x4ad   : > { %v1528_v38 = vpop.permute.xlu1 %1527  ;;  %v1624_v39 = vpop.permute.xlu0 %1623 }
 0x4ae   : > { %v1630_v41 = vsel %vm1538_vm6, %v1629_v40, %v1624_v39  ;;  %v1537_v46 = vsel %vm1536_vm5, %v13112_v17, %v1528_v38 }
 0x4b1   : > { %v1627_v42 = vpop.permute.xlu1 %1626  ;;  %v1808_v45 = vpop.permute.xlu0 %1807 }
 0x4b2   : > { %v1631_v43 = vsel %vm1540_vm7, %v1630_v41, %v1627_v42 }
 0x4b3   : > { %9749 = vmatmul.mubr.msk.f32.vlgmr.msra.gmra.mrb[0].mxu1 %vm1546_vm8, %v1631_v43 }
 0x4b4   : > { %10530 = vmatpush3.bf16.msra.mxu1 %v13121_v22  ;;  %9794 = vmatprep.mubr.msk.f32.mxu1 %vm12490_vm3, %v12491_v34 }
 0x4b5   : > { %v13237_v44 = vpop.permute.xlu1 %1530  ;;  %10531 = vmatprep.subr.bf16.mxu1 %v12489_v21  ;;  %v1713_v50 = vpop.permute.xlu0 %1712 }
 0x4b6   : > { %v1539_v47 = vsel %vm1538_vm6, %v1537_v46, %v13237_v44 }
 0x4b8   : > { %10533 = vmatpush3.bf16.msra.mxu1 %v13126_v24 }
 0x4b9   : > { %v13245_v48 = vpop.permute.xlu1 %1533  ;;  %10534 = vmatprep.subr.bf16.mxu1 %v12489_v21  ;;  %v1716_v53 = vpop.permute.xlu0 %1715 }
 0x4ba   : > { %v1541_v49 = vsel %vm1540_vm7, %v1539_v47, %v13245_v48 }
 0x4bb   : > { %9726 = vmatmul.mubr.msk.f32.vlgmr.msra.gmra.mrb[0].mxu0 %vm1546_vm8, %v1541_v49 }
 0x4bc   : > { %10515 = vmatpush3.bf16.msra.mxu0 %v13121_v22  ;;  %10536 = vmatpush3.bf16.msra.mxu1 %v13134_v27 }
 0x4bd   : > { %v1802_v51 = vpop.permute.xlu1 %1801  ;;  %10516 = vmatprep.subr.bf16.mxu0 %v12489_v21  ;;  %10537 = vmatprep.subr.bf16.mxu1 %v12489_v21  ;;  %v1983_v56 = vpop.permute.xlu0 %1982 }
 0x4be   : > { %9771 = vmatprep.mubr.msk.f32.mxu0 %vm12490_vm3, %v12491_v34 }
 0x4c0   : > { %10518 = vmatpush3.bf16.msra.mxu0 %v13126_v24  ;;  %10539 = vmatpush3.bf16.msra.mxu1 %v13142_v30 }
 0x4c1   : > { %v1710_v52 = vpop.permute.xlu1 %1709  ;;  %10519 = vmatprep.subr.bf16.mxu0 %v12489_v21  ;;  %10540 = vmatprep.subr.bf16.mxu1 %v12489_v21  ;;  %v1989_v0 = vpop.permute.xlu0 %1988 }
 0x4c2   : > { %v1721_v59 = vsel %vm1536_vm5, %v1710_v52, %v1713_v50 }
 0x4c3   : > { %v1722_v61 = vsel %vm1538_vm6, %v1721_v59, %v1716_v53  ;;  %v2753_v59 = vld [vmem:[#allocation7 + $0x8] sm:$0xff] }
 0x4c4   : > { %10521 = vmatpush3.bf16.msra.mxu0 %v13134_v27  ;;  %10542 = vmatpush3.bf16.msra.mxu1 %v13153_v33 }
 0x4c5   : > { %v1805_v54 = vpop.permute.xlu1 %1804  ;;  %10522 = vmatprep.subr.bf16.mxu0 %v12489_v21  ;;  %10558 = vmatprep.subr.bf16.mxu1 %v12489_v21  ;;  %v1897_v2 = vpop.permute.xlu0 %1896 }
 0x4c6   : > { %v1813_v55 = vsel %vm1536_vm5, %v1802_v51, %v1805_v54 }
 0x4c7   : > { %v1814_v57 = vsel %vm1538_vm6, %v1813_v55, %v1808_v45 }
 0x4c8   : > { %10524 = vmatpush3.bf16.msra.mxu0 %v13142_v30 }
 0x4c9   : > { %v1811_v58 = vpop.permute.xlu1 %1810  ;;  %10525 = vmatprep.subr.bf16.mxu0 %v12489_v21  ;;  %v1900_v7 = vpop.permute.xlu0 %1899 }
 0x4ca   : > { %v1815_v60 = vsel %vm1540_vm7, %v1814_v57, %v1811_v58  ;;  %v2752_v58 = vld [vmem:[#allocation7] sm:$0xff] }
 0x4cb   : > { %9795 = vmatmul.mubr.msk.f32.vlgmr.msra.gmra.mrb[2].mxu1 %vm1546_vm8, %v1815_v60  ;;  %v2754_v60 = vld [vmem:[#allocation7 + $0x10] sm:$0xff] }
 0x4cc   : > { %10527 = vmatpush3.bf16.msra.mxu0 %v13153_v33  ;;  %10560 = vmatpush3.bf16.msra.mxu1 %v13121_v22 }
 0x4cd   : > { %v1719_v62 = vpop.permute.xlu1 %1718  ;;  %10543 = vmatprep.subr.bf16.mxu0 %v12489_v21  ;;  %10561 = vmatprep.subr.bf16.mxu1 %v12489_v21  ;;  %v2075_v13 = vpop.permute.xlu0 %2074 }
 0x4ce   : > { %v1723_v63 = vsel %vm1540_vm7, %v1722_v61, %v1719_v62  ;;  %9840 = vmatprep.mubr.msk.f32.mxu1 %vm12490_vm3, %v12491_v34  ;;  %v10675_v61 = vpack.c.bf16 %v2753_v59, %v2752_v58  ;;  %v2755_v62 = vld [vmem:[#allocation7 + $0x18] sm:$0xff] }
 0x4cf   : > { %9772 = vmatmul.mubr.msk.f32.vlgmr.msra.gmra.mrb[2].mxu0 %vm1546_vm8, %v1723_v63  ;;  %v10679_v63 = vpack.c.bf16 %v2755_v62, %v2754_v60 }
 0x4d0   : > { %10545 = vmatpush3.bf16.msra.mxu0 %v13121_v22  ;;  %10563 = vmatpush3.bf16.msra.mxu1 %v13126_v24 }
 0x4d1   : > { %v1894_v1 = vpop.permute.xlu1 %1893  ;;  %10546 = vmatprep.subr.bf16.mxu0 %v12489_v21  ;;  %10564 = vmatprep.subr.bf16.mxu1 %v12489_v21  ;;  %v2170_v17 = vpop.permute.xlu0 %2169 }
 0x4d2   : > { %9817 = vmatprep.mubr.msk.f32.mxu0 %vm12490_vm3, %v12491_v34  ;;  %v1902_v8 = vsel %vm1536_vm5, %v1894_v1, %v1897_v2 }
 0x4d3   : > { %v1903_v12 = vsel %vm1538_vm6, %v1902_v8, %v1900_v7 }
 0x4d4   : > { %10548 = vmatpush3.bf16.msra.mxu0 %v13126_v24  ;;  %10566 = vmatpush3.bf16.msra.mxu1 %v13134_v27  ;;  %v1904_v14 = vsel %vm1540_vm7, %v1903_v12, %v13237_v44 }
 0x4d5   : > { %v13289_v4 = vpop.permute.xlu1 %1985  ;;  %10549 = vmatprep.subr.bf16.mxu0 %v12489_v21  ;;  %10567 = vmatprep.subr.bf16.mxu1 %v12489_v21  ;;  %v2176_v19 = vpop.permute.xlu0 %2175 }
 0x4d6   : > { %v1994_v6 = vsel %vm1536_vm5, %v1983_v56, %v13289_v4  ;;  %v1542_v56 = vlaneseq }
 0x4d7   : > { %v1995_v9 = vsel %vm1538_vm6, %v1994_v6, %v1989_v0  ;;  %v1425_v0 = vld [vmem:[%s14588_s23] sm:$0xff] }
 0x4d8   : > { %10551 = vmatpush3.bf16.msra.mxu0 %v13134_v27  ;;  %10569 = vmatpush3.bf16.msra.mxu1 %v13142_v30  ;;  %v13416_v57 = vshrl.u32 %v1542_v56, 7 }
 0x4d9   : > { %v1992_v5 = vpop.permute.xlu1 %1991  ;;  %10552 = vmatprep.subr.bf16.mxu0 %v12489_v21  ;;  %10570 = vmatprep.subr.bf16.mxu1 %v12489_v21  ;;  %v2084_v29 = vpop.permute.xlu0 %2083 }
 0x4da   : > { %v1996_v11 = vsel %vm1540_vm7, %v1995_v9, %v1992_v5  ;;  %v1544_v5 = vsub.s32 0, %v13416_v57 }
 0x4dc   : > { %10554 = vmatpush3.bf16.msra.mxu0 %v13142_v30  ;;  %10572 = vmatpush3.bf16.msra.mxu1 %v13153_v33  ;;  %v1545_v7 = vrot.slane %v1425_v0, %v1544_v5 }
 0x4dd   : > { %v2167_v10 = vpop.permute.xlu1 %2166  ;;  %10555 = vmatprep.subr.bf16.mxu0 %v12489_v21  ;;  %10588 = vmatprep.subr.bf16.mxu1 %v12489_v21  ;;  %v2259_v37 = vpop.permute.xlu0 %2258 }
 0x4de   : > { %v2178_v20 = vsel %vm1536_vm5, %v2167_v10, %v2170_v17 }
 0x4df   : > { %9841 = vmatmul.mubr.msk.f32.vlgmr.msra.gmra.mrb[4].mxu1 %vm1546_vm8, %v1996_v11 }
 0x4e0   : > { %10557 = vmatpush3.bf16.msra.mxu0 %v13153_v33  ;;  %10590 = vmatpush3.bf16.msra.mxu1 %v13121_v22 }
 0x4e1   : > { %10573 = vmatprep.subr.bf16.mxu0 %v12489_v21  ;;  %10591 = vmatprep.subr.bf16.mxu1 %v12489_v21  ;;  %v2173_v16 = vpop.permute.xlu1 %2172  ;;  %v2348_v39 = vpop.permute.xlu0 %2347 }
 0x4e2   : > { %9886 = vmatprep.mubr.msk.f32.mxu1 %vm12490_vm3, %v12491_v34  ;;  %v2179_v23 = vsel %vm1538_vm6, %v2178_v20, %v2173_v16  ;;  %v1726_v16 = vsub.s32 2, %v13416_v57 }
 0x4e3   : > { %9818 = vmatmul.mubr.msk.f32.vlgmr.msra.gmra.mrb[4].mxu0 %vm1546_vm8, %v1904_v14  ;;  %v2180_v26 = vsel %vm1540_vm7, %v2179_v23, %v2176_v19 }
 0x4e4   : > { %10575 = vmatpush3.bf16.msra.mxu0 %v13121_v22  ;;  %10593 = vmatpush3.bf16.msra.mxu1 %v13126_v24  ;;  %v1727_v20 = vrot.slane %v1425_v0, %v1726_v16 }
 0x4e5   : > { %10576 = vmatprep.subr.bf16.mxu0 %v12489_v21  ;;  %10594 = vmatprep.subr.bf16.mxu1 %v12489_v21  ;;  %v2078_v18 = vpop.permute.xlu1 %2077  ;;  %v2354_v44 = vpop.permute.xlu0 %2353 }
 0x4e6   : > { %9863 = vmatprep.mubr.msk.f32.mxu0 %vm12490_vm3, %v12491_v34  ;;  %v2086_v28 = vsel %vm1536_vm5, %v2075_v13, %v2078_v18  ;;  %v1818_v13 = vsub.s32 3, %v13416_v57 }
 0x4e8   : > { %10578 = vmatpush3.bf16.msra.mxu0 %v13126_v24  ;;  %10596 = vmatpush3.bf16.msra.mxu1 %v13134_v27  ;;  %v1819_v14 = vrot.slane %v1425_v0, %v1818_v13 }
 0x4e9   : > { %10579 = vmatprep.subr.bf16.mxu0 %v12489_v21  ;;  %10597 = vmatprep.subr.bf16.mxu1 %v12489_v21  ;;  %v13333_v25 = vpop.permute.xlu1 %2080 }
 0x4ea   : > { %v2087_v31 = vsel %vm1538_vm6, %v2086_v28, %v13333_v25 }
 0x4eb   : > { %v2088_v35 = vsel %vm1540_vm7, %v2087_v31, %v2084_v29 }
 0x4ec   : > { %10581 = vmatpush3.bf16.msra.mxu0 %v13134_v27  ;;  %10599 = vmatpush3.bf16.msra.mxu1 %v13142_v30 }
 0x4ed   : > { %10582 = vmatprep.subr.bf16.mxu0 %v12489_v21  ;;  %10600 = vmatprep.subr.bf16.mxu1 %v12489_v21  ;;  %v2345_v32 = vpop.permute.xlu1 %2344 }
 0x4ee   : > { %v2356_v41 = vsel %vm1536_vm5, %v2345_v32, %v2348_v39  ;;  %v1999_v32 = vsub.s32 5, %v13416_v57 }
 0x4f0   : > { %10584 = vmatpush3.bf16.msra.mxu0 %v13142_v30  ;;  %10602 = vmatpush3.bf16.msra.mxu1 %v13153_v33 }
 0x4f1   : > { %10585 = vmatprep.subr.bf16.mxu0 %v12489_v21  ;;  %10618 = vmatprep.subr.bf16.mxu1 %v12489_v21  ;;  %v2351_v38 = vpop.permute.xlu1 %2350 }
 0x4f2   : > { %v2357_v42 = vsel %vm1538_vm6, %v2356_v41, %v2351_v38 }
 0x4f3   : > { %9887 = vmatmul.mubr.msk.f32.vlgmr.msra.gmra.mrb[6].mxu1 %vm1546_vm8, %v2180_v26  ;;  %v2358_v45 = vsel %vm1540_vm7, %v2357_v42, %v2354_v44 }
 0x4f4   : > { %10587 = vmatpush3.bf16.msra.mxu0 %v13153_v33  ;;  %10620 = vmatpush3.bf16.msra.mxu1 %v13121_v22 }
 0x4f5   : > { %10603 = vmatprep.subr.bf16.mxu0 %v12489_v21  ;;  %10621 = vmatprep.subr.bf16.mxu1 %v12489_v21  ;;  %v2262_v40 = vpop.permute.xlu1 %2261 }
 0x4f6   : > { %9932 = vmatprep.mubr.msk.f32.mxu1 %vm12490_vm3, %v12491_v34  ;;  %v2264_v43 = vsel %vm1536_vm5, %v2259_v37, %v2262_v40  ;;  %v1907_v37 = vsub.s32 4, %v13416_v57 }
 0x4f7   : > { %9864 = vmatmul.mubr.msk.f32.vlgmr.msra.gmra.mrb[6].mxu0 %vm1546_vm8, %v2088_v35  ;;  %v2265_v46 = vsel %vm1538_vm6, %v2264_v43, %v13289_v4  ;;  %v2000_v35 = vrot.slane %v1425_v0, %v1999_v32  ;;  %v9081_v32 = vld [vmem:[%s14589_s2] ss:$0 sm:$0xff]  ;;  %s14598_s2 = smov 112  }
 0x4f8   : > { %10605 = vmatpush3.bf16.msra.mxu0 %v13121_v22  ;;  %10623 = vmatpush3.bf16.msra.mxu1 %v13126_v24  ;;  %v2266_v47 = vsel %vm1540_vm7, %v2265_v46, %v13165_v36  ;;  %v2532_v36 = vpop.permute.xlu0 %2531  ;;  %v1908_v41 = vrot.slane %v1425_v0, %v1907_v37 }
 0x4f9   : > { %10606 = vmatprep.subr.bf16.mxu0 %v12489_v21  ;;  %10624 = vmatprep.subr.bf16.mxu1 %v12489_v21  ;;  %v2529_v49 = vpop.permute.xlu1 %2528 }
 0x4fa   : > { %9909 = vmatprep.mubr.msk.f32.mxu0 %vm12490_vm3, %v12491_v34 }
 0x4fc   : > { %10608 = vmatpush3.bf16.msra.mxu0 %v13126_v24  ;;  %10626 = vmatpush3.bf16.msra.mxu1 %v13134_v27 }
 0x4fd   : > { %10609 = vmatprep.subr.bf16.mxu0 %v12489_v21  ;;  %10627 = vmatprep.subr.bf16.mxu1 %v12489_v21  ;;  %v2437_v50 = vpop.permute.xlu1 %2436 }
 0x500   : > { %10611 = vmatpush3.bf16.msra.mxu0 %v13134_v27  ;;  %10629 = vmatpush3.bf16.msra.mxu1 %v13142_v30 }
 0x501   : > { %10612 = vmatprep.subr.bf16.mxu0 %v12489_v21  ;;  %10630 = vmatprep.subr.bf16.mxu1 %v12489_v21  ;;  %v2443_v52 = vpop.permute.xlu1 %2442 }
 0x504   : > { %10614 = vmatpush3.bf16.msra.mxu0 %v13142_v30  ;;  %10632 = vmatpush3.bf16.msra.mxu1 %v13153_v33 }
 0x505   : > { %10615 = vmatprep.subr.bf16.mxu0 %v12489_v21  ;;  %10648 = vmatprep.subr.bf16.mxu1 %v12489_v21 }
 0x507   : > { %9933 = vmatmul.mubr.msk.f32.vlgmr.msra.gmra.mrb[8].mxu1 %vm1546_vm8, %v2358_v45 }
 0x508   : > { %10617 = vmatpush3.bf16.msra.mxu0 %v13153_v33  ;;  %10650 = vmatpush3.bf16.msra.mxu1 %v13121_v22 }
 0x509   : > { %10633 = vmatprep.subr.bf16.mxu0 %v12489_v21  ;;  %10651 = vmatprep.subr.bf16.mxu1 %v12489_v21 }
 0x50a   : > { %9978 = vmatprep.mubr.msk.f32.mxu1 %vm12490_vm3, %v12491_v34 }
 0x50b   : > { %9910 = vmatmul.mubr.msk.f32.vlgmr.msra.gmra.mrb[8].mxu0 %vm1546_vm8, %v2266_v47  ;;  %v2183_v47 = vsub.s32 7, %v13416_v57 }
 0x50c   : > { %10635 = vmatpush3.bf16.msra.mxu0 %v13121_v22  ;;  %10653 = vmatpush3.bf16.msra.mxu1 %v13126_v24  ;;  %v2534_v22 = vsel %vm1536_vm5, %v2529_v49, %v13245_v48 }
 0x50d   : > { %10636 = vmatprep.subr.bf16.mxu0 %v12489_v21  ;;  %10654 = vmatprep.subr.bf16.mxu1 %v12489_v21  ;;  %v2535_v51 = vsel %vm1538_vm6, %v2534_v22, %v2532_v36  ;;  %v2184_v49 = vrot.slane %v1425_v0, %v2183_v47  ;;  %v2091_v36 = vsub.s32 6, %v13416_v57 }
 0x50e   : > { %9955 = vmatprep.mubr.msk.f32.mxu0 %vm12490_vm3, %v12491_v34 }
 0x510   : > { %10638 = vmatpush3.bf16.msra.mxu0 %v13126_v24  ;;  %10656 = vmatpush3.bf16.msra.mxu1 %v13134_v27  ;;  %v2440_v24 = vpop.permute.xlu0 %2439 }
 0x511   : > { %10639 = vmatprep.subr.bf16.mxu0 %v12489_v21  ;;  %10657 = vmatprep.subr.bf16.mxu1 %v12489_v21  ;;  %v2448_v48 = vsel %vm1536_vm5, %v2437_v50, %v2440_v24 }
 0x512   : > { %v2449_v53 = vsel %vm1538_vm6, %v2448_v48, %v2443_v52 }
 0x514   : > { %10641 = vmatpush3.bf16.msra.mxu0 %v13134_v27  ;;  %10659 = vmatpush3.bf16.msra.mxu1 %v13142_v30  ;;  %v2536_v27 = vsel %vm1540_vm7, %v2535_v51, %v13333_v25  ;;  %v2446_v54 = vpop.permute.xlu0 %2445  ;;  %v2092_v51 = vrot.slane %v1425_v0, %v2091_v36 }
 0x515   : > { %10642 = vmatprep.subr.bf16.mxu0 %v12489_v21  ;;  %10660 = vmatprep.subr.bf16.mxu1 %v12489_v21  ;;  %v2450_v55 = vsel %vm1540_vm7, %v2449_v53, %v2446_v54 }
 0x518   : > { %10644 = vmatpush3.bf16.msra.mxu0 %v13142_v30  ;;  %10662 = vmatpush3.bf16.msra.mxu1 %v13153_v33  ;;  %v1413_v30 = vld [vmem:[#allocation2] sm:$0xff] }
 0x519   : > { %10645 = vmatprep.subr.bf16.mxu0 %v12489_v21  ;;  %10676 = vmatprep.subr.bf16.mxu1 %v10675_v61 }
 0x51b   : > { %9979 = vmatmul.mubr.msk.f32.vlgmr.msra.gmra.mrb[10].mxu1 %vm1546_vm8, %v2536_v27 }
 0x51c   : > { %10647 = vmatpush3.bf16.msra.mxu0 %v13153_v33  ;;  %v1634_v33 = vsub.s32 1, %v13416_v57  ;;  %10678 = vmatpush3.bf16.msra.mxu1 %v10675_v61 }
 0x51d   : > { %10680 = vmatprep.subr.bf16.mxu1 %v10679_v63 }
 0x51e   : > { %v1635_v2 = vrot.slane %v1425_v0, %v1634_v33 }
 0x51f   : > { %9956 = vmatmul.mubr.msk.f32.vlgmr.msra.gmra.mrb[10].mxu0 %vm1546_vm8, %v2450_v55 }
 0x520   : > { %9993 = vmatprep.mubr.msk.f32.mxu0 %vm1540_vm7, %v1413_v30  ;;  %10682 = vmatpush3.bf16.msra.mxu1 %v10679_v63  ;;  %v1426_v30 = vld [vmem:[%s14588_s23 + $0x8] sm:$0xf] }
 0x521   : > { %v2362_v58 = vrot.slane %v1426_v30, %v1634_v33  ;;  %v2270_v62 = vrot.slane %v1426_v30, %v1544_v5  ;;  %v1414_v5 = vld [vmem:[#allocation2 + $0x8] sm:$0xff] }
 0x586   : > { %v1705_v1 = vpop.f32.mrb[0].mxu1 }
 0x587   : > { %v9750_v4 = vpop.f32.mrb[1].mxu1  ;;  %v1706_v6 = vadd.f32 %v1705_v1, %v1635_v2 }
 0x589   : > { %v2615_v9 = vrot.slane %v1706_v6, 4  ;;  %v2540_v6 = vrot.slane %v1426_v30, %v1818_v13  ;;  %v1416_v13 = vld [vmem:[#allocation2 + $0x18] sm:$0xff] }
 0x58e   : > { %v1616_v8 = vpop.f32.mrb[0].mxu0 }
 0x58f   : > { %v1617_v10 = vadd.f32 %v1616_v8, %v1545_v7  ;;  %v9727_v11 = vpop.f32.mrb[1].mxu0 }
 0x591   : > { %v2633_v12 = vsel %vm2632_vm9, %v1617_v10, %v2615_v9  ;;  %v2454_v10 = vrot.slane %v1426_v30, %v1726_v16  ;;  %v1418_v16 = vld [vmem:[#allocation2 + $0x28] sm:$0xff] }
 0x59e   : > { %v1889_v17 = vpop.f32.mrb[2].mxu1 }
 0x59f   : > { %v1890_v18 = vadd.f32 %v1889_v17, %v1819_v14  ;;  %v9796_v19 = vpop.f32.mrb[3].mxu1 }
 0x5a0   : > { %v1415_v19 = vld [vmem:[#allocation2 + $0x10] sm:$0xff] }
 0x5a1   : > { %v2618_v25 = vrot.slane %v1890_v18, 4 }
 0x5a2   : > { %v1797_v23 = vpop.f32.mrb[2].mxu0 }
 0x5a3   : > { %v1798_v26 = vadd.f32 %v1797_v23, %v1727_v20  ;;  %v9773_v28 = vpop.f32.mrb[3].mxu0  ;;  %v1417_v20 = vld [vmem:[#allocation2 + $0x20] sm:$0xff] }
 0x5a5   : > { %v2634_v29 = vsel %vm2632_vm9, %v1798_v26, %v2618_v25 }
 0x5a6   : > { %v10663_v31 = vpack.c.bf16 %v2634_v29, %v2633_v12 }
 0x5a8   : > { %10664 = vmatprep.subr.bf16.mxu0 %v10663_v31 }
 0x5a9   : > { %10666 = vmatpush3.bf16.msra.mxu0 %v10663_v31 }
 0x5b2   : > { %v2070_v38 = vpop.f32.mrb[4].mxu1 }
 0x5b3   : > { %v2071_v39 = vadd.f32 %v2070_v38, %v2000_v35  ;;  %v9842_v40 = vpop.f32.mrb[5].mxu1 }
 0x5b5   : > { %v2621_v43 = vrot.slane %v2071_v39, 4 }
 0x5b6   : > { %v1978_v42 = vpop.f32.mrb[4].mxu0 }
 0x5b7   : > { %v1979_v44 = vadd.f32 %v1978_v42, %v1908_v41  ;;  %v9819_v45 = vpop.f32.mrb[5].mxu0 }
 0x5b9   : > { %v2635_v46 = vsel %vm2632_vm9, %v1979_v44, %v2621_v43 }
 0x5c6   : > { %v2254_v50 = vpop.f32.mrb[6].mxu1 }
 0x5c7   : > { %v2255_v22 = vadd.f32 %v2254_v50, %v2184_v49  ;;  %v9888_v24 = vpop.f32.mrb[7].mxu1 }
 0x5c9   : > { %v2624_v48 = vrot.slane %v2255_v22, 4 }
 0x5ca   : > { %v2162_v52 = vpop.f32.mrb[6].mxu0 }
 0x5cb   : > { %v2163_v27 = vadd.f32 %v2162_v52, %v2092_v51  ;;  %v9865_v53 = vpop.f32.mrb[7].mxu0 }
 0x5cd   : > { %v2636_v54 = vsel %vm2632_vm9, %v2163_v27, %v2624_v48 }
 0x5ce   : > { %v10667_v55 = vpack.c.bf16 %v2636_v54, %v2635_v46 }
 0x5d0   : > { %10668 = vmatprep.subr.bf16.mxu0 %v10667_v55 }
 0x5d1   : > { %10670 = vmatpush3.bf16.msra.mxu0 %v10667_v55 }
 0x5da   : > { %v2432_v59 = vpop.f32.mrb[8].mxu1 }
 0x5db   : > { %v2433_v60 = vadd.f32 %v2432_v59, %v2362_v58  ;;  %v9934_v61 = vpop.f32.mrb[9].mxu1 }
 0x5dd   : > { %v2627_v1 = vrot.slane %v2433_v60, 4 }
 0x5de   : > { %v2340_v63 = vpop.f32.mrb[8].mxu0 }
 0x5df   : > { %v2341_v2 = vadd.f32 %v2340_v63, %v2270_v62  ;;  %v9911_v4 = vpop.f32.mrb[9].mxu0 }
 0x5e1   : > { %v2637_v0 = vsel %vm2632_vm9, %v2341_v2, %v2627_v1 }
 0x5ee   : > { %v2610_v7 = vpop.f32.mrb[10].mxu1 }
 0x5ef   : > { %v2611_v8 = vadd.f32 %v2610_v7, %v2540_v6  ;;  %v9980_v9 = vpop.f32.mrb[11].mxu1  ;;  %v2908_v6 = vadd.s32 8, %v13416_v57  ;;  %v2910_v7 = vand.u32 127, %v1542_v56 }
 0x5f1   : > { %v2630_v12 = vrot.slane %v2611_v8, 4  ;;  %vm13521_vm12 = vcmp.gt.s32.totalorder %v2910_v7, %v2908_v6  ;;  %vm13526_vm13 = vcmp.gt.s32.totalorder %v2910_v7, %v13416_v57 }
 0x5f2   : > { %v2524_v11 = vpop.f32.mrb[10].mxu0 }
 0x5f3   : > { %v2525_v14 = vadd.f32 %v2524_v11, %v2454_v10  ;;  %v9957_v17 = vpop.f32.mrb[11].mxu0 }
 0x5f5   : > { %v2638_v33 = vsel %vm2632_vm9, %v2525_v14, %v2630_v12 }
 0x5f6   : > { %v10671_v18 = vpack.c.bf16 %v2638_v33, %v2637_v0 }
 0x5f8   : > { %10672 = vmatprep.subr.bf16.mxu0 %v10671_v18 }
 0x5f9   : > { %10674 = vmatpush3.bf16.msra.mxu0 %v10671_v18 }
 0x5fc   : > { %9994 = vmatmul.mubr.msk.f32.vlgmr.msra.gmra.mrb[12].mxu0 %vm1540_vm7, %v1414_v5 }
 0x5fd   : > { %9996 = vmatprep.mubr.msk.f32.mxu0 %vm1540_vm7, %v1415_v19 }
 0x600   : > { %9997 = vmatmul.mubr.msk.f32.gmra.mrb[14].mxu0 %vm1540_vm7, %v1416_v13 }
 0x601   : > { %9999 = vmatprep.mubr.msk.f32.mxu0 %vm1540_vm7, %v1417_v20 }
 0x604   : > { %10000 = vmatmul.mubr.msk.f32.gmra.mrb[16].mxu0 %vm1540_vm7, %v1418_v16 }
 0x6cf   : > { %v13439_v23 = vpop.f32.mrb[12].mxu0 }
 0x6d0   : > { %v13441_v25 = vpop.f32.mrb[13].mxu0 }
 0x6d1   : > { %10010 = vmatprep.mubr.msk.f32.mxu1 %vm2786_vm10, %v13441_v25 }
 0x6d2   : > { %10011 = vmatmul.mubr.msk.f32.vlgmr.msra.gmra.mrb[12].mxu1 %vm2786_vm10, %v13439_v23 }
 0x6d3   : > { %v13447_v26 = vpop.f32.mrb[14].mxu0 }
 0x6d4   : > { %v13449_v28 = vpop.f32.mrb[15].mxu0 }
 0x6d5   : > { %10013 = vmatprep.mubr.msk.f32.mxu1 %vm2786_vm10, %v13449_v28 }
 0x6d6   : > { %10014 = vmatmul.mubr.msk.f32.gmra.mrb[14].mxu1 %vm2786_vm10, %v13447_v26 }
 0x6d7   : > { %v13455_v29 = vpop.f32.mrb[16].mxu0 }
 0x6d8   : > { %v13457_v31 = vpop.f32.mrb[17].mxu0 }
 0x6d9   : > { %10016 = vmatprep.mubr.msk.f32.mxu1 %vm2786_vm10, %v13457_v31 }
 0x6da   : > { %10017 = vmatmul.mubr.msk.f32.gmra.mrb[16].mxu1 %vm2786_vm10, %v13455_v29 }
 0x7a5   : > { %v10012_v35 = vpop.f32.mrb[12].mxu1 }
 0x7a6   : > { %v2877_v37 = vadd.f32 %v10012_v35, %v9081_v32  ;;  %v2871_v38 = vpop.f32.mrb[13].mxu1 }
 0x7a7   : > { %v2872_v39 = vadd.f32 %v9081_v32, %v2871_v38 }
 0x7a8   : > { %v13477_v46 = vmul.f32 0.35355338, %v2877_v37  ;;  %v3763_v47 = vrot.slane %v2877_v37, 4 }
 0x7a9   : > { %v10015_v40 = vpop.f32.mrb[14].mxu1  ;;  %v13464_v41 = vpack.i.bf16 %v2877_v37, %v2872_v39  ;;  %v13466_v42 = vmul.f32 0.35355338, %v2872_v39 }
 0x7aa   : > { %v2881_v43 = vpop.f32.mrb[15].mxu1  ;;  %v13504_v60 = vadd.f32 %v10015_v40, %v9081_v32 }
 0x7ab   : > { %v13468_v44 = vadd.f32 %v9081_v32, %v2881_v43  ;;  %11357 = vrot.lane.b32.xlu0 %v13464_v41, %s14503_s16  ;;  %11352 = vrot.lane.b32.xlu1 %v13464_v41, %s14505_s4 }
 0x7ac   : > { %10023 = vmatprep.mubr.msk.f32.mxu1 %vm1536_vm5, %v13466_v42 }
 0x7ad   : > { %v3764_v45 = vrot.slane %v13468_v44, 4  ;;  %v10018_v50 = vpop.f32.mrb[16].mxu1 }
 0x7ae   : > { %v2891_v22 = vpop.f32.mrb[17].mxu1  ;;  %v13512_v63 = vadd.f32 %v10018_v50, %v9081_v32 }
 0x7af   : > { %3120 = vrot.lane.b32.xlu0 %v13477_v46, %s14509_s11  ;;  %3118 = vrot.lane.b32.xlu1 %v13466_v42, %s14509_s11  ;;  %v3765_v49 = vsel %vm2632_vm9, %v3763_v47, %v3764_v45  ;;  %v13506_v61 = vadd.f32 %v9081_v32, %v2891_v22 }
 0x7b0   : > { %v13484_v36 = vpack.i.bf16 %v3764_v45, %v3765_v49  ;;  %v5452_v1 = vrot.slane %v13512_v63, 4 }
 0x7b1   : > { %v13510_v62 = vpack.i.bf16 %v13506_v61, %v13504_v60  ;;  %v5451_v2 = vrot.slane %v13506_v61, 4 }
 0x7b3   : > { %v5453_v4 = vsel %vm2632_vm9, %v5451_v2, %v5452_v1 }
 0x7b4   : > { %v13517_v0 = vpack.i.bf16 %v5452_v1, %v5453_v4 }
 0x81d   : > { %v11358_v24 = vpop.permute.xlu0 %11357  ;;  %v11353_v51 = vpop.permute.xlu1 %11352 }
 0x81e   : > { %v11360_v52 = vunpack.i.h.bf16 %v11358_v24  ;;  %v11359_v48 = vunpack.i.l.bf16 %v11358_v24  ;;  %v11355_v27 = vunpack.i.h.bf16 %v11353_v51  ;;  %v11354_v53 = vunpack.i.l.bf16 %v11353_v51 }
 0x820   : > { %v10683_v55 = vpack.c.bf16 %v11355_v27, %v11354_v53  ;;  %v10695_v30 = vpack.c.bf16 %v11360_v52, %v11359_v48 }
 0x821   : > { %v3119_v58 = vpop.permute.xlu1 %3118  ;;  %v3121_v59 = vpop.permute.xlu0 %3120 }
 0x822   : > { %10685 = vmatprep.subr.msk.bf16.mxu1 %vm13488_vm11, %v10683_v55 }
 0x823   : > { %10688 = vmatpush3.bf16.xpose.msk.msra.mxu1 %vm13488_vm11, %v10683_v55 }
 0x824   : > { %10697 = vmatprep.subr.msk.bf16.mxu1 %vm13488_vm11, %v10695_v30 }
 0x82a   : > { %10024 = vmatmul.mubr.msk.f32.vlgmr.msra.gmra.mrb[18].mxu1 %vm1536_vm5, %v13477_v46 }
 0x82b   : > { %10700 = vmatpush3.bf16.xpose.msk.msra.mxu1 %vm13488_vm11, %v10695_v30  ;;  %10037 = vmatprep.mubr.msk.f32.mxu1 %vm1536_vm5, %v3119_v58 }
 0x832   : > { %10038 = vmatmul.mubr.msk.f32.vlgmr.msra.gmra.mrb[20].mxu1 %vm1536_vm5, %v3121_v59 }
 0x8fd   : > { %v10025_v10 = vpop.f32.mrb[18].mxu1 }
 0x8fe   : > { %v3005_v11 = vsel %vm13521_vm12, -1e+30, %v10025_v10  ;;  %v2995_v12 = vpop.f32.mrb[19].mxu1 }
 0x8ff   : > { %v3004_v14 = vsel %vm13526_vm13, -1e+30, %v2995_v12  ;;  %v3011_v56 = vsel %vm3010_vm14, %v3005_v11, -inf }
 0x900   : > { %3012 = vmax.xlane.f32.xlu0 %v3011_v56  ;;  %v3007_v17 = vsel %vm3006_vm15, %v3004_v14, -inf }
 0x901   : > { %3008 = vmax.xlane.f32.xlu1 %v3007_v17 }
 0x905   : > { %v10039_v57 = vpop.f32.mrb[20].mxu1 }
 0x906   : > { %v3210_v33 = vsel %vm13521_vm12, -1e+30, %v10039_v57  ;;  %v3200_v18 = vpop.f32.mrb[21].mxu1 }
 0x907   : > { %v3209_v5 = vsel %vm13526_vm13, -1e+30, %v3200_v18  ;;  %v3214_v19 = vsel %vm3010_vm14, %v3210_v33, -inf }
 0x908   : > { %3215 = vmax.xlane.f32.xlu1 %v3214_v19  ;;  %v3211_v13 = vsel %vm3006_vm15, %v3209_v5, -inf }
 0x909   : > { %3212 = vmax.xlane.f32.xlu0 %v3211_v13 }
 0x98d   : > { %v3013_v20 = vpop.xlane.xlu0 %3012 }
 0x98e   : > { %v3015_v16 = vsub.f32 %v3005_v11, %v3013_v20  ;;  %v3009_v32 = vpop.xlane.xlu1 %3008 }
 0x98f   : > { %v3014_v35 = vsub.f32 %v3004_v14, %v3009_v32 }
 0x990   : > { %v3018_v37 = vmul.f32 1.442695, %v3015_v16 }
 0x991   : > { %v3016_v38 = vmul.f32 1.442695, %v3014_v35 }
 0x992   : > { %11531 = vpow2.f32 %v3018_v37 }
 0x993   : > { %11533 = vpow2.f32 %v3016_v38 }
 0x995   : > { %v3216_v39 = vpop.xlane.xlu1 %3215 }
 0x996   : > { %v3218_v40 = vsub.f32 %v3210_v33, %v3216_v39  ;;  %v3213_v43 = vpop.xlane.xlu0 %3212 }
 0x997   : > { %v3217_v45 = vsub.f32 %v3209_v5, %v3213_v43 }
 0x998   : > { %v3221_v47 = vmul.f32 1.442695, %v3218_v40 }
 0x999   : > { %v3219_v49 = vmul.f32 1.442695, %v3217_v45 }
 0x99a   : > { %11535 = vpow2.f32 %v3221_v47 }
 0x99b   : > { %11537 = vpow2.f32 %v3219_v49 }
 0x99c   : > { %v11532_v50 = vpop.eup %11531 }
 0x99d   : > { %v11534_v22 = vpop.eup %11533  ;;  %v3023_v24 = vsel %vm3010_vm14, %v11532_v50, 0.0 }
 0x99e   : > { %3024 = vadd.xlane.f32.xlu1 %v3023_v24  ;;  %v3020_v51 = vsel %vm3006_vm15, %v11534_v22, 0.0 }
 0x99f   : > { %3021 = vadd.xlane.f32.xlu0 %v3020_v51 }
 0x9a4   : > { %v11536_v52 = vpop.eup %11535 }
 0x9a5   : > { %v11538_v48 = vpop.eup %11537  ;;  %v3226_v27 = vsel %vm3010_vm14, %v11536_v52, 0.0 }
 0x9a6   : > { %3227 = vadd.xlane.f32.xlu1 %v3226_v27  ;;  %v3223_v53 = vsel %vm3006_vm15, %v11538_v48, 0.0 }
 0x9a7   : > { %3224 = vadd.xlane.f32.xlu0 %v3223_v53 }
 0x9b7   : > { %11367 = vrot.lane.b32.xlu1 %v13464_v41, %s14501_s7  ;;  %s14601_s7 = smov 104  }
 0x9bb   : > { %11372 = vrot.lane.b32.xlu1 %v13464_v41, %s14596_s0 }
 0x9bd   : > { %11362 = vrot.lane.b32.xlu0 %v13464_v41, %s14597_s6 }
 0x9bf   : > { %3323 = vrot.lane.b32.xlu1 %v13477_v46, %s14598_s2 }
 0x9c1   : > { %3321 = vrot.lane.b32.xlu0 %v13466_v42, %s14598_s2 }
 0xa2b   : > { %v3025_v30 = vpop.xlane.xlu1 %3024 }
 0xa2c   : > { %v3022_v55 = vpop.xlane.xlu0 %3021 }
 0xa2d   : > { %11539 = vrcp.f32 %v3022_v55 }
 0xa2e   : > { %11541 = vrcp.f32 %v3025_v30 }
 0xa33   : > { %v3228_v58 = vpop.xlane.xlu1 %3227 }
 0xa34   : > { %v3225_v59 = vpop.xlane.xlu0 %3224 }
 0xa35   : > { %11543 = vrcp.f32 %v3225_v59 }
 0xa36   : > { %11545 = vrcp.f32 %v3228_v58 }
 0xa37   : > { %v11540_v1 = vpop.eup %11539  ;;  %v11368_v2 = vpop.permute.xlu1 %11367 }
 0xa38   : > { %v11363_v4 = vpop.permute.xlu0 %11362  ;;  %v3028_v6 = vmul.f32 %v11540_v1, %v11534_v22  ;;  %v11370_v7 = vunpack.i.h.bf16 %v11368_v2  ;;  %v11369_v10 = vunpack.i.l.bf16 %v11368_v2  ;;  %v11542_v57 = vpop.eup %11541 }
 0xa39   : > { %v11365_v11 = vunpack.i.h.bf16 %v11363_v4  ;;  %v11364_v12 = vunpack.i.l.bf16 %v11363_v4  ;;  %v3029_v13 = vmul.f32 %v11542_v57, %v11532_v50 }
 0xa3a   : > { %10030 = vmatprep.mubr.msk.f32.mxu0 %vm3006_vm15, %v3028_v6  ;;  %v10701_v33 = vpack.c.bf16 %v11370_v7, %v11369_v10 }
 0xa3b   : > { %v10689_v56 = vpack.c.bf16 %v11365_v11, %v11364_v12  ;;  %v11373_v17 = vpop.permute.xlu1 %11372 }
 0xa3c   : > { %v11375_v18 = vunpack.i.h.bf16 %v11373_v17  ;;  %v11374_v5 = vunpack.i.l.bf16 %v11373_v17  ;;  %v3322_v37 = vpop.permute.xlu0 %3321 }
 0xa3d   : > { %10691 = vmatprep.subr.msk.bf16.mxu0 %vm13557_vm1, %v10689_v56 }
 0xa3e   : > { %10694 = vmatpush3.bf16.msk.msra.mxu0 %vm13557_vm1, %v10689_v56  ;;  %v10707_v32 = vpack.c.bf16 %v11375_v18, %v11374_v5 }
 0xa3f   : > { %v11544_v19 = vpop.eup %11543  ;;  %10703 = vmatprep.subr.msk.bf16.mxu0 %vm13557_vm1, %v10701_v33  ;;  %v3324_v38 = vpop.permute.xlu1 %3323 }
 0xa40   : > { %v11546_v20 = vpop.eup %11545  ;;  %v3231_v16 = vmul.f32 %v11544_v19, %v11538_v48 }
 0xa41   : > { %10031 = vmatmul.mubr.msk.f32.vlgmr.msra.gmra.mrb[18].mxu0 %vm3006_vm15, %v3029_v13  ;;  %v3232_v35 = vmul.f32 %v11546_v20, %v11536_v52 }
 0xa42   : > { %10706 = vmatpush3.bf16.msk.msra.mxu0 %vm13557_vm1, %v10701_v33  ;;  %10044 = vmatprep.mubr.msk.f32.mxu0 %vm3006_vm15, %v3231_v16 }
 0xa43   : > { %10709 = vmatprep.subr.msk.bf16.mxu0 %vm13488_vm11, %v10707_v32 }
 0xa45   : > { %10045 = vmatmul.mubr.msk.f32.vlgmr.msra.gmra.mrb[20].mxu0 %vm3006_vm15, %v3232_v35 }
 0xa46   : > { %10051 = vmatprep.mubr.msk.f32.mxu0 %vm1536_vm5, %v3322_v37 }
 0xa4b   : > { %10712 = vmatpush3.bf16.xpose.msk.msra.mxu0 %vm13488_vm11, %v10707_v32 }
 0xa52   : > { %10052 = vmatmul.mubr.msk.f32.vlgmr.msra.gmra.mrb[22].mxu0 %vm1536_vm5, %v3324_v38 }
 0xb14   : > { %v13579_v39 = vpop.f32.mrb[18].mxu0 }
 0xb15   : > { %v13581_v40 = vpop.f32.mrb[19].mxu0 }
 0xb18   : > { %v13583_v43 = vpop.f32.mrb[20].mxu0 }
 0xb19   : > { %v13585_v45 = vpop.f32.mrb[21].mxu0 }
 0xb25   : > { %v10053_v47 = vpop.f32.mrb[22].mxu0 }
 0xb26   : > { %v3413_v49 = vsel %vm13521_vm12, -1e+30, %v10053_v47  ;;  %v3403_v50 = vpop.f32.mrb[23].mxu0 }
 0xb27   : > { %v3412_v22 = vsel %vm13526_vm13, -1e+30, %v3403_v50  ;;  %v3417_v24 = vsel %vm3010_vm14, %v3413_v49, -inf }
 0xb28   : > { %3418 = vmax.xlane.f32.xlu1 %v3417_v24  ;;  %v3414_v51 = vsel %vm3006_vm15, %v3412_v22, -inf }
 0xb29   : > { %3415 = vmax.xlane.f32.xlu0 %v3414_v51 }
 0xb39   : > { %11377 = vrot.lane.b32.xlu1 %v13464_v41, %s12497_s8 }
 0xb3d   : > { %3524 = vrot.lane.b32.xlu1 %v13466_v42, %s14601_s7 }
 0xb41   : > { %3526 = vrot.lane.b32.xlu1 %v13477_v46, %s14601_s7 }
 0xbb5   : > { %v3419_v52 = vpop.xlane.xlu1 %3418 }
 0xbb6   : > { %v3421_v48 = vsub.f32 %v3413_v49, %v3419_v52  ;;  %v3416_v27 = vpop.xlane.xlu0 %3415 }
 0xbb7   : > { %v3420_v53 = vsub.f32 %v3412_v22, %v3416_v27 }
 0xbb8   : > { %v3424_v55 = vmul.f32 1.442695, %v3421_v48 }
 0xbb9   : > { %v3422_v30 = vmul.f32 1.442695, %v3420_v53  ;;  %v11378_v58 = vpop.permute.xlu1 %11377 }
 0xbba   : > { %11547 = vpow2.f32 %v3424_v55  ;;  %v11380_v59 = vunpack.i.h.bf16 %v11378_v58  ;;  %v11379_v1 = vunpack.i.l.bf16 %v11378_v58 }
 0xbbb   : > { %11549 = vpow2.f32 %v3422_v30 }
 0xbbc   : > { %v10713_v2 = vpack.c.bf16 %v11380_v59, %v11379_v1 }
 0xbbd   : > { %v3525_v13 = vpop.permute.xlu1 %3524 }
 0xbbe   : > { %10715 = vmatprep.subr.msk.bf16.mxu1 %vm13557_vm1, %v10713_v2 }
 0xbbf   : > { %10718 = vmatpush3.bf16.msk.msra.mxu1 %vm13557_vm1, %v10713_v2 }
 0xbc1   : > { %v3527_v20 = vpop.permute.xlu1 %3526 }
 0xbc4   : > { %v11548_v42 = vpop.eup %11547 }
 0xbc5   : > { %v3429_v4 = vsel %vm3010_vm14, %v11548_v42, 0.0  ;;  %v11550_v6 = vpop.eup %11549 }
 0xbc6   : > { %3430 = vadd.xlane.f32.xlu0 %v3429_v4  ;;  %v3426_v7 = vsel %vm3006_vm15, %v11550_v6, 0.0 }
 0xbca   : > { %3427 = vadd.xlane.f32.xlu0 %v3426_v7 }
 0xbe0   : > { %11382 = vrot.lane.b32.xlu0 %v13464_v41, %s14508_s3 }
 0xc53   : > { %v3431_v10 = vpop.xlane.xlu0 %3430 }
 0xc54   : > { %11551 = vrcp.f32 %v3431_v10 }
 0xc57   : > { %v3428_v11 = vpop.xlane.xlu0 %3427 }
 0xc58   : > { %11553 = vrcp.f32 %v3428_v11  ;;  %v2902_v11 = vmul.f32 0.35355338, %v13468_v44 }
 0xc5b   : > { %v11383_v12 = vpop.permute.xlu0 %11382 }
 0xc5c   : > { %v11385_v56 = vunpack.i.h.bf16 %v11383_v12  ;;  %v11384_v17 = vunpack.i.l.bf16 %v11383_v12 }
 0xc5e   : > { %v10719_v57 = vpack.c.bf16 %v11385_v56, %v11384_v17  ;;  %v11552_v33 = vpop.eup %11551 }
 0xc5f   : > { %v3435_v19 = vmul.f32 %v11552_v33, %v11548_v42 }
 0xc60   : > { %10721 = vmatprep.subr.msk.bf16.mxu1 %vm13488_vm11, %v10719_v57 }
 0xc62   : > { %v11554_v18 = vpop.eup %11553 }
 0xc63   : > { %v3434_v5 = vmul.f32 %v11554_v18, %v11550_v6 }
 0xc65   : > { %10058 = vmatprep.mubr.msk.f32.mxu1 %vm3006_vm15, %v3434_v5  ;;  %v3759_v5 = vrot.slane %v13477_v46, 4 }
 0xc66   : > { %10059 = vmatmul.mubr.msk.f32.vlgmr.msra.gmra.mrb[22].mxu1 %vm3006_vm15, %v3435_v19 }
 0xc67   : > { %10724 = vmatpush3.bf16.xpose.msk.msra.mxu1 %vm13488_vm11, %v10719_v57  ;;  %10065 = vmatprep.mubr.msk.f32.mxu1 %vm1536_vm5, %v3525_v13  ;;  %v13638_v57 = vrot.slane %v2902_v11, 4 }
 0xc69   : > { %v13645_v19 = vsel %vm2632_vm9, %v3759_v5, %v13638_v57 }
 0xc6e   : > { %10066 = vmatmul.mubr.msk.f32.vlgmr.msra.gmra.mrb[24].mxu1 %vm1536_vm5, %v3527_v20 }
 0xd39   : > { %v13615_v16 = vpop.f32.mrb[22].mxu1 }
 0xd3a   : > { %v13617_v32 = vpop.f32.mrb[23].mxu1 }
 0xd41   : > { %v10067_v35 = vpop.f32.mrb[24].mxu1 }
 0xd42   : > { %v3616_v37 = vsel %vm13521_vm12, -1e+30, %v10067_v35  ;;  %v3606_v38 = vpop.f32.mrb[25].mxu1 }
 0xd43   : > { %v3615_v47 = vsel %vm13526_vm13, -1e+30, %v3606_v38  ;;  %v3620_v49 = vsel %vm3010_vm14, %v3616_v37, -inf }
 0xd44   : > { %3621 = vmax.xlane.f32.xlu1 %v3620_v49  ;;  %v3617_v50 = vsel %vm3006_vm15, %v3615_v47, -inf }
 0xd45   : > { %3618 = vmax.xlane.f32.xlu0 %v3617_v50 }
 0xd55   : > { %11387 = vrot.lane.b32.xlu1 %v13464_v41, %s14507_s9 }
 0xdd1   : > { %v3622_v22 = vpop.xlane.xlu1 %3621 }
 0xdd2   : > { %v3624_v24 = vsub.f32 %v3616_v37, %v3622_v22  ;;  %v3619_v51 = vpop.xlane.xlu0 %3618 }
 0xdd3   : > { %v3623_v52 = vsub.f32 %v3615_v47, %v3619_v51 }
 0xdd4   : > { %v3627_v48 = vmul.f32 1.442695, %v3624_v24 }
 0xdd5   : > { %v3625_v27 = vmul.f32 1.442695, %v3623_v52  ;;  %v11388_v53 = vpop.permute.xlu1 %11387 }
 0xdd6   : > { %11555 = vpow2.f32 %v3627_v48  ;;  %v11390_v55 = vunpack.i.h.bf16 %v11388_v53  ;;  %v11389_v30 = vunpack.i.l.bf16 %v11388_v53 }
 0xdd7   : > { %11557 = vpow2.f32 %v3625_v27 }
 0xdd8   : > { %v10725_v58 = vpack.c.bf16 %v11390_v55, %v11389_v30 }
 0xdda   : > { %10727 = vmatprep.subr.msk.bf16.mxu0 %vm13557_vm1, %v10725_v58 }
 0xddb   : > { %10730 = vmatpush3.bf16.msk.msra.mxu0 %vm13557_vm1, %v10725_v58 }
 0xde0   : > { %v11556_v59 = vpop.eup %11555 }
 0xde1   : > { %v3632_v41 = vsel %vm3010_vm14, %v11556_v59, 0.0  ;;  %v11558_v1 = vpop.eup %11557 }
 0xde2   : > { %3633 = vadd.xlane.f32.xlu0 %v3632_v41  ;;  %v3629_v2 = vsel %vm3006_vm15, %v11558_v1, 0.0 }
 0xde6   : > { %3630 = vadd.xlane.f32.xlu0 %v3629_v2 }
 0xdfc   : > { %11392 = vrot.lane.b32.xlu0 %v13484_v36, %s14505_s4 }
 0xe6f   : > { %v3634_v42 = vpop.xlane.xlu0 %3633 }
 0xe70   : > { %11559 = vrcp.f32 %v3634_v42 }
 0xe73   : > { %v3631_v4 = vpop.xlane.xlu0 %3630 }
 0xe74   : > { %11561 = vrcp.f32 %v3631_v4 }
 0xe77   : > { %v11393_v6 = vpop.permute.xlu0 %11392 }
 0xe78   : > { %v11395_v7 = vunpack.i.h.bf16 %v11393_v6  ;;  %v11394_v10 = vunpack.i.l.bf16 %v11393_v6 }
 0xe7a   : > { %v10731_v12 = vpack.c.bf16 %v11395_v7, %v11394_v10  ;;  %v11560_v56 = vpop.eup %11559 }
 0xe7b   : > { %v3638_v18 = vmul.f32 %v11560_v56, %v11556_v59 }
 0xe7c   : > { %10733 = vmatprep.subr.msk.bf16.mxu0 %vm13488_vm11, %v10731_v12 }
 0xe7e   : > { %v11562_v17 = vpop.eup %11561 }
 0xe7f   : > { %v3637_v33 = vmul.f32 %v11562_v17, %v11558_v1 }
 0xe81   : > { %10072 = vmatprep.mubr.msk.f32.mxu0 %vm3006_vm15, %v3637_v33 }
 0xe82   : > { %10073 = vmatmul.mubr.msk.f32.vlgmr.msra.gmra.mrb[24].mxu0 %vm3006_vm15, %v3638_v18 }
 0xe83   : > { %10736 = vmatpush3.bf16.xpose.msk.msra.mxu0 %vm13488_vm11, %v10731_v12  ;;  %10079 = vmatprep.mubr.msk.f32.mxu0 %vm1536_vm5, %v13645_v19 }
 0xe8a   : > { %10080 = vmatmul.mubr.msk.f32.vlgmr.msra.gmra.mrb[26].mxu0 %vm1536_vm5, %v13638_v57 }
 0xf55   : > { %v13653_v44 = vpop.f32.mrb[24].mxu0 }
 0xf56   : > { %v13655_v46 = vpop.f32.mrb[25].mxu0 }
 0xf5d   : > { %v10081_v13 = vpop.f32.mrb[26].mxu0 }
 0xf5e   : > { %v3854_v20 = vsel %vm13521_vm12, -1e+30, %v10081_v13  ;;  %v3844_v35 = vpop.f32.mrb[27].mxu0 }
 0xf5f   : > { %v3853_v37 = vsel %vm13526_vm13, -1e+30, %v3844_v35  ;;  %v3858_v38 = vsel %vm3010_vm14, %v3854_v20, -inf }
 0xf60   : > { %3859 = vmax.xlane.f32.xlu0 %v3858_v38  ;;  %v3855_v47 = vsel %vm3006_vm15, %v3853_v37, -inf }
 0xf61   : > { %3856 = vmax.xlane.f32.xlu1 %v3855_v47 }
 0xf72   : > { %11397 = vrot.lane.b32.xlu1 %v13484_v36, %s14597_s6 }
 0xf76   : > { %3965 = vrot.lane.b32.xlu1 %v13645_v19, %s14509_s11 }
 0xfed   : > { %v3860_v49 = vpop.xlane.xlu0 %3859 }
 0xfee   : > { %v3862_v50 = vsub.f32 %v3854_v20, %v3860_v49  ;;  %v3857_v22 = vpop.xlane.xlu1 %3856 }
 0xfef   : > { %v3861_v24 = vsub.f32 %v3853_v37, %v3857_v22 }
 0xff0   : > { %v3865_v51 = vmul.f32 1.442695, %v3862_v50 }
 0xff1   : > { %v3863_v52 = vmul.f32 1.442695, %v3861_v24 }
 0xff2   : > { %11563 = vpow2.f32 %v3865_v51  ;;  %v11398_v48 = vpop.permute.xlu1 %11397 }
 0xff3   : > { %11565 = vpow2.f32 %v3863_v52  ;;  %v11400_v27 = vunpack.i.h.bf16 %v11398_v48  ;;  %v11399_v53 = vunpack.i.l.bf16 %v11398_v48 }
 0xff5   : > { %v10737_v55 = vpack.c.bf16 %v11400_v27, %v11399_v53 }
 0xff6   : > { %v3966_v1 = vpop.permute.xlu1 %3965 }
 0xff7   : > { %10739 = vmatprep.subr.msk.bf16.mxu1 %vm13557_vm1, %v10737_v55 }
 0xff8   : > { %10742 = vmatpush3.bf16.msk.msra.mxu1 %vm13557_vm1, %v10737_v55 }
 0xffc   : > { %v11564_v30 = vpop.eup %11563 }
 0xffd   : > { %v11566_v58 = vpop.eup %11565  ;;  %v3870_v59 = vsel %vm3010_vm14, %v11564_v30, 0.0 }
 0xffe   : > { %3871 = vadd.xlane.f32.xlu0 %v3870_v59  ;;  %v3867_v41 = vsel %vm3006_vm15, %v11566_v58, 0.0 }
 0xfff   : > { %3868 = vadd.xlane.f32.xlu1 %v3867_v41 }
0x1010   : > { %3967 = vrot.lane.b32.xlu1 %v13638_v57, %s14509_s11 }
0x1014   : > { %11402 = vrot.lane.b32.xlu0 %v13484_v36, %s14503_s16  ;;  %s14602_s16 = smov 56  }
0x108b   : > { %v3872_v2 = vpop.xlane.xlu0 %3871 }
0x108c   : > { %11567 = vrcp.f32 %v3872_v2  ;;  %v3869_v42 = vpop.xlane.xlu1 %3868 }
0x108d   : > { %11569 = vrcp.f32 %v3869_v42 }
0x108f   : > { %v11403_v4 = vpop.permute.xlu0 %11402 }
0x1090   : > { %v11405_v6 = vunpack.i.h.bf16 %v11403_v4  ;;  %v11404_v7 = vunpack.i.l.bf16 %v11403_v4  ;;  %v3968_v33 = vpop.permute.xlu1 %3967 }
0x1092   : > { %v10743_v10 = vpack.c.bf16 %v11405_v6, %v11404_v7 }
0x1094   : > { %10745 = vmatprep.subr.msk.bf16.mxu1 %vm13488_vm11, %v10743_v10 }
0x1096   : > { %v11568_v11 = vpop.eup %11567 }
0x1097   : > { %v11570_v12 = vpop.eup %11569  ;;  %v3876_v17 = vmul.f32 %v11568_v11, %v11564_v30 }
0x1098   : > { %v3875_v56 = vmul.f32 %v11570_v12, %v11566_v58 }
0x109a   : > { %10086 = vmatprep.mubr.msk.f32.mxu1 %vm3006_vm15, %v3875_v56 }
0x109b   : > { %10087 = vmatmul.mubr.msk.f32.vlgmr.msra.gmra.mrb[26].mxu1 %vm3006_vm15, %v3876_v17 }
0x109c   : > { %10748 = vmatpush3.bf16.xpose.msk.msra.mxu1 %vm13488_vm11, %v10743_v10  ;;  %10093 = vmatprep.mubr.msk.f32.mxu1 %vm1536_vm5, %v3966_v1 }
0x10a3   : > { %10094 = vmatmul.mubr.msk.f32.vlgmr.msra.gmra.mrb[28].mxu1 %vm1536_vm5, %v3968_v33 }
0x116e   : > { %v13685_v18 = vpop.f32.mrb[26].mxu1 }
0x116f   : > { %v13687_v5 = vpop.f32.mrb[27].mxu1 }
0x1176   : > { %v10095_v13 = vpop.f32.mrb[28].mxu1 }
0x1177   : > { %v4057_v20 = vsel %vm13521_vm12, -1e+30, %v10095_v13  ;;  %v4047_v35 = vpop.f32.mrb[29].mxu1 }
0x1178   : > { %v4056_v37 = vsel %vm13526_vm13, -1e+30, %v4047_v35  ;;  %v4061_v38 = vsel %vm3010_vm14, %v4057_v20, -inf }
0x1179   : > { %4062 = vmax.xlane.f32.xlu1 %v4061_v38  ;;  %v4058_v47 = vsel %vm3006_vm15, %v4056_v37, -inf }
0x117a   : > { %4059 = vmax.xlane.f32.xlu0 %v4058_v47 }
0x118a   : > { %11407 = vrot.lane.b32.xlu1 %v13484_v36, %s14602_s16 }
0x118e   : > { %4168 = vrot.lane.b32.xlu1 %v13645_v19, %s14598_s2 }
0x1192   : > { %4170 = vrot.lane.b32.xlu1 %v13638_v57, %s14598_s2 }
0x1206   : > { %v4063_v49 = vpop.xlane.xlu1 %4062 }
0x1207   : > { %v4065_v50 = vsub.f32 %v4057_v20, %v4063_v49  ;;  %v4060_v22 = vpop.xlane.xlu0 %4059 }
0x1208   : > { %v4064_v24 = vsub.f32 %v4056_v37, %v4060_v22 }
0x1209   : > { %v4068_v51 = vmul.f32 1.442695, %v4065_v50 }
0x120a   : > { %v4066_v52 = vmul.f32 1.442695, %v4064_v24  ;;  %v11408_v48 = vpop.permute.xlu1 %11407 }
0x120b   : > { %11571 = vpow2.f32 %v4068_v51  ;;  %v11410_v27 = vunpack.i.h.bf16 %v11408_v48  ;;  %v11409_v53 = vunpack.i.l.bf16 %v11408_v48 }
0x120c   : > { %11573 = vpow2.f32 %v4066_v52 }
0x120d   : > { %v10749_v55 = vpack.c.bf16 %v11410_v27, %v11409_v53 }
0x120e   : > { %v4169_v17 = vpop.permute.xlu1 %4168 }
0x120f   : > { %10751 = vmatprep.subr.msk.bf16.mxu0 %vm13557_vm1, %v10749_v55 }
0x1210   : > { %10754 = vmatpush3.bf16.msk.msra.mxu0 %vm13557_vm1, %v10749_v55 }
0x1212   : > { %v4171_v33 = vpop.permute.xlu1 %4170 }
0x1215   : > { %v11572_v30 = vpop.eup %11571 }
0x1216   : > { %v4073_v58 = vsel %vm3010_vm14, %v11572_v30, 0.0  ;;  %v11574_v59 = vpop.eup %11573 }
0x1217   : > { %4074 = vadd.xlane.f32.xlu0 %v4073_v58  ;;  %v4070_v41 = vsel %vm3006_vm15, %v11574_v59, 0.0 }
0x121b   : > { %4071 = vadd.xlane.f32.xlu0 %v4070_v41 }
0x1231   : > { %11412 = vrot.lane.b32.xlu0 %v13484_v36, %s14596_s0 }
0x12a4   : > { %v4075_v1 = vpop.xlane.xlu0 %4074 }
0x12a5   : > { %11575 = vrcp.f32 %v4075_v1 }
0x12a8   : > { %v4072_v2 = vpop.xlane.xlu0 %4071 }
0x12a9   : > { %11577 = vrcp.f32 %v4072_v2 }
0x12ac   : > { %v11413_v42 = vpop.permute.xlu0 %11412 }
0x12ad   : > { %v11415_v4 = vunpack.i.h.bf16 %v11413_v42  ;;  %v11414_v6 = vunpack.i.l.bf16 %v11413_v42 }
0x12af   : > { %v10755_v7 = vpack.c.bf16 %v11415_v4, %v11414_v6  ;;  %v11576_v10 = vpop.eup %11575 }
0x12b0   : > { %v4079_v56 = vmul.f32 %v11576_v10, %v11572_v30 }
0x12b1   : > { %10757 = vmatprep.subr.msk.bf16.mxu0 %vm13488_vm11, %v10755_v7 }
0x12b3   : > { %v11578_v11 = vpop.eup %11577 }
0x12b4   : > { %v4078_v12 = vmul.f32 %v11578_v11, %v11574_v59 }
0x12b6   : > { %10100 = vmatprep.mubr.msk.f32.mxu0 %vm3006_vm15, %v4078_v12 }
0x12b7   : > { %10101 = vmatmul.mubr.msk.f32.vlgmr.msra.gmra.mrb[28].mxu0 %vm3006_vm15, %v4079_v56 }
0x12b8   : > { %10760 = vmatpush3.bf16.xpose.msk.msra.mxu0 %vm13488_vm11, %v10755_v7  ;;  %10107 = vmatprep.mubr.msk.f32.mxu0 %vm1536_vm5, %v4169_v17 }
0x12bf   : > { %10108 = vmatmul.mubr.msk.f32.vlgmr.msra.gmra.mrb[30].mxu0 %vm1536_vm5, %v4171_v33 }
0x138a   : > { %v13717_v13 = vpop.f32.mrb[28].mxu0 }
0x138b   : > { %v13719_v20 = vpop.f32.mrb[29].mxu0 }
0x1392   : > { %v10109_v35 = vpop.f32.mrb[30].mxu0 }
0x1393   : > { %v4260_v37 = vsel %vm13521_vm12, -1e+30, %v10109_v35  ;;  %v4250_v38 = vpop.f32.mrb[31].mxu0 }
0x1394   : > { %v4259_v47 = vsel %vm13526_vm13, -1e+30, %v4250_v38  ;;  %v4264_v49 = vsel %vm3010_vm14, %v4260_v37, -inf }
0x1395   : > { %4265 = vmax.xlane.f32.xlu1 %v4264_v49  ;;  %v4261_v50 = vsel %vm3006_vm15, %v4259_v47, -inf }
0x1396   : > { %4262 = vmax.xlane.f32.xlu0 %v4261_v50 }
0x13a6   : > { %11417 = vrot.lane.b32.xlu1 %v13484_v36, %s12497_s8 }
0x13aa   : > { %4371 = vrot.lane.b32.xlu1 %v13645_v19, %s14601_s7 }
0x13ae   : > { %4373 = vrot.lane.b32.xlu1 %v13638_v57, %s14601_s7 }
0x1422   : > { %v4266_v22 = vpop.xlane.xlu1 %4265 }
0x1423   : > { %v4268_v24 = vsub.f32 %v4260_v37, %v4266_v22  ;;  %v4263_v51 = vpop.xlane.xlu0 %4262 }
0x1424   : > { %v4267_v52 = vsub.f32 %v4259_v47, %v4263_v51 }
0x1425   : > { %v4271_v48 = vmul.f32 1.442695, %v4268_v24 }
0x1426   : > { %v4269_v27 = vmul.f32 1.442695, %v4267_v52  ;;  %v11418_v53 = vpop.permute.xlu1 %11417 }
0x1427   : > { %11579 = vpow2.f32 %v4271_v48  ;;  %v11420_v55 = vunpack.i.h.bf16 %v11418_v53  ;;  %v11419_v30 = vunpack.i.l.bf16 %v11418_v53 }
0x1428   : > { %11581 = vpow2.f32 %v4269_v27 }
0x1429   : > { %v10761_v58 = vpack.c.bf16 %v11420_v55, %v11419_v30 }
0x142a   : > { %v4372_v17 = vpop.permute.xlu1 %4371 }
0x142b   : > { %10763 = vmatprep.subr.msk.bf16.mxu1 %vm13557_vm1, %v10761_v58 }
0x142c   : > { %10766 = vmatpush3.bf16.msk.msra.mxu1 %vm13557_vm1, %v10761_v58 }
0x142e   : > { %v4374_v33 = vpop.permute.xlu1 %4373 }
0x1431   : > { %v11580_v19 = vpop.eup %11579 }
0x1432   : > { %v4276_v57 = vsel %vm3010_vm14, %v11580_v19, 0.0  ;;  %v11582_v59 = vpop.eup %11581 }
0x1433   : > { %4277 = vadd.xlane.f32.xlu0 %v4276_v57  ;;  %v4273_v41 = vsel %vm3006_vm15, %v11582_v59, 0.0 }
0x1437   : > { %4274 = vadd.xlane.f32.xlu0 %v4273_v41 }
0x144d   : > { %11422 = vrot.lane.b32.xlu0 %v13484_v36, %s14508_s3 }
0x14c0   : > { %v4278_v1 = vpop.xlane.xlu0 %4277 }
0x14c1   : > { %11583 = vrcp.f32 %v4278_v1 }
0x14c4   : > { %v4275_v2 = vpop.xlane.xlu0 %4274 }
0x14c5   : > { %11585 = vrcp.f32 %v4275_v2 }
0x14c8   : > { %v11423_v42 = vpop.permute.xlu0 %11422 }
0x14c9   : > { %v11425_v4 = vunpack.i.h.bf16 %v11423_v42  ;;  %v11424_v6 = vunpack.i.l.bf16 %v11423_v42 }
0x14cb   : > { %v10767_v7 = vpack.c.bf16 %v11425_v4, %v11424_v6  ;;  %v11584_v10 = vpop.eup %11583 }
0x14cc   : > { %v4282_v56 = vmul.f32 %v11584_v10, %v11580_v19 }
0x14cd   : > { %10769 = vmatprep.subr.msk.bf16.mxu1 %vm13488_vm11, %v10767_v7 }
0x14cf   : > { %v11586_v11 = vpop.eup %11585 }
0x14d0   : > { %v4281_v12 = vmul.f32 %v11586_v11, %v11582_v59 }
0x14d2   : > { %10114 = vmatprep.mubr.msk.f32.mxu1 %vm3006_vm15, %v4281_v12 }
0x14d3   : > { %10115 = vmatmul.mubr.msk.f32.vlgmr.msra.gmra.mrb[30].mxu1 %vm3006_vm15, %v4282_v56 }
0x14d4   : > { %10772 = vmatpush3.bf16.xpose.msk.msra.mxu1 %vm13488_vm11, %v10767_v7  ;;  %10121 = vmatprep.mubr.msk.f32.mxu1 %vm1536_vm5, %v4372_v17 }
0x14db   : > { %10122 = vmatmul.mubr.msk.f32.vlgmr.msra.gmra.mrb[32].mxu1 %vm1536_vm5, %v4374_v33  ;;  %v13773_v33 = vmul.f32 0.35355338, %v13504_v60 }
0x15a6   : > { %v13749_v35 = vpop.f32.mrb[30].mxu1 }
0x15a7   : > { %v13751_v37 = vpop.f32.mrb[31].mxu1 }
0x15ae   : > { %v10123_v38 = vpop.f32.mrb[32].mxu1 }
0x15af   : > { %v4463_v47 = vsel %vm13521_vm12, -1e+30, %v10123_v38  ;;  %v4453_v49 = vpop.f32.mrb[33].mxu1  ;;  %v13781_v38 = vmul.f32 0.35355338, %v13506_v61 }
0x15b0   : > { %v4467_v50 = vsel %vm3010_vm14, %v4463_v47, -inf  ;;  %v4462_v22 = vsel %vm13526_vm13, -1e+30, %v4453_v49 }
0x15b1   : > { %4468 = vmax.xlane.f32.xlu1 %v4467_v50  ;;  %v4464_v24 = vsel %vm3006_vm15, %v4462_v22, -inf }
0x15b2   : > { %4465 = vmax.xlane.f32.xlu0 %v4464_v24 }
0x15c2   : > { %11427 = vrot.lane.b32.xlu1 %v13484_v36, %s14507_s9 }
0x163e   : > { %v4469_v51 = vpop.xlane.xlu1 %4468 }
0x163f   : > { %v4471_v52 = vsub.f32 %v4463_v47, %v4469_v51  ;;  %v4466_v48 = vpop.xlane.xlu0 %4465 }
0x1640   : > { %v4470_v27 = vsub.f32 %v4462_v22, %v4466_v48 }
0x1641   : > { %v4474_v53 = vmul.f32 1.442695, %v4471_v52 }
0x1642   : > { %v4472_v55 = vmul.f32 1.442695, %v4470_v27  ;;  %v11428_v30 = vpop.permute.xlu1 %11427 }
0x1643   : > { %11587 = vpow2.f32 %v4474_v53  ;;  %v11430_v58 = vunpack.i.h.bf16 %v11428_v30  ;;  %v11429_v19 = vunpack.i.l.bf16 %v11428_v30 }
0x1644   : > { %11589 = vpow2.f32 %v4472_v55 }
0x1645   : > { %v10773_v57 = vpack.c.bf16 %v11430_v58, %v11429_v19 }
0x1647   : > { %10775 = vmatprep.subr.msk.bf16.mxu0 %vm13557_vm1, %v10773_v57 }
0x1648   : > { %10778 = vmatpush3.bf16.msk.msra.mxu0 %vm13557_vm1, %v10773_v57 }
0x164d   : > { %v11588_v59 = vpop.eup %11587 }
0x164e   : > { %v4479_v36 = vsel %vm3010_vm14, %v11588_v59, 0.0  ;;  %v11590_v41 = vpop.eup %11589 }
0x164f   : > { %4480 = vadd.xlane.f32.xlu0 %v4479_v36  ;;  %v4476_v1 = vsel %vm3006_vm15, %v11590_v41, 0.0 }
0x1653   : > { %4477 = vadd.xlane.f32.xlu0 %v4476_v1 }
0x1669   : > { %11432 = vrot.lane.b32.xlu0 %v13510_v62, %s14505_s4  ;;  %s14603_s4 = smov 88  }
0x16dc   : > { %v4481_v2 = vpop.xlane.xlu0 %4480 }
0x16dd   : > { %11591 = vrcp.f32 %v4481_v2 }
0x16e0   : > { %v4478_v42 = vpop.xlane.xlu0 %4477 }
0x16e1   : > { %11593 = vrcp.f32 %v4478_v42 }
0x16e4   : > { %v11433_v4 = vpop.permute.xlu0 %11432 }
0x16e5   : > { %v11435_v6 = vunpack.i.h.bf16 %v11433_v4  ;;  %v11434_v7 = vunpack.i.l.bf16 %v11433_v4 }
0x16e7   : > { %v10779_v10 = vpack.c.bf16 %v11435_v6, %v11434_v7  ;;  %v11592_v11 = vpop.eup %11591 }
0x16e8   : > { %v4485_v17 = vmul.f32 %v11592_v11, %v11588_v59 }
0x16e9   : > { %10781 = vmatprep.subr.msk.bf16.mxu0 %vm13488_vm11, %v10779_v10 }
0x16eb   : > { %v11594_v12 = vpop.eup %11593 }
0x16ec   : > { %v4484_v56 = vmul.f32 %v11594_v12, %v11590_v41 }
0x16ee   : > { %10128 = vmatprep.mubr.msk.f32.mxu0 %vm3006_vm15, %v4484_v56 }
0x16ef   : > { %10129 = vmatmul.mubr.msk.f32.vlgmr.msra.gmra.mrb[32].mxu0 %vm3006_vm15, %v4485_v17 }
0x16f0   : > { %10784 = vmatpush3.bf16.xpose.msk.msra.mxu0 %vm13488_vm11, %v10779_v10  ;;  %10135 = vmatprep.mubr.msk.f32.mxu0 %vm1536_vm5, %v13773_v33 }
0x16f7   : > { %10136 = vmatmul.mubr.msk.f32.vlgmr.msra.gmra.mrb[34].mxu0 %vm1536_vm5, %v13781_v38 }
0x17c2   : > { %v13785_v47 = vpop.f32.mrb[32].mxu0 }
0x17c3   : > { %v13787_v49 = vpop.f32.mrb[33].mxu0 }
0x17ca   : > { %v10137_v60 = vpop.f32.mrb[34].mxu0 }
0x17cb   : > { %v4696_v50 = vsel %vm13521_vm12, -1e+30, %v10137_v60  ;;  %v4686_v22 = vpop.f32.mrb[35].mxu0 }
0x17cc   : > { %v4700_v24 = vsel %vm3010_vm14, %v4696_v50, -inf  ;;  %v4695_v51 = vsel %vm13526_vm13, -1e+30, %v4686_v22 }
0x17cd   : > { %v4697_v61 = vsel %vm3006_vm15, %v4695_v51, -inf  ;;  %4701 = vmax.xlane.f32.xlu0 %v4700_v24 }
0x17ce   : > { %4698 = vmax.xlane.f32.xlu1 %v4697_v61 }
0x17df   : > { %11437 = vrot.lane.b32.xlu1 %v13510_v62, %s14597_s6 }
0x17e3   : > { %4807 = vrot.lane.b32.xlu1 %v13773_v33, %s14509_s11 }
0x185a   : > { %v4702_v52 = vpop.xlane.xlu0 %4701 }
0x185b   : > { %v4704_v48 = vsub.f32 %v4696_v50, %v4702_v52  ;;  %v4699_v27 = vpop.xlane.xlu1 %4698 }
0x185c   : > { %v4703_v53 = vsub.f32 %v4695_v51, %v4699_v27 }
0x185d   : > { %v4707_v55 = vmul.f32 1.442695, %v4704_v48 }
0x185e   : > { %v4705_v30 = vmul.f32 1.442695, %v4703_v53 }
0x185f   : > { %11595 = vpow2.f32 %v4707_v55  ;;  %v11438_v58 = vpop.permute.xlu1 %11437 }
0x1860   : > { %11597 = vpow2.f32 %v4705_v30  ;;  %v11440_v19 = vunpack.i.h.bf16 %v11438_v58  ;;  %v11439_v57 = vunpack.i.l.bf16 %v11438_v58 }
0x1862   : > { %v10785_v59 = vpack.c.bf16 %v11440_v19, %v11439_v57 }
0x1863   : > { %v4808_v42 = vpop.permute.xlu1 %4807 }
0x1864   : > { %10787 = vmatprep.subr.msk.bf16.mxu1 %vm13557_vm1, %v10785_v59 }
0x1865   : > { %10790 = vmatpush3.bf16.msk.msra.mxu1 %vm13557_vm1, %v10785_v59 }
0x1869   : > { %v11596_v36 = vpop.eup %11595 }
0x186a   : > { %v11598_v41 = vpop.eup %11597  ;;  %v4712_v1 = vsel %vm3010_vm14, %v11596_v36, 0.0 }
0x186b   : > { %4713 = vadd.xlane.f32.xlu0 %v4712_v1  ;;  %v4709_v2 = vsel %vm3006_vm15, %v11598_v41, 0.0 }
0x186c   : > { %4710 = vadd.xlane.f32.xlu1 %v4709_v2 }
0x187d   : > { %4809 = vrot.lane.b32.xlu1 %v13781_v38, %s14509_s11 }
0x1881   : > { %11442 = vrot.lane.b32.xlu0 %v13510_v62, %s14603_s4 }
0x18f8   : > { %v4714_v4 = vpop.xlane.xlu0 %4713 }
0x18f9   : > { %11599 = vrcp.f32 %v4714_v4  ;;  %v4711_v6 = vpop.xlane.xlu1 %4710 }
0x18fa   : > { %11601 = vrcp.f32 %v4711_v6 }
0x18fc   : > { %v11443_v7 = vpop.permute.xlu0 %11442 }
0x18fd   : > { %v11445_v10 = vunpack.i.h.bf16 %v11443_v7  ;;  %v11444_v11 = vunpack.i.l.bf16 %v11443_v7  ;;  %v4810_v22 = vpop.permute.xlu1 %4809 }
0x18ff   : > { %v10791_v12 = vpack.c.bf16 %v11445_v10, %v11444_v11 }
0x1901   : > { %10793 = vmatprep.subr.msk.bf16.mxu1 %vm13488_vm11, %v10791_v12 }
0x1903   : > { %v11600_v56 = vpop.eup %11599 }
0x1904   : > { %v11602_v17 = vpop.eup %11601  ;;  %v4718_v50 = vmul.f32 %v11600_v56, %v11596_v36 }
0x1905   : > { %v4717_v60 = vmul.f32 %v11602_v17, %v11598_v41 }
0x1907   : > { %10142 = vmatprep.mubr.msk.f32.mxu1 %vm3006_vm15, %v4717_v60 }
0x1908   : > { %10143 = vmatmul.mubr.msk.f32.vlgmr.msra.gmra.mrb[34].mxu1 %vm3006_vm15, %v4718_v50 }
0x1909   : > { %10796 = vmatpush3.bf16.xpose.msk.msra.mxu1 %vm13488_vm11, %v10791_v12  ;;  %10149 = vmatprep.mubr.msk.f32.mxu1 %vm1536_vm5, %v4808_v42 }
0x1910   : > { %10150 = vmatmul.mubr.msk.f32.vlgmr.msra.gmra.mrb[36].mxu1 %vm1536_vm5, %v4810_v22 }
0x19db   : > { %v13817_v24 = vpop.f32.mrb[34].mxu1 }
0x19dc   : > { %v13819_v51 = vpop.f32.mrb[35].mxu1 }
0x19e3   : > { %v10151_v61 = vpop.f32.mrb[36].mxu1 }
0x19e4   : > { %v4899_v52 = vsel %vm13521_vm12, -1e+30, %v10151_v61  ;;  %v4889_v48 = vpop.f32.mrb[37].mxu1 }
0x19e5   : > { %v4903_v27 = vsel %vm3010_vm14, %v4899_v52, -inf  ;;  %v4898_v53 = vsel %vm13526_vm13, -1e+30, %v4889_v48 }
0x19e6   : > { %v4900_v55 = vsel %vm3006_vm15, %v4898_v53, -inf  ;;  %4904 = vmax.xlane.f32.xlu1 %v4903_v27 }
0x19e7   : > { %4901 = vmax.xlane.f32.xlu0 %v4900_v55 }
0x19f7   : > { %11447 = vrot.lane.b32.xlu1 %v13510_v62, %s14602_s16 }
0x19fb   : > { %5010 = vrot.lane.b32.xlu1 %v13773_v33, %s14598_s2 }
0x19ff   : > { %5012 = vrot.lane.b32.xlu1 %v13781_v38, %s14598_s2 }
0x1a73   : > { %v4905_v30 = vpop.xlane.xlu1 %4904 }
0x1a74   : > { %v4907_v58 = vsub.f32 %v4899_v52, %v4905_v30  ;;  %v4902_v19 = vpop.xlane.xlu0 %4901 }
0x1a75   : > { %v4906_v57 = vsub.f32 %v4898_v53, %v4902_v19 }
0x1a76   : > { %v4910_v59 = vmul.f32 1.442695, %v4907_v58 }
0x1a77   : > { %v4908_v36 = vmul.f32 1.442695, %v4906_v57  ;;  %v11448_v41 = vpop.permute.xlu1 %11447 }
0x1a78   : > { %11603 = vpow2.f32 %v4910_v59  ;;  %v11450_v1 = vunpack.i.h.bf16 %v11448_v41  ;;  %v11449_v2 = vunpack.i.l.bf16 %v11448_v41 }
0x1a79   : > { %11605 = vpow2.f32 %v4908_v36 }
0x1a7a   : > { %v10797_v42 = vpack.c.bf16 %v11450_v1, %v11449_v2 }
0x1a7b   : > { %v5011_v27 = vpop.permute.xlu1 %5010 }
0x1a7c   : > { %10799 = vmatprep.subr.msk.bf16.mxu0 %vm13557_vm1, %v10797_v42 }
0x1a7d   : > { %10802 = vmatpush3.bf16.msk.msra.mxu0 %vm13557_vm1, %v10797_v42 }
0x1a7f   : > { %v5013_v53 = vpop.permute.xlu1 %5012 }
0x1a82   : > { %v11604_v4 = vpop.eup %11603 }
0x1a83   : > { %v4915_v6 = vsel %vm3010_vm14, %v11604_v4, 0.0  ;;  %v11606_v7 = vpop.eup %11605 }
0x1a84   : > { %4916 = vadd.xlane.f32.xlu0 %v4915_v6  ;;  %v4912_v10 = vsel %vm3006_vm15, %v11606_v7, 0.0 }
0x1a88   : > { %4913 = vadd.xlane.f32.xlu0 %v4912_v10 }
0x1a9e   : > { %11452 = vrot.lane.b32.xlu0 %v13510_v62, %s14596_s0 }
0x1b11   : > { %v4917_v11 = vpop.xlane.xlu0 %4916 }
0x1b12   : > { %11607 = vrcp.f32 %v4917_v11 }
0x1b15   : > { %v4914_v12 = vpop.xlane.xlu0 %4913 }
0x1b16   : > { %11609 = vrcp.f32 %v4914_v12 }
0x1b19   : > { %v11453_v56 = vpop.permute.xlu0 %11452 }
0x1b1a   : > { %v11455_v17 = vunpack.i.h.bf16 %v11453_v56  ;;  %v11454_v60 = vunpack.i.l.bf16 %v11453_v56 }
0x1b1c   : > { %v10803_v50 = vpack.c.bf16 %v11455_v17, %v11454_v60  ;;  %v11608_v22 = vpop.eup %11607 }
0x1b1d   : > { %v4921_v48 = vmul.f32 %v11608_v22, %v11604_v4 }
0x1b1e   : > { %10805 = vmatprep.subr.msk.bf16.mxu0 %vm13488_vm11, %v10803_v50 }
0x1b20   : > { %v11610_v61 = vpop.eup %11609 }
0x1b21   : > { %v4920_v52 = vmul.f32 %v11610_v61, %v11606_v7 }
0x1b23   : > { %10156 = vmatprep.mubr.msk.f32.mxu0 %vm3006_vm15, %v4920_v52 }
0x1b24   : > { %10157 = vmatmul.mubr.msk.f32.vlgmr.msra.gmra.mrb[36].mxu0 %vm3006_vm15, %v4921_v48 }
0x1b25   : > { %10808 = vmatpush3.bf16.xpose.msk.msra.mxu0 %vm13488_vm11, %v10803_v50  ;;  %10163 = vmatprep.mubr.msk.f32.mxu0 %vm1536_vm5, %v5011_v27 }
0x1b2c   : > { %10164 = vmatmul.mubr.msk.f32.vlgmr.msra.gmra.mrb[38].mxu0 %vm1536_vm5, %v5013_v53 }
0x1bf7   : > { %v13849_v55 = vpop.f32.mrb[36].mxu0 }
0x1bf8   : > { %v13851_v30 = vpop.f32.mrb[37].mxu0 }
0x1bff   : > { %v10165_v58 = vpop.f32.mrb[38].mxu0 }
0x1c00   : > { %v5102_v19 = vsel %vm13521_vm12, -1e+30, %v10165_v58  ;;  %v5092_v57 = vpop.f32.mrb[39].mxu0 }
0x1c01   : > { %v5106_v59 = vsel %vm3010_vm14, %v5102_v19, -inf  ;;  %v5101_v36 = vsel %vm13526_vm13, -1e+30, %v5092_v57 }
0x1c02   : > { %v5103_v41 = vsel %vm3006_vm15, %v5101_v36, -inf  ;;  %5107 = vmax.xlane.f32.xlu1 %v5106_v59 }
0x1c03   : > { %5104 = vmax.xlane.f32.xlu0 %v5103_v41 }
0x1c13   : > { %11457 = vrot.lane.b32.xlu1 %v13510_v62, %s12497_s8 }
0x1c17   : > { %5213 = vrot.lane.b32.xlu1 %v13773_v33, %s14601_s7 }
0x1c1b   : > { %5215 = vrot.lane.b32.xlu1 %v13781_v38, %s14601_s7 }
0x1c8f   : > { %v5108_v1 = vpop.xlane.xlu1 %5107 }
0x1c90   : > { %v5110_v2 = vsub.f32 %v5102_v19, %v5108_v1  ;;  %v5105_v42 = vpop.xlane.xlu0 %5104 }
0x1c91   : > { %v5109_v4 = vsub.f32 %v5101_v36, %v5105_v42 }
0x1c92   : > { %v5113_v6 = vmul.f32 1.442695, %v5110_v2 }
0x1c93   : > { %v5111_v7 = vmul.f32 1.442695, %v5109_v4  ;;  %v11458_v10 = vpop.permute.xlu1 %11457 }
0x1c94   : > { %11611 = vpow2.f32 %v5113_v6  ;;  %v11460_v11 = vunpack.i.h.bf16 %v11458_v10  ;;  %v11459_v12 = vunpack.i.l.bf16 %v11458_v10 }
0x1c95   : > { %11613 = vpow2.f32 %v5111_v7 }
0x1c96   : > { %v10809_v56 = vpack.c.bf16 %v11460_v11, %v11459_v12 }
0x1c97   : > { %v5214_v36 = vpop.permute.xlu1 %5213 }
0x1c98   : > { %10811 = vmatprep.subr.msk.bf16.mxu1 %vm13557_vm1, %v10809_v56 }
0x1c99   : > { %10814 = vmatpush3.bf16.msk.msra.mxu1 %vm13557_vm1, %v10809_v56 }
0x1c9b   : > { %v5216_v41 = vpop.permute.xlu1 %5215 }
0x1c9e   : > { %v11612_v33 = vpop.eup %11611 }
0x1c9f   : > { %v5118_v17 = vsel %vm3010_vm14, %v11612_v33, 0.0  ;;  %v11614_v60 = vpop.eup %11613 }
0x1ca0   : > { %5119 = vadd.xlane.f32.xlu0 %v5118_v17  ;;  %v5115_v50 = vsel %vm3006_vm15, %v11614_v60, 0.0 }
0x1ca4   : > { %5116 = vadd.xlane.f32.xlu0 %v5115_v50 }
0x1cba   : > { %11462 = vrot.lane.b32.xlu0 %v13510_v62, %s14508_s3 }
0x1d2d   : > { %v5120_v22 = vpop.xlane.xlu0 %5119 }
0x1d2e   : > { %11615 = vrcp.f32 %v5120_v22 }
0x1d31   : > { %v5117_v61 = vpop.xlane.xlu0 %5116 }
0x1d32   : > { %11617 = vrcp.f32 %v5117_v61 }
0x1d35   : > { %v11463_v52 = vpop.permute.xlu0 %11462 }
0x1d36   : > { %v11465_v48 = vunpack.i.h.bf16 %v11463_v52  ;;  %v11464_v27 = vunpack.i.l.bf16 %v11463_v52 }
0x1d38   : > { %v10815_v53 = vpack.c.bf16 %v11465_v48, %v11464_v27  ;;  %v11616_v58 = vpop.eup %11615 }
0x1d39   : > { %v5124_v59 = vmul.f32 %v11616_v58, %v11612_v33 }
0x1d3a   : > { %10817 = vmatprep.subr.msk.bf16.mxu1 %vm13488_vm11, %v10815_v53 }
0x1d3c   : > { %v11618_v19 = vpop.eup %11617 }
0x1d3d   : > { %v5123_v57 = vmul.f32 %v11618_v19, %v11614_v60 }
0x1d3f   : > { %10170 = vmatprep.mubr.msk.f32.mxu1 %vm3006_vm15, %v5123_v57 }
0x1d40   : > { %10171 = vmatmul.mubr.msk.f32.vlgmr.msra.gmra.mrb[38].mxu1 %vm3006_vm15, %v5124_v59 }
0x1d41   : > { %10820 = vmatpush3.bf16.xpose.msk.msra.mxu1 %vm13488_vm11, %v10815_v53  ;;  %10177 = vmatprep.mubr.msk.f32.mxu1 %vm1536_vm5, %v5214_v36 }
0x1d48   : > { %10178 = vmatmul.mubr.msk.f32.vlgmr.msra.gmra.mrb[40].mxu1 %vm1536_vm5, %v5216_v41 }
0x1e13   : > { %v13881_v1 = vpop.f32.mrb[38].mxu1 }
0x1e14   : > { %v13883_v2 = vpop.f32.mrb[39].mxu1 }
0x1e1b   : > { %v10179_v42 = vpop.f32.mrb[40].mxu1 }
0x1e1c   : > { %v5305_v4 = vsel %vm13521_vm12, -1e+30, %v10179_v42  ;;  %v5295_v6 = vpop.f32.mrb[41].mxu1  ;;  %v2905_v42 = vmul.f32 0.35355338, %v13512_v63 }
0x1e1d   : > { %v5309_v7 = vsel %vm3010_vm14, %v5305_v4, -inf  ;;  %v5304_v10 = vsel %vm13526_vm13, -1e+30, %v5295_v6 }
0x1e1e   : > { %v5306_v11 = vsel %vm3006_vm15, %v5304_v10, -inf  ;;  %5310 = vmax.xlane.f32.xlu1 %v5309_v7 }
0x1e1f   : > { %5307 = vmax.xlane.f32.xlu0 %v5306_v11  ;;  %v5447_v11 = vrot.slane %v13781_v38, 4 }
0x1e2f   : > { %11467 = vrot.lane.b32.xlu1 %v13510_v62, %s14507_s9  ;;  %s14604_s9 = smov 96  }
0x1eab   : > { %v5311_v12 = vpop.xlane.xlu1 %5310 }
0x1eac   : > { %v5313_v56 = vsub.f32 %v5305_v4, %v5311_v12  ;;  %v5308_v33 = vpop.xlane.xlu0 %5307 }
0x1ead   : > { %v5312_v17 = vsub.f32 %v5304_v10, %v5308_v33  ;;  %v13904_v10 = vrot.slane %v2905_v42, 4 }
0x1eae   : > { %v5316_v60 = vmul.f32 1.442695, %v5313_v56 }
0x1eaf   : > { %v5314_v50 = vmul.f32 1.442695, %v5312_v17  ;;  %v11468_v22 = vpop.permute.xlu1 %11467  ;;  %v13911_v33 = vsel %vm2632_vm9, %v5447_v11, %v13904_v10 }
0x1eb0   : > { %11619 = vpow2.f32 %v5316_v60  ;;  %v11470_v61 = vunpack.i.h.bf16 %v11468_v22  ;;  %v11469_v52 = vunpack.i.l.bf16 %v11468_v22 }
0x1eb1   : > { %11621 = vpow2.f32 %v5314_v50 }
0x1eb2   : > { %v10821_v48 = vpack.c.bf16 %v11470_v61, %v11469_v52 }
0x1eb4   : > { %10823 = vmatprep.subr.msk.bf16.mxu0 %vm13557_vm1, %v10821_v48 }
0x1eb5   : > { %10826 = vmatpush3.bf16.msk.msra.mxu0 %vm13557_vm1, %v10821_v48 }
0x1eba   : > { %v11620_v27 = vpop.eup %11619 }
0x1ebb   : > { %v5321_v62 = vsel %vm3010_vm14, %v11620_v27, 0.0  ;;  %v11622_v53 = vpop.eup %11621 }
0x1ebc   : > { %5322 = vadd.xlane.f32.xlu0 %v5321_v62  ;;  %v5318_v58 = vsel %vm3006_vm15, %v11622_v53, 0.0 }
0x1ec0   : > { %5319 = vadd.xlane.f32.xlu0 %v5318_v58 }
0x1ed6   : > { %11472 = vrot.lane.b32.xlu0 %v13517_v0, %s14604_s9 }
0x1f49   : > { %v5323_v19 = vpop.xlane.xlu0 %5322 }
0x1f4a   : > { %11623 = vrcp.f32 %v5323_v19 }
0x1f4d   : > { %v5320_v57 = vpop.xlane.xlu0 %5319 }
0x1f4e   : > { %11625 = vrcp.f32 %v5320_v57 }
0x1f51   : > { %v11473_v59 = vpop.permute.xlu0 %11472 }
0x1f52   : > { %v11475_v36 = vunpack.i.h.bf16 %v11473_v59  ;;  %v11474_v41 = vunpack.i.l.bf16 %v11473_v59 }
0x1f54   : > { %v10827_v4 = vpack.c.bf16 %v11475_v36, %v11474_v41  ;;  %v11624_v6 = vpop.eup %11623 }
0x1f55   : > { %v5327_v56 = vmul.f32 %v11624_v6, %v11620_v27 }
0x1f56   : > { %10829 = vmatprep.subr.msk.bf16.mxu0 %vm13488_vm11, %v10827_v4 }
0x1f58   : > { %v11626_v7 = vpop.eup %11625 }
0x1f59   : > { %v5326_v12 = vmul.f32 %v11626_v7, %v11622_v53 }
0x1f5b   : > { %10184 = vmatprep.mubr.msk.f32.mxu0 %vm3006_vm15, %v5326_v12 }
0x1f5c   : > { %10185 = vmatmul.mubr.msk.f32.vlgmr.msra.gmra.mrb[40].mxu0 %vm3006_vm15, %v5327_v56 }
0x1f5d   : > { %10832 = vmatpush3.bf16.xpose.msk.msra.mxu0 %vm13488_vm11, %v10827_v4  ;;  %10191 = vmatprep.mubr.msk.f32.mxu0 %vm1536_vm5, %v13911_v33 }
0x1f64   : > { %10192 = vmatmul.mubr.msk.f32.vlgmr.msra.gmra.mrb[42].mxu0 %vm1536_vm5, %v13904_v10 }
0x202f   : > { %v13919_v63 = vpop.f32.mrb[40].mxu0 }
0x2030   : > { %v13921_v38 = vpop.f32.mrb[41].mxu0 }
0x2037   : > { %v10193_v17 = vpop.f32.mrb[42].mxu0 }
0x2038   : > { %v5542_v60 = vsel %vm13521_vm12, -1e+30, %v10193_v17  ;;  %v5532_v50 = vpop.f32.mrb[43].mxu0 }
0x2039   : > { %v5546_v22 = vsel %vm3010_vm14, %v5542_v60, -inf  ;;  %v5541_v61 = vsel %vm13526_vm13, -1e+30, %v5532_v50 }
0x203a   : > { %v5543_v52 = vsel %vm3006_vm15, %v5541_v61, -inf  ;;  %5547 = vmax.xlane.f32.xlu0 %v5546_v22 }
0x203b   : > { %5544 = vmax.xlane.f32.xlu1 %v5543_v52 }
0x204c   : > { %11477 = vrot.lane.b32.xlu1 %v13517_v0, %s14597_s6 }
0x2050   : > { %5653 = vrot.lane.b32.xlu1 %v13911_v33, %s14509_s11 }
0x20c7   : > { %v5548_v48 = vpop.xlane.xlu0 %5547 }
0x20c8   : > { %v5550_v27 = vsub.f32 %v5542_v60, %v5548_v48  ;;  %v5545_v62 = vpop.xlane.xlu1 %5544 }
0x20c9   : > { %v5549_v53 = vsub.f32 %v5541_v61, %v5545_v62 }
0x20ca   : > { %v5553_v58 = vmul.f32 1.442695, %v5550_v27 }
0x20cb   : > { %v5551_v19 = vmul.f32 1.442695, %v5549_v53 }
0x20cc   : > { %11627 = vpow2.f32 %v5553_v58  ;;  %v11478_v57 = vpop.permute.xlu1 %11477 }
0x20cd   : > { %11629 = vpow2.f32 %v5551_v19  ;;  %v11480_v59 = vunpack.i.h.bf16 %v11478_v57  ;;  %v11479_v36 = vunpack.i.l.bf16 %v11478_v57 }
0x20cf   : > { %v10833_v41 = vpack.c.bf16 %v11480_v59, %v11479_v36 }
0x20d0   : > { %v5654_v11 = vpop.permute.xlu1 %5653 }
0x20d1   : > { %10835 = vmatprep.subr.msk.bf16.mxu1 %vm13557_vm1, %v10833_v41 }
0x20d2   : > { %10838 = vmatpush3.bf16.msk.msra.mxu1 %vm13557_vm1, %v10833_v41 }
0x20d6   : > { %v11628_v42 = vpop.eup %11627 }
0x20d7   : > { %v11630_v4 = vpop.eup %11629  ;;  %v5558_v6 = vsel %vm3010_vm14, %v11628_v42, 0.0 }
0x20d8   : > { %5559 = vadd.xlane.f32.xlu0 %v5558_v6  ;;  %v5555_v7 = vsel %vm3006_vm15, %v11630_v4, 0.0 }
0x20d9   : > { %5556 = vadd.xlane.f32.xlu1 %v5555_v7 }
0x20ea   : > { %5655 = vrot.lane.b32.xlu1 %v13904_v10, %s14509_s11  ;;  %s14607_s11 = smov 24  }
0x20ee   : > { %11482 = vrot.lane.b32.xlu0 %v13517_v0, %s14603_s4 }
0x2165   : > { %v5560_v12 = vpop.xlane.xlu0 %5559 }
0x2166   : > { %11631 = vrcp.f32 %v5560_v12  ;;  %v5557_v56 = vpop.xlane.xlu1 %5556 }
0x2167   : > { %11633 = vrcp.f32 %v5557_v56 }
0x2169   : > { %v11483_v17 = vpop.permute.xlu0 %11482 }
0x216a   : > { %v11485_v60 = vunpack.i.h.bf16 %v11483_v17  ;;  %v11484_v50 = vunpack.i.l.bf16 %v11483_v17  ;;  %v5656_v62 = vpop.permute.xlu1 %5655 }
0x216c   : > { %v10839_v22 = vpack.c.bf16 %v11485_v60, %v11484_v50 }
0x216e   : > { %10841 = vmatprep.subr.msk.bf16.mxu1 %vm13488_vm11, %v10839_v22 }
0x2170   : > { %v11632_v61 = vpop.eup %11631 }
0x2171   : > { %v11634_v52 = vpop.eup %11633  ;;  %v5564_v27 = vmul.f32 %v11632_v61, %v11628_v42 }
0x2172   : > { %v5563_v48 = vmul.f32 %v11634_v52, %v11630_v4 }
0x2174   : > { %10198 = vmatprep.mubr.msk.f32.mxu1 %vm3006_vm15, %v5563_v48 }
0x2175   : > { %10199 = vmatmul.mubr.msk.f32.vlgmr.msra.gmra.mrb[42].mxu1 %vm3006_vm15, %v5564_v27 }
0x2176   : > { %10844 = vmatpush3.bf16.xpose.msk.msra.mxu1 %vm13488_vm11, %v10839_v22  ;;  %10205 = vmatprep.mubr.msk.f32.mxu1 %vm1536_vm5, %v5654_v11 }
0x217d   : > { %10206 = vmatmul.mubr.msk.f32.vlgmr.msra.gmra.mrb[44].mxu1 %vm1536_vm5, %v5656_v62 }
0x2248   : > { %v13951_v53 = vpop.f32.mrb[42].mxu1 }
0x2249   : > { %v13953_v58 = vpop.f32.mrb[43].mxu1 }
0x2250   : > { %v10207_v19 = vpop.f32.mrb[44].mxu1 }
0x2251   : > { %v5745_v57 = vsel %vm13521_vm12, -1e+30, %v10207_v19  ;;  %v5735_v59 = vpop.f32.mrb[45].mxu1 }
0x2252   : > { %v5749_v36 = vsel %vm3010_vm14, %v5745_v57, -inf  ;;  %v5744_v41 = vsel %vm13526_vm13, -1e+30, %v5735_v59 }
0x2253   : > { %v5746_v42 = vsel %vm3006_vm15, %v5744_v41, -inf  ;;  %5750 = vmax.xlane.f32.xlu1 %v5749_v36 }
0x2254   : > { %5747 = vmax.xlane.f32.xlu0 %v5746_v42 }
0x2264   : > { %11487 = vrot.lane.b32.xlu1 %v13517_v0, %s14602_s16  ;;  %s14511_s16 = smov 16  }
0x2268   : > { %5856 = vrot.lane.b32.xlu1 %v13911_v33, %s14598_s2 }
0x226c   : > { %5858 = vrot.lane.b32.xlu1 %v13904_v10, %s14598_s2 }
0x22e0   : > { %v5751_v4 = vpop.xlane.xlu1 %5750 }
0x22e1   : > { %v5753_v6 = vsub.f32 %v5745_v57, %v5751_v4  ;;  %v5748_v7 = vpop.xlane.xlu0 %5747 }
0x22e2   : > { %v5752_v11 = vsub.f32 %v5744_v41, %v5748_v7 }
0x22e3   : > { %v5756_v12 = vmul.f32 1.442695, %v5753_v6 }
0x22e4   : > { %v5754_v56 = vmul.f32 1.442695, %v5752_v11  ;;  %v11488_v17 = vpop.permute.xlu1 %11487 }
0x22e5   : > { %11635 = vpow2.f32 %v5756_v12  ;;  %v11490_v60 = vunpack.i.h.bf16 %v11488_v17  ;;  %v11489_v50 = vunpack.i.l.bf16 %v11488_v17 }
0x22e6   : > { %11637 = vpow2.f32 %v5754_v56 }
0x22e7   : > { %v10845_v22 = vpack.c.bf16 %v11490_v60, %v11489_v50 }
0x22e8   : > { %v5857_v11 = vpop.permute.xlu1 %5856 }
0x22e9   : > { %10847 = vmatprep.subr.msk.bf16.mxu0 %vm13557_vm1, %v10845_v22 }
0x22ea   : > { %10850 = vmatpush3.bf16.msk.msra.mxu0 %vm13557_vm1, %v10845_v22 }
0x22ec   : > { %v5859_v12 = vpop.permute.xlu1 %5858 }
0x22ef   : > { %v11636_v61 = vpop.eup %11635 }
0x22f0   : > { %v5761_v52 = vsel %vm3010_vm14, %v11636_v61, 0.0  ;;  %v11638_v48 = vpop.eup %11637 }
0x22f1   : > { %5762 = vadd.xlane.f32.xlu0 %v5761_v52  ;;  %v5758_v27 = vsel %vm3006_vm15, %v11638_v48, 0.0 }
0x22f5   : > { %5759 = vadd.xlane.f32.xlu0 %v5758_v27 }
0x230b   : > { %11492 = vrot.lane.b32.xlu0 %v13517_v0, %s14596_s0 }
0x237e   : > { %v5763_v62 = vpop.xlane.xlu0 %5762 }
0x237f   : > { %11639 = vrcp.f32 %v5763_v62 }
0x2382   : > { %v5760_v19 = vpop.xlane.xlu0 %5759 }
0x2383   : > { %11641 = vrcp.f32 %v5760_v19 }
0x2386   : > { %v11493_v57 = vpop.permute.xlu0 %11492 }
0x2387   : > { %v11495_v59 = vunpack.i.h.bf16 %v11493_v57  ;;  %v11494_v36 = vunpack.i.l.bf16 %v11493_v57 }
0x2389   : > { %v10851_v41 = vpack.c.bf16 %v11495_v59, %v11494_v36  ;;  %v11640_v42 = vpop.eup %11639 }
0x238a   : > { %v5767_v7 = vmul.f32 %v11640_v42, %v11636_v61 }
0x238b   : > { %10853 = vmatprep.subr.msk.bf16.mxu0 %vm13488_vm11, %v10851_v41 }
0x238d   : > { %v11642_v4 = vpop.eup %11641 }
0x238e   : > { %v5766_v6 = vmul.f32 %v11642_v4, %v11638_v48 }
0x2390   : > { %10212 = vmatprep.mubr.msk.f32.mxu0 %vm3006_vm15, %v5766_v6 }
0x2391   : > { %10213 = vmatmul.mubr.msk.f32.vlgmr.msra.gmra.mrb[44].mxu0 %vm3006_vm15, %v5767_v7 }
0x2392   : > { %10856 = vmatpush3.bf16.xpose.msk.msra.mxu0 %vm13488_vm11, %v10851_v41  ;;  %10219 = vmatprep.mubr.msk.f32.mxu0 %vm1536_vm5, %v5857_v11 }
0x2399   : > { %10220 = vmatmul.mubr.msk.f32.vlgmr.msra.gmra.mrb[46].mxu0 %vm1536_vm5, %v5859_v12 }
0x2464   : > { %v13983_v56 = vpop.f32.mrb[44].mxu0 }
0x2465   : > { %v13985_v17 = vpop.f32.mrb[45].mxu0 }
0x246c   : > { %v10221_v60 = vpop.f32.mrb[46].mxu0 }
0x246d   : > { %v5948_v50 = vsel %vm13521_vm12, -1e+30, %v10221_v60  ;;  %v5938_v22 = vpop.f32.mrb[47].mxu0 }
0x246e   : > { %v5952_v61 = vsel %vm3010_vm14, %v5948_v50, -inf  ;;  %v5947_v52 = vsel %vm13526_vm13, -1e+30, %v5938_v22 }
0x246f   : > { %v5949_v48 = vsel %vm3006_vm15, %v5947_v52, -inf  ;;  %5953 = vmax.xlane.f32.xlu1 %v5952_v61 }
0x2470   : > { %5950 = vmax.xlane.f32.xlu0 %v5949_v48 }
0x2480   : > { %11497 = vrot.lane.b32.xlu1 %v13517_v0, %s12497_s8  ;;  %s14605_s8 = smov 40  }
0x2484   : > { %6059 = vrot.lane.b32.xlu1 %v13911_v33, %s14601_s7 }
0x2488   : > { %6061 = vrot.lane.b32.xlu1 %v13904_v10, %s14601_s7 }
0x24fc   : > { %v5954_v27 = vpop.xlane.xlu1 %5953 }
0x24fd   : > { %v5956_v62 = vsub.f32 %v5948_v50, %v5954_v27  ;;  %v5951_v19 = vpop.xlane.xlu0 %5950 }
0x24fe   : > { %v5955_v57 = vsub.f32 %v5947_v52, %v5951_v19 }
0x24ff   : > { %v5959_v59 = vmul.f32 1.442695, %v5956_v62 }
0x2500   : > { %v5957_v36 = vmul.f32 1.442695, %v5955_v57  ;;  %v11498_v41 = vpop.permute.xlu1 %11497 }
0x2501   : > { %11643 = vpow2.f32 %v5959_v59  ;;  %v11500_v42 = vunpack.i.h.bf16 %v11498_v41  ;;  %v11499_v4 = vunpack.i.l.bf16 %v11498_v41 }
0x2502   : > { %11645 = vpow2.f32 %v5957_v36 }
0x2503   : > { %v10857_v6 = vpack.c.bf16 %v11500_v42, %v11499_v4 }
0x2504   : > { %v6060_v57 = vpop.permute.xlu1 %6059 }
0x2505   : > { %10859 = vmatprep.subr.msk.bf16.mxu1 %vm13557_vm1, %v10857_v6 }
0x2506   : > { %10862 = vmatpush3.bf16.msk.msra.mxu1 %vm13557_vm1, %v10857_v6 }
0x2508   : > { %v6062_v59 = vpop.permute.xlu1 %6061 }
0x250b   : > { %v11644_v33 = vpop.eup %11643 }
0x250c   : > { %v5964_v10 = vsel %vm3010_vm14, %v11644_v33, 0.0  ;;  %v11646_v7 = vpop.eup %11645 }
0x250d   : > { %5965 = vadd.xlane.f32.xlu0 %v5964_v10  ;;  %v5961_v11 = vsel %vm3006_vm15, %v11646_v7, 0.0 }
0x2511   : > { %5962 = vadd.xlane.f32.xlu0 %v5961_v11 }
0x2527   : > { %11502 = vrot.lane.b32.xlu0 %v13517_v0, %s14508_s3  ;;  %s14606_s3 = smov 8  }
0x259a   : > { %v5966_v12 = vpop.xlane.xlu0 %5965 }
0x259b   : > { %11647 = vrcp.f32 %v5966_v12 }
0x259e   : > { %v5963_v60 = vpop.xlane.xlu0 %5962 }
0x259f   : > { %11649 = vrcp.f32 %v5963_v60  ;;  %v2757_v60 = vld [vmem:[#allocation8] sm:$0xff] }
0x25a2   : > { %v11503_v50 = vpop.permute.xlu0 %11502 }
0x25a3   : > { %v11505_v22 = vunpack.i.h.bf16 %v11503_v50  ;;  %v11504_v61 = vunpack.i.l.bf16 %v11503_v50  ;;  %v2758_v50 = vld [vmem:[#allocation8 + $0x8] sm:$0xff] }
0x25a5   : > { %v10863_v52 = vpack.c.bf16 %v11505_v22, %v11504_v61  ;;  %v11648_v48 = vpop.eup %11647  ;;  %v10875_v22 = vpack.c.bf16 %v2758_v50, %v2757_v60 }
0x25a6   : > { %v5970_v19 = vmul.f32 %v11648_v48, %v11644_v33 }
0x25a7   : > { %10865 = vmatprep.subr.msk.bf16.mxu1 %vm13488_vm11, %v10863_v52 }
0x25a9   : > { %v11650_v27 = vpop.eup %11649 }
0x25aa   : > { %v5969_v62 = vmul.f32 %v11650_v27, %v11646_v7  ;;  %v2759_v27 = vld [vmem:[#allocation8 + $0x10] sm:$0xff] }
0x25ac   : > { %10226 = vmatprep.mubr.msk.f32.mxu1 %vm3006_vm15, %v5969_v62 }
0x25ad   : > { %10227 = vmatmul.mubr.msk.f32.vlgmr.msra.gmra.mrb[46].mxu1 %vm3006_vm15, %v5970_v19 }
0x25ae   : > { %10868 = vmatpush3.bf16.xpose.msk.msra.mxu1 %vm13488_vm11, %v10863_v52  ;;  %10233 = vmatprep.mubr.msk.f32.mxu1 %vm1536_vm5, %v6060_v57 }
0x25b5   : > { %10234 = vmatmul.mubr.msk.f32.vlgmr.msra.gmra.mrb[48].mxu1 %vm1536_vm5, %v6062_v59 }
0x2680   : > { %v10228_v36 = vpop.f32.mrb[46].mxu1 }
0x2681   : > { %v6050_v41 = vpop.f32.mrb[47].mxu1 }
0x2688   : > { %v10235_v42 = vpop.f32.mrb[48].mxu1 }
0x2689   : > { %v6151_v4 = vsel %vm13521_vm12, -1e+30, %v10235_v42  ;;  %v6141_v6 = vpop.f32.mrb[49].mxu1 }
0x268a   : > { %v6155_v33 = vsel %vm3010_vm14, %v6151_v4, -inf  ;;  %v6150_v10 = vsel %vm13526_vm13, -1e+30, %v6141_v6 }
0x268b   : > { %v6152_v54 = vsel %vm3006_vm15, %v6150_v10, -inf  ;;  %6156 = vmax.xlane.f32.xlu1 %v6155_v33 }
0x268c   : > { %6153 = vmax.xlane.f32.xlu0 %v6152_v54 }
0x269c   : > { %11507 = vrot.lane.b32.xlu1 %v13517_v0, %s14605_s8  ;;  %s14608_s8 = sld [smem:[#allocation55_spill]] }
0x26a0   : > { %4584 = vrot.lane.b32.xlu1 %v13751_v37, %s14511_s16 }
0x26a2   : > { %v9200_v60 = vld [vmem:[%s14608_s8] ss:$0 sm:$0xff]  ;;  %s14609_s8 = sld [smem:[#allocation56_spill]] }
0x26a4   : > { %3729 = vrot.lane.b32.xlu1 %v13585_v45, %s14606_s3 }
0x26a8   : > { %4592 = vrot.lane.b32.xlu1 %v13787_v49, %s14607_s11 }
0x26ac   : > { %3739 = vrot.lane.b32.xlu1 %v13615_v16, %s14511_s16 }
0x26b0   : > { %3745 = vrot.lane.b32.xlu1 %v13655_v46, %s14607_s11 }
0x26b4   : > { %4586 = vrot.lane.b32.xlu1 %v13749_v35, %s14511_s16 }
0x26b8   : > { %5418 = vrot.lane.b32.xlu1 %v13851_v30, %s14606_s3 }
0x26bc   : > { %5426 = vrot.lane.b32.xlu1 %v13883_v2, %s14511_s16 }
0x26c0   : > { %6272 = vrot.lane.b32.xlu1 %v6050_v41, %s14511_s16 }
0x26c4   : > { %5434 = vrot.lane.b32.xlu1 %v13921_v38, %s14607_s11 }
0x2718   : > { %v6157_v0 = vpop.xlane.xlu1 %6156 }
0x2719   : > { %v6159_v8 = vsub.f32 %v6151_v4, %v6157_v0  ;;  %v6154_v45 = vpop.xlane.xlu0 %6153 }
0x271a   : > { %v6158_v16 = vsub.f32 %v6150_v10, %v6154_v45 }
0x271b   : > { %v6162_v37 = vmul.f32 1.442695, %v6159_v8 }
0x271c   : > { %v6160_v46 = vmul.f32 1.442695, %v6158_v16  ;;  %v11508_v49 = vpop.permute.xlu1 %11507 }
0x271d   : > { %v11510_v7 = vunpack.i.h.bf16 %v11508_v49  ;;  %v11509_v35 = vunpack.i.l.bf16 %v11508_v49 }
0x271e   : > { %11651 = vpow2.f32 %v6160_v46 }
0x271f   : > { %v10869_v11 = vpack.c.bf16 %v11510_v7, %v11509_v35  ;;  %11653 = vpow2.f32 %v6162_v37 }
0x2720   : > { %v4585_v14 = vpop.permute.xlu1 %4584 }
0x2721   : > { %10871 = vmatprep.subr.msk.bf16.mxu0 %vm13557_vm1, %v10869_v11 }
0x2722   : > { %10874 = vmatpush3.bf16.msk.msra.mxu0 %vm13557_vm1, %v10869_v11 }
0x2723   : > { %10876 = vmatprep.subr.bf16.mxu0 %v10875_v22 }
0x2728   : > { %v11652_v30 = vpop.eup %11651 }
0x2729   : > { %v6164_v2 = vsel %vm3006_vm15, %v11652_v30, 0.0  ;;  %v11654_v38 = vpop.eup %11653 }
0x272a   : > { %6165 = vadd.xlane.f32.xlu0 %v6164_v2  ;;  %v6167_v12 = vsel %vm3010_vm14, %v11654_v38, 0.0  ;;  %vm6819_vm14 = vcmask 523264  }
0x272e   : > { %6168 = vadd.xlane.f32.xlu0 %v6167_v12 }
0x2744   : > { %4576 = vrot.lane.b32.xlu0 %v13719_v20, %s14606_s3 }
0x2748   : > { %3731 = vrot.lane.b32.xlu0 %v13583_v43, %s14606_s3  ;;  %v3730_v43 = vpop.permute.xlu1 %3729 }
0x2749   : > { %v3751_v19 = vsel %vm1536_vm5, %v13581_v40, %v3730_v43 }
0x274c   : > { %3737 = vrot.lane.b32.xlu0 %v13617_v32, %s14511_s16  ;;  %v4593_v32 = vpop.permute.xlu1 %4592 }
0x2750   : > { %4578 = vrot.lane.b32.xlu0 %v13717_v13, %s14606_s3 }
0x2754   : > { %3747 = vrot.lane.b32.xlu0 %v13653_v44, %s14607_s11  ;;  %v3740_v44 = vpop.permute.xlu1 %3739 }
0x2758   : > { %4594 = vrot.lane.b32.xlu0 %v13785_v47, %s14607_s11  ;;  %v3746_v13 = vpop.permute.xlu1 %3745 }
0x275c   : > { %6264 = vrot.lane.b32.xlu0 %v13985_v17, %s14606_s3 }
0x2760   : > { %6266 = vrot.lane.b32.xlu0 %v13983_v56, %s14606_s3  ;;  %v4587_v56 = vpop.permute.xlu1 %4586 }
0x2764   : > { %5420 = vrot.lane.b32.xlu0 %v13849_v55, %s14606_s3  ;;  %v5419_v61 = vpop.permute.xlu1 %5418 }
0x2765   : > { %v5440_v11 = vsel %vm1536_vm5, %v13819_v51, %v5419_v61 }
0x2768   : > { %6274 = vrot.lane.b32.xlu0 %v10228_v36, %s14511_s16  ;;  %v5427_v42 = vpop.permute.xlu1 %5426 }
0x276c   : > { %5428 = vrot.lane.b32.xlu0 %v13881_v1, %s14511_s16  ;;  %v2760_v1 = vld [vmem:[#allocation8 + $0x18] sm:$0xff]  ;;  %v6273_v10 = vpop.permute.xlu1 %6272  ;;  %s14610_s16 = sld [smem:[#allocation57_spill]] }
0x276d   : > { %v10879_v36 = vpack.c.bf16 %v2760_v1, %v2759_v27 }
0x2770   : > { %5436 = vrot.lane.b32.xlu0 %v13919_v63, %s14607_s11  ;;  %v5435_v7 = vpop.permute.xlu1 %5434 }
0x27b7   : > { %v6166_v20 = vpop.xlane.xlu0 %6165 }
0x27b8   : > { %11655 = vrcp.f32 %v6166_v20 }
0x27bb   : > { %v6169_v47 = vpop.xlane.xlu0 %6168 }
0x27bc   : > { %11657 = vrcp.f32 %v6169_v47 }
0x27bf   : > { %v4577_v17 = vpop.permute.xlu0 %4576 }
0x27c0   : > { %v4598_v62 = vsel %vm1536_vm5, %v13687_v5, %v4577_v17 }
0x27c1   : > { %v4600_v4 = vsel %vm3753_vm2, %v4598_v62, %v4585_v14 }
0x27c2   : > { %v11656_v55 = vpop.eup %11655  ;;  %v4602_v40 = vsel %vm1538_vm6, %v4600_v4, %v4593_v32 }
0x27c3   : > { %v3732_v52 = vpop.permute.xlu0 %3731  ;;  %v6172_v48 = vmul.f32 %v11656_v55, %v11652_v30  ;;  %v6294_v54 = vrot.slane %v4602_v40, 4  ;;  %v5442_v30 = vsel %vm3753_vm2, %v5440_v11, %v5427_v42 }
0x27c4   : > { %v3752_v33 = vsel %vm1536_vm5, %v13579_v39, %v3732_v52  ;;  %v5444_v2 = vsel %vm1538_vm6, %v5442_v30, %v5435_v7 }
0x27c5   : > { %10240 = vmatprep.mubr.msk.f32.mxu0 %vm3006_vm15, %v6172_v48  ;;  %v3755_v0 = vsel %vm3753_vm2, %v3752_v33, %v3740_v44 }
0x27c6   : > { %v11658_v63 = vpop.eup %11657 }
0x27c7   : > { %v6173_v57 = vmul.f32 %v11658_v63, %v11654_v38  ;;  %v3738_v59 = vpop.permute.xlu0 %3737 }
0x27c8   : > { %v3754_v41 = vsel %vm3753_vm2, %v3751_v19, %v3738_v59 }
0x27c9   : > { %10241 = vmatmul.mubr.msk.f32.vlgmr.msra.gmra.mrb[48].mxu0 %vm3006_vm15, %v6173_v57  ;;  %v3756_v6 = vsel %vm1538_vm6, %v3754_v41, %v3746_v13 }
0x27ca   : > { %10251 = vmatprep.mubr.msk.f32.mxu0 %vm2786_vm10, %v3756_v6  ;;  %10878 = vmatpush3.bf16.msra.mxu0 %v10875_v22 }
0x27cb   : > { %v4579_v5 = vpop.permute.xlu0 %4578  ;;  %10880 = vmatprep.subr.bf16.mxu0 %v10879_v36 }
0x27cc   : > { %v4599_v45 = vsel %vm1536_vm5, %v13685_v18, %v4579_v5 }
0x27cd   : > { %v4601_v46 = vsel %vm3753_vm2, %v4599_v45, %v4587_v56 }
0x27ce   : > { %10882 = vmatpush3.bf16.msra.mxu0 %v10879_v36 }
0x27cf   : > { %v3748_v8 = vpop.permute.xlu0 %3747 }
0x27d0   : > { %v3757_v16 = vsel %vm1538_vm6, %v3755_v0, %v3748_v8 }
0x27d1   : > { %v6304_v37 = vsel %vm2632_vm9, %v3757_v16, %v6294_v54 }
0x27d2   : > { %10252 = vmatmul.mubr.msk.f32.vlgmr.msra.gmra.mrb[50].mxu0 %vm2786_vm10, %v6304_v37 }
0x27d3   : > { %v4595_v49 = vpop.permute.xlu0 %4594 }
0x27d4   : > { %v4603_v39 = vsel %vm1538_vm6, %v4601_v46, %v4595_v49 }
0x27d5   : > { %v6295_v35 = vrot.slane %v4603_v39, 4 }
0x27d7   : > { %v6296_v18 = vsel %vm2632_vm9, %v6294_v54, %v6295_v35 }
0x27d8   : > { %10254 = vmatprep.mubr.msk.f32.mxu0 %vm2786_vm10, %v6296_v18 }
0x27d9   : > { %10255 = vmatmul.mubr.msk.f32.gmra.mrb[52].mxu0 %vm2786_vm10, %v5444_v2 }
0x289c   : > { %v10242_v38 = vpop.f32.mrb[48].mxu0 }
0x289d   : > { %v6253_v12 = vpop.f32.mrb[49].mxu0 }
0x289e   : > { %6280 = vrot.lane.b32.xlu1 %v6253_v12, %s14607_s11 }
0x28a2   : > { %6282 = vrot.lane.b32.xlu1 %v10242_v38, %s14607_s11 }
0x28a5   : > { %v10253_v50 = vpop.f32.mrb[50].mxu0 }
0x28a6   : > { %v6400_v22 = vadd.f32 %v10253_v50, %v9200_v60  ;;  %v6394_v51 = vpop.f32.mrb[51].mxu0 }
0x28a7   : > { %v6395_v14 = vadd.f32 %v9200_v60, %v6394_v51 }
0x28a8   : > { %v6424_v43 = vadd.f32 %v13439_v23, %v6400_v22 }
0x28a9   : > { %v6423_v32 = vadd.f32 %v6395_v14, %v13441_v25  ;;  %v6265_v25 = vpop.permute.xlu0 %6264 }
0x28aa   : > { %v6432_v44 = vsel %vm2786_vm10, %v6424_v43, 0.0  ;;  %v6286_v62 = vsel %vm1536_vm5, %v13953_v58, %v6265_v25 }
0x28ab   : > { %6433 = vadd.xlane.f32.xlu0 %v6432_v44  ;;  %v6429_v52 = vsel %vm2786_vm10, %v6423_v32, 0.0  ;;  %v2764_v44 = vld [vmem:[#allocation10] sm:$0xff] }
0x28ac   : > { %v10256_v13 = vpop.f32.mrb[52].mxu0 }
0x28ad   : > { %v6410_v20 = vadd.f32 %v10256_v13, %v9200_v60  ;;  %v6404_v47 = vpop.f32.mrb[53].mxu0  ;;  %v6267_v48 = vpop.permute.xlu0 %6266  ;;  %v2765_v13 = vld [vmem:[#allocation10 + $0x8] sm:$0xff] }
0x28ae   : > { %v6405_v56 = vadd.f32 %v9200_v60, %v6404_v47  ;;  %v6287_v42 = vsel %vm1536_vm5, %v13951_v53, %v6267_v48  ;;  %v2766_v47 = vld [vmem:[#allocation10 + $0x10] sm:$0xff] }
0x28af   : > { %v6426_v17 = vadd.f32 %v13447_v26, %v6410_v20  ;;  %v10883_v20 = vpack.c.bf16 %v2765_v13, %v2764_v44  ;;  %v2774_v44 = vld [vmem:[#allocation11 + $0x28] sm:$0xff] }
0x28b0   : > { %v6425_v55 = vadd.f32 %v6405_v56, %v13449_v28  ;;  %v6288_v28 = vsel %vm3753_vm2, %v6286_v62, %v6273_v10  ;;  %v2767_v56 = vld [vmem:[#allocation10 + $0x18] sm:$0xff] }
0x28b1   : > { %v6438_v23 = vsel %vm2786_vm10, %v6426_v17, 0.0  ;;  %v5421_v27 = vpop.permute.xlu0 %5420  ;;  %10884 = vmatprep.subr.bf16.mxu1 %v10883_v20 }
0x28b2   : > { %v6435_v61 = vsel %vm2786_vm10, %v6425_v55, 0.0  ;;  %v5441_v57 = vsel %vm1536_vm5, %v13817_v24, %v5421_v27  ;;  %10886 = vmatpush3.bf16.msra.mxu1 %v10883_v20  ;;  %v2775_v20 = vld [vmem:[#allocation11 + $0x30] sm:$0xff] }
0x28b3   : > { %6436 = vadd.xlane.f32.xlu0 %v6435_v61 }
0x28b5   : > { %v6275_v1 = vpop.permute.xlu0 %6274 }
0x28b6   : > { %v6289_v6 = vsel %vm3753_vm2, %v6287_v42, %v6275_v1 }
0x28b9   : > { %v5429_v63 = vpop.permute.xlu0 %5428 }
0x28ba   : > { %v5443_v36 = vsel %vm3753_vm2, %v5441_v57, %v5429_v63 }
0x28bd   : > { %v5437_v26 = vpop.permute.xlu0 %5436 }
0x28be   : > { %v5445_v4 = vsel %vm1538_vm6, %v5443_v36, %v5437_v26 }
0x28c6   : > { %6430 = vadd.xlane.f32.xlu1 %v6429_v52 }
0x28ca   : > { %6439 = vadd.xlane.f32.xlu1 %v6438_v23 }
0x2910   : > { %v6281_v19 = vpop.permute.xlu1 %6280 }
0x2911   : > { %v6290_v59 = vsel %vm1538_vm6, %v6288_v28, %v6281_v19 }
0x2912   : > { %v6300_v41 = vrot.slane %v6290_v59, 4 }
0x2914   : > { %v6283_v58 = vpop.permute.xlu1 %6282  ;;  %v6305_v5 = vsel %vm2632_vm9, %v5445_v4, %v6300_v41 }
0x2915   : > { %v6291_v40 = vsel %vm1538_vm6, %v6289_v6, %v6283_v58  ;;  %10257 = vmatprep.mubr.msk.f32.mxu0 %vm2786_vm10, %v6305_v5 }
0x2916   : > { %v6301_v24 = vrot.slane %v6291_v40, 4 }
0x2918   : > { %v6302_v33 = vsel %vm2632_vm9, %v6300_v41, %v6301_v24  ;;  %v9207_v24 = vld [vmem:[%s14609_s8] ss:$0 sm:$0xff]  ;;  %s14612_s8 = sld [smem:[#allocation60_spill]] }
0x2919   : > { %10258 = vmatmul.mubr.msk.f32.gmra.mrb[54].mxu0 %vm2786_vm10, %v6302_v33 }
0x2938   : > { %v6434_v54 = vpop.xlane.xlu0 %6433 }
0x2939   : > { %v6449_v0 = vmul.f32 0.03125, %v6434_v54 }
0x293b   : > { %v14126_v37 = vsub.f32 %v6424_v43, %v6449_v0  ;;  %v9208_v0 = vld [vmem:[%s14610_s16] ss:$0 sm:$0xff]  ;;  %s14611_s16 = sld [smem:[#allocation58_spill]] }
0x293d   : > { %v6461_v12 = vmul.f32 %v14126_v37, %v14126_v37 }
0x2940   : > { %v6437_v45 = vpop.xlane.xlu0 %6436 }
0x2941   : > { %v6450_v7 = vmul.f32 0.03125, %v6437_v45 }
0x2943   : > { %v14137_v50 = vsub.f32 %v6425_v55, %v6450_v7 }
0x2945   : > { %v6462_v14 = vmul.f32 %v14137_v50, %v14137_v50 }
0x2953   : > { %v6431_v10 = vpop.xlane.xlu1 %6430 }
0x2954   : > { %v6448_v53 = vmul.f32 0.03125, %v6431_v10 }
0x2956   : > { %v14128_v35 = vsub.f32 %v6423_v32, %v6448_v53  ;;  %v6472_v32 = vsel %vm2786_vm10, %v6462_v14, 0.0 }
0x2957   : > { %v6440_v8 = vpop.xlane.xlu1 %6439 }
0x2958   : > { %v6451_v46 = vmul.f32 0.03125, %v6440_v8  ;;  %v6460_v51 = vmul.f32 %v14128_v35, %v14128_v35 }
0x295a   : > { %v14132_v2 = vsub.f32 %v6426_v17, %v6451_v46  ;;  %v10887_v17 = vpack.c.bf16 %v2767_v56, %v2766_v47  ;;  %v2776_v47 = vld [vmem:[#allocation11 + $0x38] sm:$0xff] }
0x295b   : > { %v10903_v56 = vpack.c.bf16 %v2776_v47, %v2775_v20 }
0x295c   : > { %10888 = vmatprep.subr.bf16.mxu1 %v10887_v17 }
0x295d   : > { %10890 = vmatpush3.bf16.msra.mxu1 %v10887_v17 }
0x29ec   : > { %v10259_v16 = vpop.f32.mrb[54].mxu0 }
0x29ed   : > { %v6420_v49 = vadd.f32 %v10259_v16, %v9200_v60  ;;  %v6414_v39 = vpop.f32.mrb[55].mxu0 }
0x29ee   : > { %v6415_v11 = vadd.f32 %v9200_v60, %v6414_v39  ;;  %v6466_v60 = vsel %vm2786_vm10, %v6460_v51, 0.0 }
0x29ef   : > { %v6428_v30 = vadd.f32 %v13455_v29, %v6420_v49  ;;  %v6469_v29 = vsel %vm2786_vm10, %v6461_v12, 0.0 }
0x29f0   : > { %v6427_v18 = vadd.f32 %v6415_v11, %v13457_v31  ;;  %v6463_v31 = vmul.f32 %v14132_v2, %v14132_v2 }
0x29f1   : > { %v6444_v38 = vsel %vm2786_vm10, %v6428_v30, 0.0 }
0x29f2   : > { %6445 = vadd.xlane.f32.xlu1 %v6444_v38  ;;  %v6441_v22 = vsel %vm2786_vm10, %v6427_v18, 0.0  ;;  %v6475_v43 = vsel %vm2786_vm10, %v6463_v31, 0.0 }
0x29f3   : > { %6442 = vadd.xlane.f32.xlu0 %v6441_v22  ;;  %v2772_v22 = vld [vmem:[#allocation11 + $0x18] sm:$0xff] }
0x29f6   : > { %6470 = vadd.xlane.f32.xlu1 %v6469_v29 }
0x29f7   : > { %6467 = vadd.xlane.f32.xlu0 %v6466_v60 }
0x29fa   : > { %6476 = vadd.xlane.f32.xlu1 %v6475_v43 }
0x29fb   : > { %6473 = vadd.xlane.f32.xlu0 %v6472_v32  ;;  %v2773_v32 = vld [vmem:[#allocation11 + $0x20] sm:$0xff] }
0x29fc   : > { %v10899_v13 = vpack.c.bf16 %v2774_v44, %v2773_v32 }
0x2a7f   : > { %v6446_v55 = vpop.xlane.xlu1 %6445 }
0x2a80   : > { %v6453_v61 = vmul.f32 0.03125, %v6446_v55  ;;  %v6443_v52 = vpop.xlane.xlu0 %6442 }
0x2a81   : > { %v6452_v23 = vmul.f32 0.03125, %v6443_v52 }
0x2a82   : > { %v14150_v25 = vsub.f32 %v6428_v30, %v6453_v61 }
0x2a83   : > { %v14152_v48 = vsub.f32 %v6427_v18, %v6452_v23  ;;  %v6471_v27 = vpop.xlane.xlu1 %6470  ;;  %v2769_v18 = vld [vmem:[#allocation11] sm:$0xff] }
0x2a84   : > { %v6485_v1 = vmul.f32 0.03125, %v6471_v27  ;;  %v6468_v63 = vpop.xlane.xlu0 %6467  ;;  %v6465_v62 = vmul.f32 %v14150_v25, %v14150_v25 }
0x2a85   : > { %v6484_v26 = vmul.f32 0.03125, %v6468_v63  ;;  %v6464_v19 = vmul.f32 %v14152_v48, %v14152_v48 }
0x2a86   : > { %v6491_v28 = vadd.f32 1e-05, %v6485_v1  ;;  %v6481_v57 = vsel %vm2786_vm10, %v6465_v62, 0.0  ;;  %v14194_v62 = vld [vmem:[%s14611_s16] ss:$0 sm:$0xff]  ;;  %s14613_s16 = sld [smem:[#allocation61_spill]] }
0x2a87   : > { %v6490_v59 = vadd.f32 1e-05, %v6484_v26  ;;  %6482 = vadd.xlane.f32.xlu1 %v6481_v57  ;;  %v6477_v36 = vpop.xlane.xlu1 %6476  ;;  %v6478_v41 = vsel %vm2786_vm10, %v6464_v19, 0.0 }
0x2a88   : > { %11659 = vrsqrt.f32 %v6491_v28  ;;  %v6487_v42 = vmul.f32 0.03125, %v6477_v36  ;;  %6479 = vadd.xlane.f32.xlu0 %v6478_v41  ;;  %v6474_v4 = vpop.xlane.xlu0 %6473 }
0x2a89   : > { %11661 = vrsqrt.f32 %v6490_v59  ;;  %v6486_v6 = vmul.f32 0.03125, %v6474_v4 }
0x2a8a   : > { %v6493_v58 = vadd.f32 1e-05, %v6487_v42 }
0x2a8b   : > { %v6492_v5 = vadd.f32 1e-05, %v6486_v6 }
0x2a8c   : > { %11663 = vrsqrt.f32 %v6493_v58 }
0x2a8d   : > { %11665 = vrsqrt.f32 %v6492_v5 }
0x2a92   : > { %v11660_v40 = vpop.eup %11659 }
0x2a93   : > { %v11662_v33 = vpop.eup %11661  ;;  %v6503_v10 = vmul.f32 %v11660_v40, %v14126_v37 }
0x2a94   : > { %v6502_v54 = vmul.f32 %v11662_v33, %v14128_v35 }
0x2a95   : > { %v6515_v53 = vmul.f32 %v9207_v24, %v6503_v10 }
0x2a96   : > { %v11664_v8 = vpop.eup %11663  ;;  %v6514_v45 = vmul.f32 %v9207_v24, %v6502_v54 }
0x2a97   : > { %v11666_v16 = vpop.eup %11665  ;;  %v6505_v46 = vmul.f32 %v11664_v8, %v14132_v2  ;;  %v14168_v7 = vadd.f32 %v9208_v0, %v6515_v53  ;;  %v2770_v2 = vld [vmem:[#allocation11 + $0x8] sm:$0xff] }
0x2a98   : > { %v14165_v49 = vadd.f32 %v9208_v0, %v6514_v45  ;;  %v6504_v39 = vmul.f32 %v11666_v16, %v14137_v50  ;;  %v10891_v38 = vpack.c.bf16 %v2770_v2, %v2769_v18  ;;  %v2771_v50 = vld [vmem:[#allocation11 + $0x10] sm:$0xff] }
0x2a99   : > { %v6517_v11 = vmul.f32 %v9207_v24, %v6505_v46  ;;  %v10895_v31 = vpack.c.bf16 %v2772_v22, %v2771_v50 }
0x2a9a   : > { %10268 = vmatprep.mubr.msk.f32.mxu1 %vm2786_vm10, %v14165_v49  ;;  %v6516_v37 = vmul.f32 %v9207_v24, %v6504_v39  ;;  %10892 = vmatprep.subr.bf16.mxu0 %v10891_v38 }
0x2a9b   : > { %10269 = vmatmul.mubr.msk.f32.vlgmr.msra.gmra.mrb[50].mxu1 %vm2786_vm10, %v14168_v7  ;;  %v14176_v30 = vadd.f32 %v9208_v0, %v6517_v11  ;;  %10894 = vmatpush3.bf16.msra.mxu0 %v10891_v38 }
0x2a9c   : > { %v14174_v35 = vadd.f32 %v9208_v0, %v6516_v37  ;;  %10896 = vmatprep.subr.bf16.mxu0 %v10895_v31 }
0x2a9e   : > { %10271 = vmatprep.mubr.msk.f32.mxu1 %vm2786_vm10, %v14174_v35 }
0x2a9f   : > { %10272 = vmatmul.mubr.msk.f32.gmra.mrb[52].mxu1 %vm2786_vm10, %v14176_v30  ;;  %10898 = vmatpush3.bf16.msra.mxu0 %v10895_v31 }
0x2aa0   : > { %10900 = vmatprep.subr.bf16.mxu0 %v10899_v13 }
0x2aa3   : > { %10902 = vmatpush3.bf16.msra.mxu0 %v10899_v13 }
0x2aa4   : > { %10904 = vmatprep.subr.bf16.mxu0 %v10903_v56 }
0x2aa7   : > { %10906 = vmatpush3.bf16.msra.mxu0 %v10903_v56 }
0x2aa8   : > { %10951 = vmatprep.subr.bf16.mxu0 %v12489_v21 }
0x2b14   : > { %v6483_v12 = vpop.xlane.xlu1 %6482 }
0x2b15   : > { %v6489_v51 = vmul.f32 0.03125, %v6483_v12  ;;  %v6480_v29 = vpop.xlane.xlu0 %6479 }
0x2b16   : > { %v6488_v60 = vmul.f32 0.03125, %v6480_v29 }
0x2b17   : > { %v6495_v14 = vadd.f32 1e-05, %v6489_v51 }
0x2b18   : > { %v6494_v43 = vadd.f32 1e-05, %v6488_v60 }
0x2b19   : > { %11667 = vrsqrt.f32 %v6495_v14 }
0x2b1a   : > { %11669 = vrsqrt.f32 %v6494_v43 }
0x2b23   : > { %v11668_v17 = vpop.eup %11667 }
0x2b24   : > { %v11670_v55 = vpop.eup %11669  ;;  %v6507_v61 = vmul.f32 %v11668_v17, %v14150_v25 }
0x2b25   : > { %v6506_v52 = vmul.f32 %v11670_v55, %v14152_v48 }
0x2b26   : > { %v6519_v23 = vmul.f32 %v9207_v24, %v6507_v61 }
0x2b27   : > { %v6518_v27 = vmul.f32 %v9207_v24, %v6506_v52 }
0x2b28   : > { %v14187_v63 = vadd.f32 %v9208_v0, %v6519_v23 }
0x2b29   : > { %v14185_v1 = vadd.f32 %v9208_v0, %v6518_v27 }
0x2b2b   : > { %10274 = vmatprep.mubr.msk.f32.mxu1 %vm2786_vm10, %v14185_v1 }
0x2b2c   : > { %10275 = vmatmul.mubr.msk.f32.gmra.mrb[54].mxu1 %vm2786_vm10, %v14187_v63 }
0x2b6e   : > { %v10270_v26 = vpop.f32.mrb[50].mxu1 }
0x2b6f   : > { %v14197_v19 = vadd.f32 %v10270_v26, %v14194_v62  ;;  %v6622_v25 = vpop.f32.mrb[51].mxu1 }
0x2b70   : > { %v14200_v48 = vadd.f32 %v14194_v62, %v6622_v25 }
0x2b71   : > { %v14203_v28 = vmul.f32 0.70710677, %v14197_v19 }
0x2b72   : > { %v14206_v57 = vmul.f32 0.70710677, %v14200_v48  ;;  %v10273_v59 = vpop.f32.mrb[52].mxu1 }
0x2b73   : > { %v6664_v36 = vand.u32 2147483647, %v14203_v28  ;;  %v14210_v41 = vadd.f32 %v10273_v59, %v14194_v62  ;;  %v6632_v42 = vpop.f32.mrb[53].mxu1  ;;  %vm6784_vm8 = vcmp.lt.f32.partialorder %v14203_v28, 0.0 }
0x2b74   : > { %v6663_v4 = vand.u32 2147483647, %v14206_v57  ;;  %v14214_v6 = vadd.f32 %v14194_v62, %v6632_v42  ;;  %vm6783_vm11 = vcmp.lt.f32.partialorder %v14206_v57, 0.0 }
0x2b75   : > { %v6670_v58 = vmul.f32 0.3275911, %v6664_v36  ;;  %v14217_v5 = vmul.f32 0.70710677, %v14210_v41  ;;  %v6748_v46 = vsub.f32 0.0, %v6664_v36 }
0x2b76   : > { %v6669_v40 = vmul.f32 0.3275911, %v6663_v4  ;;  %v14220_v24 = vmul.f32 0.70710677, %v14214_v6  ;;  %v6747_v39 = vsub.f32 0.0, %v6663_v4 }
0x2b77   : > { %v6676_v33 = vadd.f32 1.0, %v6670_v58  ;;  %v6666_v10 = vand.u32 2147483647, %v14217_v5  ;;  %v6754_v37 = vmul.f32 %v6748_v46, %v6664_v36  ;;  %vm6786_vm12 = vcmp.lt.f32.partialorder %v14217_v5, 0.0 }
0x2b78   : > { %v6675_v54 = vadd.f32 1.0, %v6669_v40  ;;  %v6665_v0 = vand.u32 2147483647, %v14220_v24  ;;  %v6753_v12 = vmul.f32 %v6747_v39, %v6663_v4  ;;  %vm6785_vm15 = vcmp.lt.f32.partialorder %v14220_v24, 0.0 }
0x2b79   : > { %11671 = vrcp.f32 %v6676_v33  ;;  %v6672_v53 = vmul.f32 0.3275911, %v6666_v10  ;;  %v6750_v18 = vsub.f32 0.0, %v6666_v10  ;;  %v6761_v31 = vmul.f32 1.442695, %v6754_v37 }
0x2b7a   : > { %11673 = vrcp.f32 %v6675_v54  ;;  %v6671_v8 = vmul.f32 0.3275911, %v6665_v0  ;;  %v6749_v50 = vsub.f32 0.0, %v6665_v0  ;;  %v6759_v44 = vmul.f32 1.442695, %v6753_v12 }
0x2b7b   : > { %v6678_v45 = vadd.f32 1.0, %v6672_v53  ;;  %v6756_v14 = vmul.f32 %v6750_v18, %v6666_v10 }
0x2b7c   : > { %v6677_v16 = vadd.f32 1.0, %v6671_v8  ;;  %v6755_v20 = vmul.f32 %v6749_v50, %v6665_v0 }
0x2b7d   : > { %11675 = vrcp.f32 %v6678_v45  ;;  %v6765_v52 = vmul.f32 1.442695, %v6756_v14 }
0x2b7e   : > { %11677 = vrcp.f32 %v6677_v16  ;;  %v6763_v25 = vmul.f32 1.442695, %v6755_v20 }
0x2b7f   : > { %11679 = vpow2.f32 %v6761_v31 }
0x2b80   : > { %11681 = vpow2.f32 %v6759_v44 }
0x2b81   : > { %11683 = vpow2.f32 %v6765_v52 }
0x2b82   : > { %11685 = vpow2.f32 %v6763_v25 }
0x2b83   : > { %v11672_v11 = vpop.eup %11671 }
0x2b84   : > { %v11674_v2 = vpop.eup %11673  ;;  %v6694_v38 = vmul.f32 1.0614054, %v11672_v11 }
0x2b85   : > { %v6693_v22 = vmul.f32 1.0614054, %v11674_v2 }
0x2b86   : > { %v6700_v51 = vadd.f32 -1.4531521, %v6694_v38 }
0x2b87   : > { %v11676_v29 = vpop.eup %11675  ;;  %v6699_v60 = vadd.f32 -1.4531521, %v6693_v22 }
0x2b88   : > { %v11678_v43 = vpop.eup %11677  ;;  %v6706_v32 = vmul.f32 %v11672_v11, %v6700_v51  ;;  %v6696_v13 = vmul.f32 1.0614054, %v11676_v29 }
0x2b89   : > { %v6705_v47 = vmul.f32 %v11674_v2, %v6699_v60  ;;  %v6695_v56 = vmul.f32 1.0614054, %v11678_v43  ;;  %v11680_v37 = vpop.eup %11679 }
0x2b8a   : > { %v6712_v17 = vadd.f32 1.4214138, %v6706_v32  ;;  %v6702_v55 = vadd.f32 -1.4531521, %v6696_v13  ;;  %v11682_v12 = vpop.eup %11681 }
0x2b8b   : > { %v6711_v61 = vadd.f32 1.4214138, %v6705_v47  ;;  %v6701_v23 = vadd.f32 -1.4531521, %v6695_v56  ;;  %v11684_v32 = vpop.eup %11683 }
0x2b8c   : > { %v6718_v27 = vmul.f32 %v11672_v11, %v6712_v17  ;;  %v6708_v26 = vmul.f32 %v11676_v29, %v6702_v55  ;;  %v11686_v20 = vpop.eup %11685 }
0x2b8d   : > { %v6717_v59 = vmul.f32 %v11674_v2, %v6711_v61  ;;  %v6707_v36 = vmul.f32 %v11678_v43, %v6701_v23 }
0x2b8e   : > { %v6724_v42 = vadd.f32 -0.28449672, %v6718_v27  ;;  %v6714_v4 = vadd.f32 1.4214138, %v6708_v26  ;;  %v6651_v27 = vmul.f32 0.5, %v14200_v48  ;;  %v6654_v48 = vmul.f32 0.5, %v14210_v41 }
0x2b8f   : > { %v6723_v58 = vadd.f32 -0.28449672, %v6717_v59  ;;  %v6713_v40 = vadd.f32 1.4214138, %v6707_v36 }
0x2b90   : > { %v6730_v33 = vmul.f32 %v11672_v11, %v6724_v42  ;;  %v6720_v10 = vmul.f32 %v11676_v29, %v6714_v4  ;;  %v6653_v4 = vmul.f32 0.5, %v14214_v6 }
0x2b91   : > { %v6729_v54 = vmul.f32 %v11674_v2, %v6723_v58  ;;  %v6719_v0 = vmul.f32 %v11678_v43, %v6713_v40 }
0x2b92   : > { %v6736_v53 = vadd.f32 0.2548296, %v6730_v33  ;;  %v6726_v8 = vadd.f32 -0.28449672, %v6720_v10 }
0x2b93   : > { %v6735_v45 = vadd.f32 0.2548296, %v6729_v54  ;;  %v6725_v16 = vadd.f32 -0.28449672, %v6719_v0 }
0x2b94   : > { %v6742_v46 = vmul.f32 %v11672_v11, %v6736_v53  ;;  %v6732_v39 = vmul.f32 %v11676_v29, %v6726_v8 }
0x2b95   : > { %v6741_v18 = vmul.f32 %v11674_v2, %v6735_v45  ;;  %v6731_v38 = vmul.f32 %v11678_v43, %v6725_v16 }
0x2b96   : > { %v6772_v50 = vmul.f32 %v11680_v37, %v6742_v46  ;;  %v6738_v22 = vadd.f32 0.2548296, %v6732_v39 }
0x2b97   : > { %v6771_v51 = vmul.f32 %v11682_v12, %v6741_v18  ;;  %v6737_v31 = vadd.f32 0.2548296, %v6731_v38 }
0x2b98   : > { %v6778_v60 = vsub.f32 1.0, %v6772_v50  ;;  %v6744_v14 = vmul.f32 %v11676_v29, %v6738_v22 }
0x2b99   : > { %v6777_v44 = vsub.f32 1.0, %v6771_v51  ;;  %v6743_v13 = vmul.f32 %v11678_v43, %v6737_v31  ;;  %v6652_v43 = vmul.f32 0.5, %v14197_v19 }
0x2b9a   : > { %v6790_v47 = vsub.f32 0.0, %v6778_v60  ;;  %v6774_v56 = vmul.f32 %v11684_v32, %v6744_v14 }
0x2b9b   : > { %v6789_v11 = vsub.f32 0.0, %v6777_v44  ;;  %v6773_v17 = vmul.f32 %v11686_v20, %v6743_v13 }
0x2b9c   : > { %v6796_v55 = vsel %vm6784_vm8, %v6790_v47, %v6778_v60  ;;  %v6780_v2 = vsub.f32 1.0, %v6774_v56 }
0x2b9d   : > { %v6802_v61 = vadd.f32 1.0, %v6796_v55  ;;  %v6795_v52 = vsel %vm6783_vm11, %v6789_v11, %v6777_v44  ;;  %v6779_v23 = vsub.f32 1.0, %v6773_v17 }
0x2b9e   : > { %v6801_v29 = vadd.f32 1.0, %v6795_v52  ;;  %v6792_v26 = vsub.f32 0.0, %v6780_v2 }
0x2b9f   : > { %v6791_v25 = vsub.f32 0.0, %v6779_v23  ;;  %v6808_v36 = vmul.f32 %v6802_v61, %v6652_v43 }
0x2ba0   : > { %v6807_v28 = vmul.f32 %v6801_v29, %v6651_v27  ;;  %v6798_v59 = vsel %vm6786_vm12, %v6792_v26, %v6780_v2 }
0x2ba1   : > { %v6804_v57 = vadd.f32 1.0, %v6798_v59  ;;  %v6797_v42 = vsel %vm6785_vm15, %v6791_v25, %v6779_v23 }
0x2ba2   : > { %v6803_v58 = vadd.f32 1.0, %v6797_v42  ;;  %10293 = vmatprep.mubr.msk.f32.mxu0 %vm6819_vm14, %v6807_v28 }
0x2ba3   : > { %10294 = vmatmul.mubr.msk.f32.vlgmr.msra.gmra.mrb[56].mxu0 %vm6819_vm14, %v6808_v36  ;;  %v6810_v5 = vmul.f32 %v6804_v57, %v6654_v48 }
0x2ba4   : > { %v6809_v19 = vmul.f32 %v6803_v58, %v6653_v4 }
0x2ba6   : > { %10296 = vmatprep.mubr.msk.f32.mxu0 %vm6819_vm14, %v6809_v19 }
0x2ba7   : > { %10297 = vmatmul.mubr.msk.f32.gmra.mrb[58].mxu0 %vm6819_vm14, %v6810_v5 }
0x2bff   : > { %v10276_v40 = vpop.f32.mrb[54].mxu1 }
0x2c00   : > { %v6648_v24 = vadd.f32 %v10276_v40, %v14194_v62  ;;  %v6642_v33 = vpop.f32.mrb[55].mxu1 }
0x2c01   : > { %v6643_v10 = vadd.f32 %v14194_v62, %v6642_v33  ;;  %v9216_v33 = vld [vmem:[%s14612_s8] ss:$0 sm:$0xff]  ;;  %s14614_s8 = sld [smem:[#allocation62_spill]] }
0x2c02   : > { %v6662_v6 = vmul.f32 0.70710677, %v6648_v24  ;;  %v6656_v19 = vmul.f32 0.5, %v6648_v24 }
0x2c03   : > { %v6661_v54 = vmul.f32 0.70710677, %v6643_v10  ;;  %v6655_v58 = vmul.f32 0.5, %v6643_v10 }
0x2c04   : > { %v6668_v0 = vand.u32 2147483647, %v6662_v6  ;;  %vm6788_vm0 = vcmp.lt.f32.partialorder %v6662_v6, 0.0 }
0x2c05   : > { %v6667_v53 = vand.u32 2147483647, %v6661_v54  ;;  %vm6787_vm1 = vcmp.lt.f32.partialorder %v6661_v54, 0.0 }
0x2c06   : > { %v6674_v8 = vmul.f32 0.3275911, %v6668_v0  ;;  %v6752_v46 = vsub.f32 0.0, %v6668_v0 }
0x2c07   : > { %v6673_v41 = vmul.f32 0.3275911, %v6667_v53  ;;  %v6751_v39 = vsub.f32 0.0, %v6667_v53 }
0x2c08   : > { %v6680_v45 = vadd.f32 1.0, %v6674_v8  ;;  %v6758_v18 = vmul.f32 %v6752_v46, %v6668_v0 }
0x2c09   : > { %v6679_v16 = vadd.f32 1.0, %v6673_v41  ;;  %v6757_v50 = vmul.f32 %v6751_v39, %v6667_v53 }
0x2c0a   : > { %11687 = vrcp.f32 %v6680_v45  ;;  %v6769_v62 = vmul.f32 1.442695, %v6758_v18 }
0x2c0b   : > { %11689 = vrcp.f32 %v6679_v16  ;;  %v6767_v14 = vmul.f32 1.442695, %v6757_v50 }
0x2c0c   : > { %11691 = vpow2.f32 %v6769_v62 }
0x2c0d   : > { %11693 = vpow2.f32 %v6767_v14 }
0x2c14   : > { %v11688_v37 = vpop.eup %11687 }
0x2c15   : > { %v11690_v38 = vpop.eup %11689  ;;  %v6698_v12 = vmul.f32 1.0614054, %v11688_v37 }
0x2c16   : > { %v6697_v22 = vmul.f32 1.0614054, %v11690_v38  ;;  %v11692_v23 = vpop.eup %11691 }
0x2c17   : > { %v6704_v51 = vadd.f32 -1.4531521, %v6698_v12  ;;  %v11694_v29 = vpop.eup %11693 }
0x2c18   : > { %v6703_v31 = vadd.f32 -1.4531521, %v6697_v22 }
0x2c19   : > { %v6710_v60 = vmul.f32 %v11688_v37, %v6704_v51 }
0x2c1a   : > { %v6709_v32 = vmul.f32 %v11690_v38, %v6703_v31 }
0x2c1b   : > { %v6716_v44 = vadd.f32 1.4214138, %v6710_v60 }
0x2c1c   : > { %v6715_v13 = vadd.f32 1.4214138, %v6709_v32 }
0x2c1d   : > { %v6722_v20 = vmul.f32 %v11688_v37, %v6716_v44 }
0x2c1e   : > { %v6721_v47 = vmul.f32 %v11690_v38, %v6715_v13 }
0x2c1f   : > { %v6728_v56 = vadd.f32 -0.28449672, %v6722_v20 }
0x2c20   : > { %v6727_v11 = vadd.f32 -0.28449672, %v6721_v47 }
0x2c21   : > { %v6734_v17 = vmul.f32 %v11688_v37, %v6728_v56 }
0x2c22   : > { %v6733_v55 = vmul.f32 %v11690_v38, %v6727_v11 }
0x2c23   : > { %v6740_v2 = vadd.f32 0.2548296, %v6734_v17 }
0x2c24   : > { %v6739_v61 = vadd.f32 0.2548296, %v6733_v55 }
0x2c25   : > { %v6746_v52 = vmul.f32 %v11688_v37, %v6740_v2 }
0x2c26   : > { %v6745_v27 = vmul.f32 %v11690_v38, %v6739_v61 }
0x2c27   : > { %v6776_v26 = vmul.f32 %v11692_v23, %v6746_v52 }
0x2c28   : > { %v6775_v43 = vmul.f32 %v11694_v29, %v6745_v27 }
0x2c29   : > { %v6782_v25 = vsub.f32 1.0, %v6776_v26 }
0x2c2a   : > { %v6781_v28 = vsub.f32 1.0, %v6775_v43 }
0x2c2b   : > { %v6794_v59 = vsub.f32 0.0, %v6782_v25 }
0x2c2c   : > { %v6793_v36 = vsub.f32 0.0, %v6781_v28 }
0x2c2d   : > { %v6800_v57 = vsel %vm6788_vm0, %v6794_v59, %v6782_v25 }
0x2c2e   : > { %v6806_v42 = vadd.f32 1.0, %v6800_v57  ;;  %v6799_v4 = vsel %vm6787_vm1, %v6793_v36, %v6781_v28 }
0x2c2f   : > { %v6805_v48 = vadd.f32 1.0, %v6799_v4 }
0x2c30   : > { %v6812_v40 = vmul.f32 %v6806_v42, %v6656_v19 }
0x2c31   : > { %v6811_v5 = vmul.f32 %v6805_v48, %v6655_v58 }
0x2c33   : > { %10299 = vmatprep.mubr.msk.f32.mxu0 %vm6819_vm14, %v6811_v5 }
0x2c34   : > { %10300 = vmatmul.mubr.msk.f32.gmra.mrb[60].mxu0 %vm6819_vm14, %v6812_v40 }
0x2c35   : > { %10355 = vmatprep.mubr.msk.f32.mxu0 %vm12490_vm3, %v12491_v34 }
0x2c76   : > { %v10295_v0 = vpop.f32.mrb[56].mxu0 }
0x2c77   : > { %v6910_v6 = vadd.f32 %v10295_v0, %v9216_v33  ;;  %v6904_v53 = vpop.f32.mrb[57].mxu0 }
0x2c78   : > { %v6905_v8 = vadd.f32 %v9216_v33, %v6904_v53 }
0x2c79   : > { %v6934_v54 = vadd.f32 %v6910_v6, %v14168_v7 }
0x2c7a   : > { %v6933_v10 = vadd.f32 %v6905_v8, %v14165_v49  ;;  %v10298_v41 = vpop.f32.mrb[58].mxu0 }
0x2c7b   : > { %v6920_v24 = vadd.f32 %v10298_v41, %v9216_v33  ;;  %v6914_v45 = vpop.f32.mrb[59].mxu0  ;;  %v6942_v16 = vsel %vm2786_vm10, %v6934_v54, 0.0 }
0x2c7c   : > { %v6915_v46 = vadd.f32 %v9216_v33, %v6914_v45  ;;  %6943 = vadd.xlane.f32.xlu1 %v6942_v16  ;;  %v6939_v39 = vsel %vm2786_vm10, %v6933_v10, 0.0  ;;  %v9223_v45 = vld [vmem:[%s14613_s16] ss:$0 sm:$0xff]  ;;  %s12524_s16 = smov 32  }
0x2c7d   : > { %v6936_v37 = vadd.f32 %v6920_v24, %v14176_v30  ;;  %6940 = vadd.xlane.f32.xlu0 %v6939_v39  ;;  %v9224_v39 = vld [vmem:[%s14614_s8] ss:$0 sm:$0xff]  ;;  %s14616_s8 = smov 120  }
0x2c7e   : > { %v6935_v18 = vadd.f32 %v6915_v46, %v14174_v35 }
0x2c7f   : > { %v6948_v38 = vsel %vm2786_vm10, %v6936_v37, 0.0 }
0x2c80   : > { %6949 = vadd.xlane.f32.xlu1 %v6948_v38  ;;  %v6945_v7 = vsel %vm2786_vm10, %v6935_v18, 0.0 }
0x2c81   : > { %6946 = vadd.xlane.f32.xlu0 %v6945_v7 }
0x2d07   : > { %v10301_v49 = vpop.f32.mrb[60].mxu0 }
0x2d08   : > { %v6930_v12 = vadd.f32 %v10301_v49, %v9216_v33  ;;  %v6924_v50 = vpop.f32.mrb[61].mxu0 }
0x2d09   : > { %v6925_v22 = vadd.f32 %v9216_v33, %v6924_v50  ;;  %v6944_v51 = vpop.xlane.xlu1 %6943 }
0x2d0a   : > { %v6938_v62 = vadd.f32 %v6930_v12, %v14187_v63  ;;  %v6958_v31 = vmul.f32 0.03125, %v6944_v51  ;;  %v6941_v60 = vpop.xlane.xlu0 %6940 }
0x2d0b   : > { %v6937_v30 = vadd.f32 %v6925_v22, %v14185_v1  ;;  %v6957_v14 = vmul.f32 0.03125, %v6941_v60 }
0x2d0c   : > { %v6964_v32 = vsub.f32 %v6934_v54, %v6958_v31  ;;  %v6954_v35 = vsel %vm2786_vm10, %v6938_v62, 0.0 }
0x2d0d   : > { %v6963_v44 = vsub.f32 %v6933_v10, %v6957_v14  ;;  %v6950_v13 = vpop.xlane.xlu1 %6949  ;;  %6955 = vadd.xlane.f32.xlu1 %v6954_v35  ;;  %v6951_v20 = vsel %vm2786_vm10, %v6937_v30, 0.0 }
0x2d0e   : > { %v6960_v47 = vmul.f32 0.03125, %v6950_v13  ;;  %6952 = vadd.xlane.f32.xlu0 %v6951_v20  ;;  %v6947_v56 = vpop.xlane.xlu0 %6946  ;;  %v6970_v11 = vmul.f32 %v6964_v32, %v6964_v32 }
0x2d0f   : > { %v6959_v17 = vmul.f32 0.03125, %v6947_v56  ;;  %v6969_v55 = vmul.f32 %v6963_v44, %v6963_v44 }
0x2d10   : > { %v6966_v63 = vsub.f32 %v6936_v37, %v6960_v47  ;;  %v6978_v2 = vsel %vm2786_vm10, %v6970_v11, 0.0 }
0x2d11   : > { %v6965_v61 = vsub.f32 %v6935_v18, %v6959_v17  ;;  %6979 = vadd.xlane.f32.xlu1 %v6978_v2  ;;  %v6975_v1 = vsel %vm2786_vm10, %v6969_v55, 0.0 }
0x2d12   : > { %6976 = vadd.xlane.f32.xlu0 %v6975_v1  ;;  %v6972_v52 = vmul.f32 %v6966_v63, %v6966_v63 }
0x2d13   : > { %v6971_v23 = vmul.f32 %v6965_v61, %v6965_v61 }
0x2d14   : > { %v6984_v27 = vsel %vm2786_vm10, %v6972_v52, 0.0 }
0x2d15   : > { %6985 = vadd.xlane.f32.xlu1 %v6984_v27  ;;  %v6981_v29 = vsel %vm2786_vm10, %v6971_v23, 0.0 }
0x2d16   : > { %6982 = vadd.xlane.f32.xlu0 %v6981_v29  ;;  %v1420_v29 = vld [vmem:[#allocation5 + $0x8] sm:$0xff] }
0x2d9a   : > { %v6956_v26 = vpop.xlane.xlu1 %6955 }
0x2d9b   : > { %v6962_v43 = vmul.f32 0.03125, %v6956_v26  ;;  %v6953_v25 = vpop.xlane.xlu0 %6952  ;;  %v1421_v26 = vld [vmem:[#allocation5 + $0x10] sm:$0xff] }
0x2d9c   : > { %v6961_v28 = vmul.f32 0.03125, %v6953_v25  ;;  %v1423_v25 = vld [vmem:[#allocation5 + $0x20] sm:$0xff] }
0x2d9d   : > { %v6968_v59 = vsub.f32 %v6938_v62, %v6962_v43  ;;  %v1422_v43 = vld [vmem:[#allocation5 + $0x18] sm:$0xff] }
0x2d9e   : > { %v6967_v36 = vsub.f32 %v6937_v30, %v6961_v28  ;;  %v6980_v57 = vpop.xlane.xlu1 %6979  ;;  %v1424_v28 = vld [vmem:[#allocation5 + $0x28] sm:$0xff] }
0x2d9f   : > { %v6994_v42 = vmul.f32 0.03125, %v6980_v57  ;;  %v6977_v4 = vpop.xlane.xlu0 %6976  ;;  %v6974_v58 = vmul.f32 %v6968_v59, %v6968_v59  ;;  %v1437_v57 = vld [vmem:[#allocation13] sm:$0xff] }
0x2da0   : > { %v6993_v48 = vmul.f32 0.03125, %v6977_v4  ;;  %v6973_v19 = vmul.f32 %v6967_v36, %v6967_v36  ;;  %v1438_v4 = vld [vmem:[#allocation13 + $0x8] sm:$0xff] }
0x2da1   : > { %v7000_v5 = vadd.f32 1e-05, %v6994_v42  ;;  %v6990_v40 = vsel %vm2786_vm10, %v6974_v58, 0.0  ;;  %v1455_v58 = vld [vmem:[#allocation13 + $0x90] sm:$0xff] }
0x2da2   : > { %v6999_v33 = vadd.f32 1e-05, %v6993_v48  ;;  %6991 = vadd.xlane.f32.xlu1 %v6990_v40  ;;  %v6986_v0 = vpop.xlane.xlu1 %6985  ;;  %v6987_v6 = vsel %vm2786_vm10, %v6973_v19, 0.0  ;;  %v1456_v48 = vld [vmem:[#allocation13 + $0x98] sm:$0xff]  ;;  %v10921_v19 = vpack.c.bf16 %v1438_v4, %v1437_v57  ;;  %v1469_v40 = vld [vmem:[#allocation13 + $0x100] sm:$0xff] }
0x2da3   : > { %11695 = vrsqrt.f32 %v7000_v5  ;;  %v6996_v53 = vmul.f32 0.03125, %v6986_v0  ;;  %6988 = vadd.xlane.f32.xlu0 %v6987_v6  ;;  %v6983_v8 = vpop.xlane.xlu0 %6982  ;;  %v10923_v5 = vpack.c.bf16 %v1456_v48, %v1455_v58  ;;  %v1439_v0 = vld [vmem:[#allocation13 + $0x10] sm:$0xff]  ;;  %v1468_v57 = vld [vmem:[#allocation13 + $0xf8] sm:$0xff]  ;;  %v1482_v58 = vld [vmem:[#allocation13 + $0x168] sm:$0xff] }
0x2da4   : > { %11697 = vrsqrt.f32 %v6999_v33  ;;  %v6995_v54 = vmul.f32 0.03125, %v6983_v8  ;;  %v1470_v33 = vld [vmem:[#allocation13 + $0x108] sm:$0xff]  ;;  %v1457_v8 = vld [vmem:[#allocation13 + $0xa0] sm:$0xff]  ;;  %v1451_v48 = vld [vmem:[#allocation13 + $0x70] sm:$0xff] }
0x2da5   : > { %v7002_v10 = vadd.f32 1e-05, %v6996_v53  ;;  %v10952_v6 = vpack.c.bf16 %v1470_v33, %v1469_v40  ;;  %v1440_v53 = vld [vmem:[#allocation13 + $0x18] sm:$0xff] }
0x2da6   : > { %v7001_v41 = vadd.f32 1e-05, %v6995_v54  ;;  %v1458_v54 = vld [vmem:[#allocation13 + $0xa8] sm:$0xff] }
0x2da7   : > { %11699 = vrsqrt.f32 %v7002_v10  ;;  %v10925_v10 = vpack.c.bf16 %v1440_v53, %v1439_v0  ;;  %10953 = vmatpush3.bf16.msra.mxu0 %v10952_v6  ;;  %v1483_v0 = vld [vmem:[#allocation13 + $0x170] sm:$0xff]  ;;  %v1484_v6 = vld [vmem:[#allocation13 + $0x178] sm:$0xff] }
0x2da8   : > { %11701 = vrsqrt.f32 %v7001_v41  ;;  %v1471_v41 = vld [vmem:[#allocation13 + $0x110] sm:$0xff]  ;;  %10954 = vmatprep.subr.bf16.mxu0 %v12489_v21 }
0x2dad   : > { %v11696_v24 = vpop.eup %11695 }
0x2dae   : > { %v11698_v16 = vpop.eup %11697  ;;  %v7012_v46 = vmul.f32 %v11696_v24, %v6964_v32  ;;  %v1419_v32 = vld [vmem:[#allocation5] sm:$0xff]  ;;  %v1472_v24 = vld [vmem:[#allocation13 + $0x118] sm:$0xff] }
0x2daf   : > { %v7011_v37 = vmul.f32 %v11698_v16, %v6963_v44  ;;  %10314 = vmatprep.mubr.msk.f32.mxu1 %vm1540_vm7, %v1419_v32  ;;  %v10955_v16 = vpack.c.bf16 %v1472_v24, %v1471_v41 }
0x2db0   : > { %v7024_v18 = vmul.f32 %v9223_v45, %v7012_v46  ;;  %v1441_v46 = vld [vmem:[#allocation13 + $0x20] sm:$0xff] }
0x2db1   : > { %v11700_v38 = vpop.eup %11699  ;;  %v7023_v7 = vmul.f32 %v9223_v45, %v7011_v37  ;;  %v1459_v37 = vld [vmem:[#allocation13 + $0xb0] sm:$0xff]  ;;  %10956 = vmatpush3.bf16.msra.mxu0 %v10955_v16 }
0x2db2   : > { %v11702_v49 = vpop.eup %11701  ;;  %v7036_v12 = vadd.f32 %v9224_v39, %v7024_v18  ;;  %v7014_v50 = vmul.f32 %v11700_v38, %v6966_v63  ;;  %v1460_v18 = vld [vmem:[#allocation13 + $0xb8] sm:$0xff]  ;;  %v1473_v38 = vld [vmem:[#allocation13 + $0x120] sm:$0xff]  ;;  %10957 = vmatprep.subr.bf16.mxu0 %v12489_v21 }
0x2db3   : > { %v7035_v22 = vadd.f32 %v9224_v39, %v7023_v7  ;;  %v7013_v51 = vmul.f32 %v11702_v49, %v6965_v61  ;;  %v1474_v7 = vld [vmem:[#allocation13 + $0x128] sm:$0xff] }
0x2db4   : > { %v7026_v62 = vmul.f32 %v9223_v45, %v7014_v50  ;;  %v10958_v50 = vpack.c.bf16 %v1474_v7, %v1473_v38 }
0x2db5   : > { %v10907_v31 = vpack.c.bf16 %v7036_v12, %v7035_v22  ;;  %v7025_v60 = vmul.f32 %v9223_v45, %v7013_v51  ;;  %v10931_v12 = vpack.c.bf16 %v1460_v18, %v1459_v37  ;;  %v1443_v22 = vld [vmem:[#allocation13 + $0x30] sm:$0xff]  ;;  %v1444_v51 = vld [vmem:[#allocation13 + $0x38] sm:$0xff] }
0x2db6   : > { %v7038_v30 = vadd.f32 %v9224_v39, %v7026_v62  ;;  %v1461_v62 = vld [vmem:[#allocation13 + $0xc0] sm:$0xff]  ;;  %10959 = vmatpush3.bf16.msra.mxu0 %v10958_v50 }
0x2db7   : > { %10908 = vmatprep.subr.bf16.mxu1 %v10907_v31  ;;  %v7037_v14 = vadd.f32 %v9224_v39, %v7025_v60  ;;  %v1475_v60 = vld [vmem:[#allocation13 + $0x130] sm:$0xff]  ;;  %10960 = vmatprep.subr.bf16.mxu0 %v12489_v21 }
0x2db8   : > { %10910 = vmatpush3.bf16.msra.mxu1 %v10907_v31  ;;  %v1462_v31 = vld [vmem:[#allocation13 + $0xc8] sm:$0xff] }
0x2db9   : > { %v10911_v35 = vpack.c.bf16 %v7038_v30, %v7037_v14  ;;  %v1476_v30 = vld [vmem:[#allocation13 + $0x138] sm:$0xff]  ;;  %v10933_v14 = vpack.c.bf16 %v1444_v51, %v1443_v22 }
0x2dba   : > { %v10961_v32 = vpack.c.bf16 %v1476_v30, %v1475_v60 }
0x2dbb   : > { %10912 = vmatprep.subr.bf16.mxu1 %v10911_v35 }
0x2dbc   : > { %10914 = vmatpush3.bf16.msra.mxu1 %v10911_v35  ;;  %v10935_v35 = vpack.c.bf16 %v1462_v31, %v1461_v62  ;;  %10962 = vmatpush3.bf16.msra.mxu0 %v10961_v32 }
0x2dbd   : > { %10963 = vmatprep.subr.bf16.mxu0 %v12489_v21 }
0x2e2f   : > { %v6992_v44 = vpop.xlane.xlu1 %6991 }
0x2e30   : > { %v6998_v13 = vmul.f32 0.03125, %v6992_v44  ;;  %v6989_v20 = vpop.xlane.xlu0 %6988  ;;  %v1445_v44 = vld [vmem:[#allocation13 + $0x40] sm:$0xff] }
0x2e31   : > { %v6997_v47 = vmul.f32 0.03125, %v6989_v20  ;;  %v1463_v20 = vld [vmem:[#allocation13 + $0xd0] sm:$0xff] }
0x2e32   : > { %v7004_v56 = vadd.f32 1e-05, %v6998_v13  ;;  %v1446_v13 = vld [vmem:[#allocation13 + $0x48] sm:$0xff] }
0x2e33   : > { %v7003_v11 = vadd.f32 1e-05, %v6997_v47  ;;  %v1464_v47 = vld [vmem:[#allocation13 + $0xd8] sm:$0xff] }
0x2e34   : > { %11703 = vrsqrt.f32 %v7004_v56  ;;  %v1477_v56 = vld [vmem:[#allocation13 + $0x140] sm:$0xff] }
0x2e35   : > { %11705 = vrsqrt.f32 %v7003_v11  ;;  %v1478_v11 = vld [vmem:[#allocation13 + $0x148] sm:$0xff] }
0x2e3e   : > { %v11704_v17 = vpop.eup %11703 }
0x2e3f   : > { %v11706_v55 = vpop.eup %11705  ;;  %v7016_v63 = vmul.f32 %v11704_v17, %v6968_v59  ;;  %v1453_v59 = vld [vmem:[#allocation13 + $0x80] sm:$0xff]  ;;  %v10937_v17 = vpack.c.bf16 %v1446_v13, %v1445_v44 }
0x2e40   : > { %v7015_v2 = vmul.f32 %v11706_v55, %v6967_v36  ;;  %v1454_v36 = vld [vmem:[#allocation13 + $0x88] sm:$0xff]  ;;  %v10939_v55 = vpack.c.bf16 %v1464_v47, %v1463_v20 }
0x2e41   : > { %v7028_v61 = vmul.f32 %v9223_v45, %v7016_v63  ;;  %v10919_v42 = vpack.c.bf16 %v1454_v36, %v1453_v59  ;;  %v10964_v63 = vpack.c.bf16 %v1478_v11, %v1477_v56  ;;  %v1467_v36 = vld [vmem:[#allocation13 + $0xf0] sm:$0xff] }
0x2e42   : > { %v7027_v1 = vmul.f32 %v9223_v45, %v7015_v2  ;;  %v10927_v45 = vpack.c.bf16 %v1458_v54, %v1457_v8  ;;  %v1447_v2 = vld [vmem:[#allocation13 + $0x50] sm:$0xff]  ;;  %v10947_v4 = vpack.c.bf16 %v1468_v57, %v1467_v36  ;;  %v10973_v8 = vpack.c.bf16 %v1484_v6, %v1483_v0 }
0x2e43   : > { %v7040_v52 = vadd.f32 %v9224_v39, %v7028_v61  ;;  %v1448_v61 = vld [vmem:[#allocation13 + $0x58] sm:$0xff]  ;;  %10965 = vmatpush3.bf16.msra.mxu0 %v10964_v63 }
0x2e44   : > { %v7039_v23 = vadd.f32 %v9224_v39, %v7027_v1  ;;  %v1442_v39 = vld [vmem:[#allocation13 + $0x28] sm:$0xff]  ;;  %v10941_v1 = vpack.c.bf16 %v1448_v61, %v1447_v2  ;;  %10966 = vmatprep.subr.bf16.mxu0 %v12489_v21  ;;  %v1486_v61 = vld [vmem:[#allocation14] sm:$0xff] }
0x2e45   : > { %v10929_v49 = vpack.c.bf16 %v1442_v39, %v1441_v46 }
0x2e46   : > { %v10915_v27 = vpack.c.bf16 %v7040_v52, %v7039_v23  ;;  %v1465_v52 = vld [vmem:[#allocation13 + $0xe0] sm:$0xff]  ;;  %v1466_v23 = vld [vmem:[#allocation13 + $0xe8] sm:$0xff] }
0x2e48   : > { %10916 = vmatprep.subr.bf16.mxu1 %v10915_v27 }
0x2e49   : > { %10918 = vmatpush3.bf16.msra.mxu1 %v10915_v27  ;;  %v1479_v27 = vld [vmem:[#allocation13 + $0x150] sm:$0xff] }
0x2e4a   : > { %10920 = vmatprep.subr.bf16.mxu1 %v10919_v42  ;;  %v1481_v42 = vld [vmem:[#allocation13 + $0x160] sm:$0xff] }
0x2e4c   : > { %10315 = vmatmul.mubr.msk.f32.vlgmr.msra.gmra.mrb[56].mxu1 %vm1540_vm7, %v1420_v29  ;;  %v10943_v29 = vpack.c.bf16 %v1466_v23, %v1465_v52  ;;  %v7348_v52 = vld [vmem:[#allocation17] sm:$0xff] }
0x2e4d   : > { %10317 = vmatprep.mubr.msk.f32.mxu1 %vm1540_vm7, %v1421_v26  ;;  %10922 = vmatpush3.bf16.msra.mxu1 %v10921_v19  ;;  %v1480_v26 = vld [vmem:[#allocation13 + $0x158] sm:$0xff] }
0x2e4e   : > { %10924 = vmatprep.subr.bf16.mxu1 %v10923_v5  ;;  %v1452_v19 = vld [vmem:[#allocation13 + $0x78] sm:$0xff]  ;;  %v10970_v5 = vpack.c.bf16 %v1482_v58, %v1481_v42 }
0x2e4f   : > { %v10949_v40 = vpack.c.bf16 %v1452_v19, %v1451_v48  ;;  %v7353_v48 = vld [vmem:[#allocation20] sm:$0xff]  ;;  %v7354_v19 = vld [vmem:[#allocation20 + $0x8] sm:$0xff] }
0x2e50   : > { %10318 = vmatmul.mubr.msk.f32.gmra.mrb[58].mxu1 %vm1540_vm7, %v1422_v43  ;;  %v1449_v43 = vld [vmem:[#allocation13 + $0x60] sm:$0xff]  ;;  %v10988_v0 = vpack.c.bf16 %v7354_v19, %v7353_v48 }
0x2e51   : > { %10320 = vmatprep.mubr.msk.f32.mxu1 %vm1540_vm7, %v1423_v25  ;;  %10926 = vmatpush3.bf16.msra.mxu1 %v10925_v10  ;;  %v1450_v25 = vld [vmem:[#allocation13 + $0x68] sm:$0xff] }
0x2e52   : > { %10928 = vmatprep.subr.bf16.mxu1 %v10927_v45  ;;  %v10945_v59 = vpack.c.bf16 %v1450_v25, %v1449_v43  ;;  %v1489_v43 = vld [vmem:[#allocation14 + $0x18] sm:$0xff] }
0x2e54   : > { %10321 = vmatmul.mubr.msk.f32.gmra.mrb[60].mxu1 %vm1540_vm7, %v1424_v28  ;;  %v10967_v28 = vpack.c.bf16 %v1480_v26, %v1479_v27  ;;  %v7349_v27 = vld [vmem:[#allocation17 + $0x8] sm:$0xff]  ;;  %vm7707_vm7 = vcmask 31744  }
0x2e55   : > { %10930 = vmatpush3.bf16.msra.mxu1 %v10929_v49  ;;  %v1488_v26 = vld [vmem:[#allocation14 + $0x10] sm:$0xff] }
0x2e56   : > { %10932 = vmatprep.subr.bf16.mxu1 %v10931_v12  ;;  %10968 = vmatpush3.bf16.msra.mxu0 %v10967_v28  ;;  %v10979_v25 = vpack.c.bf16 %v1489_v43, %v1488_v26  ;;  %v7350_v28 = vld [vmem:[#allocation17 + $0x10] sm:$0xff] }
0x2e57   : > { %10969 = vmatprep.subr.bf16.mxu0 %v12489_v21 }
0x2e59   : > { %10934 = vmatpush3.bf16.msra.mxu1 %v10933_v14 }
0x2e5a   : > { %10936 = vmatprep.subr.bf16.mxu1 %v10935_v35  ;;  %10971 = vmatpush3.bf16.msra.mxu0 %v10970_v5 }
0x2e5b   : > { %10972 = vmatprep.subr.bf16.mxu0 %v12489_v21 }
0x2e5d   : > { %10938 = vmatpush3.bf16.msra.mxu1 %v10937_v17 }
0x2e5e   : > { %10940 = vmatprep.subr.bf16.mxu1 %v10939_v55  ;;  %10974 = vmatpush3.bf16.msra.mxu0 %v10973_v8  ;;  %v7356_v8 = vld [vmem:[#allocation20 + $0x18] sm:$0xff] }
0x2e5f   : > { %10981 = vmatprep.subr.bf16.mxu0 %v12489_v21 }
0x2e61   : > { %10942 = vmatpush3.bf16.msra.mxu1 %v10941_v1  ;;  %v1487_v1 = vld [vmem:[#allocation14 + $0x8] sm:$0xff] }
0x2e62   : > { %10944 = vmatprep.subr.bf16.mxu1 %v10943_v29  ;;  %v10976_v23 = vpack.c.bf16 %v1487_v1, %v1486_v61  ;;  %v10982_v29 = vpack.c.bf16 %v7349_v27, %v7348_v52 }
0x2e65   : > { %10946 = vmatpush3.bf16.msra.mxu1 %v10945_v59  ;;  %v7351_v59 = vld [vmem:[#allocation17 + $0x18] sm:$0xff] }
0x2e66   : > { %10948 = vmatprep.subr.bf16.mxu1 %v10947_v4  ;;  %v10985_v36 = vpack.c.bf16 %v7351_v59, %v7350_v28 }
0x2e69   : > { %10950 = vmatpush3.bf16.msra.mxu1 %v10949_v40 }
0x2e6a   : > { %10975 = vmatprep.subr.bf16.mxu1 %v12489_v21 }
0x2f1f   : > { %v10316_v33 = vpop.f32.mrb[56].mxu1 }
0x2f20   : > { %v7125_v53 = vpop.f32.mrb[57].mxu1  ;;  %v7163_v10 = vrot.slane %v10316_v33, 4 }
0x2f21   : > { %v7155_v16 = vrot.slane %v7125_v53, 4 }
0x2f23   : > { %v10319_v54 = vpop.f32.mrb[58].mxu1 }
0x2f24   : > { %v11511_v41 = vpack.i.bf16 %v10316_v33, %v10319_v54  ;;  %v7176_v24 = vrot.slane %v10319_v54, 4  ;;  %v7135_v45 = vpop.f32.mrb[59].mxu1 }
0x2f25   : > { %v7168_v46 = vrot.slane %v7135_v45, 4 }
0x2f26   : > { %v11516_v39 = vpack.i.bf16 %v7163_v10, %v7176_v24  ;;  %11512 = vrot.lane.b32.xlu1 %v11511_v41, %s14597_s6  ;;  %v9232_v10 = vld [vmem:[#allocation16] ss:$0 sm:$0xff]  ;;  %v9234_v41 = vld [vmem:[#allocation19] ss:$0 sm:$0xff] }
0x2f27   : > { %v11521_v37 = vpack.i.bf16 %v7155_v16, %v7168_v46  ;;  %v10322_v18 = vpop.f32.mrb[60].mxu1 }
0x2f28   : > { %v7145_v38 = vpop.f32.mrb[61].mxu1  ;;  %v7189_v49 = vrot.slane %v10322_v18, 4 }
0x2f29   : > { %11522 = vrot.lane.b32.xlu0 %v11521_v37, %s12524_s16  ;;  %v7181_v7 = vrot.slane %v7145_v38, 4 }
0x2f2a   : > { %11517 = vrot.lane.b32.xlu1 %v11516_v39, %s14604_s9 }
0x2f2d   : > { %7182 = vrot.lane.b32.xlu0 %v7181_v7, %s12524_s16  ;;  %s9267_s16 = sshll.u32 %s12742_s15, 6  ;;  %s12525_s15 = smov [#allocation35]  }
0x2f2e   : > { %7186 = vrot.lane.b32.xlu1 %v10322_v18, %s14597_s6  ;;  %s14615_s6 = sld [smem:[#allocation64_spill]] }
0x2f31   : > { %7190 = vrot.lane.b32.xlu0 %v7189_v49, %s14604_s9 }
0x2f34   : > { %v9231_v4 = vld [vmem:[%s14615_s6] ss:$0 sm:$0xff] }
0x2f98   : > { %v11513_v12 = vpop.permute.xlu1 %11512 }
0x2f99   : > { %v11515_v31 = vunpack.i.h.bf16 %v11513_v12  ;;  %v11514_v60 = vunpack.i.l.bf16 %v11513_v12 }
0x2f9b   : > { %v11523_v50 = vpop.permute.xlu0 %11522 }
0x2f9c   : > { %v11525_v22 = vunpack.i.h.bf16 %v11523_v50  ;;  %v11524_v51 = vunpack.i.l.bf16 %v11523_v50  ;;  %v11518_v62 = vpop.permute.xlu1 %11517 }
0x2f9d   : > { %v11520_v30 = vunpack.i.h.bf16 %v11518_v62  ;;  %v11519_v14 = vunpack.i.l.bf16 %v11518_v62 }
0x2f9e   : > { %v7193_v35 = vsel %vm2786_vm10, %v7125_v53, %v11525_v22  ;;  %v7196_v32 = vsel %vm2786_vm10, %v7135_v45, %v11524_v51  ;;  %v7355_v53 = vld [vmem:[#allocation20 + $0x10] sm:$0xff] }
0x2f9f   : > { %v7183_v44 = vpop.permute.xlu0 %7182  ;;  %v7197_v13 = vsel %vm6819_vm14, %v7196_v32, %v11514_v60  ;;  %v7194_v20 = vsel %vm6819_vm14, %v7193_v35, %v11515_v31  ;;  %v10991_v54 = vpack.c.bf16 %v7356_v8, %v7355_v53 }
0x2fa0   : > { %v7199_v47 = vsel %vm2786_vm10, %v7145_v38, %v7183_v44  ;;  %v7187_v56 = vpop.permute.xlu1 %7186  ;;  %v7198_v11 = vsel %vm1524_vm4, %v7197_v13, %v11519_v14  ;;  %v7195_v17 = vsel %vm1524_vm4, %v7194_v20, %v11520_v30  ;;  %v9236_v38 = vld [vmem:[#allocation22] ss:$0 sm:$0xff] }
0x2fa1   : > { %7272 = vmatprep.mubr.f32.mxu1 %v7198_v11  ;;  %v7200_v55 = vsel %vm6819_vm14, %v7199_v47, %v7187_v56 }
0x2fa2   : > { %7273 = vmatmul.mubr.f32.vlgmr.msra.gmra.mrb[62].mxu1 %v7195_v17 }
0x2fa3   : > { %v7191_v63 = vpop.permute.xlu0 %7190  ;;  %10366 = vmatprep.mubr.msk.f32.mxu1 %vm12490_vm3, %v12491_v34  ;;  %10977 = vmatpush3.bf16.msra.mxu1 %v10976_v23 }
0x2fa4   : > { %v7201_v2 = vsel %vm1524_vm4, %v7200_v55, %v7191_v63  ;;  %10978 = vmatprep.subr.bf16.mxu1 %v12489_v21  ;;  %vm7693_vm4 = vcmask 27648  }
0x2fa5   : > { %10356 = vmatmul.mubr.f32.vlgmr.msra.gmra.mrb[62].mxu0 %v7201_v2 }
0x2fa6   : > { %10377 = vmatprep.mubr.msk.f32.mxu0 %vm12490_vm3, %v12491_v34  ;;  %10983 = vmatpush3.bf16.msra.mxu0 %v10982_v29 }
0x2fa7   : > { %10984 = vmatprep.subr.bf16.mxu0 %v12489_v21  ;;  %10980 = vmatpush3.bf16.msra.mxu1 %v10979_v25 }
0x2fa8   : > { %10987 = vmatprep.subr.bf16.mxu1 %v12489_v21 }
0x2faa   : > { %10986 = vmatpush3.bf16.msra.mxu0 %v10985_v36 }
0x2fab   : > { %10391 = vmatprep.subr.mxu0 %v12491_v34 }
0x3075   : > { %v9630_v57 = vpop.f32.mrb[62].mxu1 }
0x3076   : > { %v9631_v42 = vpop.f32.mrb[63].mxu1 }
0x3077   : > { %v9632_v58 = vadd.f32 %v9631_v42, %v9630_v57 }
0x3078   : > { %v7344_v5 = vpop.f32.mrb[62].mxu0 }
0x3079   : > { %v7275_v40 = vadd.f32 %v9632_v58, %v9231_v4  ;;  %v10357_v33 = vpop.f32.mrb[63].mxu0 }
0x307b   : > { %v14300_v6 = vadd.f32 %v7344_v5, %v7275_v40 }
0x307d   : > { %10367 = vmatmul.mubr.msk.f32.vlgmr.msra.gmra.mrb[64].mxu1 %vm2786_vm10, %v14300_v6  ;;  %10378 = vmatmul.mubr.msk.f32.vlgmr.msra.gmra.mrb[64].mxu0 %vm2786_vm10, %v14300_v6 }
0x307e   : > { %10989 = vmatpush3.bf16.msra.mxu1 %v10988_v0  ;;  %10388 = vmatprep.mubr.msk.f32.mxu1 %vm12490_vm3, %v12491_v34 }
0x307f   : > { %10990 = vmatprep.subr.bf16.mxu1 %v12489_v21  ;;  %10393 = vmatprep.mubr.msk.f32.mxu0 %vm12490_vm3, %v12491_v34 }
0x3082   : > { %10992 = vmatpush3.bf16.msra.mxu1 %v10991_v54 }
0x3083   : > { %10401 = vmatprep.subr.mxu1 %v12491_v34 }
0x3150   : > { %v7456_v24 = vpop.f32.mrb[64].mxu1  ;;  %v7532_v45 = vpop.f32.mrb[64].mxu0 }
0x3151   : > { %v7457_v16 = vadd.f32 %v9232_v10, %v7456_v24  ;;  %v7533_v46 = vadd.f32 %v9234_v41, %v7532_v45  ;;  %v10368_v39 = vpop.f32.mrb[65].mxu1  ;;  %v10379_v37 = vpop.f32.mrb[65].mxu0 }
0x3153   : > { %v7536_v18 = vmul.f32 0.35355338, %v7533_v46  ;;  %10389 = vmatmul.mubr.msk.f32.vlgmr.msra.gmra.mrb[66].mxu1 %vm2786_vm10, %v7457_v16 }
0x3154   : > { %10403 = vmatprep.mubr.msk.f32.mxu1 %vm12490_vm3, %v12491_v34 }
0x3155   : > { %7783 = vrot.lane.b32.xlu0 %v7536_v18, %s14616_s8 }
0x3159   : > { %7950 = vrot.lane.b32.xlu0 %v7536_v18, %s14598_s2 }
0x315d   : > { %8117 = vrot.lane.b32.xlu0 %v7536_v18, %s14601_s7 }
0x31c7   : > { %v7784_v50 = vpop.permute.xlu0 %7783 }
0x31cb   : > { %v7951_v62 = vpop.permute.xlu0 %7950 }
0x31cf   : > { %v8118_v60 = vpop.permute.xlu0 %8117 }
0x3226   : > { %v7612_v7 = vpop.f32.mrb[66].mxu1 }
0x3227   : > { %v14318_v49 = vadd.f32 %v9236_v38, %v7612_v7  ;;  %v10390_v12 = vpop.f32.mrb[67].mxu1 }
0x3229   : > { %7785 = vrot.lane.b32.xlu1 %v14318_v49, %s14616_s8  ;;  %10392 = vmatpush3.xpose.msk.msra.mxu0 %vm1536_vm5, %v14318_v49 }
0x322a   : > { %10396 = vmatprep.subr.mxu0 %v12491_v34 }
0x322c   : > { %10394 = vmatmul.mubr.msk.f32.vlgmr.msra.gmra.mrb[66].mxu0 %vm1536_vm5, %v7536_v18 }
0x322d   : > { %7952 = vrot.lane.b32.xlu1 %v14318_v49, %s14598_s2  ;;  %10398 = vmatprep.mubr.msk.f32.mxu0 %vm12490_vm3, %v12491_v34 }
0x3231   : > { %8119 = vrot.lane.b32.xlu1 %v14318_v49, %s14601_s7  ;;  %s14617_s7 = smov 72  }
0x329b   : > { %v7786_v22 = vpop.permute.xlu1 %7785 }
0x329c   : > { %10402 = vmatpush3.xpose.msk.msra.mxu1 %vm1536_vm5, %v7786_v22  ;;  %v7358_v22 = vld [vmem:[#allocation23] sm:$0xff] }
0x329d   : > { %10411 = vmatprep.subr.mxu1 %v12491_v34 }
0x329f   : > { %v7953_v51 = vpop.permute.xlu1 %7952  ;;  %10404 = vmatmul.mubr.msk.f32.vlgmr.msra.gmra.mrb[68].mxu1 %vm1536_vm5, %v7784_v50 }
0x32a0   : > { %10412 = vmatpush3.xpose.msk.msra.mxu1 %vm1536_vm5, %v7953_v51  ;;  %10413 = vmatprep.mubr.msk.f32.mxu1 %vm12490_vm3, %v12491_v34  ;;  %v7359_v51 = vld [vmem:[#allocation23 + $0x8] sm:$0xff] }
0x32a1   : > { %10421 = vmatprep.subr.mxu1 %v12491_v34 }
0x32a3   : > { %v8120_v31 = vpop.permute.xlu1 %8119  ;;  %10414 = vmatmul.mubr.msk.f32.vlgmr.msra.gmra.mrb[70].mxu1 %vm1536_vm5, %v7951_v62  ;;  %v10994_v62 = vpack.c.bf16 %v7359_v51, %v7358_v22 }
0x32a4   : > { %10422 = vmatpush3.xpose.msk.msra.mxu1 %vm1536_vm5, %v8120_v31  ;;  %10423 = vmatprep.mubr.msk.f32.mxu1 %vm12490_vm3, %v12491_v34  ;;  %v7360_v31 = vld [vmem:[#allocation23 + $0x10] sm:$0xff] }
0x32a5   : > { %10993 = vmatprep.subr.bf16.mxu1 %v12489_v21 }
0x32a7   : > { %10424 = vmatmul.mubr.msk.f32.vlgmr.msra.gmra.mrb[72].mxu1 %vm1536_vm5, %v8118_v60  ;;  %v7361_v60 = vld [vmem:[#allocation23 + $0x18] sm:$0xff] }
0x32a8   : > { %10439 = vmatprep.mubr.msk.f32.mxu1 %vm12490_vm3, %v12491_v34  ;;  %10995 = vmatpush3.bf16.msra.mxu1 %v10994_v62 }
0x32a9   : > { %10996 = vmatprep.subr.bf16.mxu1 %v12489_v21 }
0x32ff   : > { %v7688_v30 = vpop.f32.mrb[66].mxu0 }
0x3300   : > { %v7692_v14 = vsel %vm13526_vm13, -1e+30, %v7688_v30  ;;  %v10395_v35 = vpop.f32.mrb[67].mxu0  ;;  %v10997_v30 = vpack.c.bf16 %v7361_v60, %v7360_v31 }
0x3301   : > { %v7694_v32 = vsel %vm7693_vm4, %v7692_v14, -inf }
0x3302   : > { %7695 = vmax.xlane.f32.xlu1 %v7694_v32  ;;  %10998 = vmatpush3.bf16.msra.mxu1 %v10997_v30 }
0x3303   : > { %11005 = vmatprep.subr.bf16.mxu1 %v12489_v21 }
0x3372   : > { %v7857_v44 = vpop.f32.mrb[68].mxu1 }
0x3373   : > { %v7861_v13 = vsel %vm13526_vm13, -1e+30, %v7857_v44  ;;  %v10405_v20 = vpop.f32.mrb[69].mxu1 }
0x3374   : > { %v7862_v47 = vsel %vm7693_vm4, %v7861_v13, -inf }
0x3375   : > { %7863 = vmax.xlane.f32.xlu0 %v7862_v47 }
0x3376   : > { %v8024_v56 = vpop.f32.mrb[70].mxu1 }
0x3377   : > { %v8028_v11 = vsel %vm13526_vm13, -1e+30, %v8024_v56  ;;  %v10415_v17 = vpop.f32.mrb[71].mxu1 }
0x3378   : > { %v8029_v55 = vsel %vm7693_vm4, %v8028_v11, -inf }
0x3379   : > { %8030 = vmax.xlane.f32.xlu0 %v8029_v55 }
0x337a   : > { %v8191_v63 = vpop.f32.mrb[72].mxu1 }
0x337b   : > { %v8195_v2 = vsel %vm13526_vm13, -1e+30, %v8191_v63  ;;  %v10425_v61 = vpop.f32.mrb[73].mxu1 }
0x337c   : > { %v8196_v1 = vsel %vm7693_vm4, %v8195_v2, -inf }
0x337d   : > { %8197 = vmax.xlane.f32.xlu1 %v8196_v1 }
0x338e   : > { %7873 = vrot.lane.b32.xlu1 %v14318_v49, %s14603_s4  ;;  %s14618_s4 = smov 16  }
0x338f   : > { %v7696_v52 = vpop.xlane.xlu1 %7695 }
0x3390   : > { %v7697_v23 = vsub.f32 %v7692_v14, %v7696_v52 }
0x3392   : > { %v7698_v27 = vmul.f32 1.442695, %v7697_v23 }
0x3394   : > { %11707 = vpow2.f32 %v7698_v27 }
0x339e   : > { %v11708_v29 = vpop.eup %11707 }
0x339f   : > { %v7700_v26 = vsel %vm7693_vm4, %v11708_v29, 0.0 }
0x33a0   : > { %7701 = vadd.xlane.f32.xlu0 %v7700_v26 }
0x33b6   : > { %7705 = vrot.lane.b32.xlu0 %v14318_v49, %s14604_s9  ;;  %s14621_s9 = sld [smem:[#allocation74_spill]] }
0x3402   : > { %v7864_v9 = vpop.xlane.xlu0 %7863 }
0x3403   : > { %v7865_v43 = vsub.f32 %v7861_v13, %v7864_v9 }
0x3405   : > { %v7866_v25 = vmul.f32 1.442695, %v7865_v43 }
0x3406   : > { %v8031_v28 = vpop.xlane.xlu0 %8030 }
0x3407   : > { %11709 = vpow2.f32 %v7866_v25  ;;  %v8032_v59 = vsub.f32 %v8028_v11, %v8031_v28  ;;  %v7365_v28 = vld [vmem:[#allocation26] sm:$0xff] }
0x3409   : > { %v8033_v36 = vmul.f32 1.442695, %v8032_v59  ;;  %v7366_v59 = vld [vmem:[#allocation26 + $0x8] sm:$0xff] }
0x340a   : > { %v8198_v57 = vpop.xlane.xlu1 %8197 }
0x340b   : > { %11711 = vpow2.f32 %v8033_v36  ;;  %v8199_v42 = vsub.f32 %v8195_v2, %v8198_v57  ;;  %v9254_v2 = vld [vmem:[#allocation25] ss:$0 sm:$0xff]  ;;  %v11000_v36 = vpack.c.bf16 %v7366_v59, %v7365_v28  ;;  %v7367_v57 = vld [vmem:[#allocation26 + $0x10] sm:$0xff] }
0x340d   : > { %v8200_v4 = vmul.f32 1.442695, %v8199_v42 }
0x340e   : > { %v7874_v10 = vpop.permute.xlu1 %7873 }
0x340f   : > { %11713 = vpow2.f32 %v8200_v4 }
0x3411   : > { %v11710_v58 = vpop.eup %11709 }
0x3412   : > { %v7868_v48 = vsel %vm7693_vm4, %v11710_v58, 0.0 }
0x3413   : > { %7869 = vadd.xlane.f32.xlu1 %v7868_v48 }
0x3415   : > { %v11712_v19 = vpop.eup %11711 }
0x3416   : > { %v8035_v5 = vsel %vm7693_vm4, %v11712_v19, 0.0 }
0x3417   : > { %8036 = vadd.xlane.f32.xlu0 %v8035_v5 }
0x3419   : > { %v11714_v40 = vpop.eup %11713 }
0x341a   : > { %v8202_v33 = vsel %vm7693_vm4, %v11714_v40, 0.0 }
0x341b   : > { %8203 = vadd.xlane.f32.xlu1 %v8202_v33 }
0x342c   : > { %8040 = vrot.lane.b32.xlu1 %v14318_v49, %s14596_s0  ;;  %s1406_s0 = sand.u32 1, %s12417_s10  }
0x342d   : > { %8207 = vrot.lane.b32.xlu0 %v14318_v49, %s14617_s7  ;;  %v7702_v0 = vpop.xlane.xlu0 %7701  ;;  %s9061_s2 = sshll.u32 %s1406_s0, 2  ;;  %s14427_s7 = scalar_lea.hbm %s12719_s14, %s9267_s16 }
0x342e   : > { %11715 = vrcp.f32 %v7702_v0  ;;  %s1408_s6 = scalar_lea.vmem [#allocation35], %s9061_s2 }
0x342f   : > { %s8717_s8 = sshll.u32 %s1408_s6, 4  ;;  %s14429_s8 = int_to_ptr.vmem [resolvable:$true] %s8717_s8 }
0x3431   : > { %v7706_v53 = vpop.permute.xlu0 %7705 }
0x3432   : > { %10397 = vmatpush3.msk.msra.mxu0 %vm2632_vm9, %v7706_v53 }
0x3433   : > { %10406 = vmatprep.subr.mxu0 %v12491_v34 }
0x3438   : > { %v11716_v8 = vpop.eup %11715 }
0x3439   : > { %v7704_v54 = vmul.f32 %v11716_v8, %v11708_v29  ;;  %v7370_v8 = vld [vmem:[#allocation29] sm:$0xff] }
0x343b   : > { %10399 = vmatmul.mubr.msk.f32.vlgmr.msra.gmra.mrb[68].mxu0 %vm7707_vm7, %v7704_v54  ;;  %v7371_v54 = vld [vmem:[#allocation29 + $0x8] sm:$0xff] }
0x343c   : > { %10407 = vmatpush3.msk.msra.mxu0 %vm2632_vm9, %v7874_v10  ;;  %10408 = vmatprep.mubr.msk.f32.mxu0 %vm12490_vm3, %v12491_v34  ;;  %v11006_v10 = vpack.c.bf16 %v7371_v54, %v7370_v8  ;;  %v9262_v54 = vld [vmem:[%s14621_s9] ss:$0 sm:$0xff] }
0x343d   : > { %10416 = vmatprep.subr.mxu0 %v12491_v34 }
0x34a0   : > { %v7870_v41 = vpop.xlane.xlu1 %7869 }
0x34a1   : > { %11717 = vrcp.f32 %v7870_v41  ;;  %v7372_v41 = vld [vmem:[#allocation29 + $0x10] sm:$0xff] }
0x34a4   : > { %v8037_v24 = vpop.xlane.xlu0 %8036 }
0x34a5   : > { %11719 = vrcp.f32 %v8037_v24  ;;  %v7373_v24 = vld [vmem:[#allocation29 + $0x18] sm:$0xff] }
0x34a8   : > { %v8204_v45 = vpop.xlane.xlu1 %8203  ;;  %v8208_v38 = vpop.permute.xlu0 %8207 }
0x34a9   : > { %11721 = vrcp.f32 %v8204_v45  ;;  %v11009_v45 = vpack.c.bf16 %v7373_v24, %v7372_v41  ;;  %v9263_v41 = vld [vmem:[%s12704_s29] ss:$0 sm:$0xff] }
0x34ab   : > { %v11718_v16 = vpop.eup %11717 }
0x34ac   : > { %v7872_v46 = vmul.f32 %v11718_v16, %v11710_v58  ;;  %v8041_v39 = vpop.permute.xlu1 %8040  ;;  %v7374_v16 = vld [vmem:[#allocation29 + $0x20] sm:$0xff] }
0x34ae   : > { %10409 = vmatmul.mubr.msk.f32.vlgmr.msra.gmra.mrb[70].mxu0 %vm7707_vm7, %v7872_v46  ;;  %v7375_v46 = vld [vmem:[#allocation29 + $0x28] sm:$0xff] }
0x34af   : > { %v11720_v37 = vpop.eup %11719  ;;  %10417 = vmatpush3.msk.msra.mxu0 %vm2632_vm9, %v8041_v39  ;;  %10418 = vmatprep.mubr.msk.f32.mxu0 %vm12490_vm3, %v12491_v34  ;;  %v11012_v39 = vpack.c.bf16 %v7375_v46, %v7374_v16 }
0x34b0   : > { %v8039_v18 = vmul.f32 %v11720_v37, %v11712_v19  ;;  %10426 = vmatprep.subr.mxu0 %v12491_v34  ;;  %v7376_v37 = vld [vmem:[#allocation29 + $0x30] sm:$0xff] }
0x34b2   : > { %10419 = vmatmul.mubr.msk.f32.vlgmr.msra.gmra.mrb[72].mxu0 %vm7707_vm7, %v8039_v18 }
0x34b3   : > { %v11722_v7 = vpop.eup %11721  ;;  %10427 = vmatpush3.msk.msra.mxu0 %vm2632_vm9, %v8208_v38  ;;  %10428 = vmatprep.mubr.msk.f32.mxu0 %vm12490_vm3, %v12491_v34  ;;  %vm8379_vm9 = vcmask 257024   ;;  %v9258_v38 = vld [vmem:[#allocation28] ss:$0 sm:$0xff] }
0x34b4   : > { %v8206_v49 = vmul.f32 %v11722_v7, %v11714_v40  ;;  %10999 = vmatprep.subr.bf16.mxu0 %v12489_v21 }
0x34b6   : > { %10429 = vmatmul.mubr.msk.f32.vlgmr.msra.gmra.mrb[74].mxu0 %vm7707_vm7, %v8206_v49 }
0x34b7   : > { %10450 = vmatprep.mubr.msk.f32.mxu0 %vm12490_vm3, %v12491_v34  ;;  %11001 = vmatpush3.bf16.msra.mxu0 %v11000_v36 }
0x34b8   : > { %11002 = vmatprep.subr.bf16.mxu0 %v12489_v21 }
0x350e   : > { %v7779_v12 = vpop.f32.mrb[68].mxu0 }
0x350f   : > { %v10400_v50 = vpop.f32.mrb[69].mxu0 }
0x3581   : > { %v7946_v14 = vpop.f32.mrb[70].mxu0 }
0x3582   : > { %8285 = vrot.lane.b32.xlu1 %v7946_v14, %s14606_s3  ;;  %v10410_v35 = vpop.f32.mrb[71].mxu0  ;;  %s14620_s3 = sld [smem:[#allocation70_spill]] }
0x3585   : > { %v8113_v32 = vpop.f32.mrb[72].mxu0 }
0x3586   : > { %8289 = vrot.lane.b32.xlu0 %v8113_v32, %s14618_s4  ;;  %v10420_v44 = vpop.f32.mrb[73].mxu0  ;;  %s8704_s4 = scalar_lea.sflag [#allocation4], %s1406_s0 }
0x3588   : > { %v9257_v33 = vld [vmem:[%s14620_s3] ss:$0 sm:$0xff]  ;;  %s12323_s3 = sshll.u32 %s12525_s15, 4  ;;  %s12324_s3 = int_to_ptr.vmem [resolvable:$false] %s12323_s3 }
0x3589   : > { %v8280_v13 = vpop.f32.mrb[74].mxu0  ;;  %s12325_s9 = scalar_lea.vmem %s12324_s3, 128  ;;  %p12326_p13 = scmp.lt.s32.totalorder %s14429_s8, %s12324_s3 }
0x358a   : > { %8293 = vrot.lane.b32.xlu1 %v8280_v13, %s14607_s11  ;;  %v10430_v20 = vpop.f32.mrb[75].mxu0  ;;  %s14619_s11 = sld [smem:[#allocation69_spill]] }
0x3590   : > { %v9256_v5 = vld [vmem:[%s14619_s11] ss:$0 sm:$0xff]  ;;  %s12319_s11 = scalar_lea.vmem %s14429_s8, 64 }
0x3591   : > { %p12320_p4 = scmp.ne.s32.totalorder %s14429_s8, %s12319_s11  ;;  %p12327_p6 = scmp.lt.s32.totalorder %s12325_s9, %s12319_s11 }
0x3593   : > { %p12321_p8 = pnand %p12320_p4, %p14622_p7  ;;  %p12328_p5 = por %p12327_p6, %p12326_p13 }
0x3595   : > { %p12322_p11 = pneg %p12321_p8 }
0x3597   : > { %p12329_p0 = pnand %p12328_p5, %p12322_p11 }
0x35f4   : > { %v8286_v47 = vpop.permute.xlu1 %8285 }
0x35f5   : > { %v8296_v11 = vsel %vm1536_vm5, %v7779_v12, %v8286_v47  ;;  %vm8701_vm5 = vcmask 125952  }
0x35f8   : > { %v8290_v56 = vpop.permute.xlu0 %8289 }
0x35f9   : > { %v8297_v17 = vsel %vm3753_vm2, %v8296_v11, %v8290_v56 }
0x35fc   : > { %v8294_v55 = vpop.permute.xlu1 %8293 }
0x35fd   : > { %v8298_v63 = vsel %vm1538_vm6, %v8297_v17, %v8294_v55 }
0x35fe   : > { %10440 = vmatmul.mubr.msk.f32.vlgmr.msra.gmra.mrb[74].mxu1 %vm2786_vm10, %v8298_v63 }
0x35ff   : > { %10469 = vmatprep.mubr.msk.f32.mxu1 %vm12490_vm3, %v12491_v34  ;;  %11007 = vmatpush3.bf16.msra.mxu1 %v11006_v10 }
0x3600   : > { %11008 = vmatprep.subr.bf16.mxu1 %v12489_v21 }
0x3603   : > { %11010 = vmatpush3.bf16.msra.mxu1 %v11009_v45 }
0x3604   : > { %11011 = vmatprep.subr.bf16.mxu1 %v12489_v21 }
0x3607   : > { %11013 = vmatpush3.bf16.msra.mxu1 %v11012_v39 }
0x3608   : > { %11014 = vmatprep.subr.bf16.mxu1 %v12489_v21 }
0x36d1   : > { %v8374_v61 = vpop.f32.mrb[74].mxu1 }
0x36d2   : > { %v8375_v1 = vadd.f32 %v9254_v2, %v8374_v61  ;;  %v10441_v52 = vpop.f32.mrb[75].mxu1 }
0x36d4   : > { %v8378_v23 = vadd.f32 %v8375_v1, %v14300_v6  ;;  %v7368_v6 = vld [vmem:[#allocation26 + $0x18] sm:$0xff] }
0x36d5   : > { %v11003_v42 = vpack.c.bf16 %v7368_v6, %v7367_v57 }
0x36d6   : > { %v8380_v27 = vsel %vm8379_vm9, %v8378_v23, 0.0 }
0x36d7   : > { %8381 = vadd.xlane.f32.xlu0 %v8380_v27  ;;  %11004 = vmatpush3.bf16.msra.mxu0 %v11003_v42 }
0x36d8   : > { %11017 = vmatprep.subr.bf16.mxu0 %v12489_v21 }
0x3764   : > { %v8382_v29 = vpop.xlane.xlu0 %8381 }
0x3765   : > { %v8383_v26 = vmul.f32 0.03125, %v8382_v29  ;;  %v9260_v29 = vld [vmem:[#allocation31] ss:$0 sm:$0xff] }
0x3767   : > { %v8384_v9 = vsub.f32 %v8378_v23, %v8383_v26 }
0x3769   : > { %v8385_v43 = vmul.f32 %v8384_v9, %v8384_v9 }
0x376b   : > { %v8386_v25 = vsel %vm8379_vm9, %v8385_v43, 0.0 }
0x376c   : > { %8387 = vadd.xlane.f32.xlu1 %v8386_v25 }
0x37f9   : > { %v8388_v4 = vpop.xlane.xlu1 %8387 }
0x37fa   : > { %v8389_v58 = vmul.f32 0.03125, %v8388_v4  ;;  %v1491_v4 = vld [vmem:[#allocation32] sm:$0xff] }
0x37fc   : > { %v8390_v48 = vadd.f32 1e-05, %v8389_v58  ;;  %v1492_v58 = vld [vmem:[#allocation32 + $0x8] sm:$0xff] }
0x37fe   : > { %11723 = vrsqrt.f32 %v8390_v48  ;;  %v11018_v48 = vpack.c.bf16 %v1492_v58, %v1491_v4 }
0x3808   : > { %v11724_v19 = vpop.eup %11723 }
0x3809   : > { %v8392_v40 = vmul.f32 %v11724_v19, %v8384_v9  ;;  %v1493_v19 = vld [vmem:[#allocation32 + $0x10] sm:$0xff] }
0x380b   : > { %v8399_v0 = vmul.f32 %v9256_v5, %v8392_v40  ;;  %v1494_v5 = vld [vmem:[#allocation32 + $0x18] sm:$0xff] }
0x380c   : > { %v11021_v40 = vpack.c.bf16 %v1494_v5, %v1493_v19 }
0x380d   : > { %v8406_v53 = vadd.f32 %v9257_v33, %v8399_v0 }
0x380f   : > { %10451 = vmatmul.mubr.msk.f32.vlgmr.msra.gmra.mrb[76].mxu0 %vm2786_vm10, %v8406_v53 }
0x3810   : > { %10480 = vmatprep.mubr.msk.f32.mxu0 %vm12490_vm3, %v12491_v34  ;;  %v7377_v34 = vld [vmem:[#allocation29 + $0x38] sm:$0xff]  ;;  %11019 = vmatpush3.bf16.msra.mxu0 %v11018_v48 }
0x3811   : > { %v11015_v18 = vpack.c.bf16 %v7377_v34, %v7376_v37  ;;  %11020 = vmatprep.subr.bf16.mxu0 %v12489_v21  ;;  %v9264_v21 = vld [vmem:[#allocation34] ss:$0 sm:$0xff] }
0x3813   : > { %11016 = vmatpush3.bf16.msra.mxu1 %v11015_v18 }
0x3814   : > { %11022 = vmatpush3.bf16.msra.mxu0 %v11021_v40 }
0x38e2   : > { %v8482_v7 = vpop.f32.mrb[76].mxu0 }
0x38e3   : > { %v8483_v49 = vadd.f32 %v9258_v38, %v8482_v7  ;;  %v10452_v12 = vpop.f32.mrb[77].mxu0 }
0x38e5   : > { %v8487_v50 = vmul.f32 0.70710677, %v8483_v49  ;;  %v8486_v52 = vmul.f32 0.5, %v8483_v49 }
0x38e7   : > { %v8488_v22 = vand.u32 2147483647, %v8487_v50  ;;  %vm8508_vm3 = vcmp.lt.f32.partialorder %v8487_v50, 0.0 }
0x38e9   : > { %v8489_v51 = vmul.f32 0.3275911, %v8488_v22  ;;  %v8502_v31 = vsub.f32 0.0, %v8488_v22 }
0x38eb   : > { %v8490_v62 = vadd.f32 1.0, %v8489_v51  ;;  %v8503_v30 = vmul.f32 %v8502_v31, %v8488_v22 }
0x38ed   : > { %11725 = vrcp.f32 %v8490_v62  ;;  %v8504_v32 = vmul.f32 1.442695, %v8503_v30 }
0x38ef   : > { %11727 = vpow2.f32 %v8504_v32 }
0x38f7   : > { %v11726_v60 = vpop.eup %11725 }
0x38f8   : > { %v8493_v14 = vmul.f32 1.0614054, %v11726_v60 }
0x38f9   : > { %v11728_v55 = vpop.eup %11727 }
0x38fa   : > { %v8494_v35 = vadd.f32 -1.4531521, %v8493_v14 }
0x38fc   : > { %v8495_v44 = vmul.f32 %v11726_v60, %v8494_v35 }
0x38fe   : > { %v8496_v13 = vadd.f32 1.4214138, %v8495_v44 }
0x3900   : > { %v8497_v20 = vmul.f32 %v11726_v60, %v8496_v13 }
0x3902   : > { %v8498_v47 = vadd.f32 -0.28449672, %v8497_v20 }
0x3904   : > { %v8499_v56 = vmul.f32 %v11726_v60, %v8498_v47 }
0x3906   : > { %v8500_v11 = vadd.f32 0.2548296, %v8499_v56 }
0x3908   : > { %v8501_v17 = vmul.f32 %v11726_v60, %v8500_v11 }
0x390a   : > { %v8506_v63 = vmul.f32 %v11728_v55, %v8501_v17 }
0x390c   : > { %v8507_v2 = vsub.f32 1.0, %v8506_v63 }
0x390e   : > { %v8509_v61 = vsub.f32 0.0, %v8507_v2 }
0x3910   : > { %v8510_v1 = vsel %vm8508_vm3, %v8509_v61, %v8507_v2 }
0x3911   : > { %v8511_v23 = vadd.f32 1.0, %v8510_v1 }
0x3913   : > { %v8512_v27 = vmul.f32 %v8511_v23, %v8486_v52 }
0x3915   : > { %10470 = vmatmul.mubr.msk.f32.vlgmr.msra.gmra.mrb[76].mxu1 %vm6819_vm14, %v8512_v27 }
0x39e8   : > { %v8588_v26 = vpop.f32.mrb[76].mxu1 }
0x39e9   : > { %v8589_v9 = vadd.f32 %v9260_v29, %v8588_v26  ;;  %v10471_v43 = vpop.f32.mrb[77].mxu1 }
0x39eb   : > { %v8592_v25 = vadd.f32 %v8589_v9, %v8406_v53 }
0x39ed   : > { %v8593_v28 = vsel %vm8379_vm9, %v8592_v25, 0.0 }
0x39ee   : > { %8594 = vadd.xlane.f32.xlu0 %v8593_v28 }
0x3a7b   : > { %v8595_v59 = vpop.xlane.xlu0 %8594 }
0x3a7c   : > { %v8596_v36 = vmul.f32 0.03125, %v8595_v59 }
0x3a7e   : > { %v8597_v57 = vsub.f32 %v8592_v25, %v8596_v36 }
0x3a80   : > { %v8598_v6 = vmul.f32 %v8597_v57, %v8597_v57 }
0x3a82   : > { %v8599_v42 = vsel %vm8379_vm9, %v8598_v6, 0.0 }
0x3a83   : > { %8600 = vadd.xlane.f32.xlu0 %v8599_v42 }
0x3b10   : > { %v8601_v33 = vpop.xlane.xlu0 %8600 }
0x3b11   : > { %v8602_v0 = vmul.f32 0.03125, %v8601_v33 }
0x3b13   : > { %v8603_v53 = vadd.f32 1e-05, %v8602_v0 }
0x3b15   : > { %11729 = vrsqrt.f32 %v8603_v53 }
0x3b1f   : > { %v11730_v8 = vpop.eup %11729 }
0x3b20   : > { %v8605_v10 = vmul.f32 %v11730_v8, %v8597_v57 }
0x3b22   : > { %v8612_v24 = vmul.f32 %v9262_v54, %v8605_v10 }
0x3b24   : > { %v8619_v45 = vadd.f32 %v9263_v41, %v8612_v24 }
0x3b26   : > { %10481 = vmatmul.mubr.msk.f32.vlgmr.msra.gmra.mrb[78].mxu0 %vm2786_vm10, %v8619_v45 }
0x3bf9   : > { %v8695_v16 = vpop.f32.mrb[78].mxu0 }
0x3bfa   : > { %v8696_v46 = vadd.f32 %v9264_v21, %v8695_v16  ;;  %v10482_v39 = vpop.f32.mrb[79].mxu0 }
0x3bfc   : > { %v8699_v37 = vmul.f32 %v8696_v46, %v13109_v15 }
0x3bfe   : > { %v8700_v34 = vadd.f32 %v8699_v37, %v13106_v3 }
0x3c00   : > { %8702 = vst.msk [vmem:[%s1408_s6] sm:$0xf] %vm8701_vm5, %v8700_v34 }
0x3c01   : > { %12332 = shalt.err (!%p12329_p0)
}
0x3c02   : > { %s12333_s0 = scalar_lea.hbm %s14427_s7, 64  ;;  %s12337_s2 = scalar_lea.hbm %s12719_s14, 128 }
0x3c03   : > { %p12334_p9 = scmp.ne.s32.totalorder %s14427_s7, %s12333_s0  ;;  %p12338_p1 = scmp.lt.u32.totalorder %s14427_s7, %s12719_s14 }
0x3c04   : > { %p12339_p2 = scmp.lt.u32.totalorder %s12337_s2, %s12333_s0  ;;  %p12341_p4 = scmp.lt.u32.totalorder %s12333_s0, %s14427_s7 }
0x3c05   : > { %p12335_p10 = pnand %p12334_p9, %p14622_p7 }
0x3c06   : > { %p12340_p3 = por %p12339_p2, %p12338_p1 }
0x3c07   : > { %p12336_p12 = pneg %p12335_p10 }
0x3c08   : > { %p12342_p8 = por %p12341_p4, %p12340_p3 }
0x3c0a   : > { %p12343_p11 = pnand %p12342_p8, %p12336_p12 }
0x3c0c   : > { %12346 = shalt.err (!%p12343_p11)
}
0x3c0d   : > { %11107 = dma.vmem_to_hbm [thread:$0]  (%p14622_p7), %s14429_s8, 64, %s14427_s7, %s8704_s4  }
0x3c0e PF: > { %s14623_s16 = sld [smem:[#allocation77_spill]]  ;;  %s14624_s6 = sld [smem:[#allocation75_spill]] }
0x3c0f   : > { %s14625_s11 = sld [smem:[#allocation80_spill]] }
0x3c14   : > { %p11219_p13 = scmp.ge.s32.totalorder %s14623_s16, 2  ;;  %s8729_s15 = sand.u32 1, %s14624_s6  }
0x3c15   : > { %p14626_p6 = scmp.ne.s32.totalorder %s14625_s11, 0  ;;  %s8730_s3 = scalar_lea.sflag [#allocation4], %s8729_s15 }
0x3c17   : > { %p11174_p5 = pnand %p11219_p13, %p14626_p6 }
0x3c19   : > { %12408 = dma.done.wait (!%p11174_p5), %s8730_s3, 64  }
0x3c1a   : > { %12410 = vsyncadd (!%p11174_p5), %s8730_s3, 4294967232  ;;  %s14627_s0 = sld [smem:[#allocation78_spill]]  ;;  %s14628_s9 = sld [smem:[#allocation76_spill]] }
0x3c1b   : > { %s14629_s11 = sld [smem:[#allocation79_spill]]  ;;  %s14630_s7 = smov %s12417_s10 }
0x3c20   : > { %p96_p0 = scmp.ge.s32.totalorder %s14627_s0, 4   ;;  %s14631_s10 = smov %s14628_s9 }
0x3c22   :  { %98 = sbr.rel (!%p96_p0) target bundleno = 80 (0x50), region = 325 }
0x3c29   :  { %8735 = vsyncpa [#allocation3], 1 }
0x3c2a   :  { %8737 = vsyncpa [#allocation3 + $0x1], 1 }
0x3c2b   :  { %8738 = vsyncpa [#allocation6], 1 }
0x3c2c   :  { %8739 = vsyncpa [#allocation9], 1 }
0x3c2d   :  { %8740 = vsyncpa [#allocation12], 1 }
0x3c2e   :  { %8741 = vsyncpa [#allocation15], 1 }
0x3c2f   :  { %8742 = vsyncpa [#allocation18], 1 }
0x3c30   :  { %8743 = vsyncpa [#allocation21], 1 }
0x3c31   :  { %8744 = vsyncpa [#allocation24], 1 }
0x3c32   :  { %8745 = vsyncpa [#allocation27], 1 }
0x3c33   :  { %8746 = vsyncpa [#allocation30], 1 }
0x3c34   :  { %8747 = vsyncpa [#allocation33], 1 }
0x3c35   :  { %8748 = vsyncpa [#allocation4], 1 }
0x3c36   :  { %8750 = vsyncpa [#allocation4 + $0x1], 1 }

</bundles_post_ra>
